<compile_context>
chip_gen: v7x
topology: tpu7x:2x2x1
jax: 0.10.0
libtpu: 0.0.40
codegen_flags: <defaults>
</compile_context>

<pallas_src>
import functools

import jax
import jax.numpy as jnp
from jax.experimental import pallas as pl
from jax.experimental.pallas import tpu as pltpu

LEAKY_SLOPE = 0.1
BN_EPS = 1e-5
USE_BF16_STREAM = True   # stream x / matmul weights as bf16 (f32 accumulate)
_PAD_L = 8               # left halo offset -> sublane-aligned interior store


# ----------------------------- in-kernel math ------------------------------
def _erf(x):
    # Abramowitz & Stegun 7.1.26 rational approximation (elementwise ops only).
    a1, a2, a3, a4, a5 = (0.254829592, -0.284496736, 1.421413741,
                          -1.453152027, 1.061405429)
    p = 0.3275911
    s = jnp.where(x >= 0, 1.0, -1.0)
    ax = jnp.abs(x)
    # approx reciprocal lands on the EUP slot instead of occupying the VALU.
    t = pl.reciprocal(1.0 + p * ax, approx=True)
    poly = ((((a5 * t + a4) * t + a3) * t + a2) * t + a1) * t
    return s * (1.0 - poly * jnp.exp(-ax * ax))


def _gelu(x):
    # erf-based GELU, matching torch.nn.GELU() default.
    return 0.5 * x * (1.0 + _erf(x * 0.7071067811865476))


def _leaky_relu(x):
    return jnp.where(x > 0, x, LEAKY_SLOPE * x)


# ------------------------------ Pallas kernels ------------------------------
def branch_stack_kernel(x_ref, dww_ref, dwb_ref, pww_ref, pwb_ref,
                        linw_ref, linb_ref, s_ref, xpad_ref, *, H, W):
    # One grid step = one image; the 4 branches are unrolled inside.
    #   x_ref   : (1, H, W, C)      NHWC image (bf16 or f32)
    #   dww_ref : (4, 3, 3, C)      depthwise weights, BN scale folded in
    #   dwb_ref : (4, 1, C)         depthwise bias + BN shift
    #   pww_ref : (4, C, Comax)     pointwise weights (BN folded, zero-padded)
    #   pwb_ref : (4, 1, Comax)     pointwise bias (zero-padded)
    #   linw_ref: (4, Comax, C)     linear_i weights (rows >= Co zero-padded)
    #   linb_ref: (4, 1, C)         linear_i bias
    #   s_ref   : (1, 1, C)         gate vector for this image
    #   xpad_ref: (H+2, W+PAD_L+1, C) f32 VMEM scratch (halo built here)
    C = x_ref.shape[-1]
    mm_dtype = pww_ref.dtype

    # In-kernel zero-padded halo: no HBM jnp.pad round trip.  Zeroing the
    # scratch every step keeps it correct regardless of how the "parallel"
    # image axis is sharded across TensorCores; the interior store starts at
    # sublane offset _PAD_L so it is sublane-aligned.
    xpad_ref[...] = jnp.zeros(xpad_ref.shape, xpad_ref.dtype)
    xpad_ref[pl.ds(1, H), pl.ds(_PAD_L, W), :] = x_ref[0].astype(jnp.float32)

    # Three column-shifted views, computed once per image and reused by all
    # four branches and all three dy taps of each.
    cols = [xpad_ref[:, pl.ds(_PAD_L - 1 + dx, W), :] for dx in range(3)]

    s_acc = jnp.zeros((1, C), jnp.float32)
    for b in range(4):                                  # branches, unrolled
        # Depthwise 3x3 (groups=C) + BN + LeakyReLU.
        w = dww_ref[b]                                  # (3, 3, C)
        acc = jnp.zeros((H, W, C), jnp.float32)
        for dy in range(3):
            for dx in range(3):
                acc = acc + cols[dx][dy:dy + H] * w[dy, dx]
        dwout = _leaky_relu(acc + dwb_ref[b])           # (H, W, C)

        # Pointwise 1x1 conv + BN + LeakyReLU (MXU).  Zero-padded channels
        # stay exactly zero and hit zero rows of linw.
        pw = jnp.dot(dwout.reshape(H * W, C).astype(mm_dtype), pww_ref[b],
                     preferred_element_type=jnp.float32) + pwb_ref[b]
        pw = _leaky_relu(pw)                            # (H*W, Comax)

        # AdaptiveAvgPool2d(1) -> GELU -> linear_i (1x1 conv, Co -> C).
        pooled = jnp.mean(pw, axis=0, keepdims=True)    # (1, Comax)
        s_acc = s_acc + jnp.dot(_gelu(pooled).astype(mm_dtype), linw_ref[b],
                                preferred_element_type=jnp.float32) + linb_ref[b]

    s_ref[0] = s_acc


def main_combine_kernel(x_ref, w1_ref, b1_ref, w2_ref, b2_ref, s_ref, o_ref):
    # Transposed (channels-on-sublanes, pixels-on-lanes) layout:
    #   x_ref : (1, C, tile)   flattened pixels of the NCHW input (lane-dense)
    #   w1_ref: (Cr, C), b1_ref: (Cr, 1), w2_ref: (C, Cr), b2_ref: (C, 1)
    #   s_ref : (1, C, 1)      per-image gate vector (sum_i linear_i branch)
    #   o_ref : (1, C, tile)   lane-dense output block
    x = x_ref[0]                                        # (C, tile)
    h = jnp.dot(w1_ref[...], x,
                preferred_element_type=jnp.float32) + b1_ref[...]
    # TODO(synk): KAN_Convolutional_Layer has no available definition; it is
    # shape-preserving (n_convs=1, 3x3, pad 1) and is treated as identity.
    h = _gelu(h).astype(w2_ref.dtype)                   # (Cr, tile)
    main = jnp.dot(w2_ref[...], h,
                   preferred_element_type=jnp.float32) + b2_ref[...]
    o_ref[0] = jax.nn.sigmoid(s_ref[0] * main)          # (C, tile)


# ------------------------------- wrappers -----------------------------------
def _device_caps():
    """(row_tile_cap, vmem_limit_bytes), tuned per TPU generation.

    v7x has 64 MiB VMEM per TensorCore -> keep the 32 MiB scoped limit and
    512-pixel tiles; v5e/v6e have 128 MiB -> 64 MiB limit and 1024-pixel tiles.
    """
    try:
        kind = jax.devices()[0].device_kind.lower()
    except Exception:
        kind = ""
    if "v7" in kind:
        return 512, 32 * 1024 * 1024
    return 1024, 64 * 1024 * 1024


def _row_tile(hw, cap):
    """Largest lane-dense (multiple-of-128) divisor of hw that is <= cap.

    Falls back to the full hw (block == full array dim, always a legal
    BlockSpec) when hw is small or has no multiple-of-128 divisor <= cap.
    """
    if hw <= cap:
        return hw
    best = 0
    t = 128
    while t <= cap:
        if hw % t == 0:
            best = t
        t += 128
    return best if best else hw


def _check_branch_vmem(H, W, C, comax, x_itemsize, vmem_limit):
    pad_w = W + _PAD_L + 1
    est = ((H + 2) * pad_w * C * 4          # zero-padded image scratch
           + 2 * H * W * C * x_itemsize     # double-buffered input block
           + 3 * (H + 2) * W * C * 4        # three column-shifted views
           + 2 * H * W * C * 4              # depthwise acc + activation
           + H * W * comax * 4)             # pointwise activation
    if est > 0.75 * vmem_limit:
        # TODO(synk): row-tile the branch kernel (2-row halo + partial-pool
        # accumulation) for images whose whole-image working set exceeds VMEM.
        raise ValueError(
            f"branch_stack whole-image working set (~{est / 2**20:.1f} MiB) "
            f"exceeds the scoped VMEM budget ({vmem_limit / 2**20:.0f} MiB)")


def _fold_bn(w, bias, gamma, beta, mean, var):
    scale = gamma / jnp.sqrt(var + BN_EPS)
    return w * scale, (bias - mean) * scale + beta


def _stack_branch_params(params, C, mm_dtype):
    """Fold BN (inference mode) into conv weights and stack the 4 branches,
    zero-padding the pointwise/linear channel dim to the widest branch."""
    branches = [params[f"dws{i + 1}"] for i in range(4)]
    comax = max(int(p["pw_w"].shape[1]) for p in branches)
    dww, dwb, pww, pwb, linw, linb = [], [], [], [], [], []
    for p in branches:
        w_dw, b_dw = _fold_bn(p["dw_w"], p["dw_b"], p["dw_gamma"],
                              p["dw_beta"], p["dw_mean"], p["dw_var"])
        w_pw, b_pw = _fold_bn(p["pw_w"], p["pw_b"], p["pw_gamma"],
                              p["pw_beta"], p["pw_mean"], p["pw_var"])
        co = int(w_pw.shape[1])
        dww.append(w_dw)
        dwb.append(b_dw.reshape(1, C))
        pww.append(jnp.pad(w_pw, ((0, 0), (0, comax - co))))
        pwb.append(jnp.pad(b_pw, (0, comax - co)).reshape(1, comax))
        linw.append(jnp.pad(p["lin_w"], ((0, comax - co), (0, 0))))
        linb.append(p["lin_b"].reshape(1, C))
    f32 = lambda xs: jnp.stack(xs).astype(jnp.float32)
    mmd = lambda xs: jnp.stack(xs).astype(mm_dtype)
    return f32(dww), f32(dwb), mmd(pww), f32(pwb), mmd(linw), f32(linb)


def branch_stack(x_nhwc, dww, dwb, pww, pwb, linw, linb, *, vmem_limit):
    """Fused 4-branch depthwise-separable + pool + GELU + linear_i, summed."""
    N, H, W, C = x_nhwc.shape
    comax = pww.shape[-1]
    _check_branch_vmem(H, W, C, comax, x_nhwc.dtype.itemsize, vmem_limit)
    kernel = functools.partial(branch_stack_kernel, H=H, W=W)
    return pl.pallas_call(
        kernel,
        out_shape=jax.ShapeDtypeStruct((N, 1, C), jnp.float32),
        grid=(N,),
        in_specs=[
            pl.BlockSpec((1, H, W, C), lambda n: (n, 0, 0, 0)),
            pl.BlockSpec((4, 3, 3, C), lambda n: (0, 0, 0, 0)),   # resident
            pl.BlockSpec((4, 1, C), lambda n: (0, 0, 0)),
            pl.BlockSpec((4, C, comax), lambda n: (0, 0, 0)),
            pl.BlockSpec((4, 1, comax), lambda n: (0, 0, 0)),
            pl.BlockSpec((4, comax, C), lambda n: (0, 0, 0)),
            pl.BlockSpec((4, 1, C), lambda n: (0, 0, 0)),
        ],
        out_specs=pl.BlockSpec((1, 1, C), lambda n: (n, 0, 0)),
        scratch_shapes=[pltpu.VMEM((H + 2, W + _PAD_L + 1, C), jnp.float32)],
        compiler_params=pltpu.CompilerParams(
            dimension_semantics=("parallel",),
            vmem_limit_bytes=vmem_limit),
    )(x_nhwc, dww, dwb, pww, pwb, linw, linb)


def main_and_combine(x3, w1t, b1, w2t, b2, s_col, *, row_cap, vmem_limit):
    """Fused fc1 -> GELU -> fc2 -> sigmoid(gate * main) on (N, C, H*W)."""
    N, C, HW = x3.shape
    Cr = w1t.shape[0]
    tile = _row_tile(HW, row_cap)
    cdt = x3.dtype
    return pl.pallas_call(
        main_combine_kernel,
        out_shape=jax.ShapeDtypeStruct((N, C, HW), jnp.float32),
        grid=(N, HW // tile),
        in_specs=[
            pl.BlockSpec((1, C, tile), lambda n, t: (n, 0, t)),
            pl.BlockSpec((Cr, C), lambda n, t: (0, 0)),         # resident
            pl.BlockSpec((Cr, 1), lambda n, t: (0, 0)),
            pl.BlockSpec((C, Cr), lambda n, t: (0, 0)),
            pl.BlockSpec((C, 1), lambda n, t: (0, 0)),
            pl.BlockSpec((1, C, 1), lambda n, t: (n, 0, 0)),     # per-image s
        ],
        out_specs=pl.BlockSpec((1, C, tile), lambda n, t: (n, 0, t)),
        compiler_params=pltpu.CompilerParams(
            dimension_semantics=("parallel", "parallel"),
            vmem_limit_bytes=vmem_limit),
    )(x3, w1t.astype(cdt), b1.reshape(Cr, 1).astype(jnp.float32),
      w2t.astype(cdt), b2.reshape(C, 1).astype(jnp.float32), s_col)


def se_module_forward(x_nchw, params, *, use_bf16_stream=USE_BF16_STREAM):
    N, C, H, W = x_nchw.shape
    HW = H * W
    row_cap, vmem_limit = _device_caps()
    cdt = jnp.bfloat16 if use_bf16_stream else jnp.float32
    xb = x_nchw.astype(cdt)

    # Branch kernel works in NHWC (channels on lanes for the depthwise conv).
    x_nhwc = jnp.transpose(xb, (0, 2, 3, 1))
    dww, dwb, pww, pwb, linw, linb = _stack_branch_params(params, C, cdt)
    s_sum = branch_stack(x_nhwc, dww, dwb, pww, pwb, linw, linb,
                         vmem_limit=vmem_limit)                  # (N, 1, C)
    s_col = jnp.swapaxes(s_sum, 1, 2)                            # (N, C, 1)

    # Main branch + final gate stay in the original NCHW layout (reshape is a
    # free bitcast), so the output needs no transpose and all pixel-dim I/O
    # blocks are lane-dense.
    out3 = main_and_combine(xb.reshape(N, C, HW),
                            params["fc1_w"].T, params["fc1_b"],
                            params["fc2_w"].T, params["fc2_b"],
                            s_col, row_cap=row_cap, vmem_limit=vmem_limit)
    return out3.reshape(N, C, H, W)                              # NCHW, f32


# ------------------------ deterministic parameter init ----------------------
def init_params(key, C, reduction=16):
    keys = iter(jax.random.split(key, 64))

    def nrm(shape, scale=0.1):
        return scale * jax.random.normal(next(keys), shape, jnp.float32)

    params = {
        "fc1_w": nrm((C, C // reduction)),
        "fc1_b": nrm((C // reduction,)),
        "fc2_w": nrm((C // reduction, C)),
        "fc2_b": nrm((C,)),
    }
    outs = [C // 2, C // 4, C // 8, C // reduction]
    for i, Co in enumerate(outs):
        params[f"dws{i + 1}"] = {
            "dw_w": nrm((3, 3, C)),            # depthwise 3x3, per-channel
            "dw_b": nrm((C,)),
            "dw_gamma": 1.0 + nrm((C,), 0.05),
            "dw_beta": nrm((C,), 0.05),
            "dw_mean": nrm((C,), 0.05),
            "dw_var": 1.0 + jnp.abs(nrm((C,), 0.05)),
            "pw_w": nrm((C, Co)),              # pointwise 1x1
            "pw_b": nrm((Co,)),
            "pw_gamma": 1.0 + nrm((Co,), 0.05),
            "pw_beta": nrm((Co,), 0.05),
            "pw_mean": nrm((Co,), 0.05),
            "pw_var": 1.0 + jnp.abs(nrm((Co,), 0.05)),
            "lin_w": nrm((Co, C)),             # linear_i (1x1 conv Co -> C)
            "lin_b": nrm((C,)),
        }
    return params


if __name__ == "__main__":
    key = jax.random.PRNGKey(0)
    kx, kp = jax.random.split(key)
    N, C, H, W = 2, 32, 16, 16                 # channels divisible by 16
    x = jax.random.normal(kx, (N, C, H, W), jnp.float32)
    params = init_params(kp, C)

    y = jax.jit(se_module_forward)(x, params)
    jax.block_until_ready(y)
    assert y.shape == (N, C, H, W) and y.dtype == jnp.float32
    assert bool(jnp.all(jnp.isfinite(y)))
    print("KERNEL_OK")
</pallas_src>

<mosaic_0001>
module attributes {stable_mosaic.version = 11 : i64} {
  func.func @branch_stack_kernel(%arg0: i32, %arg1: memref<1x16x16x32xbf16, #tpu.memory_space<vmem>>, %arg2: memref<4x3x3x32xf32, #tpu.memory_space<vmem>>, %arg3: memref<4x1x32xf32, #tpu.memory_space<vmem>>, %arg4: memref<4x32x16xbf16, #tpu.memory_space<vmem>>, %arg5: memref<4x1x16xf32, #tpu.memory_space<vmem>>, %arg6: memref<4x16x32xbf16, #tpu.memory_space<vmem>>, %arg7: memref<4x1x32xf32, #tpu.memory_space<vmem>>, %arg8: memref<1x1x32xf32, #tpu.memory_space<vmem>>, %arg9: memref<18x25x32xf32, #tpu.memory_space<vmem>>) attributes {dimension_semantics = [#tpu.dimension_semantics<parallel>], iteration_bounds = array<i64: 2>, scalar_prefetch = 0 : i64, scratch_operands = 1 : i64, tpu.core_type = #tpu.core_type<tc>, window_params = [{transform_indices = @transform_0, window_bounds = array<i64: 1, 16, 16, 32>}, {pipeline_mode = #tpu.pipeline_mode<synchronous>, transform_indices = @transform_1, window_bounds = array<i64: 4, 3, 3, 32>}, {pipeline_mode = #tpu.pipeline_mode<synchronous>, transform_indices = @transform_2, window_bounds = array<i64: 4, 1, 32>}, {pipeline_mode = #tpu.pipeline_mode<synchronous>, transform_indices = @transform_3, window_bounds = array<i64: 4, 32, 16>}, {pipeline_mode = #tpu.pipeline_mode<synchronous>, transform_indices = @transform_4, window_bounds = array<i64: 4, 1, 16>}, {pipeline_mode = #tpu.pipeline_mode<synchronous>, transform_indices = @transform_5, window_bounds = array<i64: 4, 16, 32>}, {pipeline_mode = #tpu.pipeline_mode<synchronous>, transform_indices = @transform_6, window_bounds = array<i64: 4, 1, 32>}, {transform_indices = @transform_7, window_bounds = array<i64: 1, 1, 32>}]} {
    %cst = arith.constant 0.000000e+00 : f32
    %0 = vector.broadcast %cst : f32 to vector<18x25x32xf32>
    %c0 = arith.constant 0 : index
    %c0_0 = arith.constant 0 : index
    %c0_1 = arith.constant 0 : index
    %1 = vector.load %arg9[%c0, %c0_0, %c0_1] : memref<18x25x32xf32, #tpu.memory_space<vmem>>, vector<18x25x32xf32>
    tpu.vector_store %arg9[%c0, %c0_0, %c0_1], %0 {strides = array<i32>} : memref<18x25x32xf32, #tpu.memory_space<vmem>>, vector<18x25x32xf32>,
    %c0_2 = arith.constant 0 : index
    %c0_3 = arith.constant 0 : index
    %c0_4 = arith.constant 0 : index
    %c0_5 = arith.constant 0 : index
    %2 = vector.load %arg1[%c0_2, %c0_3, %c0_4, %c0_5] : memref<1x16x16x32xbf16, #tpu.memory_space<vmem>>, vector<1x16x16x32xbf16>
    %3 = vector.shape_cast %2 : vector<1x16x16x32xbf16> to vector<16x16x32xbf16>
    %4 = arith.extf %3 : vector<16x16x32xbf16> to vector<16x16x32xf32>
    %c1 = arith.constant 1 : index
    %c8 = arith.constant 8 : index
    %c0_6 = arith.constant 0 : index
    %5 = vector.load %arg9[%c1, %c8, %c0_6] : memref<18x25x32xf32, #tpu.memory_space<vmem>>, vector<16x16x32xf32>
    tpu.vector_store %arg9[%c1, %c8, %c0_6], %4 {strides = array<i32>} : memref<18x25x32xf32, #tpu.memory_space<vmem>>, vector<16x16x32xf32>,
    %c0_7 = arith.constant 0 : index
    %c7 = arith.constant 7 : index
    %c0_8 = arith.constant 0 : index
    %6 = vector.load %arg9[%c0_7, %c7, %c0_8] : memref<18x25x32xf32, #tpu.memory_space<vmem>>, vector<18x16x32xf32>
    %c0_9 = arith.constant 0 : index
    %c8_10 = arith.constant 8 : index
    %c0_11 = arith.constant 0 : index
    %7 = vector.load %arg9[%c0_9, %c8_10, %c0_11] : memref<18x25x32xf32, #tpu.memory_space<vmem>>, vector<18x16x32xf32>
    %c0_12 = arith.constant 0 : index
    %c9 = arith.constant 9 : index
    %c0_13 = arith.constant 0 : index
    %8 = vector.load %arg9[%c0_12, %c9, %c0_13] : memref<18x25x32xf32, #tpu.memory_space<vmem>>, vector<18x16x32xf32>
    %cst_14 = arith.constant 0.000000e+00 : f32
    %9 = vector.broadcast %cst_14 : f32 to vector<1x32xf32>
    %c0_15 = arith.constant 0 : index
    %c0_16 = arith.constant 0 : index
    %c0_17 = arith.constant 0 : index
    %c0_18 = arith.constant 0 : index
    %10 = vector.load %arg2[%c0_15, %c0_16, %c0_17, %c0_18] : memref<4x3x3x32xf32, #tpu.memory_space<vmem>>, vector<1x3x3x32xf32>
    %11 = vector.shape_cast %10 : vector<1x3x3x32xf32> to vector<3x3x32xf32>
    %cst_19 = arith.constant 0.000000e+00 : f32
    %12 = vector.broadcast %cst_19 : f32 to vector<16x16x32xf32>
    %13 = vector.extract_strided_slice %6 {offsets = [0, 0, 0], sizes = [16, 16, 32], strides = [1, 1, 1]} : vector<18x16x32xf32> to vector<16x16x32xf32>
    %14 = vector.extract_strided_slice %11 {offsets = [0, 0, 0], sizes = [1, 1, 32], strides = [1, 1, 1]} : vector<3x3x32xf32> to vector<1x1x32xf32>
    %15 = vector.shape_cast %14 : vector<1x1x32xf32> to vector<32xf32>
    %16 = vector.shape_cast %15 : vector<32xf32> to vector<1x1x32xf32>
    %17 = vector.broadcast %16 : vector<1x1x32xf32> to vector<16x16x32xf32>
    %18 = arith.mulf %13, %17 : vector<16x16x32xf32>
    %19 = arith.addf %12, %18 : vector<16x16x32xf32>
    %20 = vector.extract_strided_slice %7 {offsets = [0, 0, 0], sizes = [16, 16, 32], strides = [1, 1, 1]} : vector<18x16x32xf32> to vector<16x16x32xf32>
    %21 = vector.extract_strided_slice %11 {offsets = [0, 1, 0], sizes = [1, 1, 32], strides = [1, 1, 1]} : vector<3x3x32xf32> to vector<1x1x32xf32>
    %22 = vector.shape_cast %21 : vector<1x1x32xf32> to vector<32xf32>
    %23 = vector.shape_cast %22 : vector<32xf32> to vector<1x1x32xf32>
    %24 = vector.broadcast %23 : vector<1x1x32xf32> to vector<16x16x32xf32>
    %25 = arith.mulf %20, %24 : vector<16x16x32xf32>
    %26 = arith.addf %19, %25 : vector<16x16x32xf32>
    %27 = vector.extract_strided_slice %8 {offsets = [0, 0, 0], sizes = [16, 16, 32], strides = [1, 1, 1]} : vector<18x16x32xf32> to vector<16x16x32xf32>
    %28 = vector.extract_strided_slice %11 {offsets = [0, 2, 0], sizes = [1, 1, 32], strides = [1, 1, 1]} : vector<3x3x32xf32> to vector<1x1x32xf32>
    %29 = vector.shape_cast %28 : vector<1x1x32xf32> to vector<32xf32>
    %30 = vector.shape_cast %29 : vector<32xf32> to vector<1x1x32xf32>
    %31 = vector.broadcast %30 : vector<1x1x32xf32> to vector<16x16x32xf32>
    %32 = arith.mulf %27, %31 : vector<16x16x32xf32>
    %33 = arith.addf %26, %32 : vector<16x16x32xf32>
    %34 = vector.extract_strided_slice %6 {offsets = [1, 0, 0], sizes = [16, 16, 32], strides = [1, 1, 1]} : vector<18x16x32xf32> to vector<16x16x32xf32>
    %35 = vector.extract_strided_slice %11 {offsets = [1, 0, 0], sizes = [1, 1, 32], strides = [1, 1, 1]} : vector<3x3x32xf32> to vector<1x1x32xf32>
    %36 = vector.shape_cast %35 : vector<1x1x32xf32> to vector<32xf32>
    %37 = vector.shape_cast %36 : vector<32xf32> to vector<1x1x32xf32>
    %38 = vector.broadcast %37 : vector<1x1x32xf32> to vector<16x16x32xf32>
    %39 = arith.mulf %34, %38 : vector<16x16x32xf32>
    %40 = arith.addf %33, %39 : vector<16x16x32xf32>
    %41 = vector.extract_strided_slice %7 {offsets = [1, 0, 0], sizes = [16, 16, 32], strides = [1, 1, 1]} : vector<18x16x32xf32> to vector<16x16x32xf32>
    %42 = vector.extract_strided_slice %11 {offsets = [1, 1, 0], sizes = [1, 1, 32], strides = [1, 1, 1]} : vector<3x3x32xf32> to vector<1x1x32xf32>
    %43 = vector.shape_cast %42 : vector<1x1x32xf32> to vector<32xf32>
    %44 = vector.shape_cast %43 : vector<32xf32> to vector<1x1x32xf32>
    %45 = vector.broadcast %44 : vector<1x1x32xf32> to vector<16x16x32xf32>
    %46 = arith.mulf %41, %45 : vector<16x16x32xf32>
    %47 = arith.addf %40, %46 : vector<16x16x32xf32>
    %48 = vector.extract_strided_slice %8 {offsets = [1, 0, 0], sizes = [16, 16, 32], strides = [1, 1, 1]} : vector<18x16x32xf32> to vector<16x16x32xf32>
    %49 = vector.extract_strided_slice %11 {offsets = [1, 2, 0], sizes = [1, 1, 32], strides = [1, 1, 1]} : vector<3x3x32xf32> to vector<1x1x32xf32>
    %50 = vector.shape_cast %49 : vector<1x1x32xf32> to vector<32xf32>
    %51 = vector.shape_cast %50 : vector<32xf32> to vector<1x1x32xf32>
    %52 = vector.broadcast %51 : vector<1x1x32xf32> to vector<16x16x32xf32>
    %53 = arith.mulf %48, %52 : vector<16x16x32xf32>
    %54 = arith.addf %47, %53 : vector<16x16x32xf32>
    %55 = vector.extract_strided_slice %6 {offsets = [2, 0, 0], sizes = [16, 16, 32], strides = [1, 1, 1]} : vector<18x16x32xf32> to vector<16x16x32xf32>
    %56 = vector.extract_strided_slice %11 {offsets = [2, 0, 0], sizes = [1, 1, 32], strides = [1, 1, 1]} : vector<3x3x32xf32> to vector<1x1x32xf32>
    %57 = vector.shape_cast %56 : vector<1x1x32xf32> to vector<32xf32>
    %58 = vector.shape_cast %57 : vector<32xf32> to vector<1x1x32xf32>
    %59 = vector.broadcast %58 : vector<1x1x32xf32> to vector<16x16x32xf32>
    %60 = arith.mulf %55, %59 : vector<16x16x32xf32>
    %61 = arith.addf %54, %60 : vector<16x16x32xf32>
    %62 = vector.extract_strided_slice %7 {offsets = [2, 0, 0], sizes = [16, 16, 32], strides = [1, 1, 1]} : vector<18x16x32xf32> to vector<16x16x32xf32>
    %63 = vector.extract_strided_slice %11 {offsets = [2, 1, 0], sizes = [1, 1, 32], strides = [1, 1, 1]} : vector<3x3x32xf32> to vector<1x1x32xf32>
    %64 = vector.shape_cast %63 : vector<1x1x32xf32> to vector<32xf32>
    %65 = vector.shape_cast %64 : vector<32xf32> to vector<1x1x32xf32>
    %66 = vector.broadcast %65 : vector<1x1x32xf32> to vector<16x16x32xf32>
    %67 = arith.mulf %62, %66 : vector<16x16x32xf32>
    %68 = arith.addf %61, %67 : vector<16x16x32xf32>
    %69 = vector.extract_strided_slice %8 {offsets = [2, 0, 0], sizes = [16, 16, 32], strides = [1, 1, 1]} : vector<18x16x32xf32> to vector<16x16x32xf32>
    %70 = vector.extract_strided_slice %11 {offsets = [2, 2, 0], sizes = [1, 1, 32], strides = [1, 1, 1]} : vector<3x3x32xf32> to vector<1x1x32xf32>
    %71 = vector.shape_cast %70 : vector<1x1x32xf32> to vector<32xf32>
    %72 = vector.shape_cast %71 : vector<32xf32> to vector<1x1x32xf32>
    %73 = vector.broadcast %72 : vector<1x1x32xf32> to vector<16x16x32xf32>
    %74 = arith.mulf %69, %73 : vector<16x16x32xf32>
    %75 = arith.addf %68, %74 : vector<16x16x32xf32>
    %c0_20 = arith.constant 0 : index
    %c0_21 = arith.constant 0 : index
    %c0_22 = arith.constant 0 : index
    %76 = vector.load %arg3[%c0_20, %c0_21, %c0_22] : memref<4x1x32xf32, #tpu.memory_space<vmem>>, vector<1x1x32xf32>
    %77 = vector.shape_cast %76 : vector<1x1x32xf32> to vector<1x32xf32>
    %78 = vector.shape_cast %77 : vector<1x32xf32> to vector<1x1x32xf32>
    %79 = vector.broadcast %78 : vector<1x1x32xf32> to vector<16x16x32xf32>
    %80 = arith.addf %75, %79 : vector<16x16x32xf32>
    %cst_23 = arith.constant 0.000000e+00 : f32
    %81 = vector.broadcast %cst_23 : f32 to vector<16x16x32xf32>
    %82 = arith.cmpf ogt, %80, %81 : vector<16x16x32xf32>
    %cst_24 = arith.constant 1.000000e-01 : f32
    %83 = vector.broadcast %cst_24 : f32 to vector<16x16x32xf32>
    %84 = arith.mulf %83, %80 : vector<16x16x32xf32>
    %85 = arith.select %82, %80, %84 : vector<16x16x32xi1>, vector<16x16x32xf32>
    %86 = vector.shape_cast %85 : vector<16x16x32xf32> to vector<256x32xf32>
    %87 = arith.truncf %86 : vector<256x32xf32> to vector<256x32xbf16>
    %c0_25 = arith.constant 0 : index
    %c0_26 = arith.constant 0 : index
    %c0_27 = arith.constant 0 : index
    %88 = vector.load %arg4[%c0_25, %c0_26, %c0_27] : memref<4x32x16xbf16, #tpu.memory_space<vmem>>, vector<1x32x16xbf16>
    %89 = vector.shape_cast %88 : vector<1x32x16xbf16> to vector<32x16xbf16>
    %cst_28 = arith.constant dense<0.000000e+00> : vector<256x16xf32>
    %90 = tpu.matmul %87, %89, %cst_28 {dimension_numbers = #tpu.dot_dimension_numbers<[1], [0], [0], [1], [0, 0, 1, 1], [], []>} : vector<256x32xbf16>, vector<32x16xbf16>, vector<256x16xf32> -> vector<256x16xf32>
    %c0_29 = arith.constant 0 : index
    %c0_30 = arith.constant 0 : index
    %c0_31 = arith.constant 0 : index
    %91 = vector.load %arg5[%c0_29, %c0_30, %c0_31] : memref<4x1x16xf32, #tpu.memory_space<vmem>>, vector<1x1x16xf32>
    %92 = vector.shape_cast %91 : vector<1x1x16xf32> to vector<1x16xf32>
    %93 = vector.broadcast %92 : vector<1x16xf32> to vector<256x16xf32>
    %94 = arith.addf %90, %93 : vector<256x16xf32>
    %cst_32 = arith.constant 0.000000e+00 : f32
    %95 = vector.broadcast %cst_32 : f32 to vector<256x16xf32>
    %96 = arith.cmpf ogt, %94, %95 : vector<256x16xf32>
    %cst_33 = arith.constant 1.000000e-01 : f32
    %97 = vector.broadcast %cst_33 : f32 to vector<256x16xf32>
    %98 = arith.mulf %97, %94 : vector<256x16xf32>
    %99 = arith.select %96, %94, %98 : vector<256x16xi1>, vector<256x16xf32>
    %cst_34 = arith.constant dense<0.000000e+00> : vector<16xf32>
    %100 = vector.multi_reduction <add>, %99, %cst_34 [0] : vector<256x16xf32> to vector<16xf32>
    %101 = vector.shape_cast %100 : vector<16xf32> to vector<1x16xf32>
    %cst_35 = arith.constant 2.560000e+02 : f32
    %102 = vector.broadcast %cst_35 : f32 to vector<1x16xf32>
    %103 = arith.divf %101, %102 : vector<1x16xf32>
    %cst_36 = arith.constant 5.000000e-01 : f32
    %104 = vector.broadcast %cst_36 : f32 to vector<1x16xf32>
    %105 = arith.mulf %104, %103 : vector<1x16xf32>
    %cst_37 = arith.constant 0.707106769 : f32
    %106 = vector.broadcast %cst_37 : f32 to vector<1x16xf32>
    %107 = arith.mulf %103, %106 : vector<1x16xf32>
    %cst_38 = arith.constant 0.000000e+00 : f32
    %108 = vector.broadcast %cst_38 : f32 to vector<1x16xf32>
    %109 = arith.cmpf oge, %107, %108 : vector<1x16xf32>
    %cst_39 = arith.constant 1.000000e+00 : f32
    %cst_40 = arith.constant -1.000000e+00 : f32
    %110 = vector.broadcast %cst_39 : f32 to vector<1x16xf32>
    %111 = vector.broadcast %cst_40 : f32 to vector<1x16xf32>
    %112 = arith.select %109, %110, %111 : vector<1x16xi1>, vector<1x16xf32>
    %113 = math.absf %107 : vector<1x16xf32>
    %cst_41 = arith.constant 0.327591091 : f32
    %114 = vector.broadcast %cst_41 : f32 to vector<1x16xf32>
    %115 = arith.mulf %114, %113 : vector<1x16xf32>
    %cst_42 = arith.constant 1.000000e+00 : f32
    %116 = vector.broadcast %cst_42 : f32 to vector<1x16xf32>
    %117 = arith.addf %116, %115 : vector<1x16xf32>
    %118 = tpu.reciprocal %117 {approx = true} : vector<1x16xf32> -> vector<1x16xf32>
    %cst_43 = arith.constant 1.06140542 : f32
    %119 = vector.broadcast %cst_43 : f32 to vector<1x16xf32>
    %120 = arith.mulf %119, %118 : vector<1x16xf32>
    %cst_44 = arith.constant -1.45315206 : f32
    %121 = vector.broadcast %cst_44 : f32 to vector<1x16xf32>
    %122 = arith.addf %120, %121 : vector<1x16xf32>
    %123 = arith.mulf %122, %118 : vector<1x16xf32>
    %cst_45 = arith.constant 1.42141378 : f32
    %124 = vector.broadcast %cst_45 : f32 to vector<1x16xf32>
    %125 = arith.addf %123, %124 : vector<1x16xf32>
    %126 = arith.mulf %125, %118 : vector<1x16xf32>
    %cst_46 = arith.constant -0.284496725 : f32
    %127 = vector.broadcast %cst_46 : f32 to vector<1x16xf32>
    %128 = arith.addf %126, %127 : vector<1x16xf32>
    %129 = arith.mulf %128, %118 : vector<1x16xf32>
    %cst_47 = arith.constant 0.254829586 : f32
    %130 = vector.broadcast %cst_47 : f32 to vector<1x16xf32>
    %131 = arith.addf %129, %130 : vector<1x16xf32>
    %132 = arith.mulf %131, %118 : vector<1x16xf32>
    %cst_48 = arith.constant 0.000000e+00 : f32
    %133 = vector.broadcast %cst_48 : f32 to vector<1x16xf32>
    %134 = arith.subf %133, %113 : vector<1x16xf32>
    %135 = arith.mulf %134, %113 : vector<1x16xf32>
    %136 = math.exp %135 : vector<1x16xf32>
    %137 = arith.mulf %132, %136 : vector<1x16xf32>
    %cst_49 = arith.constant 1.000000e+00 : f32
    %138 = vector.broadcast %cst_49 : f32 to vector<1x16xf32>
    %139 = arith.subf %138, %137 : vector<1x16xf32>
    %140 = arith.mulf %112, %139 : vector<1x16xf32>
    %cst_50 = arith.constant 1.000000e+00 : f32
    %141 = vector.broadcast %cst_50 : f32 to vector<1x16xf32>
    %142 = arith.addf %141, %140 : vector<1x16xf32>
    %143 = arith.mulf %105, %142 : vector<1x16xf32>
    %144 = arith.truncf %143 : vector<1x16xf32> to vector<1x16xbf16>
    %c0_51 = arith.constant 0 : index
    %c0_52 = arith.constant 0 : index
    %c0_53 = arith.constant 0 : index
    %145 = vector.load %arg6[%c0_51, %c0_52, %c0_53] : memref<4x16x32xbf16, #tpu.memory_space<vmem>>, vector<1x16x32xbf16>
    %146 = vector.shape_cast %145 : vector<1x16x32xbf16> to vector<16x32xbf16>
    %cst_54 = arith.constant dense<0.000000e+00> : vector<1x32xf32>
    %147 = tpu.matmul %144, %146, %cst_54 {dimension_numbers = #tpu.dot_dimension_numbers<[1], [0], [0], [1], [0, 0, 1, 1], [], []>} : vector<1x16xbf16>, vector<16x32xbf16>, vector<1x32xf32> -> vector<1x32xf32>
    %148 = arith.addf %9, %147 : vector<1x32xf32>
    %c0_55 = arith.constant 0 : index
    %c0_56 = arith.constant 0 : index
    %c0_57 = arith.constant 0 : index
    %149 = vector.load %arg7[%c0_55, %c0_56, %c0_57] : memref<4x1x32xf32, #tpu.memory_space<vmem>>, vector<1x1x32xf32>
    %150 = vector.shape_cast %149 : vector<1x1x32xf32> to vector<1x32xf32>
    %151 = arith.addf %148, %150 : vector<1x32xf32>
    %c1_58 = arith.constant 1 : index
    %c0_59 = arith.constant 0 : index
    %c0_60 = arith.constant 0 : index
    %c0_61 = arith.constant 0 : index
    %152 = vector.load %arg2[%c1_58, %c0_59, %c0_60, %c0_61] : memref<4x3x3x32xf32, #tpu.memory_space<vmem>>, vector<1x3x3x32xf32>
    %153 = vector.shape_cast %152 : vector<1x3x3x32xf32> to vector<3x3x32xf32>
    %cst_62 = arith.constant 0.000000e+00 : f32
    %154 = vector.broadcast %cst_62 : f32 to vector<16x16x32xf32>
    %155 = vector.extract_strided_slice %6 {offsets = [0, 0, 0], sizes = [16, 16, 32], strides = [1, 1, 1]} : vector<18x16x32xf32> to vector<16x16x32xf32>
    %156 = vector.extract_strided_slice %153 {offsets = [0, 0, 0], sizes = [1, 1, 32], strides = [1, 1, 1]} : vector<3x3x32xf32> to vector<1x1x32xf32>
    %157 = vector.shape_cast %156 : vector<1x1x32xf32> to vector<32xf32>
    %158 = vector.shape_cast %157 : vector<32xf32> to vector<1x1x32xf32>
    %159 = vector.broadcast %158 : vector<1x1x32xf32> to vector<16x16x32xf32>
    %160 = arith.mulf %155, %159 : vector<16x16x32xf32>
    %161 = arith.addf %154, %160 : vector<16x16x32xf32>
    %162 = vector.extract_strided_slice %7 {offsets = [0, 0, 0], sizes = [16, 16, 32], strides = [1, 1, 1]} : vector<18x16x32xf32> to vector<16x16x32xf32>
    %163 = vector.extract_strided_slice %153 {offsets = [0, 1, 0], sizes = [1, 1, 32], strides = [1, 1, 1]} : vector<3x3x32xf32> to vector<1x1x32xf32>
    %164 = vector.shape_cast %163 : vector<1x1x32xf32> to vector<32xf32>
    %165 = vector.shape_cast %164 : vector<32xf32> to vector<1x1x32xf32>
    %166 = vector.broadcast %165 : vector<1x1x32xf32> to vector<16x16x32xf32>
    %167 = arith.mulf %162, %166 : vector<16x16x32xf32>
    %168 = arith.addf %161, %167 : vector<16x16x32xf32>
    %169 = vector.extract_strided_slice %8 {offsets = [0, 0, 0], sizes = [16, 16, 32], strides = [1, 1, 1]} : vector<18x16x32xf32> to vector<16x16x32xf32>
    %170 = vector.extract_strided_slice %153 {offsets = [0, 2, 0], sizes = [1, 1, 32], strides = [1, 1, 1]} : vector<3x3x32xf32> to vector<1x1x32xf32>
    %171 = vector.shape_cast %170 : vector<1x1x32xf32> to vector<32xf32>
    %172 = vector.shape_cast %171 : vector<32xf32> to vector<1x1x32xf32>
    %173 = vector.broadcast %172 : vector<1x1x32xf32> to vector<16x16x32xf32>
    %174 = arith.mulf %169, %173 : vector<16x16x32xf32>
    %175 = arith.addf %168, %174 : vector<16x16x32xf32>
    %176 = vector.extract_strided_slice %6 {offsets = [1, 0, 0], sizes = [16, 16, 32], strides = [1, 1, 1]} : vector<18x16x32xf32> to vector<16x16x32xf32>
    %177 = vector.extract_strided_slice %153 {offsets = [1, 0, 0], sizes = [1, 1, 32], strides = [1, 1, 1]} : vector<3x3x32xf32> to vector<1x1x32xf32>
    %178 = vector.shape_cast %177 : vector<1x1x32xf32> to vector<32xf32>
    %179 = vector.shape_cast %178 : vector<32xf32> to vector<1x1x32xf32>
    %180 = vector.broadcast %179 : vector<1x1x32xf32> to vector<16x16x32xf32>
    %181 = arith.mulf %176, %180 : vector<16x16x32xf32>
    %182 = arith.addf %175, %181 : vector<16x16x32xf32>
    %183 = vector.extract_strided_slice %7 {offsets = [1, 0, 0], sizes = [16, 16, 32], strides = [1, 1, 1]} : vector<18x16x32xf32> to vector<16x16x32xf32>
    %184 = vector.extract_strided_slice %153 {offsets = [1, 1, 0], sizes = [1, 1, 32], strides = [1, 1, 1]} : vector<3x3x32xf32> to vector<1x1x32xf32>
    %185 = vector.shape_cast %184 : vector<1x1x32xf32> to vector<32xf32>
    %186 = vector.shape_cast %185 : vector<32xf32> to vector<1x1x32xf32>
    %187 = vector.broadcast %186 : vector<1x1x32xf32> to vector<16x16x32xf32>
    %188 = arith.mulf %183, %187 : vector<16x16x32xf32>
    %189 = arith.addf %182, %188 : vector<16x16x32xf32>
    %190 = vector.extract_strided_slice %8 {offsets = [1, 0, 0], sizes = [16, 16, 32], strides = [1, 1, 1]} : vector<18x16x32xf32> to vector<16x16x32xf32>
    %191 = vector.extract_strided_slice %153 {offsets = [1, 2, 0], sizes = [1, 1, 32], strides = [1, 1, 1]} : vector<3x3x32xf32> to vector<1x1x32xf32>
    %192 = vector.shape_cast %191 : vector<1x1x32xf32> to vector<32xf32>
    %193 = vector.shape_cast %192 : vector<32xf32> to vector<1x1x32xf32>
    %194 = vector.broadcast %193 : vector<1x1x32xf32> to vector<16x16x32xf32>
    %195 = arith.mulf %190, %194 : vector<16x16x32xf32>
    %196 = arith.addf %189, %195 : vector<16x16x32xf32>
    %197 = vector.extract_strided_slice %6 {offsets = [2, 0, 0], sizes = [16, 16, 32], strides = [1, 1, 1]} : vector<18x16x32xf32> to vector<16x16x32xf32>
    %198 = vector.extract_strided_slice %153 {offsets = [2, 0, 0], sizes = [1, 1, 32], strides = [1, 1, 1]} : vector<3x3x32xf32> to vector<1x1x32xf32>
    %199 = vector.shape_cast %198 : vector<1x1x32xf32> to vector<32xf32>
    %200 = vector.shape_cast %199 : vector<32xf32> to vector<1x1x32xf32>
    %201 = vector.broadcast %200 : vector<1x1x32xf32> to vector<16x16x32xf32>
    %202 = arith.mulf %197, %201 : vector<16x16x32xf32>
    %203 = arith.addf %196, %202 : vector<16x16x32xf32>
    %204 = vector.extract_strided_slice %7 {offsets = [2, 0, 0], sizes = [16, 16, 32], strides = [1, 1, 1]} : vector<18x16x32xf32> to vector<16x16x32xf32>
    %205 = vector.extract_strided_slice %153 {offsets = [2, 1, 0], sizes = [1, 1, 32], strides = [1, 1, 1]} : vector<3x3x32xf32> to vector<1x1x32xf32>
    %206 = vector.shape_cast %205 : vector<1x1x32xf32> to vector<32xf32>
    %207 = vector.shape_cast %206 : vector<32xf32> to vector<1x1x32xf32>
    %208 = vector.broadcast %207 : vector<1x1x32xf32> to vector<16x16x32xf32>
    %209 = arith.mulf %204, %208 : vector<16x16x32xf32>
    %210 = arith.addf %203, %209 : vector<16x16x32xf32>
    %211 = vector.extract_strided_slice %8 {offsets = [2, 0, 0], sizes = [16, 16, 32], strides = [1, 1, 1]} : vector<18x16x32xf32> to vector<16x16x32xf32>
    %212 = vector.extract_strided_slice %153 {offsets = [2, 2, 0], sizes = [1, 1, 32], strides = [1, 1, 1]} : vector<3x3x32xf32> to vector<1x1x32xf32>
    %213 = vector.shape_cast %212 : vector<1x1x32xf32> to vector<32xf32>
    %214 = vector.shape_cast %213 : vector<32xf32> to vector<1x1x32xf32>
    %215 = vector.broadcast %214 : vector<1x1x32xf32> to vector<16x16x32xf32>
    %216 = arith.mulf %211, %215 : vector<16x16x32xf32>
    %217 = arith.addf %210, %216 : vector<16x16x32xf32>
    %c1_63 = arith.constant 1 : index
    %c0_64 = arith.constant 0 : index
    %c0_65 = arith.constant 0 : index
    %218 = vector.load %arg3[%c1_63, %c0_64, %c0_65] : memref<4x1x32xf32, #tpu.memory_space<vmem>>, vector<1x1x32xf32>
    %219 = vector.shape_cast %218 : vector<1x1x32xf32> to vector<1x32xf32>
    %220 = vector.shape_cast %219 : vector<1x32xf32> to vector<1x1x32xf32>
    %221 = vector.broadcast %220 : vector<1x1x32xf32> to vector<16x16x32xf32>
    %222 = arith.addf %217, %221 : vector<16x16x32xf32>
    %cst_66 = arith.constant 0.000000e+00 : f32
    %223 = vector.broadcast %cst_66 : f32 to vector<16x16x32xf32>
    %224 = arith.cmpf ogt, %222, %223 : vector<16x16x32xf32>
    %cst_67 = arith.constant 1.000000e-01 : f32
    %225 = vector.broadcast %cst_67 : f32 to vector<16x16x32xf32>
    %226 = arith.mulf %225, %222 : vector<16x16x32xf32>
    %227 = arith.select %224, %222, %226 : vector<16x16x32xi1>, vector<16x16x32xf32>
    %228 = vector.shape_cast %227 : vector<16x16x32xf32> to vector<256x32xf32>
    %229 = arith.truncf %228 : vector<256x32xf32> to vector<256x32xbf16>
    %c1_68 = arith.constant 1 : index
    %c0_69 = arith.constant 0 : index
    %c0_70 = arith.constant 0 : index
    %230 = vector.load %arg4[%c1_68, %c0_69, %c0_70] : memref<4x32x16xbf16, #tpu.memory_space<vmem>>, vector<1x32x16xbf16>
    %231 = vector.shape_cast %230 : vector<1x32x16xbf16> to vector<32x16xbf16>
    %cst_71 = arith.constant dense<0.000000e+00> : vector<256x16xf32>
    %232 = tpu.matmul %229, %231, %cst_71 {dimension_numbers = #tpu.dot_dimension_numbers<[1], [0], [0], [1], [0, 0, 1, 1], [], []>} : vector<256x32xbf16>, vector<32x16xbf16>, vector<256x16xf32> -> vector<256x16xf32>
    %c1_72 = arith.constant 1 : index
    %c0_73 = arith.constant 0 : index
    %c0_74 = arith.constant 0 : index
    %233 = vector.load %arg5[%c1_72, %c0_73, %c0_74] : memref<4x1x16xf32, #tpu.memory_space<vmem>>, vector<1x1x16xf32>
    %234 = vector.shape_cast %233 : vector<1x1x16xf32> to vector<1x16xf32>
    %235 = vector.broadcast %234 : vector<1x16xf32> to vector<256x16xf32>
    %236 = arith.addf %232, %235 : vector<256x16xf32>
    %cst_75 = arith.constant 0.000000e+00 : f32
    %237 = vector.broadcast %cst_75 : f32 to vector<256x16xf32>
    %238 = arith.cmpf ogt, %236, %237 : vector<256x16xf32>
    %cst_76 = arith.constant 1.000000e-01 : f32
    %239 = vector.broadcast %cst_76 : f32 to vector<256x16xf32>
    %240 = arith.mulf %239, %236 : vector<256x16xf32>
    %241 = arith.select %238, %236, %240 : vector<256x16xi1>, vector<256x16xf32>
    %cst_77 = arith.constant dense<0.000000e+00> : vector<16xf32>
    %242 = vector.multi_reduction <add>, %241, %cst_77 [0] : vector<256x16xf32> to vector<16xf32>
    %243 = vector.shape_cast %242 : vector<16xf32> to vector<1x16xf32>
    %cst_78 = arith.constant 2.560000e+02 : f32
    %244 = vector.broadcast %cst_78 : f32 to vector<1x16xf32>
    %245 = arith.divf %243, %244 : vector<1x16xf32>
    %cst_79 = arith.constant 5.000000e-01 : f32
    %246 = vector.broadcast %cst_79 : f32 to vector<1x16xf32>
    %247 = arith.mulf %246, %245 : vector<1x16xf32>
    %cst_80 = arith.constant 0.707106769 : f32
    %248 = vector.broadcast %cst_80 : f32 to vector<1x16xf32>
    %249 = arith.mulf %245, %248 : vector<1x16xf32>
    %cst_81 = arith.constant 0.000000e+00 : f32
    %250 = vector.broadcast %cst_81 : f32 to vector<1x16xf32>
    %251 = arith.cmpf oge, %249, %250 : vector<1x16xf32>
    %cst_82 = arith.constant 1.000000e+00 : f32
    %cst_83 = arith.constant -1.000000e+00 : f32
    %252 = vector.broadcast %cst_82 : f32 to vector<1x16xf32>
    %253 = vector.broadcast %cst_83 : f32 to vector<1x16xf32>
    %254 = arith.select %251, %252, %253 : vector<1x16xi1>, vector<1x16xf32>
    %255 = math.absf %249 : vector<1x16xf32>
    %cst_84 = arith.constant 0.327591091 : f32
    %256 = vector.broadcast %cst_84 : f32 to vector<1x16xf32>
    %257 = arith.mulf %256, %255 : vector<1x16xf32>
    %cst_85 = arith.constant 1.000000e+00 : f32
    %258 = vector.broadcast %cst_85 : f32 to vector<1x16xf32>
    %259 = arith.addf %258, %257 : vector<1x16xf32>
    %260 = tpu.reciprocal %259 {approx = true} : vector<1x16xf32> -> vector<1x16xf32>
    %cst_86 = arith.constant 1.06140542 : f32
    %261 = vector.broadcast %cst_86 : f32 to vector<1x16xf32>
    %262 = arith.mulf %261, %260 : vector<1x16xf32>
    %cst_87 = arith.constant -1.45315206 : f32
    %263 = vector.broadcast %cst_87 : f32 to vector<1x16xf32>
    %264 = arith.addf %262, %263 : vector<1x16xf32>
    %265 = arith.mulf %264, %260 : vector<1x16xf32>
    %cst_88 = arith.constant 1.42141378 : f32
    %266 = vector.broadcast %cst_88 : f32 to vector<1x16xf32>
    %267 = arith.addf %265, %266 : vector<1x16xf32>
    %268 = arith.mulf %267, %260 : vector<1x16xf32>
    %cst_89 = arith.constant -0.284496725 : f32
    %269 = vector.broadcast %cst_89 : f32 to vector<1x16xf32>
    %270 = arith.addf %268, %269 : vector<1x16xf32>
    %271 = arith.mulf %270, %260 : vector<1x16xf32>
    %cst_90 = arith.constant 0.254829586 : f32
    %272 = vector.broadcast %cst_90 : f32 to vector<1x16xf32>
    %273 = arith.addf %271, %272 : vector<1x16xf32>
    %274 = arith.mulf %273, %260 : vector<1x16xf32>
    %cst_91 = arith.constant 0.000000e+00 : f32
    %275 = vector.broadcast %cst_91 : f32 to vector<1x16xf32>
    %276 = arith.subf %275, %255 : vector<1x16xf32>
    %277 = arith.mulf %276, %255 : vector<1x16xf32>
    %278 = math.exp %277 : vector<1x16xf32>
    %279 = arith.mulf %274, %278 : vector<1x16xf32>
    %cst_92 = arith.constant 1.000000e+00 : f32
    %280 = vector.broadcast %cst_92 : f32 to vector<1x16xf32>
    %281 = arith.subf %280, %279 : vector<1x16xf32>
    %282 = arith.mulf %254, %281 : vector<1x16xf32>
    %cst_93 = arith.constant 1.000000e+00 : f32
    %283 = vector.broadcast %cst_93 : f32 to vector<1x16xf32>
    %284 = arith.addf %283, %282 : vector<1x16xf32>
    %285 = arith.mulf %247, %284 : vector<1x16xf32>
    %286 = arith.truncf %285 : vector<1x16xf32> to vector<1x16xbf16>
    %c1_94 = arith.constant 1 : index
    %c0_95 = arith.constant 0 : index
    %c0_96 = arith.constant 0 : index
    %287 = vector.load %arg6[%c1_94, %c0_95, %c0_96] : memref<4x16x32xbf16, #tpu.memory_space<vmem>>, vector<1x16x32xbf16>
    %288 = vector.shape_cast %287 : vector<1x16x32xbf16> to vector<16x32xbf16>
    %cst_97 = arith.constant dense<0.000000e+00> : vector<1x32xf32>
    %289 = tpu.matmul %286, %288, %cst_97 {dimension_numbers = #tpu.dot_dimension_numbers<[1], [0], [0], [1], [0, 0, 1, 1], [], []>} : vector<1x16xbf16>, vector<16x32xbf16>, vector<1x32xf32> -> vector<1x32xf32>
    %290 = arith.addf %151, %289 : vector<1x32xf32>
    %c1_98 = arith.constant 1 : index
    %c0_99 = arith.constant 0 : index
    %c0_100 = arith.constant 0 : index
    %291 = vector.load %arg7[%c1_98, %c0_99, %c0_100] : memref<4x1x32xf32, #tpu.memory_space<vmem>>, vector<1x1x32xf32>
    %292 = vector.shape_cast %291 : vector<1x1x32xf32> to vector<1x32xf32>
    %293 = arith.addf %290, %292 : vector<1x32xf32>
    %c2 = arith.constant 2 : index
    %c0_101 = arith.constant 0 : index
    %c0_102 = arith.constant 0 : index
    %c0_103 = arith.constant 0 : index
    %294 = vector.load %arg2[%c2, %c0_101, %c0_102, %c0_103] : memref<4x3x3x32xf32, #tpu.memory_space<vmem>>, vector<1x3x3x32xf32>
    %295 = vector.shape_cast %294 : vector<1x3x3x32xf32> to vector<3x3x32xf32>
    %cst_104 = arith.constant 0.000000e+00 : f32
    %296 = vector.broadcast %cst_104 : f32 to vector<16x16x32xf32>
    %297 = vector.extract_strided_slice %6 {offsets = [0, 0, 0], sizes = [16, 16, 32], strides = [1, 1, 1]} : vector<18x16x32xf32> to vector<16x16x32xf32>
    %298 = vector.extract_strided_slice %295 {offsets = [0, 0, 0], sizes = [1, 1, 32], strides = [1, 1, 1]} : vector<3x3x32xf32> to vector<1x1x32xf32>
    %299 = vector.shape_cast %298 : vector<1x1x32xf32> to vector<32xf32>
    %300 = vector.shape_cast %299 : vector<32xf32> to vector<1x1x32xf32>
    %301 = vector.broadcast %300 : vector<1x1x32xf32> to vector<16x16x32xf32>
    %302 = arith.mulf %297, %301 : vector<16x16x32xf32>
    %303 = arith.addf %296, %302 : vector<16x16x32xf32>
    %304 = vector.extract_strided_slice %7 {offsets = [0, 0, 0], sizes = [16, 16, 32], strides = [1, 1, 1]} : vector<18x16x32xf32> to vector<16x16x32xf32>
    %305 = vector.extract_strided_slice %295 {offsets = [0, 1, 0], sizes = [1, 1, 32], strides = [1, 1, 1]} : vector<3x3x32xf32> to vector<1x1x32xf32>
    %306 = vector.shape_cast %305 : vector<1x1x32xf32> to vector<32xf32>
    %307 = vector.shape_cast %306 : vector<32xf32> to vector<1x1x32xf32>
    %308 = vector.broadcast %307 : vector<1x1x32xf32> to vector<16x16x32xf32>
    %309 = arith.mulf %304, %308 : vector<16x16x32xf32>
    %310 = arith.addf %303, %309 : vector<16x16x32xf32>
    %311 = vector.extract_strided_slice %8 {offsets = [0, 0, 0], sizes = [16, 16, 32], strides = [1, 1, 1]} : vector<18x16x32xf32> to vector<16x16x32xf32>
    %312 = vector.extract_strided_slice %295 {offsets = [0, 2, 0], sizes = [1, 1, 32], strides = [1, 1, 1]} : vector<3x3x32xf32> to vector<1x1x32xf32>
    %313 = vector.shape_cast %312 : vector<1x1x32xf32> to vector<32xf32>
    %314 = vector.shape_cast %313 : vector<32xf32> to vector<1x1x32xf32>
    %315 = vector.broadcast %314 : vector<1x1x32xf32> to vector<16x16x32xf32>
    %316 = arith.mulf %311, %315 : vector<16x16x32xf32>
    %317 = arith.addf %310, %316 : vector<16x16x32xf32>
    %318 = vector.extract_strided_slice %6 {offsets = [1, 0, 0], sizes = [16, 16, 32], strides = [1, 1, 1]} : vector<18x16x32xf32> to vector<16x16x32xf32>
    %319 = vector.extract_strided_slice %295 {offsets = [1, 0, 0], sizes = [1, 1, 32], strides = [1, 1, 1]} : vector<3x3x32xf32> to vector<1x1x32xf32>
    %320 = vector.shape_cast %319 : vector<1x1x32xf32> to vector<32xf32>
    %321 = vector.shape_cast %320 : vector<32xf32> to vector<1x1x32xf32>
    %322 = vector.broadcast %321 : vector<1x1x32xf32> to vector<16x16x32xf32>
    %323 = arith.mulf %318, %322 : vector<16x16x32xf32>
    %324 = arith.addf %317, %323 : vector<16x16x32xf32>
    %325 = vector.extract_strided_slice %7 {offsets = [1, 0, 0], sizes = [16, 16, 32], strides = [1, 1, 1]} : vector<18x16x32xf32> to vector<16x16x32xf32>
    %326 = vector.extract_strided_slice %295 {offsets = [1, 1, 0], sizes = [1, 1, 32], strides = [1, 1, 1]} : vector<3x3x32xf32> to vector<1x1x32xf32>
    %327 = vector.shape_cast %326 : vector<1x1x32xf32> to vector<32xf32>
    %328 = vector.shape_cast %327 : vector<32xf32> to vector<1x1x32xf32>
    %329 = vector.broadcast %328 : vector<1x1x32xf32> to vector<16x16x32xf32>
    %330 = arith.mulf %325, %329 : vector<16x16x32xf32>
    %331 = arith.addf %324, %330 : vector<16x16x32xf32>
    %332 = vector.extract_strided_slice %8 {offsets = [1, 0, 0], sizes = [16, 16, 32], strides = [1, 1, 1]} : vector<18x16x32xf32> to vector<16x16x32xf32>
    %333 = vector.extract_strided_slice %295 {offsets = [1, 2, 0], sizes = [1, 1, 32], strides = [1, 1, 1]} : vector<3x3x32xf32> to vector<1x1x32xf32>
    %334 = vector.shape_cast %333 : vector<1x1x32xf32> to vector<32xf32>
    %335 = vector.shape_cast %334 : vector<32xf32> to vector<1x1x32xf32>
    %336 = vector.broadcast %335 : vector<1x1x32xf32> to vector<16x16x32xf32>
    %337 = arith.mulf %332, %336 : vector<16x16x32xf32>
    %338 = arith.addf %331, %337 : vector<16x16x32xf32>
    %339 = vector.extract_strided_slice %6 {offsets = [2, 0, 0], sizes = [16, 16, 32], strides = [1, 1, 1]} : vector<18x16x32xf32> to vector<16x16x32xf32>
    %340 = vector.extract_strided_slice %295 {offsets = [2, 0, 0], sizes = [1, 1, 32], strides = [1, 1, 1]} : vector<3x3x32xf32> to vector<1x1x32xf32>
    %341 = vector.shape_cast %340 : vector<1x1x32xf32> to vector<32xf32>
    %342 = vector.shape_cast %341 : vector<32xf32> to vector<1x1x32xf32>
    %343 = vector.broadcast %342 : vector<1x1x32xf32> to vector<16x16x32xf32>
    %344 = arith.mulf %339, %343 : vector<16x16x32xf32>
    %345 = arith.addf %338, %344 : vector<16x16x32xf32>
    %346 = vector.extract_strided_slice %7 {offsets = [2, 0, 0], sizes = [16, 16, 32], strides = [1, 1, 1]} : vector<18x16x32xf32> to vector<16x16x32xf32>
    %347 = vector.extract_strided_slice %295 {offsets = [2, 1, 0], sizes = [1, 1, 32], strides = [1, 1, 1]} : vector<3x3x32xf32> to vector<1x1x32xf32>
    %348 = vector.shape_cast %347 : vector<1x1x32xf32> to vector<32xf32>
    %349 = vector.shape_cast %348 : vector<32xf32> to vector<1x1x32xf32>
    %350 = vector.broadcast %349 : vector<1x1x32xf32> to vector<16x16x32xf32>
    %351 = arith.mulf %346, %350 : vector<16x16x32xf32>
    %352 = arith.addf %345, %351 : vector<16x16x32xf32>
    %353 = vector.extract_strided_slice %8 {offsets = [2, 0, 0], sizes = [16, 16, 32], strides = [1, 1, 1]} : vector<18x16x32xf32> to vector<16x16x32xf32>
    %354 = vector.extract_strided_slice %295 {offsets = [2, 2, 0], sizes = [1, 1, 32], strides = [1, 1, 1]} : vector<3x3x32xf32> to vector<1x1x32xf32>
    %355 = vector.shape_cast %354 : vector<1x1x32xf32> to vector<32xf32>
    %356 = vector.shape_cast %355 : vector<32xf32> to vector<1x1x32xf32>
    %357 = vector.broadcast %356 : vector<1x1x32xf32> to vector<16x16x32xf32>
    %358 = arith.mulf %353, %357 : vector<16x16x32xf32>
    %359 = arith.addf %352, %358 : vector<16x16x32xf32>
    %c2_105 = arith.constant 2 : index
    %c0_106 = arith.constant 0 : index
    %c0_107 = arith.constant 0 : index
    %360 = vector.load %arg3[%c2_105, %c0_106, %c0_107] : memref<4x1x32xf32, #tpu.memory_space<vmem>>, vector<1x1x32xf32>
    %361 = vector.shape_cast %360 : vector<1x1x32xf32> to vector<1x32xf32>
    %362 = vector.shape_cast %361 : vector<1x32xf32> to vector<1x1x32xf32>
    %363 = vector.broadcast %362 : vector<1x1x32xf32> to vector<16x16x32xf32>
    %364 = arith.addf %359, %363 : vector<16x16x32xf32>
    %cst_108 = arith.constant 0.000000e+00 : f32
    %365 = vector.broadcast %cst_108 : f32 to vector<16x16x32xf32>
    %366 = arith.cmpf ogt, %364, %365 : vector<16x16x32xf32>
    %cst_109 = arith.constant 1.000000e-01 : f32
    %367 = vector.broadcast %cst_109 : f32 to vector<16x16x32xf32>
    %368 = arith.mulf %367, %364 : vector<16x16x32xf32>
    %369 = arith.select %366, %364, %368 : vector<16x16x32xi1>, vector<16x16x32xf32>
    %370 = vector.shape_cast %369 : vector<16x16x32xf32> to vector<256x32xf32>
    %371 = arith.truncf %370 : vector<256x32xf32> to vector<256x32xbf16>
    %c2_110 = arith.constant 2 : index
    %c0_111 = arith.constant 0 : index
    %c0_112 = arith.constant 0 : index
    %372 = vector.load %arg4[%c2_110, %c0_111, %c0_112] : memref<4x32x16xbf16, #tpu.memory_space<vmem>>, vector<1x32x16xbf16>
    %373 = vector.shape_cast %372 : vector<1x32x16xbf16> to vector<32x16xbf16>
    %cst_113 = arith.constant dense<0.000000e+00> : vector<256x16xf32>
    %374 = tpu.matmul %371, %373, %cst_113 {dimension_numbers = #tpu.dot_dimension_numbers<[1], [0], [0], [1], [0, 0, 1, 1], [], []>} : vector<256x32xbf16>, vector<32x16xbf16>, vector<256x16xf32> -> vector<256x16xf32>
    %c2_114 = arith.constant 2 : index
    %c0_115 = arith.constant 0 : index
    %c0_116 = arith.constant 0 : index
    %375 = vector.load %arg5[%c2_114, %c0_115, %c0_116] : memref<4x1x16xf32, #tpu.memory_space<vmem>>, vector<1x1x16xf32>
    %376 = vector.shape_cast %375 : vector<1x1x16xf32> to vector<1x16xf32>
    %377 = vector.broadcast %376 : vector<1x16xf32> to vector<256x16xf32>
    %378 = arith.addf %374, %377 : vector<256x16xf32>
    %cst_117 = arith.constant 0.000000e+00 : f32
    %379 = vector.broadcast %cst_117 : f32 to vector<256x16xf32>
    %380 = arith.cmpf ogt, %378, %379 : vector<256x16xf32>
    %cst_118 = arith.constant 1.000000e-01 : f32
    %381 = vector.broadcast %cst_118 : f32 to vector<256x16xf32>
    %382 = arith.mulf %381, %378 : vector<256x16xf32>
    %383 = arith.select %380, %378, %382 : vector<256x16xi1>, vector<256x16xf32>
    %cst_119 = arith.constant dense<0.000000e+00> : vector<16xf32>
    %384 = vector.multi_reduction <add>, %383, %cst_119 [0] : vector<256x16xf32> to vector<16xf32>
    %385 = vector.shape_cast %384 : vector<16xf32> to vector<1x16xf32>
    %cst_120 = arith.constant 2.560000e+02 : f32
    %386 = vector.broadcast %cst_120 : f32 to vector<1x16xf32>
    %387 = arith.divf %385, %386 : vector<1x16xf32>
    %cst_121 = arith.constant 5.000000e-01 : f32
    %388 = vector.broadcast %cst_121 : f32 to vector<1x16xf32>
    %389 = arith.mulf %388, %387 : vector<1x16xf32>
    %cst_122 = arith.constant 0.707106769 : f32
    %390 = vector.broadcast %cst_122 : f32 to vector<1x16xf32>
    %391 = arith.mulf %387, %390 : vector<1x16xf32>
    %cst_123 = arith.constant 0.000000e+00 : f32
    %392 = vector.broadcast %cst_123 : f32 to vector<1x16xf32>
    %393 = arith.cmpf oge, %391, %392 : vector<1x16xf32>
    %cst_124 = arith.constant 1.000000e+00 : f32
    %cst_125 = arith.constant -1.000000e+00 : f32
    %394 = vector.broadcast %cst_124 : f32 to vector<1x16xf32>
    %395 = vector.broadcast %cst_125 : f32 to vector<1x16xf32>
    %396 = arith.select %393, %394, %395 : vector<1x16xi1>, vector<1x16xf32>
    %397 = math.absf %391 : vector<1x16xf32>
    %cst_126 = arith.constant 0.327591091 : f32
    %398 = vector.broadcast %cst_126 : f32 to vector<1x16xf32>
    %399 = arith.mulf %398, %397 : vector<1x16xf32>
    %cst_127 = arith.constant 1.000000e+00 : f32
    %400 = vector.broadcast %cst_127 : f32 to vector<1x16xf32>
    %401 = arith.addf %400, %399 : vector<1x16xf32>
    %402 = tpu.reciprocal %401 {approx = true} : vector<1x16xf32> -> vector<1x16xf32>
    %cst_128 = arith.constant 1.06140542 : f32
    %403 = vector.broadcast %cst_128 : f32 to vector<1x16xf32>
    %404 = arith.mulf %403, %402 : vector<1x16xf32>
    %cst_129 = arith.constant -1.45315206 : f32
    %405 = vector.broadcast %cst_129 : f32 to vector<1x16xf32>
    %406 = arith.addf %404, %405 : vector<1x16xf32>
    %407 = arith.mulf %406, %402 : vector<1x16xf32>
    %cst_130 = arith.constant 1.42141378 : f32
    %408 = vector.broadcast %cst_130 : f32 to vector<1x16xf32>
    %409 = arith.addf %407, %408 : vector<1x16xf32>
    %410 = arith.mulf %409, %402 : vector<1x16xf32>
    %cst_131 = arith.constant -0.284496725 : f32
    %411 = vector.broadcast %cst_131 : f32 to vector<1x16xf32>
    %412 = arith.addf %410, %411 : vector<1x16xf32>
    %413 = arith.mulf %412, %402 : vector<1x16xf32>
    %cst_132 = arith.constant 0.254829586 : f32
    %414 = vector.broadcast %cst_132 : f32 to vector<1x16xf32>
    %415 = arith.addf %413, %414 : vector<1x16xf32>
    %416 = arith.mulf %415, %402 : vector<1x16xf32>
    %cst_133 = arith.constant 0.000000e+00 : f32
    %417 = vector.broadcast %cst_133 : f32 to vector<1x16xf32>
    %418 = arith.subf %417, %397 : vector<1x16xf32>
    %419 = arith.mulf %418, %397 : vector<1x16xf32>
    %420 = math.exp %419 : vector<1x16xf32>
    %421 = arith.mulf %416, %420 : vector<1x16xf32>
    %cst_134 = arith.constant 1.000000e+00 : f32
    %422 = vector.broadcast %cst_134 : f32 to vector<1x16xf32>
    %423 = arith.subf %422, %421 : vector<1x16xf32>
    %424 = arith.mulf %396, %423 : vector<1x16xf32>
    %cst_135 = arith.constant 1.000000e+00 : f32
    %425 = vector.broadcast %cst_135 : f32 to vector<1x16xf32>
    %426 = arith.addf %425, %424 : vector<1x16xf32>
    %427 = arith.mulf %389, %426 : vector<1x16xf32>
    %428 = arith.truncf %427 : vector<1x16xf32> to vector<1x16xbf16>
    %c2_136 = arith.constant 2 : index
    %c0_137 = arith.constant 0 : index
    %c0_138 = arith.constant 0 : index
    %429 = vector.load %arg6[%c2_136, %c0_137, %c0_138] : memref<4x16x32xbf16, #tpu.memory_space<vmem>>, vector<1x16x32xbf16>
    %430 = vector.shape_cast %429 : vector<1x16x32xbf16> to vector<16x32xbf16>
    %cst_139 = arith.constant dense<0.000000e+00> : vector<1x32xf32>
    %431 = tpu.matmul %428, %430, %cst_139 {dimension_numbers = #tpu.dot_dimension_numbers<[1], [0], [0], [1], [0, 0, 1, 1], [], []>} : vector<1x16xbf16>, vector<16x32xbf16>, vector<1x32xf32> -> vector<1x32xf32>
    %432 = arith.addf %293, %431 : vector<1x32xf32>
    %c2_140 = arith.constant 2 : index
    %c0_141 = arith.constant 0 : index
    %c0_142 = arith.constant 0 : index
    %433 = vector.load %arg7[%c2_140, %c0_141, %c0_142] : memref<4x1x32xf32, #tpu.memory_space<vmem>>, vector<1x1x32xf32>
    %434 = vector.shape_cast %433 : vector<1x1x32xf32> to vector<1x32xf32>
    %435 = arith.addf %432, %434 : vector<1x32xf32>
    %c3 = arith.constant 3 : index
    %c0_143 = arith.constant 0 : index
    %c0_144 = arith.constant 0 : index
    %c0_145 = arith.constant 0 : index
    %436 = vector.load %arg2[%c3, %c0_143, %c0_144, %c0_145] : memref<4x3x3x32xf32, #tpu.memory_space<vmem>>, vector<1x3x3x32xf32>
    %437 = vector.shape_cast %436 : vector<1x3x3x32xf32> to vector<3x3x32xf32>
    %cst_146 = arith.constant 0.000000e+00 : f32
    %438 = vector.broadcast %cst_146 : f32 to vector<16x16x32xf32>
    %439 = vector.extract_strided_slice %6 {offsets = [0, 0, 0], sizes = [16, 16, 32], strides = [1, 1, 1]} : vector<18x16x32xf32> to vector<16x16x32xf32>
    %440 = vector.extract_strided_slice %437 {offsets = [0, 0, 0], sizes = [1, 1, 32], strides = [1, 1, 1]} : vector<3x3x32xf32> to vector<1x1x32xf32>
    %441 = vector.shape_cast %440 : vector<1x1x32xf32> to vector<32xf32>
    %442 = vector.shape_cast %441 : vector<32xf32> to vector<1x1x32xf32>
    %443 = vector.broadcast %442 : vector<1x1x32xf32> to vector<16x16x32xf32>
    %444 = arith.mulf %439, %443 : vector<16x16x32xf32>
    %445 = arith.addf %438, %444 : vector<16x16x32xf32>
    %446 = vector.extract_strided_slice %7 {offsets = [0, 0, 0], sizes = [16, 16, 32], strides = [1, 1, 1]} : vector<18x16x32xf32> to vector<16x16x32xf32>
    %447 = vector.extract_strided_slice %437 {offsets = [0, 1, 0], sizes = [1, 1, 32], strides = [1, 1, 1]} : vector<3x3x32xf32> to vector<1x1x32xf32>
    %448 = vector.shape_cast %447 : vector<1x1x32xf32> to vector<32xf32>
    %449 = vector.shape_cast %448 : vector<32xf32> to vector<1x1x32xf32>
    %450 = vector.broadcast %449 : vector<1x1x32xf32> to vector<16x16x32xf32>
    %451 = arith.mulf %446, %450 : vector<16x16x32xf32>
    %452 = arith.addf %445, %451 : vector<16x16x32xf32>
    %453 = vector.extract_strided_slice %8 {offsets = [0, 0, 0], sizes = [16, 16, 32], strides = [1, 1, 1]} : vector<18x16x32xf32> to vector<16x16x32xf32>
    %454 = vector.extract_strided_slice %437 {offsets = [0, 2, 0], sizes = [1, 1, 32], strides = [1, 1, 1]} : vector<3x3x32xf32> to vector<1x1x32xf32>
    %455 = vector.shape_cast %454 : vector<1x1x32xf32> to vector<32xf32>
    %456 = vector.shape_cast %455 : vector<32xf32> to vector<1x1x32xf32>
    %457 = vector.broadcast %456 : vector<1x1x32xf32> to vector<16x16x32xf32>
    %458 = arith.mulf %453, %457 : vector<16x16x32xf32>
    %459 = arith.addf %452, %458 : vector<16x16x32xf32>
    %460 = vector.extract_strided_slice %6 {offsets = [1, 0, 0], sizes = [16, 16, 32], strides = [1, 1, 1]} : vector<18x16x32xf32> to vector<16x16x32xf32>
    %461 = vector.extract_strided_slice %437 {offsets = [1, 0, 0], sizes = [1, 1, 32], strides = [1, 1, 1]} : vector<3x3x32xf32> to vector<1x1x32xf32>
    %462 = vector.shape_cast %461 : vector<1x1x32xf32> to vector<32xf32>
    %463 = vector.shape_cast %462 : vector<32xf32> to vector<1x1x32xf32>
    %464 = vector.broadcast %463 : vector<1x1x32xf32> to vector<16x16x32xf32>
    %465 = arith.mulf %460, %464 : vector<16x16x32xf32>
    %466 = arith.addf %459, %465 : vector<16x16x32xf32>
    %467 = vector.extract_strided_slice %7 {offsets = [1, 0, 0], sizes = [16, 16, 32], strides = [1, 1, 1]} : vector<18x16x32xf32> to vector<16x16x32xf32>
    %468 = vector.extract_strided_slice %437 {offsets = [1, 1, 0], sizes = [1, 1, 32], strides = [1, 1, 1]} : vector<3x3x32xf32> to vector<1x1x32xf32>
    %469 = vector.shape_cast %468 : vector<1x1x32xf32> to vector<32xf32>
    %470 = vector.shape_cast %469 : vector<32xf32> to vector<1x1x32xf32>
    %471 = vector.broadcast %470 : vector<1x1x32xf32> to vector<16x16x32xf32>
    %472 = arith.mulf %467, %471 : vector<16x16x32xf32>
    %473 = arith.addf %466, %472 : vector<16x16x32xf32>
    %474 = vector.extract_strided_slice %8 {offsets = [1, 0, 0], sizes = [16, 16, 32], strides = [1, 1, 1]} : vector<18x16x32xf32> to vector<16x16x32xf32>
    %475 = vector.extract_strided_slice %437 {offsets = [1, 2, 0], sizes = [1, 1, 32], strides = [1, 1, 1]} : vector<3x3x32xf32> to vector<1x1x32xf32>
    %476 = vector.shape_cast %475 : vector<1x1x32xf32> to vector<32xf32>
    %477 = vector.shape_cast %476 : vector<32xf32> to vector<1x1x32xf32>
    %478 = vector.broadcast %477 : vector<1x1x32xf32> to vector<16x16x32xf32>
    %479 = arith.mulf %474, %478 : vector<16x16x32xf32>
    %480 = arith.addf %473, %479 : vector<16x16x32xf32>
    %481 = vector.extract_strided_slice %6 {offsets = [2, 0, 0], sizes = [16, 16, 32], strides = [1, 1, 1]} : vector<18x16x32xf32> to vector<16x16x32xf32>
    %482 = vector.extract_strided_slice %437 {offsets = [2, 0, 0], sizes = [1, 1, 32], strides = [1, 1, 1]} : vector<3x3x32xf32> to vector<1x1x32xf32>
    %483 = vector.shape_cast %482 : vector<1x1x32xf32> to vector<32xf32>
    %484 = vector.shape_cast %483 : vector<32xf32> to vector<1x1x32xf32>
    %485 = vector.broadcast %484 : vector<1x1x32xf32> to vector<16x16x32xf32>
    %486 = arith.mulf %481, %485 : vector<16x16x32xf32>
    %487 = arith.addf %480, %486 : vector<16x16x32xf32>
    %488 = vector.extract_strided_slice %7 {offsets = [2, 0, 0], sizes = [16, 16, 32], strides = [1, 1, 1]} : vector<18x16x32xf32> to vector<16x16x32xf32>
    %489 = vector.extract_strided_slice %437 {offsets = [2, 1, 0], sizes = [1, 1, 32], strides = [1, 1, 1]} : vector<3x3x32xf32> to vector<1x1x32xf32>
    %490 = vector.shape_cast %489 : vector<1x1x32xf32> to vector<32xf32>
    %491 = vector.shape_cast %490 : vector<32xf32> to vector<1x1x32xf32>
    %492 = vector.broadcast %491 : vector<1x1x32xf32> to vector<16x16x32xf32>
    %493 = arith.mulf %488, %492 : vector<16x16x32xf32>
    %494 = arith.addf %487, %493 : vector<16x16x32xf32>
    %495 = vector.extract_strided_slice %8 {offsets = [2, 0, 0], sizes = [16, 16, 32], strides = [1, 1, 1]} : vector<18x16x32xf32> to vector<16x16x32xf32>
    %496 = vector.extract_strided_slice %437 {offsets = [2, 2, 0], sizes = [1, 1, 32], strides = [1, 1, 1]} : vector<3x3x32xf32> to vector<1x1x32xf32>
    %497 = vector.shape_cast %496 : vector<1x1x32xf32> to vector<32xf32>
    %498 = vector.shape_cast %497 : vector<32xf32> to vector<1x1x32xf32>
    %499 = vector.broadcast %498 : vector<1x1x32xf32> to vector<16x16x32xf32>
    %500 = arith.mulf %495, %499 : vector<16x16x32xf32>
    %501 = arith.addf %494, %500 : vector<16x16x32xf32>
    %c3_147 = arith.constant 3 : index
    %c0_148 = arith.constant 0 : index
    %c0_149 = arith.constant 0 : index
    %502 = vector.load %arg3[%c3_147, %c0_148, %c0_149] : memref<4x1x32xf32, #tpu.memory_space<vmem>>, vector<1x1x32xf32>
    %503 = vector.shape_cast %502 : vector<1x1x32xf32> to vector<1x32xf32>
    %504 = vector.shape_cast %503 : vector<1x32xf32> to vector<1x1x32xf32>
    %505 = vector.broadcast %504 : vector<1x1x32xf32> to vector<16x16x32xf32>
    %506 = arith.addf %501, %505 : vector<16x16x32xf32>
    %cst_150 = arith.constant 0.000000e+00 : f32
    %507 = vector.broadcast %cst_150 : f32 to vector<16x16x32xf32>
    %508 = arith.cmpf ogt, %506, %507 : vector<16x16x32xf32>
    %cst_151 = arith.constant 1.000000e-01 : f32
    %509 = vector.broadcast %cst_151 : f32 to vector<16x16x32xf32>
    %510 = arith.mulf %509, %506 : vector<16x16x32xf32>
    %511 = arith.select %508, %506, %510 : vector<16x16x32xi1>, vector<16x16x32xf32>
    %512 = vector.shape_cast %511 : vector<16x16x32xf32> to vector<256x32xf32>
    %513 = arith.truncf %512 : vector<256x32xf32> to vector<256x32xbf16>
    %c3_152 = arith.constant 3 : index
    %c0_153 = arith.constant 0 : index
    %c0_154 = arith.constant 0 : index
    %514 = vector.load %arg4[%c3_152, %c0_153, %c0_154] : memref<4x32x16xbf16, #tpu.memory_space<vmem>>, vector<1x32x16xbf16>
    %515 = vector.shape_cast %514 : vector<1x32x16xbf16> to vector<32x16xbf16>
    %cst_155 = arith.constant dense<0.000000e+00> : vector<256x16xf32>
    %516 = tpu.matmul %513, %515, %cst_155 {dimension_numbers = #tpu.dot_dimension_numbers<[1], [0], [0], [1], [0, 0, 1, 1], [], []>} : vector<256x32xbf16>, vector<32x16xbf16>, vector<256x16xf32> -> vector<256x16xf32>
    %c3_156 = arith.constant 3 : index
    %c0_157 = arith.constant 0 : index
    %c0_158 = arith.constant 0 : index
    %517 = vector.load %arg5[%c3_156, %c0_157, %c0_158] : memref<4x1x16xf32, #tpu.memory_space<vmem>>, vector<1x1x16xf32>
    %518 = vector.shape_cast %517 : vector<1x1x16xf32> to vector<1x16xf32>
    %519 = vector.broadcast %518 : vector<1x16xf32> to vector<256x16xf32>
    %520 = arith.addf %516, %519 : vector<256x16xf32>
    %cst_159 = arith.constant 0.000000e+00 : f32
    %521 = vector.broadcast %cst_159 : f32 to vector<256x16xf32>
    %522 = arith.cmpf ogt, %520, %521 : vector<256x16xf32>
    %cst_160 = arith.constant 1.000000e-01 : f32
    %523 = vector.broadcast %cst_160 : f32 to vector<256x16xf32>
    %524 = arith.mulf %523, %520 : vector<256x16xf32>
    %525 = arith.select %522, %520, %524 : vector<256x16xi1>, vector<256x16xf32>
    %cst_161 = arith.constant dense<0.000000e+00> : vector<16xf32>
    %526 = vector.multi_reduction <add>, %525, %cst_161 [0] : vector<256x16xf32> to vector<16xf32>
    %527 = vector.shape_cast %526 : vector<16xf32> to vector<1x16xf32>
    %cst_162 = arith.constant 2.560000e+02 : f32
    %528 = vector.broadcast %cst_162 : f32 to vector<1x16xf32>
    %529 = arith.divf %527, %528 : vector<1x16xf32>
    %cst_163 = arith.constant 5.000000e-01 : f32
    %530 = vector.broadcast %cst_163 : f32 to vector<1x16xf32>
    %531 = arith.mulf %530, %529 : vector<1x16xf32>
    %cst_164 = arith.constant 0.707106769 : f32
    %532 = vector.broadcast %cst_164 : f32 to vector<1x16xf32>
    %533 = arith.mulf %529, %532 : vector<1x16xf32>
    %cst_165 = arith.constant 0.000000e+00 : f32
    %534 = vector.broadcast %cst_165 : f32 to vector<1x16xf32>
    %535 = arith.cmpf oge, %533, %534 : vector<1x16xf32>
    %cst_166 = arith.constant 1.000000e+00 : f32
    %cst_167 = arith.constant -1.000000e+00 : f32
    %536 = vector.broadcast %cst_166 : f32 to vector<1x16xf32>
    %537 = vector.broadcast %cst_167 : f32 to vector<1x16xf32>
    %538 = arith.select %535, %536, %537 : vector<1x16xi1>, vector<1x16xf32>
    %539 = math.absf %533 : vector<1x16xf32>
    %cst_168 = arith.constant 0.327591091 : f32
    %540 = vector.broadcast %cst_168 : f32 to vector<1x16xf32>
    %541 = arith.mulf %540, %539 : vector<1x16xf32>
    %cst_169 = arith.constant 1.000000e+00 : f32
    %542 = vector.broadcast %cst_169 : f32 to vector<1x16xf32>
    %543 = arith.addf %542, %541 : vector<1x16xf32>
    %544 = tpu.reciprocal %543 {approx = true} : vector<1x16xf32> -> vector<1x16xf32>
    %cst_170 = arith.constant 1.06140542 : f32
    %545 = vector.broadcast %cst_170 : f32 to vector<1x16xf32>
    %546 = arith.mulf %545, %544 : vector<1x16xf32>
    %cst_171 = arith.constant -1.45315206 : f32
    %547 = vector.broadcast %cst_171 : f32 to vector<1x16xf32>
    %548 = arith.addf %546, %547 : vector<1x16xf32>
    %549 = arith.mulf %548, %544 : vector<1x16xf32>
    %cst_172 = arith.constant 1.42141378 : f32
    %550 = vector.broadcast %cst_172 : f32 to vector<1x16xf32>
    %551 = arith.addf %549, %550 : vector<1x16xf32>
    %552 = arith.mulf %551, %544 : vector<1x16xf32>
    %cst_173 = arith.constant -0.284496725 : f32
    %553 = vector.broadcast %cst_173 : f32 to vector<1x16xf32>
    %554 = arith.addf %552, %553 : vector<1x16xf32>
    %555 = arith.mulf %554, %544 : vector<1x16xf32>
    %cst_174 = arith.constant 0.254829586 : f32
    %556 = vector.broadcast %cst_174 : f32 to vector<1x16xf32>
    %557 = arith.addf %555, %556 : vector<1x16xf32>
    %558 = arith.mulf %557, %544 : vector<1x16xf32>
    %cst_175 = arith.constant 0.000000e+00 : f32
    %559 = vector.broadcast %cst_175 : f32 to vector<1x16xf32>
    %560 = arith.subf %559, %539 : vector<1x16xf32>
    %561 = arith.mulf %560, %539 : vector<1x16xf32>
    %562 = math.exp %561 : vector<1x16xf32>
    %563 = arith.mulf %558, %562 : vector<1x16xf32>
    %cst_176 = arith.constant 1.000000e+00 : f32
    %564 = vector.broadcast %cst_176 : f32 to vector<1x16xf32>
    %565 = arith.subf %564, %563 : vector<1x16xf32>
    %566 = arith.mulf %538, %565 : vector<1x16xf32>
    %cst_177 = arith.constant 1.000000e+00 : f32
    %567 = vector.broadcast %cst_177 : f32 to vector<1x16xf32>
    %568 = arith.addf %567, %566 : vector<1x16xf32>
    %569 = arith.mulf %531, %568 : vector<1x16xf32>
    %570 = arith.truncf %569 : vector<1x16xf32> to vector<1x16xbf16>
    %c3_178 = arith.constant 3 : index
    %c0_179 = arith.constant 0 : index
    %c0_180 = arith.constant 0 : index
    %571 = vector.load %arg6[%c3_178, %c0_179, %c0_180] : memref<4x16x32xbf16, #tpu.memory_space<vmem>>, vector<1x16x32xbf16>
    %572 = vector.shape_cast %571 : vector<1x16x32xbf16> to vector<16x32xbf16>
    %cst_181 = arith.constant dense<0.000000e+00> : vector<1x32xf32>
    %573 = tpu.matmul %570, %572, %cst_181 {dimension_numbers = #tpu.dot_dimension_numbers<[1], [0], [0], [1], [0, 0, 1, 1], [], []>} : vector<1x16xbf16>, vector<16x32xbf16>, vector<1x32xf32> -> vector<1x32xf32>
    %574 = arith.addf %435, %573 : vector<1x32xf32>
    %c3_182 = arith.constant 3 : index
    %c0_183 = arith.constant 0 : index
    %c0_184 = arith.constant 0 : index
    %575 = vector.load %arg7[%c3_182, %c0_183, %c0_184] : memref<4x1x32xf32, #tpu.memory_space<vmem>>, vector<1x1x32xf32>
    %576 = vector.shape_cast %575 : vector<1x1x32xf32> to vector<1x32xf32>
    %577 = arith.addf %574, %576 : vector<1x32xf32>
    %c0_185 = arith.constant 0 : index
    %c0_186 = arith.constant 0 : index
    %c0_187 = arith.constant 0 : index
    %578 = vector.load %arg8[%c0_185, %c0_186, %c0_187] : memref<1x1x32xf32, #tpu.memory_space<vmem>>, vector<1x1x32xf32>
    %579 = vector.shape_cast %578 : vector<1x1x32xf32> to vector<1x32xf32>
    %580 = vector.shape_cast %577 : vector<1x32xf32> to vector<1x1x32xf32>
    tpu.vector_store %arg8[%c0_185, %c0_186, %c0_187], %580 {strides = array<i32>} : memref<1x1x32xf32, #tpu.memory_space<vmem>>, vector<1x1x32xf32>,
    return
  }
  func.func @transform_0(%arg0: i32) -> (i32, i32, i32, i32) {
    %c0_i32 = arith.constant 0 : i32
    %c0_i32_0 = arith.constant 0 : i32
    %c0_i32_1 = arith.constant 0 : i32
    %c0_i32_2 = arith.constant 0 : i32
    return %arg0, %c0_i32, %c0_i32_0, %c0_i32_1 : i32, i32, i32, i32
  }
  func.func @transform_1(%arg0: i32) -> (i32, i32, i32, i32) {
    %c0_i32 = arith.constant 0 : i32
    %c0_i32_0 = arith.constant 0 : i32
    %c0_i32_1 = arith.constant 0 : i32
    %c0_i32_2 = arith.constant 0 : i32
    %c0_i32_3 = arith.constant 0 : i32
    return %c0_i32, %c0_i32_0, %c0_i32_1, %c0_i32_2 : i32, i32, i32, i32
  }
  func.func @transform_2(%arg0: i32) -> (i32, i32, i32) {
    %c0_i32 = arith.constant 0 : i32
    %c0_i32_0 = arith.constant 0 : i32
    %c0_i32_1 = arith.constant 0 : i32
    %c0_i32_2 = arith.constant 0 : i32
    return %c0_i32, %c0_i32_0, %c0_i32_1 : i32, i32, i32
  }
  func.func @transform_3(%arg0: i32) -> (i32, i32, i32) {
    %c0_i32 = arith.constant 0 : i32
    %c0_i32_0 = arith.constant 0 : i32
    %c0_i32_1 = arith.constant 0 : i32
    %c0_i32_2 = arith.constant 0 : i32
    return %c0_i32, %c0_i32_0, %c0_i32_1 : i32, i32, i32
  }
  func.func @transform_4(%arg0: i32) -> (i32, i32, i32) {
    %c0_i32 = arith.constant 0 : i32
    %c0_i32_0 = arith.constant 0 : i32
    %c0_i32_1 = arith.constant 0 : i32
    %c0_i32_2 = arith.constant 0 : i32
    return %c0_i32, %c0_i32_0, %c0_i32_1 : i32, i32, i32
  }
  func.func @transform_5(%arg0: i32) -> (i32, i32, i32) {
    %c0_i32 = arith.constant 0 : i32
    %c0_i32_0 = arith.constant 0 : i32
    %c0_i32_1 = arith.constant 0 : i32
    %c0_i32_2 = arith.constant 0 : i32
    return %c0_i32, %c0_i32_0, %c0_i32_1 : i32, i32, i32
  }
  func.func @transform_6(%arg0: i32) -> (i32, i32, i32) {
    %c0_i32 = arith.constant 0 : i32
    %c0_i32_0 = arith.constant 0 : i32
    %c0_i32_1 = arith.constant 0 : i32
    %c0_i32_2 = arith.constant 0 : i32
    return %c0_i32, %c0_i32_0, %c0_i32_1 : i32, i32, i32
  }
  func.func @transform_7(%arg0: i32) -> (i32, i32, i32) {
    %c0_i32 = arith.constant 0 : i32
    %c0_i32_0 = arith.constant 0 : i32
    %c0_i32_1 = arith.constant 0 : i32
    return %arg0, %c0_i32, %c0_i32_0 : i32, i32, i32
  }
}

module attributes {stable_mosaic.version = 11 : i64} {
  func.func @main_combine_kernel(%arg0: i32, %arg1: i32, %arg2: memref<1x32x256xbf16, #tpu.memory_space<vmem>>, %arg3: memref<2x32xbf16, #tpu.memory_space<vmem>>, %arg4: memref<2x1xf32, #tpu.memory_space<vmem>>, %arg5: memref<32x2xbf16, #tpu.memory_space<vmem>>, %arg6: memref<32x1xf32, #tpu.memory_space<vmem>>, %arg7: memref<1x32x1xf32, #tpu.memory_space<vmem>>, %arg8: memref<1x32x256xf32, #tpu.memory_space<vmem>>) attributes {dimension_semantics = [#tpu.dimension_semantics<parallel>, #tpu.dimension_semantics<parallel>], iteration_bounds = array<i64: 2, 1>, scalar_prefetch = 0 : i64, scratch_operands = 0 : i64, tpu.core_type = #tpu.core_type<tc>, window_params = [{transform_indices = @transform_0, window_bounds = array<i64: 1, 32, 256>}, {pipeline_mode = #tpu.pipeline_mode<synchronous>, transform_indices = @transform_1, window_bounds = array<i64: 2, 32>}, {pipeline_mode = #tpu.pipeline_mode<synchronous>, transform_indices = @transform_2, window_bounds = array<i64: 2, 1>}, {pipeline_mode = #tpu.pipeline_mode<synchronous>, transform_indices = @transform_3, window_bounds = array<i64: 32, 2>}, {pipeline_mode = #tpu.pipeline_mode<synchronous>, transform_indices = @transform_4, window_bounds = array<i64: 32, 1>}, {transform_indices = @transform_5, window_bounds = array<i64: 1, 32, 1>}, {transform_indices = @transform_6, window_bounds = array<i64: 1, 32, 256>}]} {
    %c0 = arith.constant 0 : index
    %c0_0 = arith.constant 0 : index
    %c0_1 = arith.constant 0 : index
    %0 = vector.load %arg2[%c0, %c0_0, %c0_1] : memref<1x32x256xbf16, #tpu.memory_space<vmem>>, vector<1x32x256xbf16>
    %1 = vector.shape_cast %0 : vector<1x32x256xbf16> to vector<32x256xbf16>
    %c0_2 = arith.constant 0 : index
    %c0_3 = arith.constant 0 : index
    %2 = vector.load %arg3[%c0_2, %c0_3] : memref<2x32xbf16, #tpu.memory_space<vmem>>, vector<2x32xbf16>
    %cst = arith.constant dense<0.000000e+00> : vector<2x256xf32>
    %3 = tpu.matmul %2, %1, %cst {dimension_numbers = #tpu.dot_dimension_numbers<[1], [0], [0], [1], [0, 0, 1, 1], [], []>} : vector<2x32xbf16>, vector<32x256xbf16>, vector<2x256xf32> -> vector<2x256xf32>
    %c0_4 = arith.constant 0 : index
    %c0_5 = arith.constant 0 : index
    %4 = vector.load %arg4[%c0_4, %c0_5] : memref<2x1xf32, #tpu.memory_space<vmem>>, vector<2x1xf32>
    %5 = vector.broadcast %4 : vector<2x1xf32> to vector<2x256xf32>
    %6 = arith.addf %3, %5 : vector<2x256xf32>
    %cst_6 = arith.constant 5.000000e-01 : f32
    %7 = vector.broadcast %cst_6 : f32 to vector<2x256xf32>
    %8 = arith.mulf %7, %6 : vector<2x256xf32>
    %cst_7 = arith.constant 0.707106769 : f32
    %9 = vector.broadcast %cst_7 : f32 to vector<2x256xf32>
    %10 = arith.mulf %6, %9 : vector<2x256xf32>
    %cst_8 = arith.constant 0.000000e+00 : f32
    %11 = vector.broadcast %cst_8 : f32 to vector<2x256xf32>
    %12 = arith.cmpf oge, %10, %11 : vector<2x256xf32>
    %cst_9 = arith.constant 1.000000e+00 : f32
    %cst_10 = arith.constant -1.000000e+00 : f32
    %13 = vector.broadcast %cst_9 : f32 to vector<2x256xf32>
    %14 = vector.broadcast %cst_10 : f32 to vector<2x256xf32>
    %15 = arith.select %12, %13, %14 : vector<2x256xi1>, vector<2x256xf32>
    %16 = math.absf %10 : vector<2x256xf32>
    %cst_11 = arith.constant 0.327591091 : f32
    %17 = vector.broadcast %cst_11 : f32 to vector<2x256xf32>
    %18 = arith.mulf %17, %16 : vector<2x256xf32>
    %cst_12 = arith.constant 1.000000e+00 : f32
    %19 = vector.broadcast %cst_12 : f32 to vector<2x256xf32>
    %20 = arith.addf %19, %18 : vector<2x256xf32>
    %21 = tpu.reciprocal %20 {approx = true} : vector<2x256xf32> -> vector<2x256xf32>
    %cst_13 = arith.constant 1.06140542 : f32
    %22 = vector.broadcast %cst_13 : f32 to vector<2x256xf32>
    %23 = arith.mulf %22, %21 : vector<2x256xf32>
    %cst_14 = arith.constant -1.45315206 : f32
    %24 = vector.broadcast %cst_14 : f32 to vector<2x256xf32>
    %25 = arith.addf %23, %24 : vector<2x256xf32>
    %26 = arith.mulf %25, %21 : vector<2x256xf32>
    %cst_15 = arith.constant 1.42141378 : f32
    %27 = vector.broadcast %cst_15 : f32 to vector<2x256xf32>
    %28 = arith.addf %26, %27 : vector<2x256xf32>
    %29 = arith.mulf %28, %21 : vector<2x256xf32>
    %cst_16 = arith.constant -0.284496725 : f32
    %30 = vector.broadcast %cst_16 : f32 to vector<2x256xf32>
    %31 = arith.addf %29, %30 : vector<2x256xf32>
    %32 = arith.mulf %31, %21 : vector<2x256xf32>
    %cst_17 = arith.constant 0.254829586 : f32
    %33 = vector.broadcast %cst_17 : f32 to vector<2x256xf32>
    %34 = arith.addf %32, %33 : vector<2x256xf32>
    %35 = arith.mulf %34, %21 : vector<2x256xf32>
    %cst_18 = arith.constant 0.000000e+00 : f32
    %36 = vector.broadcast %cst_18 : f32 to vector<2x256xf32>
    %37 = arith.subf %36, %16 : vector<2x256xf32>
    %38 = arith.mulf %37, %16 : vector<2x256xf32>
    %39 = math.exp %38 : vector<2x256xf32>
    %40 = arith.mulf %35, %39 : vector<2x256xf32>
    %cst_19 = arith.constant 1.000000e+00 : f32
    %41 = vector.broadcast %cst_19 : f32 to vector<2x256xf32>
    %42 = arith.subf %41, %40 : vector<2x256xf32>
    %43 = arith.mulf %15, %42 : vector<2x256xf32>
    %cst_20 = arith.constant 1.000000e+00 : f32
    %44 = vector.broadcast %cst_20 : f32 to vector<2x256xf32>
    %45 = arith.addf %44, %43 : vector<2x256xf32>
    %46 = arith.mulf %8, %45 : vector<2x256xf32>
    %47 = arith.truncf %46 : vector<2x256xf32> to vector<2x256xbf16>
    %c0_21 = arith.constant 0 : index
    %c0_22 = arith.constant 0 : index
    %48 = vector.load %arg5[%c0_21, %c0_22] : memref<32x2xbf16, #tpu.memory_space<vmem>>, vector<32x2xbf16>
    %cst_23 = arith.constant dense<0.000000e+00> : vector<32x256xf32>
    %49 = tpu.matmul %48, %47, %cst_23 {dimension_numbers = #tpu.dot_dimension_numbers<[1], [0], [0], [1], [0, 0, 1, 1], [], []>} : vector<32x2xbf16>, vector<2x256xbf16>, vector<32x256xf32> -> vector<32x256xf32>
    %c0_24 = arith.constant 0 : index
    %c0_25 = arith.constant 0 : index
    %50 = vector.load %arg6[%c0_24, %c0_25] : memref<32x1xf32, #tpu.memory_space<vmem>>, vector<32x1xf32>
    %51 = vector.broadcast %50 : vector<32x1xf32> to vector<32x256xf32>
    %52 = arith.addf %49, %51 : vector<32x256xf32>
    %c0_26 = arith.constant 0 : index
    %c0_27 = arith.constant 0 : index
    %c0_28 = arith.constant 0 : index
    %53 = vector.load %arg7[%c0_26, %c0_27, %c0_28] : memref<1x32x1xf32, #tpu.memory_space<vmem>>, vector<1x32x1xf32>
    %54 = vector.shape_cast %53 : vector<1x32x1xf32> to vector<32x1xf32>
    %55 = vector.broadcast %54 : vector<32x1xf32> to vector<32x256xf32>
    %56 = arith.mulf %55, %52 : vector<32x256xf32>
    %57 = arith.negf %56 : vector<32x256xf32>
    %58 = math.exp %57 : vector<32x256xf32>
    %cst_29 = arith.constant 1.000000e+00 : f32
    %59 = vector.broadcast %cst_29 : f32 to vector<32x256xf32>
    %60 = arith.addf %59, %58 : vector<32x256xf32>
    %61 = arith.divf %59, %60 : vector<32x256xf32>
    %c0_30 = arith.constant 0 : index
    %c0_31 = arith.constant 0 : index
    %c0_32 = arith.constant 0 : index
    %62 = vector.load %arg8[%c0_30, %c0_31, %c0_32] : memref<1x32x256xf32, #tpu.memory_space<vmem>>, vector<1x32x256xf32>
    %63 = vector.shape_cast %62 : vector<1x32x256xf32> to vector<32x256xf32>
    %64 = vector.shape_cast %61 : vector<32x256xf32> to vector<1x32x256xf32>
    tpu.vector_store %arg8[%c0_30, %c0_31, %c0_32], %64 {strides = array<i32>} : memref<1x32x256xf32, #tpu.memory_space<vmem>>, vector<1x32x256xf32>,
    return
  }
  func.func @transform_0(%arg0: i32, %arg1: i32) -> (i32, i32, i32) {
    %c0_i32 = arith.constant 0 : i32
    %c0_i32_0 = arith.constant 0 : i32
    return %arg0, %c0_i32, %arg1 : i32, i32, i32
  }
  func.func @transform_1(%arg0: i32, %arg1: i32) -> (i32, i32) {
    %c0_i32 = arith.constant 0 : i32
    %c0_i32_0 = arith.constant 0 : i32
    %c0_i32_1 = arith.constant 0 : i32
    return %c0_i32, %c0_i32_0 : i32, i32
  }
  func.func @transform_2(%arg0: i32, %arg1: i32) -> (i32, i32) {
    %c0_i32 = arith.constant 0 : i32
    %c0_i32_0 = arith.constant 0 : i32
    %c0_i32_1 = arith.constant 0 : i32
    return %c0_i32, %c0_i32_0 : i32, i32
  }
  func.func @transform_3(%arg0: i32, %arg1: i32) -> (i32, i32) {
    %c0_i32 = arith.constant 0 : i32
    %c0_i32_0 = arith.constant 0 : i32
    %c0_i32_1 = arith.constant 0 : i32
    return %c0_i32, %c0_i32_0 : i32, i32
  }
  func.func @transform_4(%arg0: i32, %arg1: i32) -> (i32, i32) {
    %c0_i32 = arith.constant 0 : i32
    %c0_i32_0 = arith.constant 0 : i32
    %c0_i32_1 = arith.constant 0 : i32
    return %c0_i32, %c0_i32_0 : i32, i32
  }
  func.func @transform_5(%arg0: i32, %arg1: i32) -> (i32, i32, i32) {
    %c0_i32 = arith.constant 0 : i32
    %c0_i32_0 = arith.constant 0 : i32
    %c0_i32_1 = arith.constant 0 : i32
    return %arg0, %c0_i32, %c0_i32_0 : i32, i32, i32
  }
  func.func @transform_6(%arg0: i32, %arg1: i32) -> (i32, i32, i32) {
    %c0_i32 = arith.constant 0 : i32
    %c0_i32_0 = arith.constant 0 : i32
    return %arg0, %c0_i32, %arg1 : i32, i32, i32
  }
}

</mosaic_0001>

<bundles_post_ra>
// kernel: se_module_forward.3
= control target key start
LH: loop header
LB: loop body
LE: loop exit
PB: predicated region body
PF: predicated region fallthrough
CT: control target
= control target key end

     0   :  { %s1765_s0 = inlined_call_operand.hbm [shape: bf16[2,32,256], index: 0, kind: input, shape index: {}]   ;;  %s1766_s1 = inlined_call_operand.hbm [shape: bf16[2,32], index: 1, kind: input, shape index: {}]   ;;  %s1767_s2 = inlined_call_operand.hbm [shape: f32[2,1], index: 2, kind: input, shape index: {}]   ;;  %s1768_s3 = inlined_call_operand.hbm [shape: bf16[32,2], index: 3, kind: input, shape index: {}]   ;;  %s1769_s4 = inlined_call_operand.hbm [shape: f32[32,1], index: 4, kind: input, shape index: {}]   ;;  %s1770_s5 = inlined_call_operand.hbm [shape: f32[2,32,1], index: 5, kind: input, shape index: {}]   ;;  %s1771_s6 = inlined_call_operand.hbm [shape: f32[2,32,256], index: 6, kind: output, shape index: {}]  }
   0x1   :  { %1779 = sst [smem:[#allocation20_spill]] %s1765_s0 }
   0x2   :  { %1780 = sst [smem:[#allocation21_spill]] %s1766_s1 }
   0x3   :  { %1781 = sst [smem:[#allocation22_spill]] %s1767_s2 }
   0x4   :  { %1782 = sst [smem:[#allocation23_spill]] %s1768_s3 }
   0x5   :  { %11 = vsyncpa [#allocation3], 0 }
   0x6   :  { %13 = vsyncpa [#allocation3 + $0x1], 0 }
   0x7   :  { %14 = vsyncpa [#allocation6], 0 }
   0x8   :  { %15 = vsyncpa [#allocation9], 0 }
   0x9   :  { %16 = vsyncpa [#allocation12], 0 }
   0xa   :  { %18 = vsyncpa [#allocation12 + $0x1], 0 }
   0xb   :  { %19 = vsyncpa [#allocation4], 0 }
   0xc   :  { %21 = vsyncpa [#allocation4 + $0x1], 0  ;;  %s1404_s21 = smov 0   ;;  %s1406_s22 = smov 0  }
   0xd   :  { %s1408_s23 = smov 0   ;;  %s1410_s24 = smov 0  }
   0xe   :  { %s1412_s25 = smov 0   ;;  %s1414_s26 = smov 0  }
   0xf LB: > { %s872_s27 = sadd.s32 4294967295, %s1352_s26   ;;  %s873_s28 = sadd.s32 4294967294, %s1352_s26   ;;  %s1352_s26 = sphi %s1414_s26, %s27_s26   ;;  %s1348_s25 = sphi %s1412_s25, %s1811_s25   ;;  %s1344_s24 = sphi %s1410_s24, %s1810_s24   ;;  %s1340_s23 = sphi %s1408_s23, %s1809_s23   ;;  %s1336_s22 = sphi %s1406_s22, %s1808_s22   ;;  %s1332_s21 = sphi %s1404_s21, %s1807_s21  }
  0x10   : > { %p61_p0 = scmp.ne.s32.totalorder %s1336_s22, %s1332_s21  ;;  %p1438_p1 = scmp.eq.s32.totalorder %s872_s27, 0 }
  0x11   : > { %p1442_p2 = scmp.eq.s32.totalorder %s872_s27, 1  ;;  %p203_p3 = scmp.eq.s32.totalorder %s873_s28, 1 }
  0x12   : > { %s1783_s29 = scalar_select %p1438_p1, 1, 0 }
  0x13   : > { %s1784_s30 = scalar_select %p1442_p2, 1, 0 }
  0x14   : > { %p1448_p4 = por %p1438_p1, %p61_p0  ;;  %p874_p5 = scmp.ge.s32.totalorder %s1352_s26, 1 }
  0x15   : > { %p1453_p6 = por %p203_p3, %p61_p0  ;;  %p210_p7 = scmp.lt.s32.totalorder %s1352_s26, 3 }
  0x16   : > { %s1785_s7 = scalar_select %p1448_p4, 1, 0 }
  0x17   : > { %s1786_s8 = scalar_select %p1453_p6, 1, 0 }
  0x18   : > { %p1458_p8 = pnand %p874_p5, %p210_p7  ;;  %s1354_s10 = smov [#allocation5]  }
  0x19   : > { %1787 = sst [smem:[#allocation19_spill]] %s1786_s8  ;;  %s223_s11 = sshll.u32 %s1354_s10, 4  ;;  %s224_s11 = int_to_ptr.vmem [resolvable:$true] %s223_s11 }
  0x1a   : > { %s1788_s9 = scalar_select %p1458_p8, 1, 0 }
  0x1b   : > { %p942_p10 = pneg %p1458_p8  ;;  %s1355_s12 = smov [#allocation8]  }
  0x1c   : > { %s244_s13 = sshll.u32 %s1355_s12, 4  ;;  %s1356_s15 = smov [#allocation7]   ;;  %s1471_s13 = int_to_ptr.vmem [resolvable:$true] %s244_s13 }
  0x1d   : > { %p1467_p11 = pnand %p942_p10, %p1438_p1  ;;  %s1473_s16 = sshll.u32 %s1356_s15, 4  ;;  %s235_s16 = int_to_ptr.vmem [resolvable:$true] %s1473_s16 }
  0x1e   : > { %s1790_s1 = sld [smem:[#allocation21_spill]] }
  0x1f   : > { %p1483_p13 = pneg %p1467_p11 }
  0x24   : > { %s1086_s19 = scalar_lea.hbm %s1790_s1, 16 }
  0x25   : > { %p1087_p12 = scmp.ne.s32.totalorder %s1790_s1, %s1086_s19  ;;  %p1093_p5 = scmp.lt.u32.totalorder %s1086_s19, %s1790_s1 }
  0x27   : > { %p1089_p0 = pnand %p1483_p13, %p1087_p12 }
  0x29   : > { %p1090_p3 = pneg %p1089_p0 }
  0x2b   : > { %p1095_p7 = pnand %p1093_p5, %p1090_p3 }
  0x2d   : > { %1098 = shalt.err (!%p1095_p7)
}
  0x2e   : > { %s1099_s15 = scalar_lea.vmem %s224_s11, 16  ;;  %s1106_s17 = scalar_lea.vmem %s224_s11, 32 }
  0x2f   : > { %p1100_p10 = scmp.ne.s32.totalorder %s224_s11, %s1099_s15  ;;  %p1107_p1 = scmp.lt.s32.totalorder %s224_s11, %s224_s11 }
  0x30   : > { %p1108_p4 = scmp.lt.s32.totalorder %s1106_s17, %s1099_s15 }
  0x31   : > { %p1102_p9 = pnand %p1100_p10, %p1483_p13 }
  0x32   : > { %p1109_p8 = por %p1108_p4, %p1107_p1 }
  0x33   : > { %p1103_p6 = pneg %p1102_p9 }
  0x35   : > { %p1110_p2 = pnand %p1109_p8, %p1103_p6 }
  0x37   : > { %1113 = shalt.err (!%p1110_p2)
}
  0x38   : > { %945 = dma.hbm_to_vmem [thread:$0]  (!%p1467_p11), %s1790_s1, 16, %s224_s11, [#allocation6]  }
  0x39   : > { %s1792_s3 = sld [smem:[#allocation23_spill]] }
  0x3f   : > { %s1114_s10 = scalar_lea.hbm %s1792_s3, 256 }
  0x40   : > { %p1115_p9 = scmp.ne.s32.totalorder %s1792_s3, %s1114_s10  ;;  %p1121_p2 = scmp.lt.u32.totalorder %s1114_s10, %s1792_s3 }
  0x42   : > { %p1117_p12 = pnand %p1115_p9, %p1483_p13 }
  0x44   : > { %p1118_p1 = pneg %p1117_p12 }
  0x46   : > { %p1123_p4 = pnand %p1121_p2, %p1118_p1 }
  0x48   : > { %1126 = shalt.err (!%p1123_p4)
}
  0x49   : > { %s1127_s11 = scalar_lea.vmem %s1471_s13, 256  ;;  %p1135_p3 = scmp.lt.s32.totalorder %s1471_s13, %s1471_s13 }
  0x4a   : > { %p1128_p6 = scmp.ne.s32.totalorder %s1471_s13, %s1127_s11  ;;  %p1136_p5 = scmp.lt.s32.totalorder %s1127_s11, %s1127_s11 }
  0x4c   : > { %p1130_p8 = pnand %p1128_p6, %p1483_p13  ;;  %p1137_p7 = por %p1136_p5, %p1135_p3 }
  0x4e   : > { %p1131_p0 = pneg %p1130_p8 }
  0x50   : > { %p1138_p10 = pnand %p1137_p7, %p1131_p0 }
  0x52   : > { %1141 = shalt.err (!%p1138_p10)
}
  0x53   : > { %s1357_s8 = smov 64   ;;  %s1358_s18 = smov 4  }
  0x54   : > { %951 = dma.hbm_to_vmem [thread:$0]  (!%p1467_p11), %s1792_s3, 256, %s1471_s13, [#allocation9], %s1357_s8, %s1357_s8, %s1358_s18  }
  0x55   : > { %s1793_s2 = sld [smem:[#allocation22_spill]] }
  0x5b   : > { %s1142_s12 = scalar_lea.hbm %s1793_s2, 32 }
  0x5c   : > { %p1143_p9 = scmp.ne.s32.totalorder %s1793_s2, %s1142_s12  ;;  %p1149_p2 = scmp.lt.u32.totalorder %s1142_s12, %s1793_s2 }
  0x5e   : > { %p1145_p12 = pnand %p1143_p9, %p1483_p13 }
  0x60   : > { %p1146_p1 = pneg %p1145_p12 }
  0x62   : > { %p1151_p4 = pnand %p1149_p2, %p1146_p1 }
  0x64   : > { %1154 = shalt.err (!%p1151_p4)
}
  0x65   : > { %s1155_s20 = scalar_lea.vmem %s235_s16, 32  ;;  %p1163_p3 = scmp.lt.s32.totalorder %s235_s16, %s235_s16 }
  0x66   : > { %p1156_p6 = scmp.ne.s32.totalorder %s235_s16, %s1155_s20  ;;  %p1164_p5 = scmp.lt.s32.totalorder %s1155_s20, %s1155_s20 }
  0x68   : > { %p1158_p8 = pnand %p1156_p6, %p1483_p13  ;;  %p1165_p7 = por %p1164_p5, %p1163_p3 }
  0x6a   : > { %p1159_p0 = pneg %p1158_p8 }
  0x6c   : > { %p1166_p10 = pnand %p1165_p7, %p1159_p0 }
  0x6e   : > { %1169 = shalt.err (!%p1166_p10)
}
  0x6f   : > { %948 = dma.hbm_to_vmem [thread:$0]  (!%p1467_p11), %s1793_s2, 32, %s235_s16, [#allocation6]  }
  0x70   : > { %s1359_s1 = smov [#allocation10]   ;;  %s1170_s10 = scalar_lea.hbm %s1769_s4, 512 }
  0x71   : > { %s257_s18 = sshll.u32 %s1359_s1, 4  ;;  %p1171_p9 = scmp.ne.s32.totalorder %s1769_s4, %s1170_s10  ;;  %s258_s18 = int_to_ptr.vmem [resolvable:$true] %s257_s18 }
  0x72   : > { %p1177_p2 = scmp.lt.u32.totalorder %s1170_s10, %s1769_s4 }
  0x73   : > { %p1173_p12 = pnand %p1171_p9, %p1483_p13 }
  0x75   : > { %p1174_p1 = pneg %p1173_p12 }
  0x77   : > { %p1179_p4 = pnand %p1177_p2, %p1174_p1 }
  0x79   : > { %1182 = shalt.err (!%p1179_p4)
}
  0x7a   : > { %s1183_s16 = scalar_lea.vmem %s258_s18, 512  ;;  %p1191_p3 = scmp.lt.s32.totalorder %s258_s18, %s258_s18 }
  0x7b   : > { %p1184_p6 = scmp.ne.s32.totalorder %s258_s18, %s1183_s16  ;;  %p1192_p5 = scmp.lt.s32.totalorder %s1183_s16, %s1183_s16 }
  0x7d   : > { %p1186_p8 = pnand %p1184_p6, %p1483_p13  ;;  %p1193_p7 = por %p1192_p5, %p1191_p3 }
  0x7f   : > { %p1187_p0 = pneg %p1186_p8 }
  0x81   : > { %p1194_p10 = pnand %p1193_p7, %p1187_p0 }
  0x83   : > { %1197 = shalt.err (!%p1194_p10)
}
  0x84   : > { %s1360_s20 = smov 128   ;;  %s1361_s28 = smov 8  }
  0x85   : > { %954 = dma.hbm_to_vmem [thread:$0]  (!%p1467_p11), %s1769_s4, 512, %s258_s18, [#allocation9], %s1360_s20, %s1360_s20, %s1361_s28  }
  0x86   : > { %s39_s1 = sadd.s32 1, %s1348_s25  ;;  %s48_s19 = sadd.s32 1, %s1340_s23 }
  0x87   : > { %p41_p13 = scmp.ge.s32.totalorder %s39_s1, 2  ;;  %p55_p9 = scmp.ne.s32.totalorder %s1340_s23, %s1336_s22 }
  0x88   : > { %p56_p12 = scmp.eq.s32.totalorder %s1352_s26, 0  ;;  %p970_p1 = scmp.lt.s32.totalorder %s1352_s26, 2 }
  0x89   : > { %s1813_s1 = smov (%p41_p13, %s39_s1), 0  ;;  %p1794_p4 = scmp.ne.s32.totalorder %s1784_s30, 0 }
  0x8a   : > { %p57_p2 = por %p56_p12, %p55_p9  ;;  %s43_s27 = ssub.s32 %s1348_s25, %s1813_s1 }
  0x8b   : > { %p1572_p6 = por %p1794_p4, %p55_p9  ;;  %s1579_s10 = sand.u32 1, %s1340_s23  }
  0x8c   : > { %p46_p11 = scmp.eq.s32.totalorder %s43_s27, 0  ;;  %s1777_s18 = sshll.u32 %s1579_s10, 5 }
  0x8d   : > { %s1778_s12 = sshll.u32 %s1348_s25, 9  ;;  %s1796_s0 = sld [smem:[#allocation20_spill]] }
  0x8e   : > { %s1584_s15 = scalar_select %p46_p11, %s1340_s23, %s48_s19  }
  0x8f   : > { %s275_s16 = scalar_lea.vmem [#allocation2], %s1777_s18  ;;  %p1597_p8 = pnand %p970_p1, %p57_p2 }
  0x90   : > { %s284_s13 = sshll.u32 %s275_s16, 4  ;;  %s1601_s13 = int_to_ptr.vmem [resolvable:$true] %s284_s13 }
  0x91   : > { %p1200_p3 = pneg %p1597_p8 }
  0x93   : > { %s1591_s30 = scalar_lea.hbm %s1796_s0, %s1778_s12  ;;  %s1203_s16 = scalar_lea.hbm %s1796_s0, 1024 }
  0x94   : > { %s1198_s27 = scalar_lea.hbm %s1591_s30, 512  ;;  %p1204_p10 = scmp.lt.u32.totalorder %s1591_s30, %s1796_s0 }
  0x95   : > { %p1199_p0 = scmp.ne.s32.totalorder %s1591_s30, %s1198_s27  ;;  %p1205_p13 = scmp.lt.u32.totalorder %s1203_s16, %s1198_s27 }
  0x96   : > { %p1207_p12 = scmp.lt.u32.totalorder %s1198_s27, %s1591_s30 }
  0x97   : > { %p1201_p5 = pnand %p1200_p3, %p1199_p0  ;;  %p1206_p9 = por %p1205_p13, %p1204_p10 }
  0x99   : > { %p1202_p7 = pneg %p1201_p5  ;;  %p1208_p1 = por %p1207_p12, %p1206_p9 }
  0x9b   : > { %p1209_p2 = pnand %p1208_p1, %p1202_p7 }
  0x9d   : > { %1212 = shalt.err (!%p1209_p2)
}
  0x9e   : > { %s1213_s19 = scalar_lea.vmem %s1601_s13, 512  ;;  %s1362_s17 = smov [#allocation2]  }
  0x9f   : > { %p1214_p4 = scmp.ne.s32.totalorder %s1601_s13, %s1213_s19  ;;  %s1218_s11 = sshll.u32 %s1362_s17, 4  ;;  %s1219_s11 = int_to_ptr.vmem [resolvable:$false] %s1218_s11 }
  0xa0   : > { %s1220_s18 = scalar_lea.vmem %s1219_s11, 1024  ;;  %p1221_p5 = scmp.lt.s32.totalorder %s1601_s13, %s1219_s11 }
  0xa1   : > { %p1216_p11 = pnand %p1214_p4, %p1200_p3  ;;  %p1222_p10 = scmp.lt.s32.totalorder %s1220_s18, %s1213_s19 }
  0xa3   : > { %p1217_p0 = pneg %p1216_p11  ;;  %p1223_p13 = por %p1222_p10, %p1221_p5 }
  0xa5   : > { %p1224_p9 = pnand %p1223_p13, %p1217_p0 }
  0xa7   : > { %1227 = shalt.err (!%p1224_p9)
}
  0xa8   : > { %s1798_s12 = scalar_lea.sflag [#allocation3], %s1579_s10  ;;  %s1799_s27 = sshll.u32 %s1348_s25, 9 }
  0xa9   : > { %958 = dma.hbm_to_vmem [thread:$0]  (!%p1597_p8), %s1591_s30, 512, %s1601_s13, %s1798_s12, %s1360_s20, %s1360_s20, %s1361_s28  }
  0xaa   : > { %s1639_s17 = scalar_lea.hbm %s1770_s5, %s1799_s27  ;;  %s1800_s11 = sshll.u32 %s1579_s10, 5 }
  0xab   : > { %s298_s18 = scalar_lea.vmem [#allocation11], %s1800_s11  ;;  %s295_s2 = scalar_lea.sflag [#allocation12], %s1579_s10 }
  0xac   : > { %s305_s0 = sshll.u32 %s298_s18, 4  ;;  %s1228_s3 = scalar_lea.hbm %s1639_s17, 512  ;;  %s1643_s0 = int_to_ptr.vmem [resolvable:$true] %s305_s0 }
  0xad   : > { %p1229_p7 = scmp.ne.s32.totalorder %s1639_s17, %s1228_s3  ;;  %s1233_s12 = scalar_lea.hbm %s1770_s5, 1024 }
  0xae   : > { %p1234_p2 = scmp.lt.u32.totalorder %s1639_s17, %s1770_s5  ;;  %p1235_p4 = scmp.lt.u32.totalorder %s1233_s12, %s1228_s3 }
  0xaf   : > { %p1231_p12 = pnand %p1229_p7, %p1200_p3  ;;  %p1237_p0 = scmp.lt.u32.totalorder %s1228_s3, %s1639_s17 }
  0xb0   : > { %p1236_p11 = por %p1235_p4, %p1234_p2 }
  0xb1   : > { %p1232_p1 = pneg %p1231_p12 }
  0xb2   : > { %p1238_p5 = por %p1237_p0, %p1236_p11 }
  0xb4   : > { %p1239_p10 = pnand %p1238_p5, %p1232_p1 }
  0xb6   : > { %1242 = shalt.err (!%p1239_p10)
}
  0xb7   : > { %s1243_s19 = scalar_lea.vmem %s1643_s0, 512  ;;  %s1363_s11 = smov [#allocation11]  }
  0xb8   : > { %p1244_p13 = scmp.ne.s32.totalorder %s1643_s0, %s1243_s19  ;;  %s1248_s18 = sshll.u32 %s1363_s11, 4  ;;  %s1249_s18 = int_to_ptr.vmem [resolvable:$false] %s1248_s18 }
  0xb9   : > { %s1250_s30 = scalar_lea.vmem %s1249_s18, 1024  ;;  %p1251_p12 = scmp.lt.s32.totalorder %s1643_s0, %s1249_s18 }
  0xba   : > { %p1246_p9 = pnand %p1244_p13, %p1200_p3  ;;  %p1252_p2 = scmp.lt.s32.totalorder %s1250_s30, %s1243_s19 }
  0xbc   : > { %p1247_p7 = pneg %p1246_p9  ;;  %p1253_p4 = por %p1252_p2, %p1251_p12 }
  0xbe   : > { %p1254_p11 = pnand %p1253_p4, %p1247_p7 }
  0xc0   : > { %1257 = shalt.err (!%p1254_p11)
}
  0xc1   : > { %961 = dma.hbm_to_vmem [thread:$0]  (!%p1597_p8), %s1639_s17, 512, %s1643_s0, %s295_s2, %s1360_s20, %s1360_s20, %s1361_s28  }
  0xc2   : > { %p1801_p3 = scmp.ne.s32.totalorder %s1788_s9, 0 }
  0xc3   : > { %s1677_s3 = sand.u32 (!%p1801_p3), 1, %s1336_s22   ;;  %p1802_p1 = scmp.ne.s32.totalorder (!%p1801_p3), %s1785_s7, 0 }
  0xc4   : > { %317 = sbr.rel (%p1801_p3) target bundleno = 758 (0x2f6), region = 44  ;;  %s887_s13 = sshll.u32 (!%p1801_p3), %s1677_s3, 5 }
  0xc5   : > { %s320_s12 = scalar_lea.sflag (!%p1801_p3), [#allocation3], %s1677_s3  ;;  %s323_s8 = scalar_lea.vmem (!%p1801_p3), [#allocation2], %s887_s13 }
  0xcb   : > { %1311 = dma.done.wait (%p1802_p1), %s320_s12, 512  }
  0xcc   : > { %1313 = vsyncadd (%p1802_p1), %s320_s12, 4294966784  ;;  %p1803_p0 = scmp.ne.s32.totalorder %s1783_s29, 0 }
  0xce   : > { %1315 = dma.done.wait (%p1803_p0), [#allocation6], 48  }
  0xcf   : > { %1317 = vsyncadd (%p1803_p0), [#allocation6], 4294967248 }
  0xd0   : > { %1319 = dma.done.wait (%p1803_p0), [#allocation9], 768  }
  0xd1   : > { %1321 = vsyncadd (%p1803_p0), [#allocation9], 4294966528  ;;  %s345_s0 = scalar_lea.sflag [#allocation12], %s1677_s3  ;;  %s1694_s2 = scalar_lea.vmem [#allocation11], %s887_s13 }
  0xd2   : > { %1323 = dma.done.wait (%p1802_p1), %s345_s0, 512  }
  0xd3   : > { %1325 = vsyncadd (%p1802_p1), %s345_s0, 4294966784  ;;  %v1364_v0 = vmov 0   ;;  %v1038_v1 = vld [vmem:[%s323_s8 + $0x4] ss:$8 sps:$4 sm:$0xff]   ;;  %v1040_v2 = vld [vmem:[%s323_s8] ss:$8 sps:$4 sm:$0xff]  }
  0xd4   : > { %452 = vmatprep.mubr.bf16.mxu0 %v1364_v0  ;;  %1036 = vset.pattern.permute.xlu0 %v1364_v0  ;;  %v1041_v3 = vld [vmem:[%s323_s8 + $0x14] ss:$8 sps:$4 sm:$0xff]   ;;  %v1043_v4 = vld [vmem:[%s323_s8 + $0x10] ss:$8 sps:$4 sm:$0xff]   ;;  %v390_v5 = vld [vmem:[#allocation7] sm:$0x3] }
  0xd5   : > { %599 = vmatprep.mubr.bf16.mxu1 %v1364_v0  ;;  %1037 = vset.pattern.permute.xlu1 %v1364_v0  ;;  %v519_v6 = vld [vmem:[#allocation10] sm:$0xff]  ;;  %v389_v7 = vld [vmem:[#allocation5] sm:$0x1]  ;;  %vm416_vm0 = vcmask 261120   ;;  %v522_v8 = vld [vmem:[#allocation10 + $0x18] sm:$0xff]  ;;  %v1365_v61 = vmov -1.0  }
  0xd6   : > { %420 = vmatprep.subr.bf16.mxu0 %v1038_v1  ;;  %393 = vperm.xlu0 %1036, %v390_v5   ;;  %v621_v9 = vld [vmem:[%s1694_s2 + $0x8] sm:$0xff]  ;;  %v623_v10 = vld [vmem:[%s1694_s2 + $0x18] sm:$0xff]  ;;  %v521_v12 = vld [vmem:[#allocation10 + $0x10] sm:$0xff]  ;;  %vm560_vm3 = vcmask 1040384   ;;  %vm553_vm4 = vcmask 15360   ;;  %s893_s29 = sshll.u32 %s1677_s3, 6 }
  0xd7   : > { %421 = vmatpush1.bf16.msra.mxu0 %v1040_v2  ;;  %v520_v11 = vld [vmem:[#allocation10 + $0x8] sm:$0xff]  ;;  %v620_v13 = vld [vmem:[%s1694_s2] sm:$0xff]  ;;  %v622_v14 = vld [vmem:[%s1694_s2 + $0x10] sm:$0xff]  ;;  %s381_s7 = scalar_lea.vmem [#allocation13], %s893_s29  ;;  %s919_s9 = sshll.u32 %s1344_s24, 10 }
  0xd8   : > { %422 = vmatprep.subr.bf16.mxu0 %v1041_v3  ;;  %530 = vperm.xlu1 %1037, %v520_v11   ;;  %s724_s20 = sshll.u32 %s381_s7, 4  ;;  %s1714_s17 = scalar_lea.hbm %s1771_s6, %s919_s9  ;;  %s1716_s20 = int_to_ptr.vmem [resolvable:$true] %s724_s20 }
  0xd9   : > { %s709_s24 = scalar_lea.sflag [#allocation4], %s1677_s3  ;;  %s1258_s27 = scalar_lea.vmem %s1716_s20, 1024 }
  0xda   : > { %525 = vperm.xlu0 %1036, %v519_v6   ;;  %p1259_p8 = scmp.ne.s32.totalorder %s1716_s20, %s1258_s27  ;;  %s1366_s16 = smov [#allocation13]  }
  0xdb   : > { %423 = vmatpush1.bf16.msra.mxu0 %v1043_v4  ;;  %s1262_s19 = sshll.u32 %s1366_s16, 4  ;;  %s1263_s19 = int_to_ptr.vmem [resolvable:$false] %s1262_s19 }
  0xdc   : > { %535 = vperm.xlu1 %1037, %v521_v12   ;;  %p1260_p5 = pnand %p1259_p8, %p1572_p6  ;;  %s1264_s11 = scalar_lea.vmem %s1263_s19, 2048 }
  0xdd   : > { %p1265_p13 = scmp.lt.s32.totalorder %s1716_s20, %s1263_s19  ;;  %p1266_p9 = scmp.lt.s32.totalorder %s1264_s11, %s1258_s27 }
  0xde   : > { %898 = vmatmul.mubr.msk.bf16.vlgmr.msra.gmra.mrb[0].mxu0 %vm416_vm0, %v389_v7  ;;  %540 = vperm.xlu0 %1036, %v522_v8   ;;  %p1261_p10 = pneg %p1260_p5 }
  0xdf   : > { %p1267_p7 = por %p1266_p9, %p1265_p13 }
  0xe0   : > { %626 = vperm.xlu1 %1037, %v620_v13   ;;  %v1044_v13 = vld [vmem:[#allocation8] sm:$0xff]  }
  0xe1   : > { %p1268_p12 = pnand %p1267_p7, %p1261_p10 }
  0xe2   : > { %631 = vperm.xlu0 %1036, %v621_v9  }
  0xe4   : > { %636 = vperm.xlu1 %1037, %v622_v14   ;;  %v1045_v14 = vld [vmem:[#allocation8 + $0x8] sm:$0xff]  }
  0xe6   : > { %641 = vperm.xlu0 %1036, %v623_v10  }
 0x155   : > { %v394_v15 = vpop.permute.xlu0 %393 }
 0x1b1   : > { %v454_v16 = vpop.f32.mrb[0].mxu0 }
 0x1b2   : > { %v455_v17 = vadd.f32 %v454_v16, %v394_v15  ;;  %v456_v18 = vpop.f32.mrb[1].mxu0  ;;  %v526_v16 = vpop.permute.xlu0 %525 }
 0x1b3   : > { %v457_v19 = vadd.f32 %v456_v18, %v394_v15  ;;  %v458_v20 = vpop.f32.mrb[2].mxu0  ;;  %v531_v15 = vpop.permute.xlu1 %530 }
 0x1b4   : > { %v463_v21 = vmul.f32 0.70710677, %v455_v17  ;;  %v459_v22 = vpop.f32.mrb[3].mxu0  ;;  %v461_v4 = vmul.f32 0.5, %v455_v17 }
 0x1b5   : > { %v464_v23 = vmul.f32 0.70710677, %v457_v19  ;;  %v462_v6 = vmul.f32 0.5, %v457_v19 }
 0x1b6   : > { %v469_v24 = vand.u32 2147483647, %v463_v21  ;;  %vm465_vm1 = vcmp.ge.f32.partialorder %v463_v21, 0.0  ;;  %v541_v18 = vpop.permute.xlu0 %540 }
 0x1b7   : > { %v470_v25 = vand.u32 2147483647, %v464_v23  ;;  %vm466_vm2 = vcmp.ge.f32.partialorder %v464_v23, 0.0  ;;  %v467_v62 = vsel %vm465_vm1, 1.0, %v1365_v61  ;;  %v536_v17 = vpop.permute.xlu1 %535 }
 0x1b8   : > { %v471_v26 = vmul.f32 0.3275911, %v469_v24  ;;  %v495_v30 = vsub.f32 0.0, %v469_v24  ;;  %v468_v1 = vsel %vm466_vm2, 1.0, %v1365_v61 }
 0x1b9   : > { %v472_v27 = vmul.f32 0.3275911, %v470_v25  ;;  %v496_v31 = vsub.f32 0.0, %v470_v25 }
 0x1ba   : > { %v473_v28 = vadd.f32 1.0, %v471_v26  ;;  %v497_v33 = vmul.f32 %v495_v30, %v469_v24 }
 0x1bb   : > { %v474_v29 = vadd.f32 1.0, %v472_v27  ;;  %v498_v35 = vmul.f32 %v496_v31, %v470_v25  ;;  %v627_v22 = vpop.permute.xlu1 %626 }
 0x1bc   : > { %1046 = vrcp.f32 %v473_v28  ;;  %v499_v39 = vmul.f32 1.442695, %v497_v33  ;;  %v632_v28 = vpop.permute.xlu0 %631 }
 0x1bd   : > { %1048 = vrcp.f32 %v474_v29  ;;  %v501_v41 = vmul.f32 1.442695, %v498_v35 }
 0x1be   : > { %1050 = vpow2.f32 %v499_v39 }
 0x1bf   : > { %1052 = vpow2.f32 %v501_v41  ;;  %v637_v39 = vpop.permute.xlu1 %636 }
 0x1c6   : > { %v1047_v32 = vpop.eup %1046 }
 0x1c7   : > { %v1049_v34 = vpop.eup %1048  ;;  %v477_v36 = vmul.f32 1.0614054, %v1047_v32 }
 0x1c8   : > { %v478_v37 = vmul.f32 1.0614054, %v1049_v34  ;;  %v1051_v55 = vpop.eup %1050 }
 0x1c9   : > { %v479_v38 = vadd.f32 -1.4531521, %v477_v36  ;;  %v1053_v57 = vpop.eup %1052 }
 0x1ca   : > { %v480_v40 = vadd.f32 -1.4531521, %v478_v37 }
 0x1cb   : > { %v481_v42 = vmul.f32 %v1047_v32, %v479_v38 }
 0x1cc   : > { %v482_v43 = vmul.f32 %v1049_v34, %v480_v40 }
 0x1cd   : > { %v483_v44 = vadd.f32 1.4214138, %v481_v42 }
 0x1ce   : > { %v484_v45 = vadd.f32 1.4214138, %v482_v43 }
 0x1cf   : > { %v485_v46 = vmul.f32 %v1047_v32, %v483_v44 }
 0x1d0   : > { %v486_v47 = vmul.f32 %v1049_v34, %v484_v45  ;;  %v642_v45 = vpop.permute.xlu0 %641 }
 0x1d1   : > { %v487_v48 = vadd.f32 -0.28449672, %v485_v46 }
 0x1d2   : > { %v488_v49 = vadd.f32 -0.28449672, %v486_v47 }
 0x1d3   : > { %v489_v50 = vmul.f32 %v1047_v32, %v487_v48 }
 0x1d4   : > { %v490_v51 = vmul.f32 %v1049_v34, %v488_v49 }
 0x1d5   : > { %v491_v52 = vadd.f32 0.2548296, %v489_v50 }
 0x1d6   : > { %v492_v53 = vadd.f32 0.2548296, %v490_v51 }
 0x1d7   : > { %v493_v54 = vmul.f32 %v1047_v32, %v491_v52 }
 0x1d8   : > { %v494_v56 = vmul.f32 %v1049_v34, %v492_v53 }
 0x1d9   : > { %v503_v58 = vmul.f32 %v1051_v55, %v493_v54 }
 0x1da   : > { %v504_v59 = vmul.f32 %v1053_v57, %v494_v56 }
 0x1db   : > { %v505_v60 = vsub.f32 1.0, %v503_v58 }
 0x1dc   : > { %v506_v63 = vsub.f32 1.0, %v504_v59 }
 0x1dd   : > { %v507_v2 = vmul.f32 %v505_v60, %v467_v62 }
 0x1de   : > { %v508_v3 = vmul.f32 %v506_v63, %v468_v1 }
 0x1df   : > { %v509_v5 = vadd.f32 1.0, %v507_v2 }
 0x1e0   : > { %v510_v7 = vadd.f32 1.0, %v508_v3 }
 0x1e1   : > { %v511_v8 = vmul.f32 %v509_v5, %v461_v4 }
 0x1e2   : > { %v512_v9 = vmul.f32 %v510_v7, %v462_v6 }
 0x1e3   : > { %v513_v10 = vpack.c.bf16 %v511_v8, %v511_v8 }
 0x1e4   : > { %v514_v11 = vpack.c.bf16 %v512_v9, %v512_v9 }
 0x1e5   : > { %v562_v12 = vsel %vm560_vm3, %v513_v10, 0 }
 0x1e6   : > { %901 = vmatprep.subr.msk.bf16.mxu1 %vm560_vm3, %v514_v11 }
 0x1e7   : > { %568 = vmatpush1.bf16.msra.mxu1 %v562_v12 }
 0x1ea   : > { %902 = vmatmul.mubr.msk.bf16.vlgmr.msra.gmra.mrb[0].mxu1 %vm553_vm4, %v1044_v13 }
 0x1eb   : > { %609 = vmatprep.mubr.bf16.mxu1 %v1364_v0 }
 0x1f2   : > { %903 = vmatmul.mubr.msk.bf16.gmra.mrb[4].mxu1 %vm553_vm4, %v1045_v14 }
 0x2bd   : > { %v601_v19 = vpop.f32.mrb[0].mxu1 }
 0x2be   : > { %v602_v20 = vadd.f32 %v601_v19, %v526_v16  ;;  %v603_v21 = vpop.f32.mrb[1].mxu1 }
 0x2bf   : > { %v604_v23 = vadd.f32 %v603_v21, %v526_v16  ;;  %v605_v24 = vpop.f32.mrb[2].mxu1 }
 0x2c0   : > { %v644_v25 = vmul.f32 %v627_v22, %v602_v20  ;;  %v606_v26 = vadd.f32 %v605_v24, %v531_v15  ;;  %v607_v27 = vpop.f32.mrb[3].mxu1 }
 0x2c1   : > { %v645_v29 = vmul.f32 %v627_v22, %v604_v23  ;;  %v608_v30 = vadd.f32 %v607_v27, %v531_v15 }
 0x2c2   : > { %v904_v31 = vmul.f32 -1.442695, %v644_v25  ;;  %v646_v0 = vmul.f32 %v632_v28, %v606_v26 }
 0x2c3   : > { %v905_v32 = vmul.f32 -1.442695, %v645_v29  ;;  %v647_v33 = vmul.f32 %v632_v28, %v608_v30 }
 0x2c4   : > { %1054 = vpow2.f32 %v904_v31  ;;  %v906_v34 = vmul.f32 -1.442695, %v646_v0 }
 0x2c5   : > { %1056 = vpow2.f32 %v905_v32  ;;  %v907_v35 = vmul.f32 -1.442695, %v647_v33  ;;  %v611_v36 = vpop.f32.mrb[4].mxu1 }
 0x2c6   : > { %1058 = vpow2.f32 %v906_v34  ;;  %v612_v37 = vadd.f32 %v611_v36, %v536_v17  ;;  %v613_v38 = vpop.f32.mrb[5].mxu1 }
 0x2c7   : > { %1060 = vpow2.f32 %v907_v35  ;;  %v614_v40 = vadd.f32 %v613_v38, %v536_v17  ;;  %v615_v41 = vpop.f32.mrb[6].mxu1 }
 0x2c8   : > { %v648_v42 = vmul.f32 %v637_v39, %v612_v37  ;;  %v616_v43 = vadd.f32 %v615_v41, %v541_v18  ;;  %v617_v44 = vpop.f32.mrb[7].mxu1 }
 0x2c9   : > { %v649_v46 = vmul.f32 %v637_v39, %v614_v40  ;;  %v618_v47 = vadd.f32 %v617_v44, %v541_v18 }
 0x2ca   : > { %v908_v48 = vmul.f32 -1.442695, %v648_v42  ;;  %v650_v49 = vmul.f32 %v642_v45, %v616_v43 }
 0x2cb   : > { %v909_v50 = vmul.f32 -1.442695, %v649_v46  ;;  %v651_v51 = vmul.f32 %v642_v45, %v618_v47 }
 0x2cc   : > { %1062 = vpow2.f32 %v908_v48  ;;  %v910_v52 = vmul.f32 -1.442695, %v650_v49 }
 0x2cd   : > { %1064 = vpow2.f32 %v909_v50  ;;  %v911_v53 = vmul.f32 -1.442695, %v651_v51 }
 0x2ce   : > { %v1055_v54 = vpop.eup %1054  ;;  %1066 = vpow2.f32 %v910_v52 }
 0x2cf   : > { %v1057_v55 = vpop.eup %1056  ;;  %v676_v56 = vadd.f32 1.0, %v1055_v54  ;;  %1068 = vpow2.f32 %v911_v53 }
 0x2d0   : > { %v1059_v57 = vpop.eup %1058  ;;  %v677_v58 = vadd.f32 1.0, %v1057_v55 }
 0x2d1   : > { %v1061_v59 = vpop.eup %1060  ;;  %1070 = vrcp.f32 %v676_v56  ;;  %v678_v60 = vadd.f32 1.0, %v1059_v57 }
 0x2d2   : > { %1072 = vrcp.f32 %v677_v58  ;;  %v679_v61 = vadd.f32 1.0, %v1061_v59 }
 0x2d3   : > { %1074 = vrcp.f32 %v678_v60 }
 0x2d4   : > { %1076 = vrcp.f32 %v679_v61 }
 0x2d6   : > { %v1063_v62 = vpop.eup %1062 }
 0x2d7   : > { %v1065_v63 = vpop.eup %1064  ;;  %v680_v1 = vadd.f32 1.0, %v1063_v62 }
 0x2d8   : > { %v1067_v2 = vpop.eup %1066  ;;  %v681_v3 = vadd.f32 1.0, %v1065_v63 }
 0x2d9   : > { %v1069_v4 = vpop.eup %1068  ;;  %1078 = vrcp.f32 %v680_v1  ;;  %v682_v5 = vadd.f32 1.0, %v1067_v2 }
 0x2da   : > { %1080 = vrcp.f32 %v681_v3  ;;  %v683_v6 = vadd.f32 1.0, %v1069_v4 }
 0x2db   : > { %v1071_v7 = vpop.eup %1070  ;;  %1082 = vrcp.f32 %v682_v5 }
 0x2dc   : > { %v1073_v8 = vpop.eup %1072  ;;  %700 = vst [vmem:[%s381_s7] sm:$0xff] %v1071_v7  ;;  %1084 = vrcp.f32 %v683_v6 }
 0x2dd   : > { %v1075_v9 = vpop.eup %1074  ;;  %701 = vst [vmem:[%s381_s7 + $0x8] sm:$0xff] %v1073_v8 }
 0x2de   : > { %v1077_v10 = vpop.eup %1076  ;;  %702 = vst [vmem:[%s381_s7 + $0x10] sm:$0xff] %v1075_v9 }
 0x2df   : > { %703 = vst [vmem:[%s381_s7 + $0x18] sm:$0xff] %v1077_v10 }
 0x2e3   : > { %v1079_v11 = vpop.eup %1078 }
 0x2e4   : > { %v1081_v12 = vpop.eup %1080  ;;  %704 = vst [vmem:[%s381_s7 + $0x20] sm:$0xff] %v1079_v11 }
 0x2e5   : > { %v1083_v13 = vpop.eup %1082  ;;  %705 = vst [vmem:[%s381_s7 + $0x28] sm:$0xff] %v1081_v12 }
 0x2e6   : > { %v1085_v14 = vpop.eup %1084  ;;  %706 = vst [vmem:[%s381_s7 + $0x30] sm:$0xff] %v1083_v13 }
 0x2e7   : > { %707 = vst [vmem:[%s381_s7 + $0x38] sm:$0xff] %v1085_v14 }
 0x2e8   : > { %1271 = shalt.err (!%p1268_p12)
}
 0x2e9   : > { %s1272_s18 = scalar_lea.hbm %s1714_s17, 1024  ;;  %s1276_s12 = scalar_lea.hbm %s1771_s6, 2048 }
 0x2ea   : > { %p1273_p2 = scmp.ne.s32.totalorder %s1714_s17, %s1272_s18  ;;  %p1277_p3 = scmp.lt.u32.totalorder %s1714_s17, %s1771_s6 }
 0x2eb   : > { %p1278_p1 = scmp.lt.u32.totalorder %s1276_s12, %s1272_s18  ;;  %p1280_p8 = scmp.lt.u32.totalorder %s1272_s18, %s1714_s17 }
 0x2ec   : > { %p1274_p4 = pnand %p1273_p2, %p1572_p6 }
 0x2ed   : > { %p1279_p0 = por %p1278_p1, %p1277_p3 }
 0x2ee   : > { %p1275_p11 = pneg %p1274_p4 }
 0x2ef   : > { %p1281_p5 = por %p1280_p8, %p1279_p0 }
 0x2f1   : > { %p1282_p10 = pnand %p1281_p5, %p1275_p11 }
 0x2f3   : > { %1285 = shalt.err (!%p1282_p10)
}
 0x2f4   : > { %s1367_s2 = smov 256   ;;  %s1368_s29 = smov 16  }
 0x2f5   : > { %940 = dma.vmem_to_hbm [thread:$0]  (%p1572_p6), %s1716_s20, 1024, %s1714_s17, %s709_s24, %s1367_s2, %s1367_s2, %s1368_s29  }
 0x2f6 PF: > { %s1804_s7 = sld [smem:[#allocation19_spill]]  ;;  %s739_s9 = sand.u32 1, %s1332_s21  }
 0x2f7   : > { %p1806_p9 = scmp.ge.s32.totalorder %s1352_s26, 2  ;;  %s740_s28 = scalar_lea.sflag [#allocation4], %s739_s9 }
 0x2fc   : > { %p1805_p13 = scmp.ne.s32.totalorder %s1804_s7, 0 }
 0x2fe   : > { %p963_p7 = pnand %p1806_p9, %p1805_p13 }
 0x300   : > { %1327 = dma.done.wait (!%p963_p7), %s740_s28, 1024  }
 0x301   : > { %1329 = vsyncadd (!%p963_p7), %s740_s28, 4294966272  ;;  %s27_s26 = sadd.s32 1, %s1352_s26   ;;  %s1807_s21 = smov %s1336_s22 }
 0x302   : > { %p24_p12 = scmp.ge.s32.totalorder %s27_s26, 4   ;;  %s1808_s22 = smov %s1340_s23 }
 0x303   : > { %s1809_s23 = smov %s1584_s15  ;;  %s1810_s24 = smov %s1348_s25 }
 0x304   : > { %s1811_s25 = smov %s1813_s1  ;;  %26 = sbr.rel (!%p24_p12) target bundleno = 15 (0xf), region = 118 }
 0x30b   :  { %745 = vsyncpa [#allocation3], 1 }
 0x30c   :  { %747 = vsyncpa [#allocation3 + $0x1], 1 }
 0x30d   :  { %748 = vsyncpa [#allocation6], 1 }
 0x30e   :  { %749 = vsyncpa [#allocation9], 1 }
 0x30f   :  { %750 = vsyncpa [#allocation12], 1 }
 0x310   :  { %752 = vsyncpa [#allocation12 + $0x1], 1 }
 0x311   :  { %753 = vsyncpa [#allocation4], 1 }
 0x312   :  { %755 = vsyncpa [#allocation4 + $0x1], 1 }

// kernel: se_module_forward.2
= control target key start
LH: loop header
LB: loop body
LE: loop exit
PB: predicated region body
PF: predicated region fallthrough
CT: control target
= control target key end

     0   :  { %12 = vsyncpa [#allocation4], 0  ;;  %s11208_s0 = inlined_call_operand.hbm [shape: bf16[2,16,16,32], index: 0, kind: input, shape index: {}]   ;;  %s11209_s1 = inlined_call_operand.hbm [shape: f32[4,3,3,32], index: 1, kind: input, shape index: {}]   ;;  %s11210_s2 = inlined_call_operand.hbm [shape: f32[4,1,32], index: 2, kind: input, shape index: {}]   ;;  %s11211_s3 = inlined_call_operand.hbm [shape: bf16[4,32,16], index: 3, kind: input, shape index: {}]   ;;  %s11212_s4 = inlined_call_operand.hbm [shape: f32[4,1,16], index: 4, kind: input, shape index: {}]   ;;  %s11213_s5 = inlined_call_operand.hbm [shape: bf16[4,16,32], index: 5, kind: input, shape index: {}]   ;;  %s11214_s6 = inlined_call_operand.hbm [shape: f32[4,1,32], index: 6, kind: input, shape index: {}]   ;;  %s11215_s7 = inlined_call_operand.hbm [shape: f32[2,1,32], index: 7, kind: output, shape index: {}]  }
   0x1   :  { %14 = vsyncpa [#allocation4 + $0x1], 0 }
   0x2   :  { %15 = vsyncpa [#allocation7], 0 }
   0x3   :  { %16 = vsyncpa [#allocation10], 0 }
   0x4   :  { %17 = vsyncpa [#allocation13], 0 }
   0x5   :  { %18 = vsyncpa [#allocation5], 0 }
   0x6   :  { %20 = vsyncpa [#allocation5 + $0x1], 0  ;;  %s7042_s24 = smov 0   ;;  %s7044_s25 = smov 0  }
   0x7   :  { %s7046_s26 = smov 0   ;;  %s7048_s27 = smov 0  }
   0x8 LB: > { %s6987_s28 = smov [#allocation6]   ;;  %s7063_s30 = sadd.s32 4294967295, %s6985_s27   ;;  %s6985_s27 = sphi %s7048_s27, %s11285_s27   ;;  %s6981_s26 = sphi %s7046_s26, %s11284_s26   ;;  %s6977_s25 = sphi %s7044_s25, %s11283_s25   ;;  %s6973_s24 = sphi %s7042_s24, %s11282_s24  }
   0x9   : > { %s221_s29 = sshll.u32 %s6987_s28, 4  ;;  %p5799_p0 = scmp.ge.s32.totalorder %s6985_s27, 1  ;;  %s7068_s29 = int_to_ptr.vmem [resolvable:$true] %s221_s29 }
   0xa   : > { %p11216_p1 = scmp.eq.s32.totalorder %s7063_s30, 0  ;;  %p209_p2 = scmp.lt.s32.totalorder %s6985_s27, 3 }
   0xb   : > { %s6988_s9 = smov [#allocation9]   ;;  %s6989_s12 = smov [#allocation12]  }
   0xc   : > { %p7070_p3 = pnand %p5799_p0, %p209_p2  ;;  %s247_s10 = sshll.u32 %s6988_s9, 4  ;;  %s7083_s10 = int_to_ptr.vmem [resolvable:$true] %s247_s10 }
   0xd   : > { %s273_s13 = sshll.u32 %s6989_s12, 4  ;;  %s6709_s16 = scalar_lea.hbm %s11209_s1, 768  ;;  %s7085_s13 = int_to_ptr.vmem [resolvable:$true] %s273_s13 }
   0xe   : > { %s11233_s8 = scalar_select %p7070_p3, 1, 0 }
   0xf   : > { %p6265_p5 = pneg %p7070_p3  ;;  %p6710_p7 = scmp.ne.s32.totalorder %s11209_s1, %s6709_s16 }
  0x10   : > { %p6716_p11 = scmp.lt.u32.totalorder %s6709_s16, %s11209_s1 }
  0x11   : > { %p7079_p6 = pnand %p6265_p5, %p11216_p1 }
  0x13   : > { %p7095_p8 = pneg %p7079_p6 }
  0x15   : > { %p6712_p9 = pnand %p7095_p8, %p6710_p7 }
  0x17   : > { %p6713_p10 = pneg %p6712_p9 }
  0x19   : > { %p6718_p12 = pnand %p6716_p11, %p6713_p10 }
  0x1b   : > { %6721 = shalt.err (!%p6718_p12)
}
  0x1c   : > { %s6722_s22 = scalar_lea.vmem %s7068_s29, 768  ;;  %p6730_p5 = scmp.lt.s32.totalorder %s7068_s29, %s7068_s29 }
  0x1d   : > { %p6723_p13 = scmp.ne.s32.totalorder %s7068_s29, %s6722_s22  ;;  %p6731_p4 = scmp.lt.s32.totalorder %s6722_s22, %s6722_s22 }
  0x1f   : > { %p6725_p0 = pnand %p6723_p13, %p7095_p8  ;;  %p6732_p7 = por %p6731_p4, %p6730_p5 }
  0x21   : > { %p6726_p2 = pneg %p6725_p0 }
  0x23   : > { %p6733_p9 = pnand %p6732_p7, %p6726_p2 }
  0x25   : > { %6736 = shalt.err (!%p6733_p9)
}
  0x26   : > { %s11218_s23 = smov 64   ;;  %s6991_s28 = smov 4  }
  0x27   : > { %6268 = dma.hbm_to_vmem [thread:$0]  (!%p7079_p6), %s11209_s1, 768, %s7068_s29, [#allocation7], %s11218_s23, %s11218_s23, %s6991_s28  }
  0x28   : > { %s6737_s16 = scalar_lea.hbm %s11211_s3, 1024 }
  0x29   : > { %p6738_p4 = scmp.ne.s32.totalorder %s11211_s3, %s6737_s16  ;;  %p6744_p12 = scmp.lt.u32.totalorder %s6737_s16, %s11211_s3 }
  0x2b   : > { %p6740_p10 = pnand %p6738_p4, %p7095_p8 }
  0x2d   : > { %p6741_p11 = pneg %p6740_p10 }
  0x2f   : > { %p6746_p13 = pnand %p6744_p12, %p6741_p11 }
  0x31   : > { %6749 = shalt.err (!%p6746_p13)
}
  0x32   : > { %s6750_s29 = scalar_lea.vmem %s7083_s10, 1024  ;;  %p6758_p7 = scmp.lt.s32.totalorder %s7083_s10, %s7083_s10 }
  0x33   : > { %p6751_p0 = scmp.ne.s32.totalorder %s7083_s10, %s6750_s29  ;;  %p6759_p9 = scmp.lt.s32.totalorder %s6750_s29, %s6750_s29 }
  0x35   : > { %p6753_p2 = pnand %p6751_p0, %p7095_p8  ;;  %p6760_p4 = por %p6759_p9, %p6758_p7 }
  0x37   : > { %p6754_p5 = pneg %p6753_p2 }
  0x39   : > { %p6761_p10 = pnand %p6760_p4, %p6754_p5 }
  0x3b   : > { %6764 = shalt.err (!%p6761_p10)
}
  0x3c   : > { %6274 = dma.hbm_to_vmem [thread:$0]  (!%p7079_p6), %s11211_s3, 1024, %s7083_s10, [#allocation10], %s11218_s23, %s11218_s23, %s6991_s28  }
  0x3d   : > { %s6765_s15 = scalar_lea.hbm %s11213_s5, 512 }
  0x3e   : > { %p6766_p11 = scmp.ne.s32.totalorder %s11213_s5, %s6765_s15  ;;  %p6772_p0 = scmp.lt.u32.totalorder %s6765_s15, %s11213_s5 }
  0x40   : > { %p6768_p12 = pnand %p6766_p11, %p7095_p8 }
  0x42   : > { %p6769_p13 = pneg %p6768_p12 }
  0x44   : > { %p6774_p2 = pnand %p6772_p0, %p6769_p13 }
  0x46   : > { %6777 = shalt.err (!%p6774_p2)
}
  0x47   : > { %s6778_s10 = scalar_lea.vmem %s7085_s13, 512  ;;  %p6786_p4 = scmp.lt.s32.totalorder %s7085_s13, %s7085_s13 }
  0x48   : > { %p6779_p5 = scmp.ne.s32.totalorder %s7085_s13, %s6778_s10  ;;  %p6787_p10 = scmp.lt.s32.totalorder %s6778_s10, %s6778_s10 }
  0x4a   : > { %p6781_p7 = pnand %p6779_p5, %p7095_p8  ;;  %p6788_p11 = por %p6787_p10, %p6786_p4 }
  0x4c   : > { %p6782_p9 = pneg %p6781_p7 }
  0x4e   : > { %p6789_p12 = pnand %p6788_p11, %p6782_p9 }
  0x50   : > { %6792 = shalt.err (!%p6789_p12)
}
  0x51   : > { %6280 = dma.hbm_to_vmem [thread:$0]  (!%p7079_p6), %s11213_s5, 512, %s7085_s13, [#allocation13], %s11218_s23, %s11218_s23, %s6991_s28  }
  0x52   : > { %s6992_s22 = smov [#allocation8]   ;;  %s6793_s15 = scalar_lea.hbm %s11210_s2, 64 }
  0x53   : > { %s234_s9 = sshll.u32 %s6992_s22, 4  ;;  %p6794_p13 = scmp.ne.s32.totalorder %s11210_s2, %s6793_s15  ;;  %s235_s9 = int_to_ptr.vmem [resolvable:$true] %s234_s9 }
  0x54   : > { %p6800_p5 = scmp.lt.u32.totalorder %s6793_s15, %s11210_s2 }
  0x55   : > { %p6796_p0 = pnand %p6794_p13, %p7095_p8 }
  0x57   : > { %p6797_p2 = pneg %p6796_p0 }
  0x59   : > { %p6802_p7 = pnand %p6800_p5, %p6797_p2 }
  0x5b   : > { %6805 = shalt.err (!%p6802_p7)
}
  0x5c   : > { %s6806_s13 = scalar_lea.vmem %s235_s9, 64  ;;  %p6814_p11 = scmp.lt.s32.totalorder %s235_s9, %s235_s9 }
  0x5d   : > { %p6807_p9 = scmp.ne.s32.totalorder %s235_s9, %s6806_s13  ;;  %p6815_p12 = scmp.lt.s32.totalorder %s6806_s13, %s6806_s13 }
  0x5f   : > { %p6809_p4 = pnand %p6807_p9, %p7095_p8  ;;  %p6816_p1 = por %p6815_p12, %p6814_p11 }
  0x61   : > { %p6810_p10 = pneg %p6809_p4 }
  0x63   : > { %p6817_p3 = pnand %p6816_p1, %p6810_p10 }
  0x65   : > { %6820 = shalt.err (!%p6817_p3)
}
  0x66   : > { %s6993_s10 = smov 16   ;;  %s6994_s21 = smov 1  }
  0x67   : > { %6271 = dma.hbm_to_vmem [thread:$0]  (!%p7079_p6), %s11210_s2, 64, %s235_s9, [#allocation7], %s6993_s10, %s6993_s10, %s6994_s21  }
  0x68   : > { %s6995_s12 = smov [#allocation11]   ;;  %s6996_s15 = smov [#allocation14]  }
  0x69   : > { %s260_s14 = sshll.u32 %s6995_s12, 4  ;;  %s286_s16 = sshll.u32 %s6996_s15, 4  ;;  %s261_s14 = int_to_ptr.vmem [resolvable:$true] %s260_s14  ;;  %s7192_s16 = int_to_ptr.vmem [resolvable:$true] %s286_s16 }
  0x6a   : > { %s6821_s20 = scalar_lea.hbm %s11212_s4, 64 }
  0x6b   : > { %p6822_p1 = scmp.ne.s32.totalorder %s11212_s4, %s6821_s20  ;;  %p6828_p0 = scmp.lt.u32.totalorder %s6821_s20, %s11212_s4 }
  0x6d   : > { %p6824_p3 = pnand %p6822_p1, %p7095_p8 }
  0x6f   : > { %p6825_p13 = pneg %p6824_p3 }
  0x71   : > { %p6830_p2 = pnand %p6828_p0, %p6825_p13 }
  0x73   : > { %6833 = shalt.err (!%p6830_p2)
}
  0x74   : > { %s6834_s22 = scalar_lea.vmem %s261_s14, 64  ;;  %p6842_p4 = scmp.lt.s32.totalorder %s261_s14, %s261_s14 }
  0x75   : > { %p6835_p5 = scmp.ne.s32.totalorder %s261_s14, %s6834_s22  ;;  %p6843_p10 = scmp.lt.s32.totalorder %s6834_s22, %s6834_s22 }
  0x77   : > { %p6837_p7 = pnand %p6835_p5, %p7095_p8  ;;  %p6844_p11 = por %p6843_p10, %p6842_p4 }
  0x79   : > { %p6838_p9 = pneg %p6837_p7 }
  0x7b   : > { %p6845_p12 = pnand %p6844_p11, %p6838_p9 }
  0x7d   : > { %6848 = shalt.err (!%p6845_p12)
}
  0x7e   : > { %6277 = dma.hbm_to_vmem [thread:$0]  (!%p7079_p6), %s11212_s4, 64, %s261_s14, [#allocation10], %s6993_s10, %s6993_s10, %s6994_s21  }
  0x7f   : > { %s6849_s18 = scalar_lea.hbm %s11214_s6, 64 }
  0x80   : > { %p6850_p1 = scmp.ne.s32.totalorder %s11214_s6, %s6849_s18  ;;  %p6856_p0 = scmp.lt.u32.totalorder %s6849_s18, %s11214_s6 }
  0x82   : > { %p6852_p3 = pnand %p6850_p1, %p7095_p8 }
  0x84   : > { %p6853_p13 = pneg %p6852_p3 }
  0x86   : > { %p6858_p2 = pnand %p6856_p0, %p6853_p13 }
  0x88   : > { %6861 = shalt.err (!%p6858_p2)
}
  0x89   : > { %s6862_s14 = scalar_lea.vmem %s7192_s16, 64  ;;  %p6870_p4 = scmp.lt.s32.totalorder %s7192_s16, %s7192_s16 }
  0x8a   : > { %p6863_p5 = scmp.ne.s32.totalorder %s7192_s16, %s6862_s14  ;;  %p6871_p10 = scmp.lt.s32.totalorder %s6862_s14, %s6862_s14 }
  0x8c   : > { %p6865_p7 = pnand %p6863_p5, %p7095_p8  ;;  %p6872_p11 = por %p6871_p10, %p6870_p4 }
  0x8e   : > { %p6866_p9 = pneg %p6865_p7 }
  0x90   : > { %p6873_p12 = pnand %p6872_p11, %p6866_p9 }
  0x92   : > { %6876 = shalt.err (!%p6873_p12)
}
  0x93   : > { %6283 = dma.hbm_to_vmem [thread:$0]  (!%p7079_p6), %s11214_s6, 64, %s7192_s16, [#allocation13], %s6993_s10, %s6993_s10, %s6994_s21  }
  0x94   : > { %s5798_s11 = sadd.s32 4294967294, %s6985_s27   ;;  %s7243_s19 = sadd.s32 1, %s6985_s27  }
  0x95   : > { %s30_s12 = ssub.s32 %s6985_s27, %s7243_s19  ;;  %s33_s15 = sadd.s32 1, %s6981_s26 }
  0x96   : > { %p31_p8 = scmp.eq.s32.totalorder %s30_s12, 0  ;;  %p40_p1 = scmp.ne.s32.totalorder %s6981_s26, %s6977_s25 }
  0x97   : > { %p41_p3 = scmp.eq.s32.totalorder %s6985_s27, 0  ;;  %p46_p13 = scmp.ne.s32.totalorder %s6977_s25, %s6973_s24 }
  0x98   : > { %s7254_s17 = scalar_select %p31_p8, %s6981_s26, %s33_s15  }
  0x99   : > { %p7256_p0 = por %p41_p3, %p40_p1  ;;  %p11237_p2 = scmp.eq.s32.totalorder %s7063_s30, 0 }
  0x9a   : > { %p196_p5 = scmp.eq.s32.totalorder %s7063_s30, 1  ;;  %p202_p7 = scmp.eq.s32.totalorder %s5798_s11, 1 }
  0x9b   : > { %p7262_p6 = por %p11237_p2, %p46_p13  ;;  %p6298_p9 = scmp.lt.s32.totalorder %s6985_s27, 2 }
  0x9c   : > { %s300_s21 = sand.u32 1, %s6981_s26   ;;  %p7269_p4 = por %p196_p5, %p40_p1 }
  0x9d   : > { %p7273_p10 = por %p202_p7, %p46_p13  ;;  %s5807_s13 = sshll.u32 %s300_s21, 7 }
  0x9e   : > { %s11239_s16 = scalar_select %p7269_p4, 1, 0 }
  0x9f   : > { %s11240_s20 = scalar_select %p7273_p10, 1, 0 }
  0xa0   : > { %s5909_s29 = sshll.u32 %s6985_s27, 11  ;;  %s304_s23 = scalar_lea.vmem [#allocation3], %s5807_s13 }
  0xa1   : > { %s7281_s22 = scalar_lea.hbm %s11208_s0, %s5909_s29  ;;  %s311_s11 = sshll.u32 %s304_s23, 4  ;;  %s7283_s11 = int_to_ptr.vmem [resolvable:$true] %s311_s11 }
  0xa2   : > { %p7287_p11 = pnand %p6298_p9, %p7256_p0  ;;  %s7291_s15 = scalar_lea.sflag [#allocation4], %s300_s21 }
  0xa3   : > { %s6877_s9 = scalar_lea.hbm %s7281_s22, 2048  ;;  %s6882_s18 = scalar_lea.hbm %s11208_s0, 4096 }
  0xa4   : > { %p6878_p12 = scmp.ne.s32.totalorder %s7281_s22, %s6877_s9  ;;  %p6879_p8 = pneg %p7287_p11 }
  0xa5   : > { %p6883_p13 = scmp.lt.u32.totalorder %s7281_s22, %s11208_s0  ;;  %p6884_p0 = scmp.lt.u32.totalorder %s6882_s18, %s6877_s9 }
  0xa6   : > { %p6880_p1 = pnand %p6879_p8, %p6878_p12  ;;  %p6886_p5 = scmp.lt.u32.totalorder %s6877_s9, %s7281_s22 }
  0xa7   : > { %p6885_p2 = por %p6884_p0, %p6883_p13 }
  0xa8   : > { %p6881_p3 = pneg %p6880_p1 }
  0xa9   : > { %p6887_p7 = por %p6886_p5, %p6885_p2 }
  0xab   : > { %p6888_p9 = pnand %p6887_p7, %p6881_p3 }
  0xad   : > { %6891 = shalt.err (!%p6888_p9)
}
  0xae   : > { %s6892_s21 = scalar_lea.vmem %s7283_s11, 2048  ;;  %s6997_s13 = smov [#allocation3]  }
  0xaf   : > { %p6893_p12 = scmp.ne.s32.totalorder %s7283_s11, %s6892_s21  ;;  %s6897_s29 = sshll.u32 %s6997_s13, 4  ;;  %s6898_s29 = int_to_ptr.vmem [resolvable:$false] %s6897_s29 }
  0xb0   : > { %s6899_s14 = scalar_lea.vmem %s6898_s29, 4096  ;;  %p6900_p4 = scmp.lt.s32.totalorder %s7283_s11, %s6898_s29 }
  0xb1   : > { %p6895_p1 = pnand %p6893_p12, %p6879_p8  ;;  %p6901_p13 = scmp.lt.s32.totalorder %s6899_s14, %s6892_s21 }
  0xb3   : > { %p6896_p10 = pneg %p6895_p1  ;;  %p6902_p0 = por %p6901_p13, %p6900_p4 }
  0xb5   : > { %p6903_p2 = pnand %p6902_p0, %p6896_p10 }
  0xb7   : > { %6906 = shalt.err (!%p6903_p2)
}
  0xb8   : > { %s11242_s9 = smov 64   ;;  %p11243_p8 = scmp.ne.s32.totalorder %s11233_s8, 0 }
  0xb9   : > { %6287 = dma.hbm_to_vmem [thread:$0]  (!%p7287_p11), %s7281_s22, 2048, %s7283_s11, %s7291_s15, %s11242_s9, %s11242_s9, %s6991_s28  }
  0xba   : > { %323 = sbr.rel (%p11243_p8) target bundleno = 1855 (0x73f), region = 48 }
  0xc1   : > { %s7325_s18 = sand.u32 1, %s6977_s25  }
  0xc2   : > { %s5811_s23 = sshll.u32 %s7325_s18, 7  ;;  %s326_s21 = scalar_lea.sflag [#allocation4], %s7325_s18 }
  0xc3   : > { %s7329_s13 = scalar_lea.vmem [#allocation3], %s5811_s23 }
  0xc4   : > { %6952 = dma.done.wait (%p7262_p6), %s326_s21, 2048  }
  0xc5   : > { %6954 = vsyncadd (%p7262_p6), %s326_s21, 4294965248  ;;  %p11244_p4 = scmp.eq.s32.totalorder %s7063_s30, 0 }
  0xc7   : > { %6956 = dma.done.wait (%p11244_p4), [#allocation7], 832   ;;  %p11245_p10 = pmov %p11244_p4 }
  0xc8   : > { %p11246_p11 = pmov %p11244_p4 }
  0xc9   : > { %6958 = vsyncadd (%p11245_p10), [#allocation7], 4294966464 }
  0xca   : > { %6960 = dma.done.wait (%p11246_p11), [#allocation10], 1088   ;;  %p11247_p3 = pmov %p11244_p4 }
  0xcc   : > { %6962 = vsyncadd (%p11247_p3), [#allocation10], 4294966208  ;;  %p11248_p5 = pmov %p11247_p3 }
  0xcd   : > { %p11249_p7 = pmov %p11247_p3 }
  0xce   : > { %6964 = dma.done.wait (%p11248_p5), [#allocation13], 576  }
  0xcf   : > { %6966 = vsyncadd (%p11249_p7), [#allocation13], 4294966720  ;;  %vm384_vm0 = vcmask 261120   ;;  %vm388_vm1 = vcmask 253952   ;;  %v666_v0 = vlaneseq  ;;  %v11220_v1 = vmov 0.0   ;;  %v6351_v4 = vld [vmem:[#allocation9] sm:$0xff]  }
  0xd0   : > { %385 = vst.msk [vmem:[#allocation2] sm:$0xff] %vm384_vm0, %v11220_v1  ;;  %386 = vst.msk [vmem:[#allocation2 + $0x8] sm:$0xff] %vm384_vm0, %v11220_v1  ;;  %6105 = vmatprep.subr.bf16.mxu1 %v11220_v1  ;;  %v6352_v6 = vld [vmem:[#allocation9 + $0x8] sm:$0xff]   ;;  %6069 = vmatprep.subr.bf16.mxu0 %v6351_v4  ;;  %v5974_v9 = vld [vmem:[%s7329_s13 + $0x8] sm:$0xff]   ;;  %s5906_s8 = sshll.u32 %s7063_s30, 4  ;;  %s382_s28 = scalar_lea.vmem [#allocation15], %s7325_s18 }
  0xd1   : > { %387 = vst.msk [vmem:[#allocation2 + $0x10] sm:$0xff] %vm384_vm0, %v11220_v1  ;;  %390 = vst.msk [vmem:[#allocation2 + $0x20] sm:$0xff] %vm384_vm0, %v11220_v1  ;;  %v667_v2 = vshrl.u32 %v666_v0, 7  ;;  %v5911_v8 = vld [vmem:[%s7329_s13] sm:$0xff]   ;;  %6070 = vmatpush3.bf16.msra.mxu0 %v6351_v4  ;;  %v5916_v12 = vunpack.c.l.bf16 %v5974_v9  ;;  %v5917_v13 = vunpack.c.h.bf16 %v5974_v9  ;;  %v665_v22 = vld [vmem:[#allocation6 + $0x8] sm:$0x7]  ;;  %s11163_s12 = scalar_lea.hbm %s11215_s7, %s5906_s8 }
  0xd2   : > { %389 = vst.msk [vmem:[#allocation2 + $0x18] sm:$0x1] %vm388_vm1, %v11220_v1  ;;  %393 = vst.msk [vmem:[#allocation2 + $0x38] sm:$0x1] %vm388_vm1, %v11220_v1  ;;  %v5912_v10 = vunpack.c.l.bf16 %v5911_v8  ;;  %v5913_v11 = vunpack.c.h.bf16 %v5911_v8  ;;  %6071 = vmatprep.subr.bf16.mxu0 %v6352_v6  ;;  %v663_v19 = vld [vmem:[#allocation6] sm:$0x7] }
  0xd3   : > { %391 = vst.msk [vmem:[#allocation2 + $0x28] sm:$0xff] %vm384_vm0, %v11220_v1  ;;  %392 = vst.msk [vmem:[#allocation2 + $0x30] sm:$0xff] %vm384_vm0, %v11220_v1  ;;  %v7493_v3 = vsub.s32 0, %v667_v2  ;;  %v7495_v5 = vsub.s32 1, %v667_v2  ;;  %v7497_v7 = vsub.s32 2, %v667_v2  ;;  %v5975_v30 = vld [vmem:[%s7329_s13 + $0x10] sm:$0xff]  }
  0xd4   : > { %394 = vst.msk [vmem:[#allocation2 + $0x40] sm:$0xff] %vm384_vm0, %v11220_v1  ;;  %395 = vst.msk [vmem:[#allocation2 + $0x48] sm:$0xff] %vm384_vm0, %v11220_v1  ;;  %v664_v21 = vld [vmem:[#allocation6 + $0x4] sm:$0x7]  ;;  %v5976_v35 = vld [vmem:[%s7329_s13 + $0x18] sm:$0xff]   ;;  %v5920_v44 = vunpack.c.l.bf16 %v5975_v30  ;;  %v5921_v45 = vunpack.c.h.bf16 %v5975_v30  ;;  %s5675_s10 = sshll.u32 %s382_s28, 4  ;;  %s11165_s10 = int_to_ptr.vmem [resolvable:$true] %s5675_s10 }
  0xd5   : > { %396 = vst.msk [vmem:[#allocation2 + $0x50] sm:$0xff] %vm384_vm0, %v11220_v1  ;;  %398 = vst.msk [vmem:[#allocation2 + $0x60] sm:$0xff] %vm384_vm0, %v11220_v1  ;;  %v7506_v23 = vrot.slane %v663_v19, %v7493_v3  ;;  %v7509_v24 = vrot.slane %v663_v19, %v7495_v5  ;;  %v7512_v25 = vrot.slane %v663_v19, %v7497_v7  ;;  %6072 = vmatpush3.bf16.msra.mxu0 %v6352_v6  ;;  %v5977_v36 = vld [vmem:[%s7329_s13 + $0x20] sm:$0xff]   ;;  %v5978_v41 = vld [vmem:[%s7329_s13 + $0x28] sm:$0xff]   ;;  %s5663_s30 = scalar_lea.sflag [#allocation5], %s7325_s18  ;;  %s6907_s15 = scalar_lea.vmem %s11165_s10, 16 }
  0xd6   : > { %397 = vst.msk [vmem:[#allocation2 + $0x58] sm:$0x1] %vm388_vm1, %v11220_v1  ;;  %401 = vst.msk [vmem:[#allocation2 + $0x78] sm:$0x1] %vm388_vm1, %v11220_v1  ;;  %v7515_v26 = vrot.slane %v664_v21, %v7493_v3  ;;  %v7518_v27 = vrot.slane %v664_v21, %v7495_v5  ;;  %v7521_v28 = vrot.slane %v664_v21, %v7497_v7  ;;  %6147 = vmatprep.subr.bf16.mxu0 %v11220_v1  ;;  %v5979_v46 = vld [vmem:[%s7329_s13 + $0x30] sm:$0xff]   ;;  %v5980_v47 = vld [vmem:[%s7329_s13 + $0x38] sm:$0xff]   ;;  %p6908_p6 = scmp.ne.s32.totalorder %s11165_s10, %s6907_s15 }
  0xd7   : > { %399 = vst.msk [vmem:[#allocation2 + $0x68] sm:$0xff] %vm384_vm0, %v11220_v1  ;;  %400 = vst.msk [vmem:[#allocation2 + $0x70] sm:$0xff] %vm384_vm0, %v11220_v1  ;;  %v555_v14 = vld [vmem:[#allocation2 + $0x7] sm:$0xff]  ;;  %v7524_v29 = vrot.slane %v665_v22, %v7493_v3  ;;  %v7536_v39 = vrot.slane %v665_v22, %v7495_v5  ;;  %v7539_v40 = vrot.slane %v665_v22, %v7497_v7  ;;  %v5924_v48 = vunpack.c.l.bf16 %v5976_v35  ;;  %p11279_p9 = scmp.ne.s32.totalorder %s11239_s16, 0  ;;  %s7001_s29 = smov [#allocation15]  }
  0xd8   : > { %402 = vst.msk [vmem:[#allocation2 + $0x80] sm:$0xff] %vm384_vm0, %v11220_v1  ;;  %403 = vst.msk [vmem:[#allocation2 + $0x88] sm:$0xff] %vm384_vm0, %v11220_v1  ;;  %v556_v15 = vld [vmem:[#allocation2 + $0xf] sm:$0xff]  ;;  %v670_v31 = vmul.f32 %v7506_v23, %v555_v14  ;;  %v5925_v49 = vunpack.c.h.bf16 %v5976_v35  ;;  %v5928_v50 = vunpack.c.l.bf16 %v5977_v36  ;;  %v5929_v51 = vunpack.c.h.bf16 %v5977_v36  ;;  %s6911_s14 = sshll.u32 %s7001_s29, 4  ;;  %s6912_s14 = int_to_ptr.vmem [resolvable:$false] %s6911_s14 }
  0xd9   : > { %404 = vst.msk [vmem:[#allocation2 + $0x90] sm:$0xff] %vm384_vm0, %v11220_v1  ;;  %406 = vst.msk [vmem:[#allocation2 + $0xa0] sm:$0xff] %vm384_vm0, %v11220_v1  ;;  %v591_v16 = vld [vmem:[#allocation2 + $0x8] sm:$0xff]  ;;  %v592_v17 = vld [vmem:[#allocation2 + $0x10] sm:$0xff]  ;;  %v671_v32 = vmul.f32 %v7506_v23, %v556_v15  ;;  %v5932_v54 = vunpack.c.l.bf16 %v5978_v41  ;;  %v5933_v55 = vunpack.c.h.bf16 %v5978_v41  ;;  %v5936_v59 = vunpack.c.l.bf16 %v5979_v46  ;;  %p6909_p12 = pnand %p6908_p6, %p11279_p9  ;;  %s6913_s9 = scalar_lea.vmem %s6912_s14, 32 }
  0xda   : > { %405 = vst.msk [vmem:[#allocation2 + $0x98] sm:$0x1] %vm388_vm1, %v11220_v1  ;;  %409 = vst.msk [vmem:[#allocation2 + $0xb8] sm:$0x1] %vm388_vm1, %v11220_v1  ;;  %v627_v18 = vld [vmem:[#allocation2 + $0x9] sm:$0xff]  ;;  %v628_v20 = vld [vmem:[#allocation2 + $0x11] sm:$0xff]  ;;  %v738_v33 = vmul.f32 %v7509_v24, %v591_v16  ;;  %v739_v34 = vmul.f32 %v7509_v24, %v592_v17  ;;  %v5937_v60 = vunpack.c.h.bf16 %v5979_v46  ;;  %v5940_v61 = vunpack.c.l.bf16 %v5980_v47  ;;  %p6914_p13 = scmp.lt.s32.totalorder %s11165_s10, %s6912_s14  ;;  %p6915_p0 = scmp.lt.s32.totalorder %s6913_s9, %s6907_s15 }
  0xdb   : > { %407 = vst.msk [vmem:[#allocation2 + $0xa8] sm:$0xff] %vm384_vm0, %v11220_v1  ;;  %408 = vst.msk [vmem:[#allocation2 + $0xb0] sm:$0xff] %vm384_vm0, %v11220_v1  ;;  %v806_v37 = vmul.f32 %v7512_v25, %v627_v18  ;;  %v807_v38 = vmul.f32 %v7512_v25, %v628_v20  ;;  %v5941_v62 = vunpack.c.h.bf16 %v5980_v47  ;;  %p6910_p1 = pneg %p6909_p12 }
  0xdc   : > { %410 = vst.msk [vmem:[#allocation2 + $0xc0] sm:$0xff] %vm384_vm0, %v11220_v1  ;;  %411 = vst.msk [vmem:[#allocation2 + $0xc8] sm:$0xff] %vm384_vm0, %v11220_v1  ;;  %v770_v42 = vadd.f32 %v738_v33, %v670_v31  ;;  %v771_v43 = vadd.f32 %v739_v34, %v671_v32  ;;  %p6916_p2 = por %p6915_p0, %p6914_p13 }
  0xdd   : > { %412 = vst.msk [vmem:[#allocation2 + $0xd0] sm:$0xff] %vm384_vm0, %v11220_v1  ;;  %414 = vst.msk [vmem:[#allocation2 + $0xe0] sm:$0xff] %vm384_vm0, %v11220_v1 }
  0xde   : > { %413 = vst.msk [vmem:[#allocation2 + $0xd8] sm:$0x1] %vm388_vm1, %v11220_v1  ;;  %417 = vst.msk [vmem:[#allocation2 + $0xf8] sm:$0x1] %vm388_vm1, %v11220_v1  ;;  %v838_v52 = vadd.f32 %v806_v37, %v770_v42  ;;  %v839_v53 = vadd.f32 %v807_v38, %v771_v43  ;;  %p6917_p8 = pnand %p6916_p2, %p6910_p1 }
  0xdf   : > { %415 = vst.msk [vmem:[#allocation2 + $0xe8] sm:$0xff] %vm384_vm0, %v11220_v1  ;;  %416 = vst.msk [vmem:[#allocation2 + $0xf0] sm:$0xff] %vm384_vm0, %v11220_v1 }
  0xe0   : > { %418 = vst.msk [vmem:[#allocation2 + $0x100] sm:$0xff] %vm384_vm0, %v11220_v1  ;;  %419 = vst.msk [vmem:[#allocation2 + $0x108] sm:$0xff] %vm384_vm0, %v11220_v1 }
  0xe1   : > { %420 = vst.msk [vmem:[#allocation2 + $0x110] sm:$0xff] %vm384_vm0, %v11220_v1  ;;  %422 = vst.msk [vmem:[#allocation2 + $0x120] sm:$0xff] %vm384_vm0, %v11220_v1 }
  0xe2   : > { %421 = vst.msk [vmem:[#allocation2 + $0x118] sm:$0x1] %vm388_vm1, %v11220_v1  ;;  %425 = vst.msk [vmem:[#allocation2 + $0x138] sm:$0x1] %vm388_vm1, %v11220_v1 }
  0xe3   : > { %423 = vst.msk [vmem:[#allocation2 + $0x128] sm:$0xff] %vm384_vm0, %v11220_v1  ;;  %424 = vst.msk [vmem:[#allocation2 + $0x130] sm:$0xff] %vm384_vm0, %v11220_v1 }
  0xe4   : > { %426 = vst.msk [vmem:[#allocation2 + $0x140] sm:$0xff] %vm384_vm0, %v11220_v1  ;;  %427 = vst.msk [vmem:[#allocation2 + $0x148] sm:$0xff] %vm384_vm0, %v11220_v1 }
  0xe5   : > { %428 = vst.msk [vmem:[#allocation2 + $0x150] sm:$0xff] %vm384_vm0, %v11220_v1  ;;  %430 = vst.msk [vmem:[#allocation2 + $0x160] sm:$0xff] %vm384_vm0, %v11220_v1 }
  0xe6   : > { %429 = vst.msk [vmem:[#allocation2 + $0x158] sm:$0x1] %vm388_vm1, %v11220_v1  ;;  %433 = vst.msk [vmem:[#allocation2 + $0x178] sm:$0x1] %vm388_vm1, %v11220_v1 }
  0xe7   : > { %431 = vst.msk [vmem:[#allocation2 + $0x168] sm:$0xff] %vm384_vm0, %v11220_v1  ;;  %432 = vst.msk [vmem:[#allocation2 + $0x170] sm:$0xff] %vm384_vm0, %v11220_v1 }
  0xe8   : > { %434 = vst.msk [vmem:[#allocation2 + $0x180] sm:$0xff] %vm384_vm0, %v11220_v1  ;;  %435 = vst.msk [vmem:[#allocation2 + $0x188] sm:$0xff] %vm384_vm0, %v11220_v1 }
  0xe9   : > { %436 = vst.msk [vmem:[#allocation2 + $0x190] sm:$0xff] %vm384_vm0, %v11220_v1  ;;  %438 = vst.msk [vmem:[#allocation2 + $0x1a0] sm:$0xff] %vm384_vm0, %v11220_v1 }
  0xea   : > { %437 = vst.msk [vmem:[#allocation2 + $0x198] sm:$0x1] %vm388_vm1, %v11220_v1  ;;  %441 = vst.msk [vmem:[#allocation2 + $0x1b8] sm:$0x1] %vm388_vm1, %v11220_v1 }
  0xeb   : > { %439 = vst.msk [vmem:[#allocation2 + $0x1a8] sm:$0xff] %vm384_vm0, %v11220_v1  ;;  %440 = vst.msk [vmem:[#allocation2 + $0x1b0] sm:$0xff] %vm384_vm0, %v11220_v1 }
  0xec   : > { %442 = vst.msk [vmem:[#allocation2 + $0x1c0] sm:$0xff] %vm384_vm0, %v11220_v1  ;;  %443 = vst.msk [vmem:[#allocation2 + $0x1c8] sm:$0xff] %vm384_vm0, %v11220_v1 }
  0xed   : > { %444 = vst.msk [vmem:[#allocation2 + $0x1d0] sm:$0xff] %vm384_vm0, %v11220_v1  ;;  %446 = vst.msk [vmem:[#allocation2 + $0x1e0] sm:$0xff] %vm384_vm0, %v11220_v1 }
  0xee   : > { %445 = vst.msk [vmem:[#allocation2 + $0x1d8] sm:$0x1] %vm388_vm1, %v11220_v1  ;;  %449 = vst.msk [vmem:[#allocation2 + $0x1f8] sm:$0x1] %vm388_vm1, %v11220_v1 }
  0xef   : > { %447 = vst.msk [vmem:[#allocation2 + $0x1e8] sm:$0xff] %vm384_vm0, %v11220_v1  ;;  %448 = vst.msk [vmem:[#allocation2 + $0x1f0] sm:$0xff] %vm384_vm0, %v11220_v1 }
  0xf0   : > { %450 = vst.msk [vmem:[#allocation2 + $0x200] sm:$0xff] %vm384_vm0, %v11220_v1  ;;  %451 = vst.msk [vmem:[#allocation2 + $0x208] sm:$0xff] %vm384_vm0, %v11220_v1 }
  0xf1   : > { %452 = vst.msk [vmem:[#allocation2 + $0x210] sm:$0xff] %vm384_vm0, %v11220_v1  ;;  %454 = vst.msk [vmem:[#allocation2 + $0x220] sm:$0xff] %vm384_vm0, %v11220_v1 }
  0xf2   : > { %453 = vst.msk [vmem:[#allocation2 + $0x218] sm:$0x1] %vm388_vm1, %v11220_v1  ;;  %457 = vst.msk [vmem:[#allocation2 + $0x238] sm:$0x1] %vm388_vm1, %v11220_v1 }
  0xf3   : > { %455 = vst.msk [vmem:[#allocation2 + $0x228] sm:$0xff] %vm384_vm0, %v11220_v1  ;;  %456 = vst.msk [vmem:[#allocation2 + $0x230] sm:$0xff] %vm384_vm0, %v11220_v1 }
  0xf4   : > { %11250 = vst [vmem:[#allocation21_spill] sm:$0xff] %v7493_v3  ;;  %11251 = vst [vmem:[#allocation22_spill] sm:$0xff] %v7495_v5 }
  0xf5   : > { %11252 = vst [vmem:[#allocation23_spill] sm:$0xff] %v7497_v7  ;;  %523 = vst.msk [vmem:[#allocation2 + $0x28] sm:$0xff] %vm384_vm0, %v5912_v10 }
  0xf6   : > { %524 = vst.msk [vmem:[#allocation2 + $0x30] sm:$0xff] %vm384_vm0, %v5913_v11  ;;  %525 = vst.msk [vmem:[#allocation2 + $0x48] sm:$0xff] %vm384_vm0, %v5916_v12 }
  0xf7   : > { %526 = vst.msk [vmem:[#allocation2 + $0x50] sm:$0xff] %vm384_vm0, %v5917_v13  ;;  %527 = vst.msk [vmem:[#allocation2 + $0x68] sm:$0xff] %vm384_vm0, %v5920_v44 }
  0xf8   : > { %528 = vst.msk [vmem:[#allocation2 + $0x70] sm:$0xff] %vm384_vm0, %v5921_v45  ;;  %529 = vst.msk [vmem:[#allocation2 + $0x88] sm:$0xff] %vm384_vm0, %v5924_v48 }
  0xf9   : > { %530 = vst.msk [vmem:[#allocation2 + $0x90] sm:$0xff] %vm384_vm0, %v5925_v49  ;;  %531 = vst.msk [vmem:[#allocation2 + $0xa8] sm:$0xff] %vm384_vm0, %v5928_v50 }
  0xfa   : > { %532 = vst.msk [vmem:[#allocation2 + $0xb0] sm:$0xff] %vm384_vm0, %v5929_v51  ;;  %533 = vst.msk [vmem:[#allocation2 + $0xc8] sm:$0xff] %vm384_vm0, %v5932_v54 }
  0xfb   : > { %534 = vst.msk [vmem:[#allocation2 + $0xd0] sm:$0xff] %vm384_vm0, %v5933_v55  ;;  %535 = vst.msk [vmem:[#allocation2 + $0xe8] sm:$0xff] %vm384_vm0, %v5936_v59 }
  0xfc   : > { %v557_v56 = vld [vmem:[#allocation2 + $0x27] sm:$0xff]  ;;  %536 = vst.msk [vmem:[#allocation2 + $0xf0] sm:$0xff] %vm384_vm0, %v5937_v60  ;;  %537 = vst.msk [vmem:[#allocation2 + $0x108] sm:$0xff] %vm384_vm0, %v5940_v61 }
  0xfd   : > { %v558_v57 = vld [vmem:[#allocation2 + $0x2f] sm:$0xff]  ;;  %v7547_v58 = vld [vmem:[#allocation2 + $0x47] sm:$0xff]  ;;  %v874_v4 = vmul.f32 %v7515_v26, %v557_v56  ;;  %v672_v9 = vmul.f32 %v7506_v23, %v557_v56  ;;  %538 = vst.msk [vmem:[#allocation2 + $0x110] sm:$0xff] %vm384_vm0, %v5941_v62 }
  0xfe   : > { %v7553_v63 = vld [vmem:[#allocation2 + $0x4f] sm:$0xff]  ;;  %v875_v6 = vmul.f32 %v7515_v26, %v558_v57  ;;  %v1078_v8 = vmul.f32 %v7524_v29, %v7547_v58  ;;  %v673_v16 = vmul.f32 %v7506_v23, %v558_v57  ;;  %v876_v43 = vmul.f32 %v7515_v26, %v7547_v58  ;;  %v7591_v49 = vld [vmem:[#allocation2 + $0x67] sm:$0xff] }
  0xff   : > { %v593_v0 = vld [vmem:[#allocation2 + $0x28] sm:$0xff]  ;;  %v594_v2 = vld [vmem:[#allocation2 + $0x30] sm:$0xff]  ;;  %v1079_v15 = vmul.f32 %v7524_v29, %v7553_v63  ;;  %v906_v20 = vadd.f32 %v874_v4, %v838_v52  ;;  %v877_v44 = vmul.f32 %v7515_v26, %v7553_v63  ;;  %v1080_v62 = vmul.f32 %v7524_v29, %v7591_v49 }
 0x100   : > { %v7562_v10 = vld [vmem:[#allocation2 + $0x48] sm:$0xff]  ;;  %v7564_v11 = vld [vmem:[#allocation2 + $0x50] sm:$0xff]  ;;  %v942_v13 = vmul.f32 %v7518_v27, %v593_v0  ;;  %v943_v14 = vmul.f32 %v7518_v27, %v594_v2  ;;  %v907_v21 = vadd.f32 %v875_v6, %v839_v53  ;;  %v740_v37 = vmul.f32 %v7509_v24, %v593_v0 }
 0x101   : > { %v629_v12 = vld [vmem:[#allocation2 + $0x29] sm:$0xff]  ;;  %v630_v17 = vld [vmem:[#allocation2 + $0x31] sm:$0xff]  ;;  %v1146_v30 = vmul.f32 %v7536_v39, %v7562_v10  ;;  %v1147_v32 = vmul.f32 %v7536_v39, %v7564_v11  ;;  %v741_v38 = vmul.f32 %v7509_v24, %v594_v2  ;;  %v944_v50 = vmul.f32 %v7518_v27, %v7562_v10 }
 0x102   : > { %v631_v18 = vld [vmem:[#allocation2 + $0x49] sm:$0xff]  ;;  %v632_v19 = vld [vmem:[#allocation2 + $0x51] sm:$0xff]  ;;  %v1010_v22 = vmul.f32 %v7521_v28, %v629_v12  ;;  %v1011_v31 = vmul.f32 %v7521_v28, %v630_v17  ;;  %v974_v35 = vadd.f32 %v942_v13, %v906_v20  ;;  %v975_v36 = vadd.f32 %v943_v14, %v907_v21 }
 0x103   : > { %v1214_v33 = vmul.f32 %v7539_v40, %v631_v18  ;;  %v1215_v34 = vmul.f32 %v7539_v40, %v632_v19  ;;  %v808_v41 = vmul.f32 %v7512_v25, %v629_v12  ;;  %v809_v42 = vmul.f32 %v7512_v25, %v630_v17  ;;  %v7599_v56 = vld [vmem:[#allocation2 + $0x6f] sm:$0xff] }
 0x104   : > { %v1042_v45 = vadd.f32 %v1010_v22, %v974_v35  ;;  %v1043_v46 = vadd.f32 %v1011_v31, %v975_v36  ;;  %v772_v47 = vadd.f32 %v740_v37, %v672_v9  ;;  %v773_v48 = vadd.f32 %v741_v38, %v673_v16  ;;  %v7601_v57 = vld [vmem:[#allocation2 + $0x68] sm:$0xff]  ;;  %v7603_v59 = vld [vmem:[#allocation2 + $0x70] sm:$0xff] }
 0x105   : > { %v945_v51 = vmul.f32 %v7518_v27, %v7564_v11  ;;  %v1012_v52 = vmul.f32 %v7521_v28, %v631_v18  ;;  %v1013_v53 = vmul.f32 %v7521_v28, %v632_v19  ;;  %v1081_v0 = vmul.f32 %v7524_v29, %v7599_v56  ;;  %v7613_v9 = vld [vmem:[#allocation2 + $0x69] sm:$0xff]  ;;  %v7615_v12 = vld [vmem:[#allocation2 + $0x71] sm:$0xff] }
 0x106   : > { %v1110_v54 = vadd.f32 %v1078_v8, %v1042_v45  ;;  %v1111_v55 = vadd.f32 %v1079_v15, %v1043_v46  ;;  %v840_v60 = vadd.f32 %v808_v41, %v772_v47  ;;  %v841_v61 = vadd.f32 %v809_v42, %v773_v48  ;;  %v7617_v15 = vld [vmem:[#allocation8] ss:$0 sm:$0xff]  ;;  %v7639_v45 = vld [vmem:[#allocation2 + $0x87] sm:$0xff] }
 0x107   : > { %v1148_v2 = vmul.f32 %v7536_v39, %v7601_v57  ;;  %v1149_v4 = vmul.f32 %v7536_v39, %v7603_v59  ;;  %v1216_v16 = vmul.f32 %v7539_v40, %v7613_v9  ;;  %v1217_v17 = vmul.f32 %v7539_v40, %v7615_v12 }
 0x108   : > { %v1178_v6 = vadd.f32 %v1146_v30, %v1110_v54  ;;  %v1179_v8 = vadd.f32 %v1147_v32, %v1111_v55  ;;  %v908_v13 = vadd.f32 %v876_v43, %v840_v60  ;;  %v909_v14 = vadd.f32 %v877_v44, %v841_v61  ;;  %v7647_v61 = vld [vmem:[#allocation2 + $0x88] sm:$0xff] }
 0x109   : > { %v674_v20 = vmul.f32 %v7506_v23, %v7547_v58  ;;  %v675_v21 = vmul.f32 %v7506_v23, %v7553_v63  ;;  %v742_v35 = vmul.f32 %v7509_v24, %v7562_v10  ;;  %v743_v36 = vmul.f32 %v7509_v24, %v7564_v11 }
 0x10a   : > { %v1246_v22 = vadd.f32 %v1214_v33, %v1178_v6  ;;  %v1247_v30 = vadd.f32 %v1215_v34, %v1179_v8  ;;  %v976_v31 = vadd.f32 %v944_v50, %v908_v13  ;;  %v977_v32 = vadd.f32 %v945_v51, %v909_v14  ;;  %v7641_v51 = vld [vmem:[#allocation2 + $0x8f] sm:$0xff] }
 0x10b   : > { %v810_v37 = vmul.f32 %v7512_v25, %v631_v18  ;;  %v811_v38 = vmul.f32 %v7512_v25, %v632_v19  ;;  %v774_v33 = vadd.f32 %v742_v35, %v674_v20  ;;  %v775_v34 = vadd.f32 %v743_v36, %v675_v21  ;;  %v7656_v21 = vld [vmem:[#allocation2 + $0x90] sm:$0xff] }
 0x10c   : > { %v1285_v41 = vadd.f32 %v7617_v15, %v1246_v22  ;;  %v1286_v58 = vadd.f32 %v7617_v15, %v1247_v30  ;;  %v1044_v42 = vadd.f32 %v1012_v52, %v976_v31  ;;  %v1045_v63 = vadd.f32 %v1013_v53, %v977_v32  ;;  %v7662_v30 = vld [vmem:[#allocation2 + $0x91] sm:$0xff] }
 0x10d   : > { %v878_v43 = vmul.f32 %v7515_v26, %v7591_v49  ;;  %v879_v10 = vmul.f32 %v7515_v26, %v7599_v56  ;;  %v842_v46 = vadd.f32 %v810_v37, %v774_v33  ;;  %v843_v47 = vadd.f32 %v811_v38, %v775_v34 }
 0x10e   : > { %vm1317_vm2 = vcmp.gt.f32.partialorder %v1285_v41, 0.0  ;;  %vm1318_vm3 = vcmp.gt.f32.partialorder %v1286_v58, 0.0  ;;  %v1349_v11 = vmul.f32 0.1, %v1285_v41  ;;  %v1350_v18 = vmul.f32 0.1, %v1286_v58 }
 0x10f   : > { %v1112_v44 = vadd.f32 %v1080_v62, %v1044_v42  ;;  %v1113_v19 = vadd.f32 %v1081_v0, %v1045_v63  ;;  %v946_v52 = vmul.f32 %v7518_v27, %v7601_v57  ;;  %v947_v53 = vmul.f32 %v7518_v27, %v7603_v59 }
 0x110   : > { %v1381_v48 = vsel %vm1317_vm2, %v1285_v41, %v1349_v11  ;;  %v1382_v50 = vsel %vm1318_vm3, %v1286_v58, %v1350_v18  ;;  %v910_v62 = vadd.f32 %v878_v43, %v842_v46  ;;  %v911_v0 = vadd.f32 %v879_v10, %v843_v47 }
 0x111   : > { %v1413_v54 = vpack.c.bf16 %v1382_v50, %v1381_v48  ;;  %v1180_v55 = vadd.f32 %v1148_v2, %v1112_v44  ;;  %v1181_v60 = vadd.f32 %v1149_v4, %v1113_v19  ;;  %v1014_v6 = vmul.f32 %v7521_v28, %v7613_v9  ;;  %v7658_v2 = vld [vmem:[#allocation2 + $0x89] sm:$0xff] }
 0x112   : > { %v1015_v8 = vmul.f32 %v7521_v28, %v7615_v12  ;;  %v1082_v13 = vmul.f32 %v7524_v29, %v7639_v45  ;;  %v978_v4 = vadd.f32 %v946_v52, %v910_v62  ;;  %v1083_v22 = vmul.f32 %v7524_v29, %v7641_v51  ;;  %v7697_v62 = vld [vmem:[#allocation2 + $0xaf] sm:$0xff] }
 0x113   : > { %6073 = vmatprep.mubr.msk.bf16.mxu0 %vm384_vm0, %v1413_v54  ;;  %v1248_v14 = vadd.f32 %v1216_v16, %v1180_v55  ;;  %v1249_v20 = vadd.f32 %v1217_v17, %v1181_v60  ;;  %v979_v31 = vadd.f32 %v947_v53, %v911_v0  ;;  %v1150_v32 = vmul.f32 %v7536_v39, %v7647_v61  ;;  %v7693_v55 = vld [vmem:[#allocation2 + $0xa7] sm:$0xff] }
 0x114   : > { %v1151_v35 = vmul.f32 %v7536_v39, %v7656_v21  ;;  %v1218_v16 = vmul.f32 %v7539_v40, %v7658_v2  ;;  %v1046_v37 = vadd.f32 %v1014_v6, %v978_v4  ;;  %v1219_v38 = vmul.f32 %v7539_v40, %v7662_v30  ;;  %v7707_v4 = vld [vmem:[#allocation2 + $0xa8] sm:$0xff] }
 0x115   : > { %v1287_v17 = vadd.f32 %v7617_v15, %v1248_v14  ;;  %v1288_v36 = vadd.f32 %v7617_v15, %v1249_v20  ;;  %v1047_v41 = vadd.f32 %v1015_v8, %v979_v31  ;;  %v676_v58 = vmul.f32 %v7506_v23, %v7591_v49  ;;  %v7711_v31 = vld [vmem:[#allocation2 + $0xa9] sm:$0xff] }
 0x116   : > { %v677_v42 = vmul.f32 %v7506_v23, %v7599_v56  ;;  %v744_v63 = vmul.f32 %v7509_v24, %v7601_v57  ;;  %v1114_v43 = vadd.f32 %v1082_v13, %v1046_v37  ;;  %v745_v11 = vmul.f32 %v7509_v24, %v7603_v59 }
 0x117   : > { %vm1319_vm4 = vcmp.gt.f32.partialorder %v1287_v17, 0.0  ;;  %vm1320_vm5 = vcmp.gt.f32.partialorder %v1288_v36, 0.0  ;;  %v1351_v33 = vmul.f32 0.1, %v1287_v17  ;;  %v1352_v34 = vmul.f32 0.1, %v1288_v36 }
 0x118   : > { %v1115_v10 = vadd.f32 %v1083_v22, %v1047_v41  ;;  %v776_v18 = vadd.f32 %v744_v63, %v676_v58  ;;  %v812_v49 = vmul.f32 %v7512_v25, %v7613_v9  ;;  %v813_v56 = vmul.f32 %v7512_v25, %v7615_v12  ;;  %v7709_v22 = vld [vmem:[#allocation2 + $0xb0] sm:$0xff] }
 0x119   : > { %v1383_v44 = vsel %vm1319_vm4, %v1287_v17, %v1351_v33  ;;  %v1384_v19 = vsel %vm1320_vm5, %v1288_v36, %v1352_v34  ;;  %v1182_v57 = vadd.f32 %v1150_v32, %v1114_v43  ;;  %v777_v48 = vadd.f32 %v745_v11, %v677_v42 }
 0x11a   : > { %v1414_v46 = vpack.c.bf16 %v1384_v19, %v1383_v44  ;;  %v1183_v47 = vadd.f32 %v1151_v35, %v1115_v10  ;;  %v844_v50 = vadd.f32 %v812_v49, %v776_v18  ;;  %v880_v52 = vmul.f32 %v7515_v26, %v7639_v45 }
 0x11b   : > { %v881_v59 = vmul.f32 %v7515_v26, %v7641_v51  ;;  %v948_v53 = vmul.f32 %v7518_v27, %v7647_v61  ;;  %v1250_v9 = vadd.f32 %v1218_v16, %v1182_v57  ;;  %v845_v12 = vadd.f32 %v813_v56, %v777_v48  ;;  %v7715_v16 = vld [vmem:[#allocation2 + $0xb1] sm:$0xff] }
 0x11c   : > { %6074 = vmatmul.mubr.msk.bf16.vlgmr.msra.gmra.mrb[0].mxu0 %vm384_vm0, %v1414_v46  ;;  %v1251_v54 = vadd.f32 %v1219_v38, %v1183_v47  ;;  %v949_v60 = vmul.f32 %v7518_v27, %v7656_v21  ;;  %v912_v0 = vadd.f32 %v880_v52, %v844_v50  ;;  %v1016_v6 = vmul.f32 %v7521_v28, %v7658_v2 }
 0x11d   : > { %v1017_v8 = vmul.f32 %v7521_v28, %v7662_v30  ;;  %v1084_v13 = vmul.f32 %v7524_v29, %v7693_v55  ;;  %v1289_v14 = vadd.f32 %v7617_v15, %v1250_v9  ;;  %v913_v32 = vadd.f32 %v881_v59, %v845_v12  ;;  %v7748_v9 = vld [vmem:[#allocation2 + $0xc7] sm:$0xff] }
 0x11e   : > { %v1290_v20 = vadd.f32 %v7617_v15, %v1251_v54  ;;  %v1085_v35 = vmul.f32 %v7524_v29, %v7697_v62  ;;  %v980_v17 = vadd.f32 %v948_v53, %v912_v0  ;;  %v1152_v36 = vmul.f32 %v7536_v39, %v7707_v4  ;;  %v7750_v54 = vld [vmem:[#allocation2 + $0xcf] sm:$0xff] }
 0x11f   : > { %v1153_v37 = vmul.f32 %v7536_v39, %v7709_v22  ;;  %v1220_v38 = vmul.f32 %v7539_v40, %v7711_v31  ;;  %vm1321_vm6 = vcmp.gt.f32.partialorder %v1289_v14, 0.0  ;;  %v1353_v41 = vmul.f32 0.1, %v1289_v14  ;;  %v7752_v12 = vld [vmem:[#allocation2 + $0xc8] sm:$0xff] }
 0x120   : > { %vm1322_vm7 = vcmp.gt.f32.partialorder %v1290_v20, 0.0  ;;  %v1354_v58 = vmul.f32 0.1, %v1290_v20  ;;  %v981_v42 = vadd.f32 %v949_v60, %v913_v32  ;;  %v1048_v63 = vadd.f32 %v1016_v6, %v980_v17  ;;  %v7756_v6 = vld [vmem:[#allocation2 + $0xd0] sm:$0xff] }
 0x121   : > { %v1221_v33 = vmul.f32 %v7539_v40, %v7715_v16  ;;  %v678_v34 = vmul.f32 %v7506_v23, %v7639_v45  ;;  %v1385_v43 = vsel %vm1321_vm6, %v1289_v14, %v1353_v41  ;;  %v679_v11 = vmul.f32 %v7506_v23, %v7641_v51  ;;  %v7765_v17 = vld [vmem:[#allocation2 + $0xc9] sm:$0xff] }
 0x122   : > { %v1386_v10 = vsel %vm1322_vm7, %v1290_v20, %v1354_v58  ;;  %v746_v18 = vmul.f32 %v7509_v24, %v7647_v61  ;;  %v1049_v19 = vadd.f32 %v1017_v8, %v981_v42  ;;  %v1116_v49 = vadd.f32 %v1084_v13, %v1048_v63 }
 0x123   : > { %v1415_v44 = vpack.c.bf16 %v1386_v10, %v1385_v43  ;;  %v747_v56 = vmul.f32 %v7509_v24, %v7656_v21  ;;  %v814_v57 = vmul.f32 %v7512_v25, %v7658_v2  ;;  %v815_v45 = vmul.f32 %v7512_v25, %v7662_v30 }
 0x124   : > { %v778_v46 = vadd.f32 %v746_v18, %v678_v34  ;;  %v882_v47 = vmul.f32 %v7515_v26, %v7693_v55  ;;  %v1117_v51 = vadd.f32 %v1085_v35, %v1049_v19  ;;  %v1184_v61 = vadd.f32 %v1152_v36, %v1116_v49  ;;  %v7767_v36 = vld [vmem:[#allocation2 + $0xd1] sm:$0xff] }
 0x125   : > { %6077 = vmatprep.mubr.msk.bf16.mxu0 %vm384_vm0, %v1415_v44  ;;  %v779_v48 = vadd.f32 %v747_v56, %v679_v11  ;;  %v883_v50 = vmul.f32 %v7515_v26, %v7697_v62  ;;  %v950_v21 = vmul.f32 %v7518_v27, %v7707_v4  ;;  %v951_v2 = vmul.f32 %v7518_v27, %v7709_v22 }
 0x126   : > { %v846_v52 = vadd.f32 %v814_v57, %v778_v46  ;;  %v1018_v30 = vmul.f32 %v7521_v28, %v7711_v31  ;;  %v1185_v59 = vadd.f32 %v1153_v37, %v1117_v51  ;;  %v1252_v53 = vadd.f32 %v1220_v38, %v1184_v61 }
 0x127   : > { %v847_v60 = vadd.f32 %v815_v45, %v779_v48  ;;  %v1019_v0 = vmul.f32 %v7521_v28, %v7715_v16  ;;  %v1086_v13 = vmul.f32 %v7524_v29, %v7748_v9  ;;  %v1087_v14 = vmul.f32 %v7524_v29, %v7750_v54 }
 0x128   : > { %v914_v8 = vadd.f32 %v882_v47, %v846_v52  ;;  %v1154_v20 = vmul.f32 %v7536_v39, %v7752_v12  ;;  %v1253_v32 = vadd.f32 %v1221_v33, %v1185_v59  ;;  %v1291_v35 = vadd.f32 %v7617_v15, %v1252_v53  ;;  %v7799_v59 = vld [vmem:[#allocation2 + $0xef] sm:$0xff] }
 0x129   : > { %v915_v37 = vadd.f32 %v883_v50, %v847_v60  ;;  %v1155_v38 = vmul.f32 %v7536_v39, %v7756_v6  ;;  %v1222_v58 = vmul.f32 %v7539_v40, %v7765_v17  ;;  %v1223_v42 = vmul.f32 %v7539_v40, %v7767_v36 }
 0x12a   : > { %v982_v41 = vadd.f32 %v950_v21, %v914_v8  ;;  %v680_v63 = vmul.f32 %v7506_v23, %v7693_v55  ;;  %v1292_v33 = vadd.f32 %v7617_v15, %v1253_v32  ;;  %vm1323_vm8 = vcmp.gt.f32.partialorder %v1291_v35, 0.0 }
 0x12b   : > { %v1355_v34 = vmul.f32 0.1, %v1291_v35  ;;  %v983_v43 = vadd.f32 %v951_v2, %v915_v37  ;;  %v681_v11 = vmul.f32 %v7506_v23, %v7697_v62  ;;  %v748_v18 = vmul.f32 %v7509_v24, %v7707_v4 }
 0x12c   : > { %v1050_v10 = vadd.f32 %v1018_v30, %v982_v41  ;;  %v749_v44 = vmul.f32 %v7509_v24, %v7709_v22  ;;  %vm1324_vm9 = vcmp.gt.f32.partialorder %v1292_v33, 0.0  ;;  %v1356_v19 = vmul.f32 0.1, %v1292_v33  ;;  %v7797_v30 = vld [vmem:[#allocation2 + $0xe7] sm:$0xff]  ;;  %v7816_v41 = vld [vmem:[#allocation2 + $0xf1] sm:$0xff] }
 0x12d   : > { %v1387_v49 = vsel %vm1323_vm8, %v1291_v35, %v1355_v34  ;;  %v1051_v56 = vadd.f32 %v1019_v0, %v983_v43  ;;  %v780_v46 = vadd.f32 %v748_v18, %v680_v63  ;;  %v816_v45 = vmul.f32 %v7512_v25, %v7711_v31 }
 0x12e   : > { %v1118_v55 = vadd.f32 %v1086_v13, %v1050_v10  ;;  %v781_v57 = vadd.f32 %v749_v44, %v681_v11  ;;  %v1388_v47 = vsel %vm1324_vm9, %v1292_v33, %v1356_v19  ;;  %v817_v62 = vmul.f32 %v7512_v25, %v7715_v16  ;;  %v7805_v13 = vld [vmem:[#allocation2 + $0xe8] sm:$0xff] }
 0x12f   : > { %v1119_v51 = vadd.f32 %v1087_v14, %v1051_v56  ;;  %v884_v4 = vmul.f32 %v7515_v26, %v7748_v9  ;;  %v1416_v61 = vpack.c.bf16 %v1388_v47, %v1387_v49  ;;  %v848_v48 = vadd.f32 %v816_v45, %v780_v46  ;;  %v7807_v14 = vld [vmem:[#allocation2 + $0xf0] sm:$0xff] }
 0x130   : > { %v1186_v22 = vadd.f32 %v1154_v20, %v1118_v55  ;;  %v885_v50 = vmul.f32 %v7515_v26, %v7750_v54  ;;  %v849_v21 = vadd.f32 %v817_v62, %v781_v57  ;;  %v952_v2 = vmul.f32 %v7518_v27, %v7752_v12 }
 0x131   : > { %v1187_v52 = vadd.f32 %v1155_v38, %v1119_v51  ;;  %v953_v31 = vmul.f32 %v7518_v27, %v7756_v6  ;;  %6078 = vmatmul.mubr.msk.bf16.gmra.mrb[4].mxu0 %vm384_vm0, %v1416_v61  ;;  %v916_v53 = vadd.f32 %v884_v4, %v848_v48  ;;  %v1020_v60 = vmul.f32 %v7521_v28, %v7765_v17  ;;  %v7814_v38 = vld [vmem:[#allocation2 + $0xe9] sm:$0xff] }
 0x132   : > { %v1254_v16 = vadd.f32 %v1222_v58, %v1186_v22  ;;  %v1021_v0 = vmul.f32 %v7521_v28, %v7767_v36  ;;  %v917_v20 = vadd.f32 %v885_v50, %v849_v21  ;;  %v1088_v32 = vmul.f32 %v7524_v29, %v7797_v30 }
 0x133   : > { %v1255_v8 = vadd.f32 %v1223_v42, %v1187_v52  ;;  %v1089_v35 = vmul.f32 %v7524_v29, %v7799_v59  ;;  %v984_v58 = vadd.f32 %v952_v2, %v916_v53  ;;  %v1156_v42 = vmul.f32 %v7536_v39, %v7805_v13  ;;  %v7846_v52 = vld [vmem:[#allocation2 + $0x107] sm:$0xff] }
 0x134   : > { %v1293_v37 = vadd.f32 %v7617_v15, %v1254_v16  ;;  %v1157_v63 = vmul.f32 %v7536_v39, %v7807_v14  ;;  %v985_v34 = vadd.f32 %v953_v31, %v917_v20  ;;  %v1224_v43 = vmul.f32 %v7539_v40, %v7814_v38  ;;  %v7850_v16 = vld [vmem:[#allocation2 + $0x10f] sm:$0xff] }
 0x135   : > { %v1294_v33 = vadd.f32 %v7617_v15, %v1255_v8  ;;  %v1225_v10 = vmul.f32 %v7539_v40, %v7816_v41  ;;  %v1052_v18 = vadd.f32 %v1020_v60, %v984_v58  ;;  %v682_v44 = vmul.f32 %v7506_v23, %v7748_v9  ;;  %v5981_v8 = vld [vmem:[%s7329_s13 + $0x40] sm:$0xff]  }
 0x136   : > { %vm1325_vm10 = vcmp.gt.f32.partialorder %v1293_v37, 0.0  ;;  %v1357_v11 = vmul.f32 0.1, %v1293_v37  ;;  %v1053_v49 = vadd.f32 %v1021_v0, %v985_v34  ;;  %v683_v56 = vmul.f32 %v7506_v23, %v7750_v54 }
 0x137   : > { %vm1326_vm11 = vcmp.gt.f32.partialorder %v1294_v33, 0.0  ;;  %v1358_v19 = vmul.f32 0.1, %v1294_v33  ;;  %v1120_v46 = vadd.f32 %v1088_v32, %v1052_v18  ;;  %v750_v57 = vmul.f32 %v7509_v24, %v7752_v12  ;;  %v7860_v32 = vld [vmem:[#allocation2 + $0x108] sm:$0xff]  ;;  %v7875_v18 = vld [vmem:[#allocation2 + $0x111] sm:$0xff] }
 0x138   : > { %v1389_v55 = vsel %vm1325_vm10, %v1293_v37, %v1357_v11  ;;  %v751_v45 = vmul.f32 %v7509_v24, %v7756_v6  ;;  %v1121_v51 = vadd.f32 %v1089_v35, %v1053_v49  ;;  %v818_v62 = vmul.f32 %v7512_v25, %v7765_v17  ;;  %v7862_v35 = vld [vmem:[#allocation2 + $0x110] sm:$0xff] }
 0x139   : > { %v1390_v47 = vsel %vm1326_vm11, %v1294_v33, %v1358_v19  ;;  %v819_v9 = vmul.f32 %v7512_v25, %v7767_v36  ;;  %v1188_v61 = vadd.f32 %v1156_v42, %v1120_v46  ;;  %v782_v22 = vadd.f32 %v750_v57, %v682_v44  ;;  %v7864_v37 = vld [vmem:[#allocation2 + $0x109] sm:$0xff] }
 0x13a   : > { %v1417_v4 = vpack.c.bf16 %v1390_v47, %v1389_v55  ;;  %v783_v54 = vadd.f32 %v751_v45, %v683_v56  ;;  %v1189_v48 = vadd.f32 %v1157_v63, %v1121_v51  ;;  %v886_v12 = vmul.f32 %v7515_v26, %v7797_v30 }
 0x13b   : > { %v887_v6 = vmul.f32 %v7515_v26, %v7799_v59  ;;  %v954_v50 = vmul.f32 %v7518_v27, %v7805_v13  ;;  %v1256_v17 = vadd.f32 %v1224_v43, %v1188_v61  ;;  %v850_v36 = vadd.f32 %v818_v62, %v782_v22 }
 0x13c   : > { %6081 = vmatprep.mubr.msk.bf16.mxu0 %vm384_vm0, %v1417_v4  ;;  %v851_v21 = vadd.f32 %v819_v9, %v783_v54  ;;  %v955_v2 = vmul.f32 %v7518_v27, %v7807_v14  ;;  %v1257_v31 = vadd.f32 %v1225_v10, %v1189_v48  ;;  %v1022_v53 = vmul.f32 %v7521_v28, %v7814_v38 }
 0x13d   : > { %v1023_v60 = vmul.f32 %v7521_v28, %v7816_v41  ;;  %v1090_v0 = vmul.f32 %v7524_v29, %v7846_v52  ;;  %v1295_v20 = vadd.f32 %v7617_v15, %v1256_v17  ;;  %v918_v58 = vadd.f32 %v886_v12, %v850_v36 }
 0x13e   : > { %v919_v42 = vadd.f32 %v887_v6, %v851_v21  ;;  %v1091_v63 = vmul.f32 %v7524_v29, %v7850_v16  ;;  %v1296_v33 = vadd.f32 %v7617_v15, %v1257_v31  ;;  %v1158_v34 = vmul.f32 %v7536_v39, %v7860_v32  ;;  %v5982_v21 = vld [vmem:[%s7329_s13 + $0x48] sm:$0xff]  }
 0x13f   : > { %v1159_v43 = vmul.f32 %v7536_v39, %v7862_v35  ;;  %v1226_v10 = vmul.f32 %v7539_v40, %v7864_v37  ;;  %vm1327_vm12 = vcmp.gt.f32.partialorder %v1295_v20, 0.0  ;;  %v1359_v11 = vmul.f32 0.1, %v1295_v20 }
 0x140   : > { %v986_v44 = vadd.f32 %v954_v50, %v918_v58  ;;  %v987_v19 = vadd.f32 %v955_v2, %v919_v42  ;;  %vm1328_vm13 = vcmp.gt.f32.partialorder %v1296_v33, 0.0  ;;  %v1360_v49 = vmul.f32 0.1, %v1296_v33 }
 0x141   : > { %v1227_v56 = vmul.f32 %v7539_v40, %v7875_v18  ;;  %v5944_v55 = vunpack.c.l.bf16 %v5981_v8  ;;  %v1391_v46 = vsel %vm1327_vm12, %v1295_v20, %v1359_v11  ;;  %v5945_v47 = vunpack.c.h.bf16 %v5981_v8 }
 0x142   : > { %v1054_v57 = vadd.f32 %v1022_v53, %v986_v44  ;;  %v1055_v45 = vadd.f32 %v1023_v60, %v987_v19  ;;  %v1392_v51 = vsel %vm1328_vm13, %v1296_v33, %v1360_v49  ;;  %v684_v62 = vmul.f32 %v7506_v23, %v7797_v30 }
 0x143   : > { %539 = vst.msk [vmem:[#allocation2 + $0x128] sm:$0xff] %vm384_vm0, %v5944_v55  ;;  %v685_v9 = vmul.f32 %v7506_v23, %v7799_v59  ;;  %v752_v4 = vmul.f32 %v7509_v24, %v7805_v13  ;;  %v1418_v61 = vpack.c.bf16 %v1392_v51, %v1391_v46  ;;  %540 = vst.msk [vmem:[#allocation2 + $0x130] sm:$0xff] %vm384_vm0, %v5945_v47  ;;  %v5948_v20 = vunpack.c.l.bf16 %v5982_v21 }
 0x144   : > { %v1122_v22 = vadd.f32 %v1090_v0, %v1054_v57  ;;  %v1123_v54 = vadd.f32 %v1091_v63, %v1055_v45  ;;  %v753_v48 = vmul.f32 %v7509_v24, %v7807_v14  ;;  %v820_v6 = vmul.f32 %v7512_v25, %v7814_v38 }
 0x145   : > { %v784_v12 = vadd.f32 %v752_v4, %v684_v62  ;;  %v821_v30 = vmul.f32 %v7512_v25, %v7816_v41  ;;  %v888_v59 = vmul.f32 %v7515_v26, %v7846_v52  ;;  %6082 = vmatmul.mubr.msk.bf16.gmra.mrb[8].mxu0 %vm384_vm0, %v1418_v61  ;;  %v889_v36 = vmul.f32 %v7515_v26, %v7850_v16 }
 0x146   : > { %v1190_v13 = vadd.f32 %v1158_v34, %v1122_v22  ;;  %v1191_v50 = vadd.f32 %v1159_v43, %v1123_v54  ;;  %v785_v17 = vadd.f32 %v753_v48, %v685_v9  ;;  %v956_v2 = vmul.f32 %v7518_v27, %v7860_v32  ;;  %541 = vst.msk [vmem:[#allocation2 + $0x148] sm:$0xff] %vm384_vm0, %v5948_v20 }
 0x147   : > { %v852_v14 = vadd.f32 %v820_v6, %v784_v12  ;;  %v957_v38 = vmul.f32 %v7518_v27, %v7862_v35  ;;  %v1024_v41 = vmul.f32 %v7521_v28, %v7864_v37  ;;  %v1025_v0 = vmul.f32 %v7521_v28, %v7875_v18 }
 0x148   : > { %v1258_v31 = vadd.f32 %v1226_v10, %v1190_v13  ;;  %v1259_v53 = vadd.f32 %v1227_v56, %v1191_v50  ;;  %v853_v60 = vadd.f32 %v821_v30, %v785_v17  ;;  %v5949_v58 = vunpack.c.h.bf16 %v5982_v21 }
 0x149   : > { %v920_v8 = vadd.f32 %v888_v59, %v852_v14  ;;  %v686_v42 = vmul.f32 %v7506_v23, %v7846_v52  ;;  %v687_v11 = vmul.f32 %v7506_v23, %v7850_v16  ;;  %v754_v55 = vmul.f32 %v7509_v24, %v7860_v32 }
 0x14a   : > { %v1297_v63 = vadd.f32 %v7617_v15, %v1258_v31  ;;  %v1298_v33 = vadd.f32 %v7617_v15, %v1259_v53  ;;  %v7911_v34 = vld [vmem:[#allocation2 + $0x127] sm:$0xff]  ;;  %v921_v10 = vadd.f32 %v889_v36, %v853_v60  ;;  %v7917_v44 = vld [vmem:[#allocation2 + $0x12f] sm:$0xff]  ;;  %542 = vst.msk [vmem:[#allocation2 + $0x150] sm:$0xff] %vm384_vm0, %v5949_v58  ;;  %v755_v6 = vmul.f32 %v7509_v24, %v7862_v35 }
 0x14b   : > { %v7913_v43 = vld [vmem:[#allocation2 + $0x128] sm:$0xff]  ;;  %v7919_v19 = vld [vmem:[#allocation2 + $0x130] sm:$0xff]  ;;  %v988_v49 = vadd.f32 %v956_v2, %v920_v8  ;;  %v1092_v52 = vmul.f32 %v7524_v29, %v7911_v34  ;;  %v1093_v62 = vmul.f32 %v7524_v29, %v7917_v44  ;;  %v786_v30 = vadd.f32 %v754_v55, %v686_v42 }
 0x14c   : > { %v1160_v56 = vmul.f32 %v7536_v39, %v7913_v43  ;;  %vm1329_vm14 = vcmp.gt.f32.partialorder %v1297_v63, 0.0  ;;  %vm1330_vm15 = vcmp.gt.f32.partialorder %v1298_v33, 0.0  ;;  %v1361_v16 = vmul.f32 0.1, %v1297_v63  ;;  %v7929_v57 = vld [vmem:[#allocation2 + $0x129] sm:$0xff]  ;;  %v7931_v45 = vld [vmem:[#allocation2 + $0x131] sm:$0xff] }
 0x14d   : > { %v1362_v46 = vmul.f32 0.1, %v1298_v33  ;;  %v989_v47 = vadd.f32 %v957_v38, %v921_v10  ;;  %v1056_v51 = vadd.f32 %v1024_v41, %v988_v49  ;;  %v1161_v9 = vmul.f32 %v7536_v39, %v7919_v19  ;;  %v5983_v38 = vld [vmem:[%s7329_s13 + $0x50] sm:$0xff]   ;;  %v7959_v53 = vld [vmem:[#allocation2 + $0x147] sm:$0xff] }
 0x14e   : > { %v1393_v4 = vsel %vm1329_vm14, %v1297_v63, %v1361_v16  ;;  %v1228_v32 = vmul.f32 %v7539_v40, %v7929_v57  ;;  %v1229_v22 = vmul.f32 %v7539_v40, %v7931_v45  ;;  %v822_v59 = vmul.f32 %v7512_v25, %v7864_v37 }
 0x14f   : > { %v1394_v61 = vsel %vm1330_vm15, %v1298_v33, %v1362_v46  ;;  %v1057_v48 = vadd.f32 %v1025_v0, %v989_v47  ;;  %v1124_v12 = vadd.f32 %v1092_v52, %v1056_v51  ;;  %v823_v13 = vmul.f32 %v7512_v25, %v7875_v18  ;;  %v7963_v0 = vld [vmem:[#allocation2 + $0x148] sm:$0xff] }
 0x150   : > { %v1419_v54 = vpack.c.bf16 %v1394_v61, %v1393_v4  ;;  %v890_v50 = vmul.f32 %v7515_v26, %v7911_v34  ;;  %v787_v21 = vadd.f32 %v755_v6, %v687_v11  ;;  %v891_v14 = vmul.f32 %v7515_v26, %v7917_v44 }
 0x151   : > { %v1125_v17 = vadd.f32 %v1093_v62, %v1057_v48  ;;  %v1192_v36 = vadd.f32 %v1160_v56, %v1124_v12  ;;  %v854_v2 = vadd.f32 %v822_v59, %v786_v30  ;;  %v958_v35 = vmul.f32 %v7518_v27, %v7913_v43  ;;  %v7961_v60 = vld [vmem:[#allocation2 + $0x14f] sm:$0xff] }
 0x152   : > { %6085 = vmatprep.mubr.msk.bf16.mxu0 %vm384_vm0, %v1419_v54  ;;  %v959_v37 = vmul.f32 %v7518_v27, %v7919_v19  ;;  %v1026_v18 = vmul.f32 %v7521_v28, %v7929_v57  ;;  %v855_v8 = vadd.f32 %v823_v13, %v787_v21  ;;  %v1027_v20 = vmul.f32 %v7521_v28, %v7931_v45  ;;  %v7967_v58 = vld [vmem:[#allocation2 + $0x150] sm:$0xff] }
 0x153   : > { %v1193_v41 = vadd.f32 %v1161_v9, %v1125_v17  ;;  %v1260_v31 = vadd.f32 %v1228_v32, %v1192_v36  ;;  %v922_v42 = vadd.f32 %v890_v50, %v854_v2  ;;  %v1094_v63 = vmul.f32 %v7524_v29, %v7959_v53  ;;  %v7976_v52 = vld [vmem:[#allocation2 + $0x149] sm:$0xff]  ;;  %v7978_v56 = vld [vmem:[#allocation2 + $0x151] sm:$0xff] }
 0x154   : > { %v1095_v33 = vmul.f32 %v7524_v29, %v7961_v60  ;;  %v1162_v10 = vmul.f32 %v7536_v39, %v7963_v0  ;;  %v923_v55 = vadd.f32 %v891_v14, %v855_v8  ;;  %v1163_v16 = vmul.f32 %v7536_v39, %v7967_v58 }
 0x155   : > { %v1261_v11 = vadd.f32 %v1229_v22, %v1193_v41  ;;  %v1299_v49 = vadd.f32 %v7617_v15, %v1260_v31  ;;  %v990_v46 = vadd.f32 %v958_v35, %v922_v42  ;;  %v1230_v47 = vmul.f32 %v7539_v40, %v7976_v52 }
 0x156   : > { %v1231_v51 = vmul.f32 %v7539_v40, %v7978_v56  ;;  %v5952_v62 = vunpack.c.l.bf16 %v5983_v38  ;;  %v991_v61 = vadd.f32 %v959_v37, %v923_v55  ;;  %v5953_v22 = vunpack.c.h.bf16 %v5983_v38 }
 0x157   : > { %v1300_v9 = vadd.f32 %v7617_v15, %v1261_v11  ;;  %vm1331_vm2 = vcmp.gt.f32.partialorder %v1299_v49, 0.0  ;;  %v1363_v4 = vmul.f32 0.1, %v1299_v49  ;;  %v1058_v32 = vadd.f32 %v1026_v18, %v990_v46  ;;  %v5984_v18 = vld [vmem:[%s7329_s13 + $0x58] sm:$0xff]  }
 0x158   : > { %543 = vst.msk [vmem:[#allocation2 + $0x168] sm:$0xff] %vm384_vm0, %v5952_v62  ;;  %v688_v54 = vmul.f32 %v7506_v23, %v7911_v34  ;;  %v689_v48 = vmul.f32 %v7506_v23, %v7917_v44  ;;  %v1059_v30 = vadd.f32 %v1027_v20, %v991_v61  ;;  %544 = vst.msk [vmem:[#allocation2 + $0x170] sm:$0xff] %vm384_vm0, %v5953_v22 }
 0x159   : > { %vm1332_vm3 = vcmp.gt.f32.partialorder %v1300_v9, 0.0  ;;  %v1364_v12 = vmul.f32 0.1, %v1300_v9  ;;  %v1395_v6 = vsel %vm1331_vm2, %v1299_v49, %v1363_v4  ;;  %v1126_v59 = vadd.f32 %v1094_v63, %v1058_v32 }
 0x15a   : > { %v756_v13 = vmul.f32 %v7509_v24, %v7913_v43  ;;  %v757_v50 = vmul.f32 %v7509_v24, %v7919_v19  ;;  %v824_v34 = vmul.f32 %v7512_v25, %v7929_v57  ;;  %v1127_v36 = vadd.f32 %v1095_v33, %v1059_v30 }
 0x15b   : > { %v1396_v17 = vsel %vm1332_vm3, %v1300_v9, %v1364_v12  ;;  %v825_v44 = vmul.f32 %v7512_v25, %v7931_v45  ;;  %v892_v21 = vmul.f32 %v7515_v26, %v7959_v53  ;;  %v1194_v2 = vadd.f32 %v1162_v10, %v1126_v59 }
 0x15c   : > { %v1420_v14 = vpack.c.bf16 %v1396_v17, %v1395_v6  ;;  %v788_v35 = vadd.f32 %v756_v13, %v688_v54  ;;  %v789_v37 = vadd.f32 %v757_v50, %v689_v48  ;;  %v1195_v43 = vadd.f32 %v1163_v16, %v1127_v36 }
 0x15d   : > { %v893_v19 = vmul.f32 %v7515_v26, %v7961_v60  ;;  %v960_v57 = vmul.f32 %v7518_v27, %v7963_v0  ;;  %v961_v38 = vmul.f32 %v7518_v27, %v7967_v58  ;;  %v1262_v45 = vadd.f32 %v1230_v47, %v1194_v2 }
 0x15e   : > { %6086 = vmatmul.mubr.msk.bf16.gmra.mrb[12].mxu0 %vm384_vm0, %v1420_v14  ;;  %v856_v41 = vadd.f32 %v824_v34, %v788_v35  ;;  %v857_v31 = vadd.f32 %v825_v44, %v789_v37  ;;  %v1028_v8 = vmul.f32 %v7521_v28, %v7976_v52  ;;  %v1263_v20 = vadd.f32 %v1231_v51, %v1195_v43 }
 0x15f   : > { %v8013_v42 = vld [vmem:[#allocation2 + $0x167] sm:$0xff]  ;;  %v1029_v63 = vmul.f32 %v7521_v28, %v7978_v56  ;;  %v5956_v33 = vunpack.c.l.bf16 %v5984_v18  ;;  %v5957_v10 = vunpack.c.h.bf16 %v5984_v18  ;;  %v1301_v11 = vadd.f32 %v7617_v15, %v1262_v45  ;;  %v8031_v61 = vld [vmem:[#allocation2 + $0x16f] sm:$0xff] }
 0x160   : > { %v8018_v49 = vld [vmem:[#allocation2 + $0x168] sm:$0xff]  ;;  %v924_v55 = vadd.f32 %v892_v21, %v856_v41  ;;  %v925_v16 = vadd.f32 %v893_v19, %v857_v31  ;;  %v1096_v46 = vmul.f32 %v7524_v29, %v8013_v42  ;;  %v1302_v47 = vadd.f32 %v7617_v15, %v1263_v20  ;;  %v8033_v32 = vld [vmem:[#allocation2 + $0x170] sm:$0xff] }
 0x161   : > { %v1164_v51 = vmul.f32 %v7536_v39, %v8018_v49  ;;  %545 = vst.msk [vmem:[#allocation2 + $0x188] sm:$0xff] %vm384_vm0, %v5956_v33  ;;  %546 = vst.msk [vmem:[#allocation2 + $0x190] sm:$0xff] %vm384_vm0, %v5957_v10  ;;  %v690_v62 = vmul.f32 %v7506_v23, %v7959_v53  ;;  %v691_v9 = vmul.f32 %v7506_v23, %v7961_v60  ;;  %vm1333_vm4 = vcmp.gt.f32.partialorder %v1301_v11, 0.0  ;;  %v8035_v12 = vld [vmem:[#allocation2 + $0x169] sm:$0xff]  ;;  %v8041_v60 = vld [vmem:[#allocation2 + $0x171] sm:$0xff] }
 0x162   : > { %v1365_v4 = vmul.f32 0.1, %v1301_v11  ;;  %v992_v22 = vadd.f32 %v960_v57, %v924_v55  ;;  %v993_v54 = vadd.f32 %v961_v38, %v925_v16  ;;  %vm1334_vm5 = vcmp.gt.f32.partialorder %v1302_v47, 0.0  ;;  %v5985_v55 = vld [vmem:[%s7329_s13 + $0x60] sm:$0xff]  }
 0x163   : > { %v1366_v48 = vmul.f32 0.1, %v1302_v47  ;;  %v1097_v6 = vmul.f32 %v7524_v29, %v8031_v61  ;;  %v1165_v53 = vmul.f32 %v7536_v39, %v8033_v32  ;;  %v1232_v50 = vmul.f32 %v7539_v40, %v8035_v12 }
 0x164   : > { %v1397_v30 = vsel %vm1333_vm4, %v1301_v11, %v1365_v4  ;;  %v1060_v59 = vadd.f32 %v1028_v8, %v992_v22  ;;  %v1061_v13 = vadd.f32 %v1029_v63, %v993_v54  ;;  %v1233_v17 = vmul.f32 %v7539_v40, %v8041_v60 }
 0x165   : > { %v1398_v34 = vsel %vm1334_vm5, %v1302_v47, %v1366_v48  ;;  %v758_v36 = vmul.f32 %v7509_v24, %v7963_v0  ;;  %v759_v44 = vmul.f32 %v7509_v24, %v7967_v58  ;;  %v826_v35 = vmul.f32 %v7512_v25, %v7976_v52 }
 0x166   : > { %v1421_v21 = vpack.c.bf16 %v1398_v34, %v1397_v30  ;;  %v1128_v14 = vadd.f32 %v1096_v46, %v1060_v59  ;;  %v1129_v2 = vadd.f32 %v1097_v6, %v1061_v13  ;;  %v827_v43 = vmul.f32 %v7512_v25, %v7978_v56 }
 0x167   : > { %v790_v37 = vadd.f32 %v758_v36, %v690_v62  ;;  %v791_v18 = vadd.f32 %v759_v44, %v691_v9  ;;  %v894_v19 = vmul.f32 %v7515_v26, %v8013_v42  ;;  %v895_v58 = vmul.f32 %v7515_v26, %v8031_v61 }
 0x168   : > { %6089 = vmatprep.mubr.msk.bf16.mxu0 %vm384_vm0, %v1421_v21  ;;  %v1196_v0 = vadd.f32 %v1164_v51, %v1128_v14  ;;  %v1197_v57 = vadd.f32 %v1165_v53, %v1129_v2  ;;  %v962_v38 = vmul.f32 %v7518_v27, %v8018_v49  ;;  %v8062_v52 = vld [vmem:[#allocation2 + $0x187] sm:$0xff]  ;;  %v963_v56 = vmul.f32 %v7518_v27, %v8033_v32  ;;  %v8068_v63 = vld [vmem:[#allocation2 + $0x18f] sm:$0xff] }
 0x169   : > { %v858_v45 = vadd.f32 %v826_v35, %v790_v37  ;;  %v859_v41 = vadd.f32 %v827_v43, %v791_v18  ;;  %v1030_v31 = vmul.f32 %v7521_v28, %v8035_v12  ;;  %v8070_v33 = vld [vmem:[#allocation2 + $0x188] sm:$0xff]  ;;  %v1031_v10 = vmul.f32 %v7521_v28, %v8041_v60  ;;  %v8077_v16 = vld [vmem:[#allocation2 + $0x190] sm:$0xff] }
 0x16a   : > { %v1264_v8 = vadd.f32 %v1232_v50, %v1196_v0  ;;  %v1265_v20 = vadd.f32 %v1233_v17, %v1197_v57  ;;  %v1098_v11 = vmul.f32 %v7524_v29, %v8062_v52  ;;  %v8079_v46 = vld [vmem:[#allocation2 + $0x189] sm:$0xff]  ;;  %v1099_v62 = vmul.f32 %v7524_v29, %v8068_v63  ;;  %v8087_v54 = vld [vmem:[#allocation2 + $0x191] sm:$0xff] }
 0x16b   : > { %v926_v47 = vadd.f32 %v894_v19, %v858_v45  ;;  %v927_v51 = vadd.f32 %v895_v58, %v859_v41  ;;  %v1166_v9 = vmul.f32 %v7536_v39, %v8070_v33  ;;  %v1167_v48 = vmul.f32 %v7536_v39, %v8077_v16  ;;  %v5986_v41 = vld [vmem:[%s7329_s13 + $0x68] sm:$0xff]  }
 0x16c   : > { %v1303_v4 = vadd.f32 %v7617_v15, %v1264_v8  ;;  %v1304_v22 = vadd.f32 %v7617_v15, %v1265_v20  ;;  %v1234_v6 = vmul.f32 %v7539_v40, %v8079_v46  ;;  %v1235_v59 = vmul.f32 %v7539_v40, %v8087_v54 }
 0x16d   : > { %v994_v53 = vadd.f32 %v962_v38, %v926_v47  ;;  %v995_v30 = vadd.f32 %v963_v56, %v927_v51  ;;  %v5960_v13 = vunpack.c.l.bf16 %v5985_v55  ;;  %v5961_v36 = vunpack.c.h.bf16 %v5985_v55 }
 0x16e   : > { %vm1335_vm6 = vcmp.gt.f32.partialorder %v1303_v4, 0.0  ;;  %vm1336_vm7 = vcmp.gt.f32.partialorder %v1304_v22, 0.0  ;;  %v1367_v50 = vmul.f32 0.1, %v1303_v4  ;;  %v1368_v34 = vmul.f32 0.1, %v1304_v22 }
 0x16f   : > { %v1062_v17 = vadd.f32 %v1030_v31, %v994_v53  ;;  %v1063_v15 = vadd.f32 %v1031_v10, %v995_v30  ;;  %547 = vst.msk [vmem:[#allocation2 + $0x1a8] sm:$0xff] %vm384_vm0, %v5960_v13  ;;  %v692_v44 = vmul.f32 %v7506_v23, %v8013_v42  ;;  %v693_v2 = vmul.f32 %v7506_v23, %v8031_v61 }
 0x170   : > { %v1399_v21 = vsel %vm1335_vm6, %v1303_v4, %v1367_v50  ;;  %v1400_v14 = vsel %vm1336_vm7, %v1304_v22, %v1368_v34  ;;  %v760_v35 = vmul.f32 %v7509_v24, %v8018_v49  ;;  %548 = vst.msk [vmem:[#allocation2 + $0x1b0] sm:$0xff] %vm384_vm0, %v5961_v36  ;;  %v761_v19 = vmul.f32 %v7509_v24, %v8033_v32 }
 0x171   : > { %v1422_v37 = vpack.c.bf16 %v1400_v14, %v1399_v21  ;;  %v1130_v18 = vadd.f32 %v1098_v11, %v1062_v17  ;;  %v1131_v43 = vadd.f32 %v1099_v62, %v1063_v15  ;;  %v828_v42 = vmul.f32 %v7512_v25, %v8035_v12 }
 0x172   : > { %v792_v0 = vadd.f32 %v760_v35, %v692_v44  ;;  %v829_v57 = vmul.f32 %v7512_v25, %v8041_v60  ;;  %v896_v61 = vmul.f32 %v7515_v26, %v8062_v52  ;;  %v793_v38 = vadd.f32 %v761_v19, %v693_v2 }
 0x173   : > { %6090 = vmatmul.mubr.msk.bf16.gmra.mrb[16].mxu0 %vm384_vm0, %v1422_v37  ;;  %v1198_v49 = vadd.f32 %v1166_v9, %v1130_v18  ;;  %v1199_v58 = vadd.f32 %v1167_v48, %v1131_v43  ;;  %v897_v45 = vmul.f32 %v7515_v26, %v8068_v63  ;;  %v964_v56 = vmul.f32 %v7518_v27, %v8070_v33  ;;  %v8127_v9 = vld [vmem:[#allocation8] ss:$0 sm:$0xff] }
 0x174   : > { %v860_v32 = vadd.f32 %v828_v42, %v792_v0  ;;  %v965_v12 = vmul.f32 %v7518_v27, %v8077_v16  ;;  %v1032_v60 = vmul.f32 %v7521_v28, %v8079_v46  ;;  %v861_v20 = vadd.f32 %v829_v57, %v793_v38 }
 0x175   : > { %v1266_v31 = vadd.f32 %v1234_v6, %v1198_v49  ;;  %v1267_v8 = vadd.f32 %v1235_v59, %v1199_v58  ;;  %v1033_v10 = vmul.f32 %v7521_v28, %v8087_v54  ;;  %v5964_v47 = vunpack.c.l.bf16 %v5986_v41 }
 0x176   : > { %v8123_v11 = vld [vmem:[#allocation2 + $0x1a7] sm:$0xff]  ;;  %v928_v55 = vadd.f32 %v896_v61, %v860_v32  ;;  %v5965_v51 = vunpack.c.h.bf16 %v5986_v41  ;;  %v694_v62 = vmul.f32 %v7506_v23, %v8062_v52  ;;  %v929_v6 = vadd.f32 %v897_v45, %v861_v20 }
 0x177   : > { %v1305_v4 = vadd.f32 %v8127_v9, %v1266_v31  ;;  %v1306_v22 = vadd.f32 %v8127_v9, %v1267_v8  ;;  %v8131_v48 = vld [vmem:[#allocation2 + $0x1a8] sm:$0xff]  ;;  %v1100_v53 = vmul.f32 %v7524_v29, %v8123_v11  ;;  %v8137_v59 = vld [vmem:[#allocation2 + $0x1b0] sm:$0xff]  ;;  %549 = vst.msk [vmem:[#allocation2 + $0x1c8] sm:$0xff] %vm384_vm0, %v5964_v47  ;;  %v695_v50 = vmul.f32 %v7506_v23, %v8068_v63 }
 0x178   : > { %v8135_v30 = vld [vmem:[#allocation2 + $0x1af] sm:$0xff]  ;;  %v996_v13 = vadd.f32 %v964_v56, %v928_v55  ;;  %v1168_v52 = vmul.f32 %v7536_v39, %v8131_v48  ;;  %550 = vst.msk [vmem:[#allocation2 + $0x1d0] sm:$0xff] %vm384_vm0, %v5965_v51  ;;  %v762_v34 = vmul.f32 %v7509_v24, %v8070_v33  ;;  %v997_v21 = vadd.f32 %v965_v12, %v929_v6 }
 0x179   : > { %vm1337_vm8 = vcmp.gt.f32.partialorder %v1305_v4, 0.0  ;;  %vm1338_vm9 = vcmp.gt.f32.partialorder %v1306_v22, 0.0  ;;  %v1369_v17 = vmul.f32 0.1, %v1305_v4  ;;  %v1370_v15 = vmul.f32 0.1, %v1306_v22 }
 0x17a   : > { %v8147_v36 = vld [vmem:[#allocation2 + $0x1a9] sm:$0xff]  ;;  %v8149_v44 = vld [vmem:[#allocation2 + $0x1b1] sm:$0xff]  ;;  %v1064_v14 = vadd.f32 %v1032_v60, %v996_v13  ;;  %v1101_v2 = vmul.f32 %v7524_v29, %v8135_v30  ;;  %v1169_v35 = vmul.f32 %v7536_v39, %v8137_v59  ;;  %v1065_v19 = vadd.f32 %v1033_v10, %v997_v21 }
 0x17b   : > { %v1401_v63 = vsel %vm1337_vm8, %v1305_v4, %v1369_v17  ;;  %v1402_v37 = vsel %vm1338_vm9, %v1306_v22, %v1370_v15  ;;  %v1236_v33 = vmul.f32 %v7539_v40, %v8147_v36  ;;  %v1237_v18 = vmul.f32 %v7539_v40, %v8149_v44  ;;  %v5987_v12 = vld [vmem:[%s7329_s13 + $0x70] sm:$0xff]  }
 0x17c   : > { %v1423_v43 = vpack.c.bf16 %v1402_v37, %v1401_v63  ;;  %v1132_v0 = vadd.f32 %v1100_v53, %v1064_v14  ;;  %v763_v42 = vmul.f32 %v7509_v24, %v8077_v16  ;;  %v794_v57 = vadd.f32 %v762_v34, %v694_v62 }
 0x17d   : > { %v830_v61 = vmul.f32 %v7512_v25, %v8079_v46  ;;  %v831_v49 = vmul.f32 %v7512_v25, %v8087_v54  ;;  %v898_v58 = vmul.f32 %v7515_v26, %v8123_v11  ;;  %v1133_v38 = vadd.f32 %v1101_v2, %v1065_v19 }
 0x17e   : > { %6093 = vmatprep.mubr.msk.bf16.mxu0 %vm384_vm0, %v1423_v43  ;;  %v1200_v45 = vadd.f32 %v1168_v52, %v1132_v0  ;;  %v795_v41 = vadd.f32 %v763_v42, %v695_v50  ;;  %v899_v32 = vmul.f32 %v7515_v26, %v8135_v30  ;;  %v966_v16 = vmul.f32 %v7518_v27, %v8131_v48  ;;  %v8177_v8 = vld [vmem:[#allocation2 + $0x1c7] sm:$0xff] }
 0x17f   : > { %v862_v56 = vadd.f32 %v830_v61, %v794_v57  ;;  %v967_v46 = vmul.f32 %v7518_v27, %v8137_v59  ;;  %v1034_v54 = vmul.f32 %v7521_v28, %v8147_v36  ;;  %v1201_v60 = vadd.f32 %v1169_v35, %v1133_v38  ;;  %v8179_v20 = vld [vmem:[#allocation2 + $0x1cf] sm:$0xff] }
 0x180   : > { %v1268_v31 = vadd.f32 %v1236_v33, %v1200_v45  ;;  %v8181_v10 = vld [vmem:[#allocation2 + $0x1c8] sm:$0xff]  ;;  %v863_v55 = vadd.f32 %v831_v49, %v795_v41  ;;  %v1035_v47 = vmul.f32 %v7521_v28, %v8149_v44  ;;  %v8185_v51 = vld [vmem:[#allocation2 + $0x1d0] sm:$0xff]  ;;  %v1102_v4 = vmul.f32 %v7524_v29, %v8177_v8 }
 0x181   : > { %v930_v62 = vadd.f32 %v898_v58, %v862_v56  ;;  %v1103_v22 = vmul.f32 %v7524_v29, %v8179_v20  ;;  %v1170_v6 = vmul.f32 %v7536_v39, %v8181_v10  ;;  %v1269_v53 = vadd.f32 %v1237_v18, %v1201_v60  ;;  %v8194_v52 = vld [vmem:[#allocation2 + $0x1c9] sm:$0xff]  ;;  %v8196_v50 = vld [vmem:[#allocation2 + $0x1d1] sm:$0xff] }
 0x182   : > { %v1307_v13 = vadd.f32 %v8127_v9, %v1268_v31  ;;  %v931_v34 = vadd.f32 %v899_v32, %v863_v55  ;;  %v1171_v17 = vmul.f32 %v7536_v39, %v8185_v51  ;;  %v1238_v21 = vmul.f32 %v7539_v40, %v8194_v52 }
 0x183   : > { %v998_v15 = vadd.f32 %v966_v16, %v930_v62  ;;  %v1239_v14 = vmul.f32 %v7539_v40, %v8196_v50  ;;  %v5968_v2 = vunpack.c.l.bf16 %v5987_v12  ;;  %v1308_v35 = vadd.f32 %v8127_v9, %v1269_v53 }
 0x184   : > { %vm1339_vm10 = vcmp.gt.f32.partialorder %v1307_v13, 0.0  ;;  %v1371_v63 = vmul.f32 0.1, %v1307_v13  ;;  %v999_v37 = vadd.f32 %v967_v46, %v931_v34  ;;  %v5969_v18 = vunpack.c.h.bf16 %v5987_v12 }
 0x185   : > { %v1066_v33 = vadd.f32 %v1034_v54, %v998_v15  ;;  %551 = vst.msk [vmem:[#allocation2 + $0x1e8] sm:$0xff] %vm384_vm0, %v5968_v2  ;;  %v696_v43 = vmul.f32 %v7506_v23, %v8123_v11  ;;  %v697_v19 = vmul.f32 %v7506_v23, %v8135_v30  ;;  %vm1340_vm11 = vcmp.gt.f32.partialorder %v1308_v35, 0.0  ;;  %v5988_v54 = vld [vmem:[%s7329_s13 + $0x78] sm:$0xff]  }
 0x186   : > { %v1372_v0 = vmul.f32 0.1, %v1308_v35  ;;  %v1403_v42 = vsel %vm1339_vm10, %v1307_v13, %v1371_v63  ;;  %v1067_v57 = vadd.f32 %v1035_v47, %v999_v37  ;;  %552 = vst.msk [vmem:[#allocation2 + $0x1f0] sm:$0xff] %vm384_vm0, %v5969_v18  ;;  %v764_v49 = vmul.f32 %v7509_v24, %v8131_v48 }
 0x187   : > { %v1134_v61 = vadd.f32 %v1102_v4, %v1066_v33  ;;  %v765_v58 = vmul.f32 %v7509_v24, %v8137_v59  ;;  %v832_v11 = vmul.f32 %v7512_v25, %v8147_v36  ;;  %v833_v30 = vmul.f32 %v7512_v25, %v8149_v44 }
 0x188   : > { %v1404_v38 = vsel %vm1340_vm11, %v1308_v35, %v1372_v0  ;;  %v1135_v45 = vadd.f32 %v1103_v22, %v1067_v57  ;;  %v900_v41 = vmul.f32 %v7515_v26, %v8177_v8  ;;  %v796_v16 = vadd.f32 %v764_v49, %v696_v43 }
 0x189   : > { %v1424_v32 = vpack.c.bf16 %v1404_v38, %v1403_v42  ;;  %v1202_v56 = vadd.f32 %v1170_v6, %v1134_v61  ;;  %v797_v46 = vadd.f32 %v765_v58, %v697_v19  ;;  %v901_v59 = vmul.f32 %v7515_v26, %v8179_v20 }
 0x18a   : > { %v1203_v48 = vadd.f32 %v1171_v17, %v1135_v45  ;;  %v968_v36 = vmul.f32 %v7518_v27, %v8181_v10  ;;  %v969_v12 = vmul.f32 %v7518_v27, %v8185_v51  ;;  %v864_v60 = vadd.f32 %v832_v11, %v796_v16 }
 0x18b   : > { %6094 = vmatmul.mubr.msk.bf16.gmra.mrb[20].mxu0 %vm384_vm0, %v1424_v32  ;;  %v1270_v44 = vadd.f32 %v1238_v21, %v1202_v56  ;;  %v865_v31 = vadd.f32 %v833_v30, %v797_v46  ;;  %v1036_v55 = vmul.f32 %v7521_v28, %v8194_v52  ;;  %v1037_v4 = vmul.f32 %v7521_v28, %v8196_v50 }
 0x18c   : > { %v1271_v47 = vadd.f32 %v1239_v14, %v1203_v48  ;;  %v8231_v62 = vld [vmem:[#allocation2 + $0x1e7] sm:$0xff]  ;;  %v5972_v22 = vunpack.c.l.bf16 %v5988_v54  ;;  %v5973_v6 = vunpack.c.h.bf16 %v5988_v54  ;;  %v932_v34 = vadd.f32 %v900_v41, %v864_v60 }
 0x18d   : > { %v1309_v53 = vadd.f32 %v8127_v9, %v1270_v44  ;;  %v8236_v13 = vld [vmem:[#allocation2 + $0x1e8] sm:$0xff]  ;;  %v933_v17 = vadd.f32 %v901_v59, %v865_v31  ;;  %v1104_v15 = vmul.f32 %v7524_v29, %v8231_v62  ;;  %v698_v2 = vmul.f32 %v7506_v23, %v8177_v8  ;;  %v8251_v33 = vld [vmem:[#allocation2 + $0x1f0] sm:$0xff] }
 0x18e   : > { %v1310_v21 = vadd.f32 %v8127_v9, %v1271_v47  ;;  %v1172_v14 = vmul.f32 %v7536_v39, %v8236_v13  ;;  %553 = vst.msk [vmem:[#allocation2 + $0x208] sm:$0xff] %vm384_vm0, %v5972_v22  ;;  %554 = vst.msk [vmem:[#allocation2 + $0x210] sm:$0xff] %vm384_vm0, %v5973_v6  ;;  %v699_v35 = vmul.f32 %v7506_v23, %v8179_v20  ;;  %v8249_v37 = vld [vmem:[#allocation2 + $0x1ef] sm:$0xff]  ;;  %vm1757_vm8 = vcmask 130048  }
 0x18f   : > { %vm1341_vm12 = vcmp.gt.f32.partialorder %v1309_v53, 0.0  ;;  %v1373_v63 = vmul.f32 0.1, %v1309_v53  ;;  %v1000_v18 = vadd.f32 %v968_v36, %v932_v34  ;;  %v1001_v43 = vadd.f32 %v969_v12, %v933_v17  ;;  %v657_v0 = vld [vmem:[#allocation2 + $0x1e9] sm:$0xff]  ;;  %v8257_v61 = vld [vmem:[#allocation2 + $0x1f1] sm:$0xff] }
 0x190   : > { %vm1342_vm13 = vcmp.gt.f32.partialorder %v1310_v21, 0.0  ;;  %v1374_v19 = vmul.f32 0.1, %v1310_v21  ;;  %v1105_v42 = vmul.f32 %v7524_v29, %v8249_v37  ;;  %v1173_v8 = vmul.f32 %v7536_v39, %v8251_v33 }
 0x191   : > { %v1405_v57 = vsel %vm1341_vm12, %v1309_v53, %v1373_v63  ;;  %v1068_v20 = vadd.f32 %v1036_v55, %v1000_v18  ;;  %v1069_v49 = vadd.f32 %v1037_v4, %v1001_v43  ;;  %v1240_v58 = vmul.f32 %v7539_v40, %v657_v0 }
 0x192   : > { %v1406_v11 = vsel %vm1342_vm13, %v1310_v21, %v1374_v19  ;;  %v1241_v38 = vmul.f32 %v7539_v40, %v8257_v61  ;;  %v766_v45 = vmul.f32 %v7509_v24, %v8181_v10  ;;  %v767_v30 = vmul.f32 %v7509_v24, %v8185_v51 }
 0x193   : > { %v1425_v41 = vpack.c.bf16 %v1406_v11, %v1405_v57  ;;  %v1136_v32 = vadd.f32 %v1104_v15, %v1068_v20  ;;  %v1137_v56 = vadd.f32 %v1105_v42, %v1069_v49  ;;  %v834_v16 = vmul.f32 %v7512_v25, %v8194_v52 }
 0x194   : > { %v798_v46 = vadd.f32 %v766_v45, %v698_v2  ;;  %v799_v54 = vadd.f32 %v767_v30, %v699_v35  ;;  %v835_v48 = vmul.f32 %v7512_v25, %v8196_v50  ;;  %v902_v59 = vmul.f32 %v7515_v26, %v8231_v62 }
 0x195   : > { %6097 = vmatprep.mubr.msk.bf16.mxu0 %vm384_vm0, %v1425_v41  ;;  %v1204_v10 = vadd.f32 %v1172_v14, %v1136_v32  ;;  %v1205_v36 = vadd.f32 %v1173_v8, %v1137_v56  ;;  %v903_v51 = vmul.f32 %v7515_v26, %v8249_v37  ;;  %v970_v12 = vmul.f32 %v7518_v27, %v8236_v13  ;;  %v587_v44 = vld [vmem:[#allocation2 + $0x207] sm:$0xff]  ;;  %v588_v4 = vld [vmem:[#allocation2 + $0x20f] sm:$0xff] }
 0x196   : > { %v866_v52 = vadd.f32 %v834_v16, %v798_v46  ;;  %v867_v60 = vadd.f32 %v835_v48, %v799_v54  ;;  %v971_v31 = vmul.f32 %v7518_v27, %v8251_v33  ;;  %v1038_v50 = vmul.f32 %v7521_v28, %v657_v0  ;;  %v623_v22 = vld [vmem:[#allocation2 + $0x208] sm:$0xff]  ;;  %v624_v34 = vld [vmem:[#allocation2 + $0x210] sm:$0xff] }
 0x197   : > { %v1272_v55 = vadd.f32 %v1240_v58, %v1204_v10  ;;  %v1273_v47 = vadd.f32 %v1241_v38, %v1205_v36  ;;  %v1039_v6 = vmul.f32 %v7521_v28, %v8257_v61  ;;  %v1106_v53 = vmul.f32 %v7524_v29, %v587_v44  ;;  %v659_v17 = vld [vmem:[#allocation2 + $0x209] sm:$0xff]  ;;  %v660_v18 = vld [vmem:[#allocation2 + $0x211] sm:$0xff] }
 0x198   : > { %v934_v15 = vadd.f32 %v902_v59, %v866_v52  ;;  %v935_v21 = vadd.f32 %v903_v51, %v867_v60  ;;  %v1107_v14 = vmul.f32 %v7524_v29, %v588_v4  ;;  %v1174_v2 = vmul.f32 %v7536_v39, %v623_v22  ;;  %v589_v60 = vld [vmem:[#allocation2 + $0x227] sm:$0xff] }
 0x199   : > { %v1311_v35 = vadd.f32 %v8127_v9, %v1272_v55  ;;  %v1312_v63 = vadd.f32 %v8127_v9, %v1273_v47  ;;  %v1175_v43 = vmul.f32 %v7536_v39, %v624_v34  ;;  %v1242_v19 = vmul.f32 %v7539_v40, %v659_v17  ;;  %v625_v47 = vld [vmem:[#allocation2 + $0x228] sm:$0xff] }
 0x19a   : > { %v1002_v42 = vadd.f32 %v970_v12, %v934_v15  ;;  %v1003_v8 = vadd.f32 %v971_v31, %v935_v21  ;;  %v1243_v57 = vmul.f32 %v7539_v40, %v660_v18  ;;  %v700_v20 = vmul.f32 %v7506_v23, %v8231_v62  ;;  %v590_v31 = vld [vmem:[#allocation2 + $0x22f] sm:$0xff] }
 0x19b   : > { %vm1343_vm14 = vcmp.gt.f32.partialorder %v1311_v35, 0.0  ;;  %vm1344_vm15 = vcmp.gt.f32.partialorder %v1312_v63, 0.0  ;;  %v1375_v49 = vmul.f32 0.1, %v1311_v35  ;;  %v1376_v58 = vmul.f32 0.1, %v1312_v63 }
 0x19c   : > { %v1070_v11 = vadd.f32 %v1038_v50, %v1002_v42  ;;  %v1071_v38 = vadd.f32 %v1039_v6, %v1003_v8  ;;  %v701_v45 = vmul.f32 %v7506_v23, %v8249_v37  ;;  %v768_v30 = vmul.f32 %v7509_v24, %v8236_v13  ;;  %v661_v6 = vld [vmem:[#allocation2 + $0x229] sm:$0xff] }
 0x19d   : > { %v1407_v41 = vsel %vm1343_vm14, %v1311_v35, %v1375_v49  ;;  %v1408_v32 = vsel %vm1344_vm15, %v1312_v63, %v1376_v58  ;;  %v769_v56 = vmul.f32 %v7509_v24, %v8251_v33  ;;  %v836_v16 = vmul.f32 %v7512_v25, %v657_v0 }
 0x19e   : > { %v1426_v62 = vpack.c.bf16 %v1408_v32, %v1407_v41  ;;  %v1138_v46 = vadd.f32 %v1106_v53, %v1070_v11  ;;  %v1139_v54 = vadd.f32 %v1107_v14, %v1071_v38  ;;  %v800_v48 = vadd.f32 %v768_v30, %v700_v20  ;;  %v662_v53 = vld [vmem:[#allocation2 + $0x231] sm:$0xff] }
 0x19f   : > { %v801_v59 = vadd.f32 %v769_v56, %v701_v45  ;;  %v837_v10 = vmul.f32 %v7512_v25, %v8257_v61  ;;  %v904_v23 = vmul.f32 %v7515_v26, %v587_v44  ;;  %v905_v37 = vmul.f32 %v7515_v26, %v588_v4  ;;  %v626_v4 = vld [vmem:[#allocation2 + $0x230] sm:$0xff] }
 0x1a0   : > { %6098 = vmatmul.mubr.msk.bf16.gmra.mrb[24].mxu0 %vm384_vm0, %v1426_v62  ;;  %v1206_v13 = vadd.f32 %v1174_v2, %v1138_v46  ;;  %v1207_v36 = vadd.f32 %v1175_v43, %v1139_v54  ;;  %v868_v51 = vadd.f32 %v836_v16, %v800_v48  ;;  %v972_v24 = vmul.f32 %v7518_v27, %v623_v22 }
 0x1a1   : > { %v869_v33 = vadd.f32 %v837_v10, %v801_v59  ;;  %v973_v0 = vmul.f32 %v7518_v27, %v624_v34  ;;  %v1040_v61 = vmul.f32 %v7521_v28, %v659_v17  ;;  %v1041_v26 = vmul.f32 %v7521_v28, %v660_v18 }
 0x1a2   : > { %v1274_v12 = vadd.f32 %v1242_v19, %v1206_v13  ;;  %v1275_v52 = vadd.f32 %v1243_v57, %v1207_v36  ;;  %v936_v50 = vadd.f32 %v904_v23, %v868_v51  ;;  %v1108_v34 = vmul.f32 %v7524_v29, %v589_v60 }
 0x1a3   : > { %v937_v25 = vadd.f32 %v905_v37, %v869_v33  ;;  %v1109_v15 = vmul.f32 %v7524_v29, %v590_v31  ;;  %v1176_v2 = vmul.f32 %v7536_v39, %v625_v47  ;;  %v1177_v35 = vmul.f32 %v7536_v39, %v626_v4 }
 0x1a4   : > { %v1313_v44 = vadd.f32 %v8127_v9, %v1274_v12  ;;  %v1314_v55 = vadd.f32 %v8127_v9, %v1275_v52  ;;  %v1004_v22 = vadd.f32 %v972_v24, %v936_v50  ;;  %v1244_v43 = vmul.f32 %v7539_v40, %v661_v6 }
 0x1a5   : > { %v1005_v27 = vadd.f32 %v973_v0, %v937_v25  ;;  %v1245_v57 = vmul.f32 %v7539_v40, %v662_v53  ;;  %v8320_v40 = vld [vmem:[#allocation11] ss:$0 sm:$0xff] }
 0x1a6   : > { %vm1345_vm2 = vcmp.gt.f32.partialorder %v1313_v44, 0.0  ;;  %vm1346_vm3 = vcmp.gt.f32.partialorder %v1314_v55, 0.0  ;;  %v1377_v21 = vmul.f32 0.1, %v1313_v44  ;;  %v1378_v17 = vmul.f32 0.1, %v1314_v55 }
 0x1a7   : > { %v1072_v14 = vadd.f32 %v1040_v61, %v1004_v22  ;;  %v1073_v28 = vadd.f32 %v1041_v26, %v1005_v27 }
 0x1a8   : > { %v1409_v63 = vsel %vm1345_vm2, %v1313_v44, %v1377_v21  ;;  %v1410_v18 = vsel %vm1346_vm3, %v1314_v55, %v1378_v17  ;;  %vm6999_vm3 = vmmov 0  }
 0x1a9   : > { %v1427_v19 = vpack.c.bf16 %v1410_v18, %v1409_v63  ;;  %v1140_v42 = vadd.f32 %v1108_v34, %v1072_v14  ;;  %v1141_v8 = vadd.f32 %v1109_v15, %v1073_v28  ;;  %6107 = vmatprep.mubr.msk.bf16.mxu1 %vm6999_vm3, %v11220_v1 }
 0x1ab   : > { %6101 = vmatprep.mubr.msk.bf16.mxu0 %vm384_vm0, %v1427_v19  ;;  %v1208_v29 = vadd.f32 %v1176_v2, %v1140_v42  ;;  %v1209_v20 = vadd.f32 %v1177_v35, %v1141_v8 }
 0x1ad   : > { %v1276_v49 = vadd.f32 %v1244_v43, %v1208_v29  ;;  %v1277_v58 = vadd.f32 %v1245_v57, %v1209_v20 }
 0x1af   : > { %v1315_v11 = vadd.f32 %v8127_v9, %v1276_v49  ;;  %v1316_v38 = vadd.f32 %v8127_v9, %v1277_v58 }
 0x1b1   : > { %vm1347_vm4 = vcmp.gt.f32.partialorder %v1315_v11, 0.0  ;;  %vm1348_vm5 = vcmp.gt.f32.partialorder %v1316_v38, 0.0  ;;  %v1379_v39 = vmul.f32 0.1, %v1315_v11  ;;  %v1380_v45 = vmul.f32 0.1, %v1316_v38 }
 0x1b3   : > { %v1411_v30 = vsel %vm1347_vm4, %v1315_v11, %v1379_v39  ;;  %v1412_v41 = vsel %vm1348_vm5, %v1316_v38, %v1380_v45 }
 0x1b4   : > { %v1428_v32 = vpack.c.bf16 %v1412_v41, %v1411_v30  ;;  %v6353_v41 = vld [vmem:[#allocation12] sm:$0xff]  }
 0x1b5   : > { %6106 = vmatpush3.bf16.msra.mxu1 %v6353_v41 }
 0x1b6   : > { %6102 = vmatmul.mubr.msk.bf16.gmra.mrb[28].mxu0 %vm384_vm0, %v1428_v32  ;;  %v6354_v32 = vld [vmem:[#allocation9 + $0x10] sm:$0xff]  }
 0x1b7   : > { %6149 = vmatprep.mubr.msk.bf16.mxu0 %vm6999_vm3, %v11220_v1  ;;  %6111 = vmatprep.subr.bf16.mxu1 %v6354_v32 }
 0x1ef   : > { %v6075_v56 = vpop.f32.mrb[0].mxu0 }
 0x1f0   : > { %v1543_v16 = vadd.f32 %v6075_v56, %v8320_v40  ;;  %v1534_v62 = vpop.f32.mrb[1].mxu0 }
 0x1f1   : > { %v1535_v46 = vadd.f32 %v8320_v40, %v1534_v62  ;;  %v6076_v54 = vpop.f32.mrb[2].mxu0 }
 0x1f2   : > { %v1546_v9 = vadd.f32 %v6076_v54, %v8320_v40  ;;  %v1537_v48 = vpop.f32.mrb[3].mxu0  ;;  %v1695_v59 = vmul.f32 0.1, %v1543_v16  ;;  %vm1663_vm7 = vcmp.gt.f32.partialorder %v1543_v16, 0.0 }
 0x1f3   : > { %vm1661_vm6 = vcmp.gt.f32.partialorder %v1535_v46, 0.0  ;;  %v1693_v10 = vmul.f32 0.1, %v1535_v46  ;;  %v1538_v23 = vadd.f32 %v8320_v40, %v1537_v48 }
 0x1f4   : > { %v1696_v13 = vmul.f32 0.1, %v1546_v9  ;;  %vm1664_vm10 = vcmp.gt.f32.partialorder %v1546_v9, 0.0  ;;  %v1727_v51 = vsel %vm1663_vm7, %v1543_v16, %v1695_v59 }
 0x1f5   : > { %v1725_v37 = vsel %vm1661_vm6, %v1535_v46, %v1693_v10  ;;  %vm1662_vm9 = vcmp.gt.f32.partialorder %v1538_v23, 0.0  ;;  %v1694_v36 = vmul.f32 0.1, %v1538_v23  ;;  %v1761_v60 = vsel %vm1757_vm8, %v1727_v51, 0.0 }
 0x1f6   : > { %v1758_v33 = vsel %vm1757_vm8, %v1725_v37, 0.0  ;;  %v1728_v12 = vsel %vm1664_vm10, %v1546_v9, %v1696_v13 }
 0x1f7   : > { %v1726_v24 = vsel %vm1662_vm9, %v1538_v23, %v1694_v36  ;;  %v1763_v50 = vsel %vm1757_vm8, %v1728_v12, 0.0 }
 0x1f8   : > { %v1759_v0 = vsel %vm1757_vm8, %v1726_v24, 0.0 }
 0x1f9   : > { %v1760_v52 = vadd.f32 %v1759_v0, %v1758_v33 }
 0x1fb   : > { %v1762_v31 = vadd.f32 %v1761_v60, %v1760_v52 }
 0x1fd   : > { %v1764_v25 = vadd.f32 %v1763_v50, %v1762_v31 }
 0x204   : > { %v6079_v61 = vpop.f32.mrb[4].mxu0 }
 0x205   : > { %v1559_v26 = vadd.f32 %v6079_v61, %v8320_v40  ;;  %v1550_v44 = vpop.f32.mrb[5].mxu0 }
 0x206   : > { %v1551_v55 = vadd.f32 %v8320_v40, %v1550_v44  ;;  %v6080_v47 = vpop.f32.mrb[6].mxu0 }
 0x207   : > { %v1562_v4 = vadd.f32 %v6080_v47, %v8320_v40  ;;  %v1553_v22 = vpop.f32.mrb[7].mxu0  ;;  %v1699_v6 = vmul.f32 0.1, %v1559_v26  ;;  %vm1667_vm12 = vcmp.gt.f32.partialorder %v1559_v26, 0.0 }
 0x208   : > { %vm1665_vm11 = vcmp.gt.f32.partialorder %v1551_v55, 0.0  ;;  %v1697_v53 = vmul.f32 0.1, %v1551_v55  ;;  %v1554_v27 = vadd.f32 %v8320_v40, %v1553_v22 }
 0x209   : > { %v1700_v15 = vmul.f32 0.1, %v1562_v4  ;;  %vm1668_vm14 = vcmp.gt.f32.partialorder %v1562_v4, 0.0  ;;  %v1731_v14 = vsel %vm1667_vm12, %v1559_v26, %v1699_v6 }
 0x20a   : > { %v1729_v34 = vsel %vm1665_vm11, %v1551_v55, %v1697_v53  ;;  %vm1666_vm13 = vcmp.gt.f32.partialorder %v1554_v27, 0.0  ;;  %v1698_v21 = vmul.f32 0.1, %v1554_v27  ;;  %v1769_v43 = vsel %vm1757_vm8, %v1731_v14, 0.0 }
 0x20b   : > { %v1765_v17 = vsel %vm1757_vm8, %v1729_v34, 0.0  ;;  %v1732_v63 = vsel %vm1668_vm14, %v1562_v4, %v1700_v15 }
 0x20c   : > { %v1766_v28 = vadd.f32 %v1765_v17, %v1764_v25  ;;  %v1730_v2 = vsel %vm1666_vm13, %v1554_v27, %v1698_v21  ;;  %v1771_v42 = vsel %vm1757_vm8, %v1732_v63, 0.0 }
 0x20d   : > { %v1767_v35 = vsel %vm1757_vm8, %v1730_v2, 0.0 }
 0x20e   : > { %v1768_v18 = vadd.f32 %v1767_v35, %v1766_v28  ;;  %v1909_v28 = vld [vmem:[#allocation6 + $0xc] sm:$0x7] }
 0x20f   : > { %v8359_v2 = vrot.slane %v1909_v28, %v7493_v3  ;;  %v8362_v35 = vrot.slane %v1909_v28, %v7495_v5 }
 0x210   : > { %v1770_v19 = vadd.f32 %v1769_v43, %v1768_v18  ;;  %v6380_v18 = vld [vmem:[#allocation2 + $0x7] sm:$0xff] }
 0x211   : > { %v1916_v43 = vmul.f32 %v6380_v18, %v8359_v2  ;;  %v6390_v18 = vld [vmem:[#allocation2 + $0x29] sm:$0xff] }
 0x212   : > { %v1772_v8 = vadd.f32 %v1771_v42, %v1770_v19  ;;  %v6381_v19 = vld [vmem:[#allocation2 + $0xf] sm:$0xff] }
 0x213   : > { %v1917_v42 = vmul.f32 %v6381_v19, %v8359_v2  ;;  %v6391_v19 = vld [vmem:[#allocation2 + $0x31] sm:$0xff] }
 0x218   : > { %v6083_v57 = vpop.f32.mrb[8].mxu0 }
 0x219   : > { %v1575_v29 = vadd.f32 %v6083_v57, %v8320_v40  ;;  %v1566_v20 = vpop.f32.mrb[9].mxu0 }
 0x21a   : > { %v1567_v49 = vadd.f32 %v8320_v40, %v1566_v20  ;;  %v6084_v58 = vpop.f32.mrb[10].mxu0 }
 0x21b   : > { %v1703_v11 = vmul.f32 0.1, %v1575_v29  ;;  %v1578_v38 = vadd.f32 %v6084_v58, %v8320_v40  ;;  %v1569_v39 = vpop.f32.mrb[11].mxu0  ;;  %vm1671_vm2 = vcmp.gt.f32.partialorder %v1575_v29, 0.0 }
 0x21c   : > { %vm1669_vm15 = vcmp.gt.f32.partialorder %v1567_v49, 0.0  ;;  %v1701_v45 = vmul.f32 0.1, %v1567_v49  ;;  %v1570_v30 = vadd.f32 %v8320_v40, %v1569_v39  ;;  %v6384_v39 = vld [vmem:[#allocation2 + $0x27] sm:$0xff] }
 0x21d   : > { %v1704_v16 = vmul.f32 0.1, %v1578_v38  ;;  %vm1672_vm5 = vcmp.gt.f32.partialorder %v1578_v38, 0.0  ;;  %v1735_v54 = vsel %vm1671_vm2, %v1575_v29, %v1703_v11  ;;  %v6383_v29 = vld [vmem:[#allocation2 + $0x10] sm:$0xff] }
 0x21e   : > { %v1733_v56 = vsel %vm1669_vm15, %v1567_v49, %v1701_v45  ;;  %vm1670_vm4 = vcmp.gt.f32.partialorder %v1570_v30, 0.0  ;;  %v1702_v62 = vmul.f32 0.1, %v1570_v30  ;;  %v1777_v37 = vsel %vm1757_vm8, %v1735_v54, 0.0  ;;  %v1910_v11 = vld [vmem:[#allocation6 + $0x10] sm:$0x7] }
 0x21f   : > { %v1773_v46 = vsel %vm1757_vm8, %v1733_v56, 0.0  ;;  %v1736_v10 = vsel %vm1672_vm5, %v1578_v38, %v1704_v16  ;;  %v1985_v20 = vmul.f32 %v6383_v29, %v8362_v35  ;;  %v8370_v38 = vrot.slane %v1909_v28, %v7497_v7  ;;  %v6389_v28 = vld [vmem:[#allocation2 + $0x30] sm:$0xff] }
 0x220   : > { %v1774_v9 = vadd.f32 %v1773_v46, %v1772_v8  ;;  %v1734_v48 = vsel %vm1670_vm4, %v1570_v30, %v1702_v62  ;;  %v1779_v36 = vsel %vm1757_vm8, %v1736_v10, 0.0  ;;  %v6382_v8 = vld [vmem:[#allocation2 + $0x8] sm:$0xff]  ;;  %v8373_v45 = vmul.f32 %v6384_v39, %v8359_v2 }
 0x221   : > { %v1775_v59 = vsel %vm1757_vm8, %v1734_v48, 0.0  ;;  %v1984_v57 = vmul.f32 %v6382_v8, %v8362_v35  ;;  %v6385_v30 = vld [vmem:[#allocation2 + $0x2f] sm:$0xff]  ;;  %v2017_v62 = vadd.f32 %v1985_v20, %v1917_v42  ;;  %v8380_v46 = vrot.slane %v1910_v11, %v7493_v3 }
 0x222   : > { %v1776_v23 = vadd.f32 %v1775_v59, %v1774_v9  ;;  %v8376_v41 = vmul.f32 %v6385_v30, %v8359_v2  ;;  %v6386_v59 = vld [vmem:[#allocation2 + $0x9] sm:$0xff] }
 0x223   : > { %v2016_v16 = vadd.f32 %v1984_v57, %v1916_v43  ;;  %v2052_v10 = vmul.f32 %v6386_v59, %v8370_v38  ;;  %v6392_v57 = vld [vmem:[#allocation2 + $0x47] sm:$0xff]  ;;  %v6393_v20 = vld [vmem:[#allocation2 + $0x4f] sm:$0xff] }
 0x224   : > { %v1778_v13 = vadd.f32 %v1777_v37, %v1776_v23 }
 0x226   : > { %v1780_v51 = vadd.f32 %v1779_v36, %v1778_v13  ;;  %v6387_v13 = vld [vmem:[#allocation2 + $0x11] sm:$0xff] }
 0x227   : > { %v2053_v36 = vmul.f32 %v6387_v13, %v8370_v38  ;;  %v8421_v13 = vld [vmem:[#allocation2 + $0x51] sm:$0xff] }
 0x231   : > { %v6087_v24 = vpop.f32.mrb[12].mxu0 }
 0x232   : > { %v1591_v33 = vadd.f32 %v6087_v24, %v8320_v40  ;;  %v1582_v0 = vpop.f32.mrb[13].mxu0 }
 0x233   : > { %v1583_v12 = vadd.f32 %v8320_v40, %v1582_v0  ;;  %v6088_v52 = vpop.f32.mrb[14].mxu0 }
 0x234   : > { %v1594_v60 = vadd.f32 %v6088_v52, %v8320_v40  ;;  %v1585_v31 = vpop.f32.mrb[15].mxu0  ;;  %v1707_v50 = vmul.f32 0.1, %v1591_v33  ;;  %vm1675_vm7 = vcmp.gt.f32.partialorder %v1591_v33, 0.0 }
 0x235   : > { %vm1673_vm6 = vcmp.gt.f32.partialorder %v1583_v12, 0.0  ;;  %v1705_v25 = vmul.f32 0.1, %v1583_v12  ;;  %v1586_v61 = vadd.f32 %v8320_v40, %v1585_v31 }
 0x236   : > { %v1708_v44 = vmul.f32 0.1, %v1594_v60  ;;  %vm1676_vm10 = vcmp.gt.f32.partialorder %v1594_v60, 0.0  ;;  %v1739_v4 = vsel %vm1675_vm7, %v1591_v33, %v1707_v50  ;;  %v2084_v33 = vadd.f32 %v2052_v10, %v2016_v16  ;;  %v1911_v50 = vld [vmem:[#allocation6 + $0x14] sm:$0x7] }
 0x237   : > { %v1737_v26 = vsel %vm1673_vm6, %v1583_v12, %v1705_v25  ;;  %vm1674_vm9 = vcmp.gt.f32.partialorder %v1586_v61, 0.0  ;;  %v1706_v55 = vmul.f32 0.1, %v1586_v61  ;;  %v1785_v15 = vsel %vm1757_vm8, %v1739_v4, 0.0 }
 0x238   : > { %v1781_v47 = vsel %vm1757_vm8, %v1737_v26, 0.0  ;;  %v1740_v27 = vsel %vm1676_vm10, %v1594_v60, %v1708_v44  ;;  %v2085_v25 = vadd.f32 %v2053_v36, %v2017_v62  ;;  %v8413_v16 = vrot.slane %v1911_v50, %v7497_v7 }
 0x239   : > { %v1782_v22 = vadd.f32 %v1781_v47, %v1780_v51  ;;  %v1738_v6 = vsel %vm1674_vm9, %v1586_v61, %v1706_v55  ;;  %v1787_v17 = vsel %vm1757_vm8, %v1740_v27, 0.0  ;;  %v2120_v61 = vmul.f32 %v6384_v39, %v8380_v46 }
 0x23a   : > { %v1783_v53 = vsel %vm1757_vm8, %v1738_v6, 0.0  ;;  %v2121_v47 = vmul.f32 %v6385_v30, %v8380_v46  ;;  %v8393_v6 = vrot.slane %v1910_v11, %v7495_v5  ;;  %v2461_v36 = vmul.f32 %v8421_v13, %v8413_v16 }
 0x23b   : > { %v1784_v34 = vadd.f32 %v1783_v53, %v1782_v22  ;;  %v2152_v22 = vadd.f32 %v2120_v61, %v2084_v33  ;;  %v8396_v53 = vrot.slane %v1910_v11, %v7497_v7  ;;  %v2055_v33 = vmul.f32 %v6391_v19, %v8370_v38 }
 0x23d   : > { %v1786_v21 = vadd.f32 %v1785_v15, %v1784_v34  ;;  %v2153_v34 = vadd.f32 %v2121_v47, %v2085_v25  ;;  %v8399_v15 = vrot.slane %v1911_v50, %v7493_v3  ;;  %v2256_v43 = vmul.f32 %v6390_v18, %v8396_v53 }
 0x23e   : > { %v2257_v42 = vmul.f32 %v6391_v19, %v8396_v53 }
 0x23f   : > { %v1788_v14 = vadd.f32 %v1787_v17, %v1786_v21  ;;  %v8402_v21 = vrot.slane %v1911_v50, %v7495_v5  ;;  %v6388_v17 = vld [vmem:[#allocation2 + $0x28] sm:$0xff]  ;;  %v2324_v29 = vmul.f32 %v6392_v57, %v8399_v15 }
 0x246   : > { %v6091_v63 = vpop.f32.mrb[16].mxu0 }
 0x247   : > { %v1607_v49 = vadd.f32 %v6091_v63, %v8320_v40  ;;  %v1598_v58 = vpop.f32.mrb[17].mxu0  ;;  %v2189_v63 = vmul.f32 %v6389_v28, %v8393_v6 }
 0x248   : > { %v1599_v32 = vadd.f32 %v8320_v40, %v1598_v58  ;;  %v6092_v56 = vpop.f32.mrb[18].mxu0  ;;  %v6394_v58 = vld [vmem:[#allocation2 + $0x48] sm:$0xff] }
 0x249   : > { %vm1679_vm11 = vcmp.gt.f32.partialorder %v1607_v49, 0.0  ;;  %v1711_v54 = vmul.f32 0.1, %v1607_v49  ;;  %v1610_v9 = vadd.f32 %v6092_v56, %v8320_v40  ;;  %v1601_v48 = vpop.f32.mrb[19].mxu0  ;;  %v2392_v11 = vmul.f32 %v6394_v58, %v8402_v21 }
 0x24a   : > { %vm1677_vm12 = vcmp.gt.f32.partialorder %v1599_v32, 0.0  ;;  %v1709_v23 = vmul.f32 0.1, %v1599_v32  ;;  %v1602_v37 = vadd.f32 %v8320_v40, %v1601_v48  ;;  %v2221_v30 = vadd.f32 %v2189_v63, %v2153_v34  ;;  %v8441_v34 = vld [vmem:[#allocation2 + $0x6f] sm:$0xff] }
 0x24b   : > { %v1743_v51 = vsel %vm1679_vm11, %v1607_v49, %v1711_v54  ;;  %vm1680_vm13 = vcmp.gt.f32.partialorder %v1610_v9, 0.0  ;;  %v1712_v24 = vmul.f32 0.1, %v1610_v9  ;;  %v2325_v49 = vmul.f32 %v6393_v20, %v8399_v15 }
 0x24c   : > { %v1793_v0 = vsel %vm1757_vm8, %v1743_v51, 0.0  ;;  %v1741_v12 = vsel %vm1677_vm12, %v1599_v32, %v1709_v23  ;;  %vm1678_vm14 = vcmp.gt.f32.partialorder %v1602_v37, 0.0  ;;  %v1710_v52 = vmul.f32 0.1, %v1602_v37  ;;  %v6395_v32 = vld [vmem:[#allocation2 + $0x50] sm:$0xff] }
 0x24d   : > { %v1789_v60 = vsel %vm1757_vm8, %v1741_v12, 0.0  ;;  %v1744_v31 = vsel %vm1680_vm13, %v1610_v9, %v1712_v24  ;;  %v2393_v56 = vmul.f32 %v6395_v32, %v8402_v21  ;;  %v1986_v54 = vmul.f32 %v6388_v17, %v8362_v35  ;;  %v6396_v23 = vld [vmem:[#allocation2 + $0x49] sm:$0xff] }
 0x24e   : > { %v1790_v26 = vadd.f32 %v1789_v60, %v1788_v14  ;;  %v1795_v44 = vsel %vm1757_vm8, %v1744_v31, 0.0  ;;  %v1742_v55 = vsel %vm1678_vm14, %v1602_v37, %v1710_v52  ;;  %v2188_v14 = vmul.f32 %v6388_v17, %v8393_v6 }
 0x24f   : > { %v1791_v4 = vsel %vm1757_vm8, %v1742_v55, 0.0  ;;  %v1987_v9 = vmul.f32 %v6389_v28, %v8362_v35  ;;  %v2054_v48 = vmul.f32 %v6390_v18, %v8370_v38  ;;  %v2289_v10 = vadd.f32 %v2257_v42, %v2221_v30  ;;  %v8435_v55 = vld [vmem:[#allocation2 + $0x67] sm:$0xff] }
 0x250   : > { %v1792_v27 = vadd.f32 %v1791_v4, %v1790_v26  ;;  %v2220_v39 = vadd.f32 %v2188_v14, %v2152_v22  ;;  %v2460_v37 = vmul.f32 %v6396_v23, %v8413_v16  ;;  %v2018_v51 = vadd.f32 %v1986_v54, %v8373_v45  ;;  %v8439_v4 = vld [vmem:[#allocation8 + $0x1] ss:$0 sm:$0xff]  ;;  %v8445_v14 = vld [vmem:[#allocation2 + $0x68] sm:$0xff] }
 0x251   : > { %v2019_v24 = vadd.f32 %v1987_v9, %v8376_v41  ;;  %v2357_v52 = vadd.f32 %v2325_v49, %v2289_v10  ;;  %v2123_v60 = vmul.f32 %v6393_v20, %v8380_v46  ;;  %v2190_v31 = vmul.f32 %v6394_v58, %v8393_v6  ;;  %v8453_v42 = vld [vmem:[#allocation2 + $0x69] sm:$0xff] }
 0x252   : > { %v1794_v8 = vadd.f32 %v1793_v0, %v1792_v27  ;;  %v2288_v59 = vadd.f32 %v2256_v43, %v2220_v39  ;;  %v2122_v0 = vmul.f32 %v6392_v57, %v8380_v46  ;;  %v2086_v50 = vadd.f32 %v2054_v48, %v2018_v51  ;;  %v8449_v43 = vld [vmem:[#allocation2 + $0x70] sm:$0xff] }
 0x253   : > { %v2087_v25 = vadd.f32 %v2055_v33, %v2019_v24  ;;  %v2191_v61 = vmul.f32 %v6395_v32, %v8393_v6  ;;  %v2258_v26 = vmul.f32 %v6396_v23, %v8396_v53  ;;  %v2425_v45 = vadd.f32 %v2393_v56, %v2357_v52 }
 0x254   : > { %v8415_v62 = vadd.f32 %v1795_v44, %v1794_v8  ;;  %v2356_v12 = vadd.f32 %v2324_v29, %v2288_v59  ;;  %v2259_v41 = vmul.f32 %v8421_v13, %v8396_v53  ;;  %v2326_v47 = vmul.f32 %v8435_v55, %v8399_v15 }
 0x255   : > { %v2154_v22 = vadd.f32 %v2122_v0, %v2086_v50  ;;  %v2155_v27 = vadd.f32 %v2123_v60, %v2087_v25  ;;  %v2327_v17 = vmul.f32 %v8441_v34, %v8399_v15  ;;  %v2394_v28 = vmul.f32 %v8445_v14, %v8402_v21 }
 0x256   : > { %v2424_v44 = vadd.f32 %v2392_v11, %v2356_v12  ;;  %v2493_v18 = vadd.f32 %v2461_v36, %v2425_v45  ;;  %v2395_v19 = vmul.f32 %v8449_v43, %v8402_v21  ;;  %v2462_v8 = vmul.f32 %v8453_v42, %v8413_v16  ;;  %v8457_v11 = vld [vmem:[#allocation2 + $0x71] sm:$0xff] }
 0x257   : > { %v2222_v29 = vadd.f32 %v2190_v31, %v2154_v22  ;;  %v2223_v49 = vadd.f32 %v2191_v61, %v2155_v27  ;;  %v2463_v39 = vmul.f32 %v8457_v11, %v8413_v16  ;;  %v1920_v30 = vmul.f32 %v6392_v57, %v8359_v2 }
 0x258   : > { %v2492_v63 = vadd.f32 %v2460_v37, %v2424_v44  ;;  %v2533_v54 = vadd.f32 %v8439_v4, %v2493_v18  ;;  %v1921_v9 = vmul.f32 %v6393_v20, %v8359_v2  ;;  %v1988_v48 = vmul.f32 %v6394_v58, %v8362_v35 }
 0x259   : > { %v2290_v10 = vadd.f32 %v2258_v26, %v2222_v29  ;;  %v2291_v37 = vadd.f32 %v2259_v41, %v2223_v49  ;;  %v1989_v36 = vmul.f32 %v6395_v32, %v8362_v35  ;;  %v2056_v51 = vmul.f32 %v6396_v23, %v8370_v38 }
 0x25a   : > { %v2532_v56 = vadd.f32 %v8439_v4, %v2492_v63  ;;  %vm2565_vm2 = vcmp.gt.f32.partialorder %v2533_v54, 0.0  ;;  %v2597_v52 = vmul.f32 0.1, %v2533_v54 }
 0x25b   : > { %v2358_v20 = vadd.f32 %v2326_v47, %v2290_v10  ;;  %v2359_v60 = vadd.f32 %v2327_v17, %v2291_v37 }
 0x25c   : > { %vm2564_vm15 = vcmp.gt.f32.partialorder %v2532_v56, 0.0  ;;  %v2596_v57 = vmul.f32 0.1, %v2532_v56  ;;  %v8474_v61 = vsel %vm2565_vm2, %v2533_v54, %v2597_v52  ;;  %v2020_v54 = vadd.f32 %v1988_v48, %v1920_v30 }
 0x25d   : > { %v2426_v63 = vadd.f32 %v2394_v28, %v2358_v20  ;;  %v2427_v18 = vadd.f32 %v2395_v19, %v2359_v60  ;;  %v2124_v28 = vmul.f32 %v8435_v55, %v8380_v46  ;;  %v2125_v30 = vmul.f32 %v8441_v34, %v8380_v46 }
 0x25e   : > { %v6095_v59 = vpop.f32.mrb[20].mxu0  ;;  %v8471_v32 = vsel %vm2564_vm15, %v2532_v56, %v2596_v57  ;;  %v2057_v57 = vmul.f32 %v8421_v13, %v8370_v38  ;;  %v2193_v13 = vmul.f32 %v8449_v43, %v8393_v6  ;;  %v2260_v60 = vmul.f32 %v8453_v42, %v8396_v53 }
 0x25f   : > { %v1623_v24 = vadd.f32 %v6095_v59, %v8320_v40  ;;  %v1614_v33 = vpop.f32.mrb[21].mxu0  ;;  %v2494_v10 = vadd.f32 %v2462_v8, %v2426_v63  ;;  %v2495_v37 = vadd.f32 %v2463_v39, %v2427_v18  ;;  %v2192_v8 = vmul.f32 %v8445_v14, %v8393_v6  ;;  %v8519_v63 = vld [vmem:[#allocation2 + $0x90] sm:$0xff] }
 0x260   : > { %v1615_v0 = vadd.f32 %v8320_v40, %v1614_v33  ;;  %v6096_v12 = vpop.f32.mrb[22].mxu0  ;;  %v2397_v18 = vmul.f32 %v8519_v63, %v8402_v21 }
 0x261   : > { %vm1683_vm4 = vcmp.gt.f32.partialorder %v1623_v24, 0.0  ;;  %v1715_v58 = vmul.f32 0.1, %v1623_v24  ;;  %v1626_v31 = vadd.f32 %v6096_v12, %v8320_v40  ;;  %v1617_v50 = vpop.f32.mrb[23].mxu0  ;;  %v2534_v19 = vadd.f32 %v8439_v4, %v2494_v10 }
 0x262   : > { %vm1681_vm5 = vcmp.gt.f32.partialorder %v1615_v0, 0.0  ;;  %v1713_v23 = vmul.f32 0.1, %v1615_v0  ;;  %v1618_v25 = vadd.f32 %v8320_v40, %v1617_v50  ;;  %v2261_v50 = vmul.f32 %v8457_v11, %v8396_v53 }
 0x263   : > { %v1747_v26 = vsel %vm1683_vm4, %v1623_v24, %v1715_v58  ;;  %vm1684_vm6 = vcmp.gt.f32.partialorder %v1626_v31, 0.0  ;;  %v1716_v44 = vmul.f32 0.1, %v1626_v31  ;;  %v2021_v24 = vadd.f32 %v1989_v36, %v1921_v9 }
 0x264   : > { %v1801_v41 = vsel %vm1757_vm8, %v1747_v26, 0.0  ;;  %v1745_v47 = vsel %vm1681_vm5, %v1615_v0, %v1713_v23  ;;  %vm1682_vm7 = vcmp.gt.f32.partialorder %v1618_v25, 0.0  ;;  %v1714_v22 = vmul.f32 0.1, %v1618_v25  ;;  %v8505_v23 = vld [vmem:[#allocation2 + $0x87] sm:$0xff] }
 0x265   : > { %v1797_v27 = vsel %vm1757_vm8, %v1745_v47, 0.0  ;;  %v1748_v17 = vsel %vm1684_vm6, %v1626_v31, %v1716_v44  ;;  %v2088_v0 = vadd.f32 %v2056_v51, %v2020_v54  ;;  %v2089_v9 = vadd.f32 %v2057_v57, %v2021_v24  ;;  %v8511_v47 = vld [vmem:[#allocation2 + $0x8f] sm:$0xff] }
 0x266   : > { %v1798_v29 = vadd.f32 %v1797_v27, %v8415_v62  ;;  %v1803_v49 = vsel %vm1757_vm8, %v1748_v17, 0.0  ;;  %v1746_v56 = vsel %vm1682_vm7, %v1618_v25, %v1714_v22  ;;  %v2535_v62 = vadd.f32 %v8439_v4, %v2495_v37  ;;  %v8515_v27 = vld [vmem:[#allocation2 + $0x88] sm:$0xff] }
 0x267   : > { %v1799_v59 = vsel %vm1757_vm8, %v1746_v56, 0.0  ;;  %v2156_v48 = vadd.f32 %v2124_v28, %v2088_v0  ;;  %vm2566_vm9 = vcmp.gt.f32.partialorder %v2534_v19, 0.0  ;;  %v2598_v36 = vmul.f32 0.1, %v2534_v19  ;;  %v8527_v56 = vld [vmem:[#allocation2 + $0x91] sm:$0xff] }
 0x268   : > { %v1800_v33 = vadd.f32 %v1799_v59, %v1798_v29  ;;  %vm2567_vm10 = vcmp.gt.f32.partialorder %v2535_v62, 0.0  ;;  %v2599_v51 = vmul.f32 0.1, %v2535_v62  ;;  %v2157_v52 = vadd.f32 %v2125_v30, %v2089_v9  ;;  %v8523_v29 = vld [vmem:[#allocation2 + $0x89] sm:$0xff] }
 0x269   : > { %v2224_v20 = vadd.f32 %v2192_v8, %v2156_v48  ;;  %v8499_v58 = vsel %vm2566_vm9, %v2534_v19, %v2598_v36  ;;  %v2328_v25 = vmul.f32 %v8505_v23, %v8399_v15  ;;  %v2329_v22 = vmul.f32 %v8511_v47, %v8399_v15 }
 0x26a   : > { %v1802_v39 = vadd.f32 %v1801_v41, %v1800_v33  ;;  %v8501_v31 = vsel %vm2567_vm10, %v2535_v62, %v2599_v51  ;;  %v2225_v44 = vadd.f32 %v2193_v13, %v2157_v52  ;;  %v2396_v17 = vmul.f32 %v8515_v27, %v8402_v21 }
 0x26b   : > { %v2292_v41 = vadd.f32 %v2260_v60, %v2224_v20  ;;  %v2465_v54 = vmul.f32 %v8527_v56, %v8413_v16  ;;  %v1922_v37 = vmul.f32 %v8435_v55, %v8359_v2  ;;  %v1923_v24 = vmul.f32 %v8441_v34, %v8359_v2 }
 0x26c   : > { %v8495_v12 = vadd.f32 %v1803_v49, %v1802_v39  ;;  %v2464_v49 = vmul.f32 %v8523_v29, %v8413_v16  ;;  %v2293_v59 = vadd.f32 %v2261_v50, %v2225_v44  ;;  %v1990_v33 = vmul.f32 %v8445_v14, %v8362_v35 }
 0x26d   : > { %v2360_v10 = vadd.f32 %v2328_v25, %v2292_v41  ;;  %v1991_v57 = vmul.f32 %v8449_v43, %v8362_v35  ;;  %v2058_v0 = vmul.f32 %v8453_v42, %v8370_v38  ;;  %v2059_v28 = vmul.f32 %v8457_v11, %v8370_v38 }
 0x26e   : > { %v2361_v19 = vadd.f32 %v2329_v22, %v2293_v59  ;;  %v2126_v55 = vmul.f32 %v8505_v23, %v8380_v46  ;;  %v2127_v34 = vmul.f32 %v8511_v47, %v8380_v46  ;;  %v2022_v8 = vadd.f32 %v1990_v33, %v1922_v37 }
 0x26f   : > { %v2428_v62 = vadd.f32 %v2396_v17, %v2360_v10  ;;  %v2023_v14 = vadd.f32 %v1991_v57, %v1923_v24  ;;  %v2194_v43 = vmul.f32 %v8515_v27, %v8393_v6  ;;  %v2195_v42 = vmul.f32 %v8519_v63, %v8393_v6 }
 0x270   : > { %v2429_v9 = vadd.f32 %v2397_v18, %v2361_v19  ;;  %v2262_v13 = vmul.f32 %v8523_v29, %v8396_v53  ;;  %v2090_v52 = vadd.f32 %v2058_v0, %v2022_v8  ;;  %v2263_v60 = vmul.f32 %v8527_v56, %v8396_v53 }
 0x271   : > { %v2496_v48 = vadd.f32 %v2464_v49, %v2428_v62  ;;  %v2091_v20 = vadd.f32 %v2059_v28, %v2023_v14 }
 0x272   : > { %v2497_v41 = vadd.f32 %v2465_v54, %v2429_v9  ;;  %v2158_v14 = vadd.f32 %v2126_v55, %v2090_v52  ;;  %v8578_v52 = vld [vmem:[#allocation2 + $0xb0] sm:$0xff] }
 0x273   : > { %v6099_v30 = vpop.f32.mrb[24].mxu0  ;;  %v2536_v18 = vadd.f32 %v8439_v4, %v2496_v48  ;;  %v6410_v48 = vld [vmem:[#allocation2 + $0xa7] sm:$0xff] }
 0x274   : > { %v1639_v39 = vadd.f32 %v6099_v30, %v8320_v40  ;;  %v1630_v11 = vpop.f32.mrb[25].mxu0  ;;  %v2537_v10 = vadd.f32 %v8439_v4, %v2497_v41  ;;  %v8572_v41 = vld [vmem:[#allocation2 + $0xa8] sm:$0xff] }
 0x275   : > { %v1631_v36 = vadd.f32 %v8320_v40, %v1630_v11  ;;  %v6100_v51 = vpop.f32.mrb[26].mxu0  ;;  %vm2568_vm15 = vcmp.gt.f32.partialorder %v2536_v18, 0.0  ;;  %v2600_v62 = vmul.f32 0.1, %v2536_v18 }
 0x276   : > { %vm1687_vm11 = vcmp.gt.f32.partialorder %v1639_v39, 0.0  ;;  %v1719_v50 = vmul.f32 0.1, %v1639_v39  ;;  %v1642_v25 = vadd.f32 %v6100_v51, %v8320_v40  ;;  %v1633_v44 = vpop.f32.mrb[27].mxu0  ;;  %vm2569_vm2 = vcmp.gt.f32.partialorder %v2537_v10, 0.0  ;;  %v6411_v51 = vld [vmem:[#allocation2 + $0xaf] sm:$0xff] }
 0x277   : > { %vm1685_vm12 = vcmp.gt.f32.partialorder %v1631_v36, 0.0  ;;  %v1717_v22 = vmul.f32 0.1, %v1631_v36  ;;  %v1634_v17 = vadd.f32 %v8320_v40, %v1633_v44  ;;  %v2601_v8 = vmul.f32 0.1, %v2537_v10 }
 0x278   : > { %v1751_v49 = vsel %vm1687_vm11, %v1639_v39, %v1719_v50  ;;  %vm1688_vm13 = vcmp.gt.f32.partialorder %v1642_v25, 0.0  ;;  %v1720_v59 = vmul.f32 0.1, %v1642_v25  ;;  %v2159_v39 = vadd.f32 %v2127_v34, %v2091_v20 }
 0x279   : > { %v1809_v37 = vsel %vm1757_vm8, %v1751_v49, 0.0  ;;  %v1749_v24 = vsel %vm1685_vm12, %v1631_v36, %v1717_v22  ;;  %vm1686_vm14 = vcmp.gt.f32.partialorder %v1634_v17, 0.0  ;;  %v1718_v33 = vmul.f32 0.1, %v1634_v17  ;;  %v8586_v49 = vld [vmem:[#allocation2 + $0xb1] sm:$0xff] }
 0x27a   : > { %v1805_v57 = vsel %vm1757_vm8, %v1749_v24, 0.0  ;;  %v1752_v0 = vsel %vm1688_vm13, %v1642_v25, %v1720_v59  ;;  %v8566_v9 = vsel %vm2568_vm15, %v2536_v18, %v2600_v62  ;;  %v2330_v36 = vmul.f32 %v6410_v48, %v8399_v15 }
 0x27b   : > { %v1806_v54 = vadd.f32 %v1805_v57, %v8495_v12  ;;  %v1811_v28 = vsel %vm1757_vm8, %v1752_v0, 0.0  ;;  %v1750_v19 = vsel %vm1686_vm14, %v1634_v17, %v1718_v33  ;;  %v2331_v50 = vmul.f32 %v6411_v51, %v8399_v15  ;;  %v8582_v17 = vld [vmem:[#allocation2 + $0xa9] sm:$0xff] }
 0x27c   : > { %v1807_v30 = vsel %vm1757_vm8, %v1750_v19, 0.0  ;;  %v8570_v25 = vsel %vm2569_vm2, %v2537_v10, %v2601_v8  ;;  %v2226_v12 = vadd.f32 %v2194_v43, %v2158_v14  ;;  %v2227_v44 = vadd.f32 %v2195_v42, %v2159_v39 }
 0x27d   : > { %v1808_v11 = vadd.f32 %v1807_v30, %v1806_v54  ;;  %v2398_v22 = vmul.f32 %v8572_v41, %v8402_v21  ;;  %v2399_v20 = vmul.f32 %v8578_v52, %v8402_v21  ;;  %v2466_v43 = vmul.f32 %v8582_v17, %v8413_v16 }
 0x27e   : > { %v2294_v42 = vadd.f32 %v2262_v13, %v2226_v12  ;;  %v2295_v18 = vadd.f32 %v2263_v60, %v2227_v44  ;;  %v2467_v59 = vmul.f32 %v8586_v49, %v8413_v16  ;;  %v1924_v10 = vmul.f32 %v8505_v23, %v8359_v2  ;;  %v8618_v12 = vld [vmem:[#allocation2 + $0xcf] sm:$0xff] }
 0x27f   : > { %v1810_v55 = vadd.f32 %v1809_v37, %v1808_v11  ;;  %v1925_v24 = vmul.f32 %v8511_v47, %v8359_v2  ;;  %v1992_v33 = vmul.f32 %v8515_v27, %v8362_v35  ;;  %v1993_v13 = vmul.f32 %v8519_v63, %v8362_v35 }
 0x280   : > { %v2362_v60 = vadd.f32 %v2330_v36, %v2294_v42  ;;  %v2363_v57 = vadd.f32 %v2331_v50, %v2295_v18  ;;  %v2060_v0 = vmul.f32 %v8523_v29, %v8370_v38  ;;  %v2061_v54 = vmul.f32 %v8527_v56, %v8370_v38  ;;  %v8614_v36 = vld [vmem:[#allocation2 + $0xc7] sm:$0xff]  ;;  %v8626_v18 = vld [vmem:[#allocation2 + $0xd0] sm:$0xff] }
 0x281   : > { %v8592_v37 = vadd.f32 %v1811_v28, %v1810_v55  ;;  %v2024_v23 = vadd.f32 %v1992_v33, %v1924_v10  ;;  %v2025_v28 = vadd.f32 %v1993_v13, %v1925_v24  ;;  %v2128_v19 = vmul.f32 %v6410_v48, %v8380_v46  ;;  %v8632_v24 = vld [vmem:[#allocation2 + $0xc9] sm:$0xff]  ;;  %v8636_v13 = vld [vmem:[#allocation2 + $0xd1] sm:$0xff] }
 0x282   : > { %v2129_v47 = vmul.f32 %v6411_v51, %v8380_v46  ;;  %v2430_v62 = vadd.f32 %v2398_v22, %v2362_v60  ;;  %v2431_v30 = vadd.f32 %v2399_v20, %v2363_v57  ;;  %v2196_v27 = vmul.f32 %v8572_v41, %v8393_v6  ;;  %v8622_v20 = vld [vmem:[#allocation2 + $0xc8] sm:$0xff] }
 0x283   : > { %v2197_v63 = vmul.f32 %v8578_v52, %v8393_v6  ;;  %v2092_v8 = vadd.f32 %v2060_v0, %v2024_v23  ;;  %v2093_v14 = vadd.f32 %v2061_v54, %v2025_v28  ;;  %v2264_v29 = vmul.f32 %v8582_v17, %v8396_v53 }
 0x284   : > { %v2265_v56 = vmul.f32 %v8586_v49, %v8396_v53  ;;  %v2498_v39 = vadd.f32 %v2466_v43, %v2430_v62  ;;  %v2499_v11 = vadd.f32 %v2467_v59, %v2431_v30  ;;  %v2332_v50 = vmul.f32 %v8614_v36, %v8399_v15 }
 0x285   : > { %v2333_v44 = vmul.f32 %v8618_v12, %v8399_v15  ;;  %v2160_v22 = vadd.f32 %v2128_v19, %v2092_v8  ;;  %v2161_v55 = vadd.f32 %v2129_v47, %v2093_v14  ;;  %v2400_v42 = vmul.f32 %v8622_v20, %v8402_v21 }
 0x286   : > { %v2401_v43 = vmul.f32 %v8626_v18, %v8402_v21  ;;  %v2538_v59 = vadd.f32 %v8439_v4, %v2498_v39  ;;  %v2539_v10 = vadd.f32 %v8439_v4, %v2499_v11  ;;  %v2468_v33 = vmul.f32 %v8632_v24, %v8413_v16 }
 0x287   : > { %v2469_v60 = vmul.f32 %v8636_v13, %v8413_v16  ;;  %v2228_v0 = vadd.f32 %v2196_v27, %v2160_v22  ;;  %v2229_v54 = vadd.f32 %v2197_v63, %v2161_v55  ;;  %v1926_v23 = vmul.f32 %v6410_v48, %v8359_v2 }
 0x288   : > { %v1927_v28 = vmul.f32 %v6411_v51, %v8359_v2  ;;  %vm2570_vm4 = vcmp.gt.f32.partialorder %v2538_v59, 0.0  ;;  %vm2571_vm5 = vcmp.gt.f32.partialorder %v2539_v10, 0.0  ;;  %v2602_v62 = vmul.f32 0.1, %v2538_v59 }
 0x289   : > { %v6103_v57 = vpop.f32.mrb[28].mxu0  ;;  %v2603_v14 = vmul.f32 0.1, %v2539_v10  ;;  %v2296_v39 = vadd.f32 %v2264_v29, %v2228_v0  ;;  %v2297_v11 = vadd.f32 %v2265_v56, %v2229_v54 }
 0x28a   : > { %v1655_v19 = vadd.f32 %v6103_v57, %v8320_v40  ;;  %v1646_v47 = vpop.f32.mrb[29].mxu0  ;;  %v8645_v48 = vsel %vm2570_vm4, %v2538_v59, %v2602_v62 }
 0x28b   : > { %v1647_v30 = vadd.f32 %v8320_v40, %v1646_v47  ;;  %v6104_v8 = vpop.f32.mrb[30].mxu0  ;;  %v8648_v55 = vsel %vm2571_vm5, %v2539_v10, %v2603_v14  ;;  %v2365_v34 = vadd.f32 %v2333_v44, %v2297_v11 }
 0x28c   : > { %vm1691_vm6 = vcmp.gt.f32.partialorder %v1655_v19, 0.0  ;;  %v1723_v1 = vmul.f32 0.1, %v1655_v19  ;;  %v1658_v27 = vadd.f32 %v6104_v8, %v8320_v40  ;;  %v1649_v63 = vpop.f32.mrb[31].mxu0  ;;  %v2364_v8 = vadd.f32 %v2332_v50, %v2296_v39 }
 0x28d   : > { %vm1689_vm7 = vcmp.gt.f32.partialorder %v1647_v30, 0.0  ;;  %v1721_v51 = vmul.f32 0.1, %v1647_v30  ;;  %v1650_v22 = vadd.f32 %v8320_v40, %v1649_v63  ;;  %v2062_v50 = vmul.f32 %v8582_v17, %v8370_v38 }
 0x28e   : > { %v1755_v57 = vsel %vm1691_vm6, %v1655_v19, %v1723_v1  ;;  %vm1692_vm9 = vcmp.gt.f32.partialorder %v1658_v27, 0.0  ;;  %v1724_v47 = vmul.f32 0.1, %v1658_v27  ;;  %v1994_v19 = vmul.f32 %v8572_v41, %v8362_v35 }
 0x28f   : > { %v1817_v56 = vsel %vm1757_vm8, %v1755_v57, 0.0  ;;  %v1753_v0 = vsel %vm1689_vm7, %v1647_v30, %v1721_v51  ;;  %vm1690_vm10 = vcmp.gt.f32.partialorder %v1650_v22, 0.0  ;;  %v1722_v54 = vmul.f32 0.1, %v1650_v22 }
 0x290   : > { %v1813_v59 = vsel %vm1757_vm8, %v1753_v0, 0.0  ;;  %v1756_v62 = vsel %vm1692_vm9, %v1658_v27, %v1724_v47  ;;  %v2432_v63 = vadd.f32 %v2400_v42, %v2364_v8  ;;  %v2433_v57 = vadd.f32 %v2401_v43, %v2365_v34  ;;  %v8679_v8 = vld [vmem:[#allocation2 + $0xe7] sm:$0xff] }
 0x291   : > { %v1814_v40 = vadd.f32 %v1813_v59, %v8592_v37  ;;  %v1819_v10 = vsel %vm1757_vm8, %v1756_v62, 0.0  ;;  %v1754_v1 = vsel %vm1690_vm10, %v1650_v22, %v1722_v54  ;;  %v1995_v30 = vmul.f32 %v8578_v52, %v8362_v35 }
 0x292   : > { %v1815_v14 = vsel %vm1757_vm8, %v1754_v1, 0.0  ;;  %v2026_v0 = vadd.f32 %v1994_v19, %v1926_v23  ;;  %v2063_v37 = vmul.f32 %v8586_v49, %v8370_v38  ;;  %v2500_v44 = vadd.f32 %v2468_v33, %v2432_v63  ;;  %v8687_v19 = vld [vmem:[#allocation2 + $0xef] sm:$0xff] }
 0x293   : > { %v1816_v51 = vadd.f32 %v1815_v14, %v1814_v40  ;;  %v2501_v39 = vadd.f32 %v2469_v60, %v2433_v57  ;;  %v2027_v11 = vadd.f32 %v1995_v30, %v1927_v28  ;;  %v2130_v41 = vmul.f32 %v8614_v36, %v8380_v46  ;;  %v8691_v63 = vld [vmem:[#allocation2 + $0xe8] sm:$0xff] }
 0x294   : > { %v2094_v42 = vadd.f32 %v2062_v50, %v2026_v0  ;;  %v2131_v34 = vmul.f32 %v8618_v12, %v8380_v46  ;;  %v2198_v52 = vmul.f32 %v8622_v20, %v8393_v6  ;;  %v2540_v43 = vadd.f32 %v8439_v4, %v2500_v44 }
 0x295   : > { %v1818_v27 = vadd.f32 %v1817_v56, %v1816_v51  ;;  %v2541_v17 = vadd.f32 %v8439_v4, %v2501_v39  ;;  %v2095_v23 = vadd.f32 %v2063_v37, %v2027_v11  ;;  %v2199_v49 = vmul.f32 %v8626_v18, %v8393_v6  ;;  %v8697_v37 = vld [vmem:[#allocation2 + $0xf0] sm:$0xff] }
 0x296   : > { %v2162_v60 = vadd.f32 %v2130_v41, %v2094_v42  ;;  %v2266_v28 = vmul.f32 %v8632_v24, %v8396_v53  ;;  %v2267_v22 = vmul.f32 %v8636_v13, %v8396_v53  ;;  %vm2572_vm11 = vcmp.gt.f32.partialorder %v2540_v43, 0.0  ;;  %v8701_v39 = vld [vmem:[#allocation2 + $0xe9] sm:$0xff]  ;;  %v8705_v41 = vld [vmem:[#allocation2 + $0xf1] sm:$0xff] }
 0x297   : > { %v1820_v33 = vadd.f32 %v1819_v10, %v1818_v27  ;;  %vm2573_vm12 = vcmp.gt.f32.partialorder %v2541_v17, 0.0  ;;  %v2604_v47 = vmul.f32 0.1, %v2540_v43  ;;  %v2605_v56 = vmul.f32 0.1, %v2541_v17 }
 0x298   : > { %v2163_v59 = vadd.f32 %v2131_v34, %v2095_v23  ;;  %v2230_v62 = vadd.f32 %v2198_v52, %v2162_v60  ;;  %v2334_v40 = vmul.f32 %v8679_v8, %v8399_v15  ;;  %v2335_v14 = vmul.f32 %v8687_v19, %v8399_v15 }
 0x299   : > { %v1821_v54 = vrot.slane %v1820_v33, 4  ;;  %v8683_v10 = vsel %vm2572_vm11, %v2540_v43, %v2604_v47  ;;  %v8685_v1 = vsel %vm2573_vm12, %v2541_v17, %v2605_v56  ;;  %v2402_v57 = vmul.f32 %v8691_v63, %v8402_v21 }
 0x29a   : > { %v2231_v0 = vadd.f32 %v2199_v49, %v2163_v59  ;;  %v2298_v50 = vadd.f32 %v2266_v28, %v2230_v62  ;;  %v2403_v44 = vmul.f32 %v8697_v37, %v8402_v21  ;;  %v2470_v11 = vmul.f32 %v8701_v39, %v8413_v16 }
 0x29b   : > { %v1822_v30 = vadd.f32 %v1821_v54, %v1820_v33  ;;  %v2471_v27 = vmul.f32 %v8705_v41, %v8413_v16  ;;  %v1928_v42 = vmul.f32 %v8614_v36, %v8359_v2  ;;  %v1929_v17 = vmul.f32 %v8618_v12, %v8359_v2 }
 0x29c   : > { %v2299_v52 = vadd.f32 %v2267_v22, %v2231_v0  ;;  %v2366_v43 = vadd.f32 %v2334_v40, %v2298_v50  ;;  %v1996_v23 = vmul.f32 %v8622_v20, %v8362_v35  ;;  %v1997_v49 = vmul.f32 %v8626_v18, %v8362_v35 }
 0x29d   : > { %v1823_v34 = vrot.slane %v1822_v30, 2  ;;  %v2064_v33 = vmul.f32 %v8632_v24, %v8370_v38  ;;  %v2065_v60 = vmul.f32 %v8636_v13, %v8370_v38  ;;  %v2132_v22 = vmul.f32 %v8679_v8, %v8380_v46 }
 0x29e   : > { %v2367_v36 = vadd.f32 %v2335_v14, %v2299_v52  ;;  %v2434_v47 = vadd.f32 %v2402_v57, %v2366_v43  ;;  %v2028_v56 = vadd.f32 %v1996_v23, %v1928_v42  ;;  %v2029_v12 = vadd.f32 %v1997_v49, %v1929_v17  ;;  %v8734_v42 = vld [vmem:[#allocation2 + $0x107] sm:$0xff]  ;;  %v8738_v52 = vld [vmem:[#allocation2 + $0x10f] sm:$0xff] }
 0x29f   : > { %v1824_v28 = vadd.f32 %v1823_v34, %v1822_v30  ;;  %v2133_v20 = vmul.f32 %v8687_v19, %v8380_v46  ;;  %v2200_v18 = vmul.f32 %v8691_v63, %v8393_v6  ;;  %v2201_v13 = vmul.f32 %v8697_v37, %v8393_v6  ;;  %v8742_v17 = vld [vmem:[#allocation2 + $0x108] sm:$0xff] }
 0x2a0   : > { %v2435_v59 = vadd.f32 %v2403_v44, %v2367_v36  ;;  %v2502_v24 = vadd.f32 %v2470_v11, %v2434_v47  ;;  %v2096_v62 = vadd.f32 %v2064_v33, %v2028_v56  ;;  %v2097_v40 = vadd.f32 %v2065_v60, %v2029_v12  ;;  %v8747_v36 = vld [vmem:[#allocation2 + $0x110] sm:$0xff] }
 0x2a1   : > { %v1825_v54 = vrot.slane %v1824_v28, 1  ;;  %v2268_v14 = vmul.f32 %v8701_v39, %v8396_v53  ;;  %v2269_v57 = vmul.f32 %v8705_v41, %v8396_v53  ;;  %v2336_v44 = vmul.f32 %v8734_v42, %v8399_v15 }
 0x2a2   : > { %v2503_v0 = vadd.f32 %v2471_v27, %v2435_v59  ;;  %v2542_v50 = vadd.f32 %v8439_v4, %v2502_v24  ;;  %v2164_v11 = vadd.f32 %v2132_v22, %v2096_v62  ;;  %v2165_v34 = vadd.f32 %v2133_v20, %v2097_v40  ;;  %v8751_v22 = vld [vmem:[#allocation2 + $0x109] sm:$0xff] }
 0x2a3   : > { %v1826_v30 = vadd.f32 %v1825_v54, %v1824_v28  ;;  %v2337_v43 = vmul.f32 %v8738_v52, %v8399_v15  ;;  %v2404_v23 = vmul.f32 %v8742_v17, %v8402_v21  ;;  %v2405_v47 = vmul.f32 %v8747_v36, %v8402_v21 }
 0x2a4   : > { %v2543_v49 = vadd.f32 %v8439_v4, %v2503_v0  ;;  %vm2574_vm13 = vcmp.gt.f32.partialorder %v2542_v50, 0.0  ;;  %v2606_v33 = vmul.f32 0.1, %v2542_v50  ;;  %v2232_v60 = vadd.f32 %v2200_v18, %v2164_v11 }
 0x2a5   : > { %v1828_v27 = vmul.f32 0.00390625, %v1826_v30  ;;  %v2233_v28 = vadd.f32 %v2201_v13, %v2165_v34  ;;  %v2472_v56 = vmul.f32 %v8751_v22, %v8413_v16  ;;  %v8759_v13 = vld [vmem:[#allocation2 + $0x111] sm:$0xff]  ;;  %v1930_v0 = vmul.f32 %v8679_v8, %v8359_v2 }
 0x2a6   : > { %vm2575_vm14 = vcmp.gt.f32.partialorder %v2543_v49, 0.0  ;;  %v2607_v54 = vmul.f32 0.1, %v2543_v49  ;;  %v8757_v59 = vsel %vm2574_vm13, %v2542_v50, %v2606_v33  ;;  %v2300_v24 = vadd.f32 %v2268_v14, %v2232_v60 }
 0x2a7   : > { %v8755_v12 = vmul.f32 0.5, %v1828_v27  ;;  %v1830_v20 = vmul.f32 0.70710677, %v1828_v27  ;;  %v2301_v18 = vadd.f32 %v2269_v57, %v2233_v28  ;;  %v2473_v62 = vmul.f32 %v8759_v13, %v8413_v16 }
 0x2a8   : > { %v8763_v30 = vsel %vm2575_vm14, %v2543_v49, %v2607_v54  ;;  %v11222_v11 = vmov -1.0   ;;  %v2368_v57 = vadd.f32 %v2336_v44, %v2300_v24  ;;  %v1931_v60 = vmul.f32 %v8687_v19, %v8359_v2 }
 0x2a9   : > { %vm1831_vm15 = vcmp.ge.f32.partialorder %v1830_v20, 0.0  ;;  %v1833_v40 = vand.u32 2147483647, %v1830_v20  ;;  %v2369_v50 = vadd.f32 %v2337_v43, %v2301_v18  ;;  %v1998_v49 = vmul.f32 %v8691_v63, %v8362_v35 }
 0x2aa   : > { %v8768_v34 = vsel %vm1831_vm15, 1.0, %v11222_v11  ;;  %v2436_v28 = vadd.f32 %v2404_v23, %v2368_v57  ;;  %v1999_v8 = vmul.f32 %v8697_v37, %v8362_v35  ;;  %v2066_v54 = vmul.f32 %v8701_v39, %v8370_v38 }
 0x2ab   : > { %v1834_v27 = vmul.f32 0.3275911, %v1833_v40  ;;  %v1846_v33 = vsub.f32 0.0, %v1833_v40  ;;  %v2437_v20 = vadd.f32 %v2405_v47, %v2369_v50  ;;  %v2030_v44 = vadd.f32 %v1998_v49, %v1930_v0 }
 0x2ac   : > { %v2067_v43 = vmul.f32 %v8705_v41, %v8370_v38  ;;  %v2504_v24 = vadd.f32 %v2472_v56, %v2436_v28  ;;  %v2031_v19 = vadd.f32 %v1999_v8, %v1931_v60  ;;  %v2134_v63 = vmul.f32 %v8734_v42, %v8380_v46  ;;  %v8796_v60 = vld [vmem:[#allocation2 + $0x127] sm:$0xff]  ;;  %v8804_v8 = vld [vmem:[#allocation2 + $0x12f] sm:$0xff] }
 0x2ad   : > { %v1835_v11 = vadd.f32 1.0, %v1834_v27  ;;  %v1847_v14 = vmul.f32 %v1846_v33, %v1833_v40  ;;  %v2505_v18 = vadd.f32 %v2473_v62, %v2437_v20  ;;  %v2098_v47 = vadd.f32 %v2066_v54, %v2030_v44  ;;  %v8808_v44 = vld [vmem:[#allocation2 + $0x128] sm:$0xff] }
 0x2ae   : > { %v2135_v37 = vmul.f32 %v8738_v52, %v8380_v46  ;;  %v2544_v39 = vadd.f32 %v8439_v4, %v2504_v24  ;;  %v2099_v0 = vadd.f32 %v2067_v43, %v2031_v19  ;;  %v2202_v41 = vmul.f32 %v8742_v17, %v8393_v6 }
 0x2af   : > { %6363 = vrcp.f32 %v1835_v11  ;;  %v1848_v23 = vmul.f32 1.442695, %v1847_v14  ;;  %v2545_v40 = vadd.f32 %v8439_v4, %v2505_v18  ;;  %v2166_v56 = vadd.f32 %v2134_v63, %v2098_v47  ;;  %v8814_v63 = vld [vmem:[#allocation2 + $0x130] sm:$0xff] }
 0x2b0   : > { %v2203_v62 = vmul.f32 %v8747_v36, %v8393_v6  ;;  %v2270_v11 = vmul.f32 %v8751_v22, %v8396_v53  ;;  %vm2576_vm2 = vcmp.gt.f32.partialorder %v2544_v39, 0.0  ;;  %v2608_v14 = vmul.f32 0.1, %v2544_v39  ;;  %v8818_v47 = vld [vmem:[#allocation2 + $0x129] sm:$0xff] }
 0x2b1   : > { %6365 = vpow2.f32 %v1848_v23  ;;  %vm2577_vm4 = vcmp.gt.f32.partialorder %v2545_v40, 0.0  ;;  %v2609_v57 = vmul.f32 0.1, %v2545_v40  ;;  %v2167_v50 = vadd.f32 %v2135_v37, %v2099_v0 }
 0x2b2   : > { %v2234_v27 = vadd.f32 %v2202_v41, %v2166_v56  ;;  %v2271_v33 = vmul.f32 %v8759_v13, %v8396_v53  ;;  %v2338_v49 = vmul.f32 %v8796_v60, %v8399_v15  ;;  %v8800_v28 = vsel %vm2576_vm2, %v2544_v39, %v2608_v14  ;;  %v8822_v39 = vld [vmem:[#allocation2 + $0x131] sm:$0xff] }
 0x2b3   : > { %11253 = vst [vmem:[#allocation24_spill] sm:$0xff] %v8800_v28  ;;  %v8802_v20 = vsel %vm2577_vm4, %v2545_v40, %v2609_v57  ;;  %v2339_v54 = vmul.f32 %v8804_v8, %v8399_v15  ;;  %v2406_v43 = vmul.f32 %v8808_v44, %v8402_v21  ;;  %v2235_v18 = vadd.f32 %v2203_v62, %v2167_v50 }
 0x2b4   : > { %v2302_v19 = vadd.f32 %v2270_v11, %v2234_v27  ;;  %v2407_v23 = vmul.f32 %v8814_v63, %v8402_v21  ;;  %v2474_v37 = vmul.f32 %v8818_v47, %v8413_v16  ;;  %v2475_v40 = vmul.f32 %v8822_v39, %v8413_v16 }
 0x2b5   : > { %v1932_v0 = vmul.f32 %v8734_v42, %v8359_v2  ;;  %v1933_v41 = vmul.f32 %v8738_v52, %v8359_v2  ;;  %v2303_v56 = vadd.f32 %v2271_v33, %v2235_v18  ;;  %v2000_v11 = vmul.f32 %v8742_v17, %v8362_v35 }
 0x2b6   : > { %v2370_v62 = vadd.f32 %v2338_v49, %v2302_v19  ;;  %v2001_v14 = vmul.f32 %v8747_v36, %v8362_v35  ;;  %v2068_v57 = vmul.f32 %v8751_v22, %v8370_v38  ;;  %v2069_v50 = vmul.f32 %v8759_v13, %v8370_v38 }
 0x2b7   : > { %v2136_v42 = vmul.f32 %v8796_v60, %v8380_v46  ;;  %v2137_v52 = vmul.f32 %v8804_v8, %v8380_v46  ;;  %v2371_v33 = vadd.f32 %v2339_v54, %v2303_v56  ;;  %v2032_v17 = vadd.f32 %v2000_v11, %v1932_v0 }
 0x2b8   : > { %v2438_v49 = vadd.f32 %v2406_v43, %v2370_v62  ;;  %v2033_v18 = vadd.f32 %v2001_v14, %v1933_v41  ;;  %v2204_v22 = vmul.f32 %v8808_v44, %v8393_v6  ;;  %v2205_v13 = vmul.f32 %v8814_v63, %v8393_v6  ;;  %v8855_v41 = vld [vmem:[#allocation2 + $0x147] sm:$0xff]  ;;  %v8859_v62 = vld [vmem:[#allocation2 + $0x14f] sm:$0xff] }
 0x2b9   : > { %v8842_v27 = vpop.eup %6363  ;;  %v2272_v19 = vmul.f32 %v8818_v47, %v8396_v53  ;;  %v2439_v51 = vadd.f32 %v2407_v23, %v2371_v33  ;;  %v2100_v26 = vadd.f32 %v2068_v57, %v2032_v17  ;;  %v2273_v0 = vmul.f32 %v8822_v39, %v8396_v53  ;;  %v8865_v33 = vld [vmem:[#allocation2 + $0x148] sm:$0xff]  ;;  %v8869_v17 = vld [vmem:[#allocation2 + $0x150] sm:$0xff] }
 0x2ba   : > { %v1837_v36 = vmul.f32 1.0614054, %v8842_v27  ;;  %v2506_v29 = vadd.f32 %v2474_v37, %v2438_v49  ;;  %v2101_v54 = vadd.f32 %v2069_v50, %v2033_v18  ;;  %v2340_v56 = vmul.f32 %v8855_v41, %v8399_v15 }
 0x2bb   : > { %v8851_v24 = vpop.eup %6365  ;;  %v2341_v11 = vmul.f32 %v8859_v62, %v8399_v15  ;;  %v2507_v14 = vadd.f32 %v2475_v40, %v2439_v51  ;;  %v2168_v37 = vadd.f32 %v2136_v42, %v2100_v26  ;;  %v2408_v49 = vmul.f32 %v8865_v33, %v8402_v21 }
 0x2bc   : > { %v1838_v43 = vadd.f32 -1.4531521, %v1837_v36  ;;  %v2546_v23 = vadd.f32 %v8439_v4, %v2506_v29  ;;  %v2169_v57 = vadd.f32 %v2137_v52, %v2101_v54  ;;  %v2409_v18 = vmul.f32 %v8869_v17, %v8402_v21  ;;  %v8873_v36 = vld [vmem:[#allocation2 + $0x149] sm:$0xff]  ;;  %v8878_v54 = vld [vmem:[#allocation2 + $0x151] sm:$0xff] }
 0x2bd   : > { %v2476_v51 = vmul.f32 %v8873_v36, %v8413_v16  ;;  %v2547_v26 = vadd.f32 %v8439_v4, %v2507_v14  ;;  %v2236_v40 = vadd.f32 %v2204_v22, %v2168_v37  ;;  %v1934_v45 = vmul.f32 %v8796_v60, %v8359_v2 }
 0x2be   : > { %v1839_v50 = vmul.f32 %v8842_v27, %v1838_v43  ;;  %vm2578_vm5 = vcmp.gt.f32.partialorder %v2546_v23, 0.0  ;;  %v2610_v29 = vmul.f32 0.1, %v2546_v23  ;;  %v2237_v52 = vadd.f32 %v2205_v13, %v2169_v57 }
 0x2bf   : > { %v2477_v43 = vmul.f32 %v8878_v54, %v8413_v16  ;;  %vm2579_vm6 = vcmp.gt.f32.partialorder %v2547_v26, 0.0  ;;  %v2611_v7 = vmul.f32 0.1, %v2547_v26  ;;  %v2304_v3 = vadd.f32 %v2272_v19, %v2236_v40 }
 0x2c0   : > { %v1840_v42 = vadd.f32 1.4214138, %v1839_v50  ;;  %v8884_v5 = vsel %vm2578_vm5, %v2546_v23, %v2610_v29  ;;  %v2305_v28 = vadd.f32 %v2273_v0, %v2237_v52  ;;  %v1935_v22 = vmul.f32 %v8804_v8, %v8359_v2 }
 0x2c1   : > { %v2002_v13 = vmul.f32 %v8808_v44, %v8362_v35  ;;  %v8891_v37 = vsel %vm2579_vm6, %v2547_v26, %v2611_v7  ;;  %v2372_v57 = vadd.f32 %v2340_v56, %v2304_v3  ;;  %v2003_v60 = vmul.f32 %v8814_v63, %v8362_v35 }
 0x2c2   : > { %v1841_v14 = vmul.f32 %v8842_v27, %v1840_v42  ;;  %v2070_v23 = vmul.f32 %v8818_v47, %v8370_v38  ;;  %v2667_v19 = vpack.c.bf16 %v8891_v37, %v8884_v5  ;;  %v2373_v0 = vadd.f32 %v2341_v11, %v2305_v28 }
 0x2c3   : > { %v2034_v29 = vadd.f32 %v2002_v13, %v1934_v45  ;;  %v2440_v40 = vadd.f32 %v2408_v49, %v2372_v57  ;;  %v2035_v8 = vadd.f32 %v2003_v60, %v1935_v22  ;;  %v2071_v44 = vmul.f32 %v8822_v39, %v8370_v38 }
 0x2c4   : > { %v1842_v50 = vadd.f32 -0.28449672, %v1841_v14  ;;  %v2138_v3 = vmul.f32 %v8855_v41, %v8380_v46  ;;  %v2441_v63 = vadd.f32 %v2409_v18, %v2373_v0  ;;  %v2139_v47 = vmul.f32 %v8859_v62, %v8380_v46 }
 0x2c5   : > { %v2102_v56 = vadd.f32 %v2070_v23, %v2034_v29  ;;  %v2508_v26 = vadd.f32 %v2476_v51, %v2440_v40  ;;  %v2103_v42 = vadd.f32 %v2071_v44, %v2035_v8  ;;  %v2206_v45 = vmul.f32 %v8865_v33, %v8393_v6  ;;  %v8915_v51 = vld [vmem:[#allocation2 + $0x167] sm:$0xff]  ;;  %v8921_v23 = vld [vmem:[#allocation2 + $0x16f] sm:$0xff] }
 0x2c6   : > { %v1843_v7 = vmul.f32 %v8842_v27, %v1842_v50  ;;  %v2207_v28 = vmul.f32 %v8869_v17, %v8393_v6  ;;  %v2509_v39 = vadd.f32 %v2477_v43, %v2441_v63  ;;  %v2274_v52 = vmul.f32 %v8873_v36, %v8396_v53  ;;  %v8925_v40 = vld [vmem:[#allocation2 + $0x168] sm:$0xff] }
 0x2c7   : > { %v2170_v49 = vadd.f32 %v2138_v3, %v2102_v56  ;;  %v2548_v18 = vadd.f32 %v8439_v4, %v2508_v26  ;;  %v2171_v14 = vadd.f32 %v2139_v47, %v2103_v42  ;;  %v2275_v22 = vmul.f32 %v8878_v54, %v8396_v53  ;;  %v8932_v56 = vld [vmem:[#allocation2 + $0x170] sm:$0xff] }
 0x2c8   : > { %v1844_v11 = vadd.f32 0.2548296, %v1843_v7  ;;  %v2342_v13 = vmul.f32 %v8915_v51, %v8399_v15  ;;  %v2549_v60 = vadd.f32 %v8439_v4, %v2509_v39  ;;  %v2343_v50 = vmul.f32 %v8921_v23, %v8399_v15  ;;  %v8936_v26 = vld [vmem:[#allocation2 + $0x169] sm:$0xff] }
 0x2c9   : > { %v2238_v43 = vadd.f32 %v2206_v45, %v2170_v49  ;;  %vm2580_vm7 = vcmp.gt.f32.partialorder %v2548_v18, 0.0  ;;  %v2612_v0 = vmul.f32 0.1, %v2548_v18  ;;  %v2239_v29 = vadd.f32 %v2207_v28, %v2171_v14 }
 0x2ca   : > { %v1845_v57 = vmul.f32 %v8842_v27, %v1844_v11  ;;  %v2410_v8 = vmul.f32 %v8925_v40, %v8402_v21  ;;  %vm2581_vm9 = vcmp.gt.f32.partialorder %v2549_v60, 0.0  ;;  %v2613_v27 = vmul.f32 0.1, %v2549_v60  ;;  %v8942_v11 = vld [vmem:[#allocation2 + $0x171] sm:$0xff] }
 0x2cb   : > { %v2306_v3 = vadd.f32 %v2274_v52, %v2238_v43  ;;  %v8930_v7 = vsel %vm2580_vm7, %v2548_v18, %v2612_v0  ;;  %v2307_v63 = vadd.f32 %v2275_v22, %v2239_v29  ;;  %v2411_v47 = vmul.f32 %v8932_v56, %v8402_v21 }
 0x2cc   : > { %v1850_v44 = vmul.f32 %v8851_v24, %v1845_v57  ;;  %v2478_v42 = vmul.f32 %v8936_v26, %v8413_v16  ;;  %v8940_v28 = vsel %vm2581_vm9, %v2549_v60, %v2613_v27  ;;  %v2479_v39 = vmul.f32 %v8942_v11, %v8413_v16 }
 0x2cd   : > { %v2374_v24 = vadd.f32 %v2342_v13, %v2306_v3  ;;  %v2668_v49 = vpack.c.bf16 %v8940_v28, %v8930_v7  ;;  %v2375_v52 = vadd.f32 %v2343_v50, %v2307_v63  ;;  %v1936_v18 = vmul.f32 %v8855_v41, %v8359_v2 }
 0x2ce   : > { %v1851_v45 = vsub.f32 1.0, %v1850_v44  ;;  %v1937_v14 = vmul.f32 %v8859_v62, %v8359_v2  ;;  %v2004_v13 = vmul.f32 %v8865_v33, %v8362_v35  ;;  %v2005_v60 = vmul.f32 %v8869_v17, %v8362_v35 }
 0x2cf   : > { %v2442_v57 = vadd.f32 %v2410_v8, %v2374_v24  ;;  %v2443_v43 = vadd.f32 %v2411_v47, %v2375_v52  ;;  %v2072_v0 = vmul.f32 %v8873_v36, %v8370_v38  ;;  %v2073_v50 = vmul.f32 %v8878_v54, %v8370_v38  ;;  %v8976_v24 = vld [vmem:[#allocation2 + $0x187] sm:$0xff] }
 0x2d0   : > { %v1852_v22 = vmul.f32 %v1851_v45, %v8768_v34  ;;  %v2140_v41 = vmul.f32 %v8915_v51, %v8380_v46  ;;  %v2036_v34 = vadd.f32 %v2004_v13, %v1936_v18  ;;  %v2037_v8 = vadd.f32 %v2005_v60, %v1937_v14  ;;  %v6355_v18 = vld [vmem:[#allocation9 + $0x18] sm:$0xff]  }
 0x2d1   : > { %v2510_v29 = vadd.f32 %v2478_v42, %v2442_v57  ;;  %v2511_v44 = vadd.f32 %v2479_v39, %v2443_v43  ;;  %v2141_v33 = vmul.f32 %v8921_v23, %v8380_v46  ;;  %v2208_v17 = vmul.f32 %v8925_v40, %v8393_v6 }
 0x2d2   : > { %v1853_v62 = vadd.f32 1.0, %v1852_v22  ;;  %v2209_v36 = vmul.f32 %v8932_v56, %v8393_v6  ;;  %v2104_v3 = vadd.f32 %v2072_v0, %v2036_v34  ;;  %v2105_v63 = vadd.f32 %v2073_v50, %v2037_v8  ;;  %v8987_v0 = vld [vmem:[#allocation2 + $0x188] sm:$0xff] }
 0x2d3   : > { %v2550_v54 = vadd.f32 %v8439_v4, %v2510_v29  ;;  %v2551_v47 = vadd.f32 %v8439_v4, %v2511_v44  ;;  %v2276_v42 = vmul.f32 %v8936_v26, %v8396_v53  ;;  %v2277_v45 = vmul.f32 %v8942_v11, %v8396_v53  ;;  %v8980_v4 = vld [vmem:[#allocation2 + $0x18f] sm:$0xff]  ;;  %v6456_v29 = vld [vmem:[#allocation9 + $0x10] sm:$0xff]  }
 0x2d4   : > { %v1854_v27 = vmul.f32 %v1853_v62, %v8755_v12  ;;  %v2344_v39 = vmul.f32 %v8976_v24, %v8399_v15  ;;  %v2172_v14 = vadd.f32 %v2140_v41, %v2104_v3  ;;  %v2173_v57 = vadd.f32 %v2141_v33, %v2105_v63  ;;  %v8991_v62 = vld [vmem:[#allocation2 + $0x190] sm:$0xff] }
 0x2d5   : > { %vm2582_vm10 = vcmp.gt.f32.partialorder %v2550_v54, 0.0  ;;  %v2614_v12 = vmul.f32 0.1, %v2550_v54  ;;  %vm2583_vm11 = vcmp.gt.f32.partialorder %v2551_v47, 0.0  ;;  %v2615_v22 = vmul.f32 0.1, %v2551_v47 }
 0x2d6   : > { %v1855_v52 = vpack.c.bf16 %v1854_v27, %v1854_v27  ;;  %v2345_v13 = vmul.f32 %v8980_v4, %v8399_v15  ;;  %v2240_v43 = vadd.f32 %v2208_v17, %v2172_v14  ;;  %v2412_v50 = vmul.f32 %v8987_v0, %v8402_v21  ;;  %v9001_v33 = vld [vmem:[#allocation2 + $0x189] sm:$0xff]  ;;  %v6356_v27 = vld [vmem:[#allocation9 + $0x20] sm:$0xff]  }
 0x2d7   : > { %v8985_v60 = vsel %vm2582_vm10, %v2550_v54, %v2614_v12  ;;  %v2413_v41 = vmul.f32 %v8991_v62, %v8402_v21  ;;  %v11254_v34 = vpack.c.bf16 %v8474_v61, %v8471_v32  ;;  %v8999_v8 = vsel %vm2583_vm11, %v2551_v47, %v2615_v22  ;;  %v9007_v63 = vld [vmem:[#allocation2 + $0x191] sm:$0xff] }
 0x2d8   : > { %6108 = vmatmul.mubr.msk.bf16.vlgmr.msra.gmra.mrb[0].mxu1 %vm1757_vm8, %v1855_v52  ;;  %v2241_v44 = vadd.f32 %v2209_v36, %v2173_v57  ;;  %v2480_v17 = vmul.f32 %v9001_v33, %v8413_v16  ;;  %v2669_v54 = vpack.c.bf16 %v8999_v8, %v8985_v60  ;;  %v2308_v3 = vadd.f32 %v2276_v42, %v2240_v43  ;;  %v6357_v43 = vld [vmem:[#allocation9 + $0x28] sm:$0xff]   ;;  %v6479_v8 = vld [vmem:[#allocation2 + $0x20f] sm:$0xff] }
 0x2d9   : > { %6112 = vmatpush3.bf16.msra.mxu1 %v6456_v29  ;;  %6115 = vmatprep.mubr.msk.bf16.mxu1 %vm384_vm0, %v11254_v34  ;;  %v2481_v32 = vmul.f32 %v9007_v63, %v8413_v16  ;;  %v1938_v61 = vmul.f32 %v8915_v51, %v8359_v2  ;;  %v1939_v47 = vmul.f32 %v8921_v23, %v8359_v2 }
 0x2da   : > { %6113 = vmatprep.subr.bf16.mxu1 %v6355_v18  ;;  %v2309_v36 = vadd.f32 %v2277_v45, %v2241_v44  ;;  %v2006_v52 = vmul.f32 %v8925_v40, %v8362_v35  ;;  %v2007_v12 = vmul.f32 %v8932_v56, %v8362_v35  ;;  %v2376_v14 = vadd.f32 %v2344_v39, %v2308_v3  ;;  %v9039_v3 = vld [vmem:[#allocation2 + $0x1a7] sm:$0xff] }
 0x2db   : > { %v2074_v42 = vmul.f32 %v8936_v26, %v8370_v38  ;;  %v2075_v22 = vmul.f32 %v8942_v11, %v8370_v38  ;;  %v2142_v51 = vmul.f32 %v8976_v24, %v8380_v46  ;;  %v2143_v40 = vmul.f32 %v8980_v4, %v8380_v46 }
 0x2dc   : > { %v2377_v45 = vadd.f32 %v2345_v13, %v2309_v36  ;;  %v2038_v57 = vadd.f32 %v2006_v52, %v1938_v61  ;;  %v2039_v23 = vadd.f32 %v2007_v12, %v1939_v47  ;;  %v2444_v56 = vadd.f32 %v2412_v50, %v2376_v14  ;;  %v9043_v36 = vld [vmem:[#allocation2 + $0x1af] sm:$0xff] }
 0x2dd   : > { %6114 = vmatpush3.bf16.msra.mxu1 %v6355_v18  ;;  %v2210_v39 = vmul.f32 %v8987_v0, %v8393_v6  ;;  %v2211_v26 = vmul.f32 %v8991_v62, %v8393_v6  ;;  %v2278_v11 = vmul.f32 %v9001_v33, %v8396_v53  ;;  %v2279_v34 = vmul.f32 %v9007_v63, %v8396_v53  ;;  %v9047_v47 = vld [vmem:[#allocation2 + $0x1a8] sm:$0xff]  ;;  %v9055_v14 = vld [vmem:[#allocation8 + $0x1] ss:$0 sm:$0xff] }
 0x2de   : > { %6153 = vmatprep.subr.bf16.mxu1 %v6356_v27  ;;  %v2445_v29 = vadd.f32 %v2413_v41, %v2377_v45  ;;  %v2106_v18 = vadd.f32 %v2074_v42, %v2038_v57  ;;  %v2107_v13 = vadd.f32 %v2075_v22, %v2039_v23  ;;  %v11255_v44 = vpack.c.bf16 %v8501_v31, %v8499_v58  ;;  %v9058_v22 = vld [vmem:[#allocation2 + $0x1b0] sm:$0xff] }
 0x2df   : > { %v2512_v50 = vadd.f32 %v2480_v17, %v2444_v56  ;;  %v2346_v61 = vmul.f32 %v9039_v3, %v8399_v15  ;;  %v2347_v41 = vmul.f32 %v9043_v36, %v8399_v15  ;;  %v2414_v52 = vmul.f32 %v9047_v47, %v8402_v21  ;;  %v9062_v57 = vld [vmem:[#allocation2 + $0x1a9] sm:$0xff] }
 0x2e0   : > { %6116 = vmatmul.mubr.msk.bf16.vlgmr.msra.gmra.mrb[4].mxu1 %vm384_vm0, %v11255_v44  ;;  %v11256_v58 = vpack.c.bf16 %v8570_v25, %v8566_v9  ;;  %v2513_v31 = vadd.f32 %v2481_v32, %v2445_v29  ;;  %v2174_v17 = vadd.f32 %v2142_v51, %v2106_v18  ;;  %v2175_v12 = vadd.f32 %v2143_v40, %v2107_v13  ;;  %v9066_v25 = vld [vmem:[#allocation2 + $0x1b1] sm:$0xff] }
 0x2e1   : > { %6154 = vmatpush3.bf16.msra.mxu1 %v6356_v27  ;;  %v2552_v42 = vadd.f32 %v9055_v14, %v2512_v50  ;;  %v2415_v45 = vmul.f32 %v9058_v22, %v8402_v21  ;;  %v2482_v9 = vmul.f32 %v9062_v57, %v8413_v16  ;;  %v2483_v27 = vmul.f32 %v9066_v25, %v8413_v16 }
 0x2e2   : > { %6119 = vmatprep.mubr.msk.bf16.mxu1 %vm384_vm0, %v11256_v58  ;;  %6155 = vmatprep.subr.bf16.mxu1 %v6357_v43  ;;  %v2553_v32 = vadd.f32 %v9055_v14, %v2513_v31  ;;  %v2242_v51 = vadd.f32 %v2210_v39, %v2174_v17  ;;  %v2243_v23 = vadd.f32 %v2211_v26, %v2175_v12  ;;  %v11257_v31 = vmov 0.0  }
 0x2e3   : > { %v1940_v40 = vmul.f32 %v8976_v24, %v8359_v2  ;;  %vm2584_vm12 = vcmp.gt.f32.partialorder %v2552_v42, 0.0  ;;  %v2616_v56 = vmul.f32 0.1, %v2552_v42  ;;  %v1941_v29 = vmul.f32 %v8980_v4, %v8359_v2 }
 0x2e4   : > { %v2008_v18 = vmul.f32 %v8987_v0, %v8362_v35  ;;  %vm2585_vm13 = vcmp.gt.f32.partialorder %v2553_v32, 0.0  ;;  %v2617_v13 = vmul.f32 0.1, %v2553_v32  ;;  %v2310_v44 = vadd.f32 %v2278_v11, %v2242_v51 }
 0x2e5   : > { %6156 = vmatpush3.bf16.msra.mxu1 %v6357_v43  ;;  %v2311_v50 = vadd.f32 %v2279_v34, %v2243_v23  ;;  %v9077_v58 = vsel %vm2584_vm12, %v2552_v42, %v2616_v56  ;;  %v2009_v39 = vmul.f32 %v8991_v62, %v8362_v35  ;;  %v2076_v24 = vmul.f32 %v9001_v33, %v8370_v38 }
 0x2e6   : > { %v2040_v26 = vadd.f32 %v2008_v18, %v1940_v40  ;;  %6231 = vmatprep.subr.bf16.mxu1 %v11257_v31  ;;  %v9084_v4 = vsel %vm2585_vm13, %v2553_v32, %v2617_v13  ;;  %v2378_v17 = vadd.f32 %v2346_v61, %v2310_v44  ;;  %v2077_v43 = vmul.f32 %v9007_v63, %v8370_v38  ;;  %v9114_v18 = vld [vmem:[#allocation2 + $0x1cf] sm:$0xff] }
 0x2e7   : > { %v2379_v0 = vadd.f32 %v2347_v41, %v2311_v50  ;;  %v11258_v11 = vpack.c.bf16 %v8648_v55, %v8645_v48  ;;  %v2670_v62 = vpack.c.bf16 %v9084_v4, %v9077_v58  ;;  %v2041_v34 = vadd.f32 %v2009_v39, %v1941_v29  ;;  %v9118_v44 = vld [vmem:[#allocation2 + $0x1c8] sm:$0xff]  ;;  %v9124_v39 = vld [vmem:[#allocation2 + $0x1d0] sm:$0xff] }
 0x2e8   : > { %v2108_v12 = vadd.f32 %v2076_v24, %v2040_v26  ;;  %v2144_v33 = vmul.f32 %v9039_v3, %v8380_v46  ;;  %v11259_v61 = vpack.c.bf16 %v8685_v1, %v8683_v10  ;;  %v2446_v41 = vadd.f32 %v2414_v52, %v2378_v17  ;;  %v9110_v52 = vld [vmem:[#allocation2 + $0x1c7] sm:$0xff] }
 0x2e9   : > { %6120 = vmatmul.mubr.msk.bf16.gmra.mrb[8].mxu1 %vm384_vm0, %v11258_v11  ;;  %v2447_v63 = vadd.f32 %v2415_v45, %v2379_v0  ;;  %v2145_v48 = vmul.f32 %v9043_v36, %v8380_v46  ;;  %v2212_v55 = vmul.f32 %v9047_v47, %v8393_v6  ;;  %v2109_v42 = vadd.f32 %v2077_v43, %v2041_v34  ;;  %v9128_v24 = vld [vmem:[#allocation2 + $0x1c9] sm:$0xff]  ;;  %v9132_v11 = vld [vmem:[#allocation2 + $0x1d1] sm:$0xff] }
 0x2ea   : > { %6123 = vmatprep.mubr.msk.bf16.mxu1 %vm384_vm0, %v11259_v61  ;;  %v2176_v32 = vadd.f32 %v2144_v33, %v2108_v12  ;;  %v2213_v51 = vmul.f32 %v9058_v22, %v8393_v6  ;;  %v2280_v23 = vmul.f32 %v9062_v57, %v8396_v53  ;;  %v2514_v40 = vadd.f32 %v2482_v9, %v2446_v41 }
 0x2eb   : > { %v2515_v10 = vadd.f32 %v2483_v27, %v2447_v63  ;;  %v2281_v1 = vmul.f32 %v9066_v25, %v8396_v53  ;;  %v2348_v45 = vmul.f32 %v9110_v52, %v8399_v15  ;;  %v2177_v56 = vadd.f32 %v2145_v48, %v2109_v42 }
 0x2ec   : > { %v2244_v29 = vadd.f32 %v2212_v55, %v2176_v32  ;;  %v2349_v13 = vmul.f32 %v9114_v18, %v8399_v15  ;;  %v2416_v9 = vmul.f32 %v9118_v44, %v8402_v21  ;;  %v2554_v27 = vadd.f32 %v9055_v14, %v2514_v40  ;;  %v11261_v32 = vld [vmem:[#allocation24_spill] sm:$0xff] }
 0x2ed   : > { %v2555_v50 = vadd.f32 %v9055_v14, %v2515_v10  ;;  %v2417_v26 = vmul.f32 %v9124_v39, %v8402_v21  ;;  %v2484_v17 = vmul.f32 %v9128_v24, %v8413_v16  ;;  %v2245_v0 = vadd.f32 %v2213_v51, %v2177_v56 }
 0x2ee   : > { %v2312_v43 = vadd.f32 %v2280_v23, %v2244_v29  ;;  %v2485_v34 = vmul.f32 %v9132_v11, %v8413_v16  ;;  %v1942_v12 = vmul.f32 %v9039_v3, %v8359_v2  ;;  %vm2586_vm14 = vcmp.gt.f32.partialorder %v2554_v27, 0.0 }
 0x2ef   : > { %vm2587_vm15 = vcmp.gt.f32.partialorder %v2555_v50, 0.0  ;;  %v2618_v33 = vmul.f32 0.1, %v2554_v27  ;;  %v2619_v61 = vmul.f32 0.1, %v2555_v50  ;;  %v11260_v41 = vpack.c.bf16 %v8763_v30, %v8757_v59 }
 0x2f0   : > { %v2313_v63 = vadd.f32 %v2281_v1, %v2245_v0  ;;  %v2380_v48 = vadd.f32 %v2348_v45, %v2312_v43  ;;  %v1943_v55 = vmul.f32 %v9043_v36, %v8359_v2  ;;  %v2010_v42 = vmul.f32 %v9047_v47, %v8362_v35 }
 0x2f1   : > { %6124 = vmatmul.mubr.msk.bf16.gmra.mrb[12].mxu1 %vm384_vm0, %v11260_v41  ;;  %v11262_v3 = vpack.c.bf16 %v8802_v20, %v11261_v32  ;;  %v9150_v51 = vsel %vm2586_vm14, %v2554_v27, %v2618_v33  ;;  %v9152_v23 = vsel %vm2587_vm15, %v2555_v50, %v2619_v61  ;;  %v2011_v59 = vmul.f32 %v9058_v22, %v8362_v35  ;;  %v9179_v61 = vld [vmem:[#allocation2 + $0x1ef] sm:$0xff] }
 0x2f2   : > { %v2078_v30 = vmul.f32 %v9062_v57, %v8370_v38  ;;  %v2671_v36 = vpack.c.bf16 %v9152_v23, %v9150_v51  ;;  %v2381_v40 = vadd.f32 %v2349_v13, %v2313_v63  ;;  %v2448_v47 = vadd.f32 %v2416_v9, %v2380_v48  ;;  %v9183_v63 = vld [vmem:[#allocation2 + $0x1e8] sm:$0xff] }
 0x2f3   : > { %6127 = vmatprep.mubr.msk.bf16.mxu1 %vm384_vm0, %v11262_v3  ;;  %v2042_v10 = vadd.f32 %v2010_v42, %v1942_v12  ;;  %v2043_v1 = vadd.f32 %v2011_v59, %v1943_v55  ;;  %v2079_v20 = vmul.f32 %v9066_v25, %v8370_v38  ;;  %v2146_v45 = vmul.f32 %v9110_v52, %v8380_v46 }
 0x2f4   : > { %v2147_v56 = vmul.f32 %v9114_v18, %v8380_v46  ;;  %v2449_v22 = vadd.f32 %v2417_v26, %v2381_v40  ;;  %v2516_v29 = vadd.f32 %v2484_v17, %v2448_v47  ;;  %v2214_v57 = vmul.f32 %v9118_v44, %v8393_v6  ;;  %v9175_v26 = vld [vmem:[#allocation2 + $0x1e7] sm:$0xff]  ;;  %v9204_v47 = vld [vmem:[#allocation2 + $0x1f1] sm:$0xff] }
 0x2f5   : > { %v2110_v27 = vadd.f32 %v2078_v30, %v2042_v10  ;;  %v2111_v50 = vadd.f32 %v2079_v20, %v2043_v1  ;;  %v2215_v13 = vmul.f32 %v9124_v39, %v8393_v6  ;;  %v2282_v9 = vmul.f32 %v9128_v24, %v8396_v53  ;;  %v9200_v30 = vld [vmem:[#allocation2 + $0x1e9] sm:$0xff] }
 0x2f6   : > { %v2283_v25 = vmul.f32 %v9132_v11, %v8396_v53  ;;  %v2517_v0 = vadd.f32 %v2485_v34, %v2449_v22  ;;  %v2556_v43 = vadd.f32 %v9055_v14, %v2516_v29  ;;  %v2350_v17 = vmul.f32 %v9175_v26, %v8399_v15  ;;  %v9187_v34 = vld [vmem:[#allocation2 + $0x1f0] sm:$0xff] }
 0x2f7   : > { %v2178_v12 = vadd.f32 %v2146_v45, %v2110_v27  ;;  %v2179_v33 = vadd.f32 %v2147_v56, %v2111_v50  ;;  %v2351_v41 = vmul.f32 %v9179_v61, %v8399_v15  ;;  %v2418_v48 = vmul.f32 %v9183_v63, %v8402_v21 }
 0x2f8   : > { %v2419_v55 = vmul.f32 %v9187_v34, %v8402_v21  ;;  %v2557_v42 = vadd.f32 %v9055_v14, %v2517_v0  ;;  %vm2588_vm2 = vcmp.gt.f32.partialorder %v2556_v43, 0.0  ;;  %v2620_v32 = vmul.f32 0.1, %v2556_v43 }
 0x2f9   : > { %6128 = vmatmul.mubr.msk.bf16.gmra.mrb[16].mxu1 %vm384_vm0, %v2667_v19  ;;  %v2246_v3 = vadd.f32 %v2214_v57, %v2178_v12  ;;  %v2247_v59 = vadd.f32 %v2215_v13, %v2179_v33  ;;  %v2486_v40 = vmul.f32 %v9200_v30, %v8413_v16  ;;  %v2487_v5 = vmul.f32 %v9204_v47, %v8413_v16 }
 0x2fa   : > { %6131 = vmatprep.mubr.msk.bf16.mxu1 %vm384_vm0, %v2668_v49  ;;  %v1944_v37 = vmul.f32 %v9110_v52, %v8359_v2  ;;  %vm2589_vm4 = vcmp.gt.f32.partialorder %v2557_v42, 0.0  ;;  %v2621_v19 = vmul.f32 0.1, %v2557_v42  ;;  %v9210_v10 = vsel %vm2588_vm2, %v2556_v43, %v2620_v32 }
 0x2fb   : > { %v2314_v7 = vadd.f32 %v2282_v9, %v2246_v3  ;;  %v2315_v28 = vadd.f32 %v2283_v25, %v2247_v59  ;;  %v1945_v49 = vmul.f32 %v9114_v18, %v8359_v2  ;;  %v2012_v1 = vmul.f32 %v9118_v44, %v8362_v35  ;;  %v6481_v3 = vld [vmem:[#allocation2 + $0x210] sm:$0xff] }
 0x2fc   : > { %v2013_v20 = vmul.f32 %v9124_v39, %v8362_v35  ;;  %v2653_v45 = vsel %vm2589_vm4, %v2557_v42, %v2621_v19  ;;  %v2080_v52 = vmul.f32 %v9128_v24, %v8370_v38  ;;  %v2081_v22 = vmul.f32 %v9132_v11, %v8370_v38  ;;  %v6480_v42 = vld [vmem:[#allocation2 + $0x208] sm:$0xff] }
 0x2fd   : > { %v2382_v56 = vadd.f32 %v2350_v17, %v2314_v7  ;;  %v2672_v29 = vpack.c.bf16 %v2653_v45, %v9210_v10  ;;  %v2383_v27 = vadd.f32 %v2351_v41, %v2315_v28  ;;  %v2044_v57 = vadd.f32 %v2012_v1, %v1944_v37  ;;  %v6478_v17 = vld [vmem:[#allocation2 + $0x207] sm:$0xff] }
 0x2fe   : > { %v2045_v50 = vadd.f32 %v2013_v20, %v1945_v49  ;;  %v2148_v44 = vmul.f32 %v9175_v26, %v8380_v46  ;;  %v2149_v39 = vmul.f32 %v9179_v61, %v8380_v46  ;;  %v2216_v13 = vmul.f32 %v9183_v63, %v8393_v6 }
 0x2ff   : > { %v2450_v18 = vadd.f32 %v2418_v48, %v2382_v56  ;;  %v2451_v9 = vadd.f32 %v2419_v55, %v2383_v27  ;;  %v2112_v24 = vadd.f32 %v2080_v52, %v2044_v57  ;;  %v2217_v11 = vmul.f32 %v9187_v34, %v8393_v6 }
 0x300   : > { %v2113_v25 = vadd.f32 %v2081_v22, %v2045_v50  ;;  %v2284_v43 = vmul.f32 %v9200_v30, %v8396_v53  ;;  %v2285_v12 = vmul.f32 %v9204_v47, %v8396_v53  ;;  %v2352_v33 = vmul.f32 %v6478_v17, %v8399_v15 }
 0x301   : > { %6132 = vmatmul.mubr.msk.bf16.gmra.mrb[20].mxu1 %vm384_vm0, %v2669_v54  ;;  %v2518_v0 = vadd.f32 %v2486_v40, %v2450_v18  ;;  %v2519_v41 = vadd.f32 %v2487_v5, %v2451_v9  ;;  %v2180_v48 = vadd.f32 %v2148_v44, %v2112_v24  ;;  %v2353_v54 = vmul.f32 %v6479_v8, %v8399_v15  ;;  %v6482_v40 = vld [vmem:[#allocation2 + $0x209] sm:$0xff]  ;;  %v6483_v5 = vld [vmem:[#allocation2 + $0x211] sm:$0xff] }
 0x302   : > { %6135 = vmatprep.mubr.msk.bf16.mxu1 %vm384_vm0, %v2670_v62  ;;  %v2181_v60 = vadd.f32 %v2149_v39, %v2113_v25  ;;  %v2420_v32 = vmul.f32 %v6480_v42, %v8402_v21  ;;  %v2421_v59 = vmul.f32 %v6481_v3, %v8402_v21  ;;  %v2488_v37 = vmul.f32 %v6482_v40, %v8413_v16  ;;  %v6484_v9 = vld [vmem:[#allocation2 + $0x227] sm:$0xff] }
 0x303   : > { %v2558_v55 = vadd.f32 %v9055_v14, %v2518_v0  ;;  %v2559_v58 = vadd.f32 %v9055_v14, %v2519_v41  ;;  %v2248_v4 = vadd.f32 %v2216_v13, %v2180_v48  ;;  %v2489_v19 = vmul.f32 %v6483_v5, %v8413_v16  ;;  %v6485_v0 = vld [vmem:[#allocation2 + $0x22f] sm:$0xff] }
 0x304   : > { %v2249_v62 = vadd.f32 %v2217_v11, %v2181_v60  ;;  %v1946_v7 = vmul.f32 %v9175_v26, %v8359_v2  ;;  %v1947_v28 = vmul.f32 %v9179_v61, %v8359_v2  ;;  %v2014_v56 = vmul.f32 %v9183_v63, %v8362_v35 }
 0x305   : > { %vm2590_vm5 = vcmp.gt.f32.partialorder %v2558_v55, 0.0  ;;  %v2622_v10 = vmul.f32 0.1, %v2558_v55  ;;  %vm2591_vm6 = vcmp.gt.f32.partialorder %v2559_v58, 0.0  ;;  %v2623_v49 = vmul.f32 0.1, %v2559_v58 }
 0x306   : > { %v2316_v1 = vadd.f32 %v2284_v43, %v2248_v4  ;;  %v2317_v20 = vadd.f32 %v2285_v12, %v2249_v62  ;;  %v2015_v52 = vmul.f32 %v9187_v34, %v8362_v35  ;;  %v2082_v22 = vmul.f32 %v9200_v30, %v8370_v38  ;;  %v6486_v43 = vld [vmem:[#allocation2 + $0x228] sm:$0xff] }
 0x307   : > { %v2654_v45 = vsel %vm2590_vm5, %v2558_v55, %v2622_v10  ;;  %v2655_v27 = vsel %vm2591_vm6, %v2559_v58, %v2623_v49  ;;  %v2083_v2 = vmul.f32 %v9204_v47, %v8370_v38  ;;  %v2046_v50 = vadd.f32 %v2014_v56, %v1946_v7  ;;  %v6491_v4 = vld [vmem:[#allocation2 + $0xf] sm:$0xff]  ;;  %v3162_v56 = vld [vmem:[#allocation6 + $0x20] sm:$0x7] }
 0x308   : > { %v2384_v57 = vadd.f32 %v2352_v33, %v2316_v1  ;;  %v2385_v26 = vadd.f32 %v2353_v54, %v2317_v20  ;;  %v2673_v61 = vpack.c.bf16 %v2655_v27, %v2654_v45  ;;  %v2047_v63 = vadd.f32 %v2015_v52, %v1947_v28  ;;  %v6487_v33 = vld [vmem:[#allocation2 + $0x230] sm:$0xff]  ;;  %v6492_v52 = vld [vmem:[#allocation2 + $0x8] sm:$0xff] }
 0x309   : > { %6136 = vmatmul.mubr.msk.bf16.gmra.mrb[24].mxu1 %vm384_vm0, %v2671_v36  ;;  %v2150_v18 = vmul.f32 %v6478_v17, %v8380_v46  ;;  %v2151_v30 = vmul.f32 %v6479_v8, %v8380_v46  ;;  %v2218_v44 = vmul.f32 %v6480_v42, %v8393_v6  ;;  %v2114_v39 = vadd.f32 %v2082_v22, %v2046_v50  ;;  %v6489_v54 = vld [vmem:[#allocation2 + $0x231] sm:$0xff]  ;;  %v3161_v42 = vld [vmem:[#allocation6 + $0x1c] sm:$0x7] }
 0x30a   : > { %6139 = vmatprep.mubr.msk.bf16.mxu1 %vm384_vm0, %v2672_v29  ;;  %v2452_v35 = vadd.f32 %v2420_v32, %v2384_v57  ;;  %v2453_v34 = vadd.f32 %v2421_v59, %v2385_v26  ;;  %v2115_v38 = vadd.f32 %v2083_v2, %v2047_v63  ;;  %v2219_v47 = vmul.f32 %v6481_v3, %v8393_v6  ;;  %v3160_v29 = vld [vmem:[#allocation6 + $0x18] sm:$0x7]  ;;  %v11265_v7 = vld [vmem:[#allocation23_spill] sm:$0xff] }
 0x30b   : > { %v2286_v51 = vmul.f32 %v6482_v40, %v8396_v53  ;;  %v2287_v13 = vmul.f32 %v6483_v5, %v8396_v53  ;;  %v2354_v24 = vmul.f32 %v6484_v9, %v8399_v15  ;;  %v2182_v25 = vadd.f32 %v2150_v18, %v2114_v39  ;;  %v6488_v53 = vld [vmem:[#allocation2 + $0x229] sm:$0xff] }
 0x30c   : > { %v2520_v23 = vadd.f32 %v2488_v37, %v2452_v35  ;;  %v2521_v36 = vadd.f32 %v2489_v19, %v2453_v34  ;;  %v2183_v11 = vadd.f32 %v2151_v30, %v2115_v38  ;;  %v2355_v46 = vmul.f32 %v6485_v0, %v8399_v15  ;;  %v11263_v15 = vld [vmem:[#allocation21_spill] sm:$0xff]  ;;  %v6490_v37 = vld [vmem:[#allocation2 + $0x7] sm:$0xff]  ;;  %v6493_v27 = vld [vmem:[#allocation2 + $0x10] sm:$0xff] }
 0x30d   : > { %v2422_v12 = vmul.f32 %v6486_v43, %v8402_v21  ;;  %v2423_v41 = vmul.f32 %v6487_v33, %v8402_v21  ;;  %v2490_v48 = vmul.f32 %v6488_v53, %v8413_v16  ;;  %v2250_v60 = vadd.f32 %v2218_v44, %v2182_v25  ;;  %v11264_v19 = vld [vmem:[#allocation22_spill] sm:$0xff]  ;;  %v6497_v30 = vld [vmem:[#allocation2 + $0x2f] sm:$0xff] }
 0x30e   : > { %v2560_v6 = vadd.f32 %v9055_v14, %v2520_v23  ;;  %v2561_v17 = vadd.f32 %v9055_v14, %v2521_v36  ;;  %v2251_v8 = vadd.f32 %v2219_v47, %v2183_v11  ;;  %v2491_v55 = vmul.f32 %v6489_v54, %v8413_v16  ;;  %v6494_v26 = vld [vmem:[#allocation2 + $0x9] sm:$0xff]  ;;  %v6501_v33 = vld [vmem:[#allocation2 + $0x31] sm:$0xff] }
 0x30f   : > { %v9283_v32 = vrot.slane %v3160_v29, %v11263_v15  ;;  %v2318_v40 = vadd.f32 %v2286_v51, %v2250_v60  ;;  %v9289_v10 = vrot.slane %v3160_v29, %v11264_v19  ;;  %v9292_v28 = vrot.slane %v3160_v29, %v11265_v7  ;;  %v6496_v35 = vld [vmem:[#allocation2 + $0x27] sm:$0xff]  ;;  %v6499_v0 = vld [vmem:[#allocation2 + $0x30] sm:$0xff] }
 0x310   : > { %vm2592_vm7 = vcmp.gt.f32.partialorder %v2560_v6, 0.0  ;;  %vm2593_vm9 = vcmp.gt.f32.partialorder %v2561_v17, 0.0  ;;  %v2624_v3 = vmul.f32 0.1, %v2560_v6  ;;  %v2625_v59 = vmul.f32 0.1, %v2561_v17 }
 0x311   : > { %6140 = vmatmul.mubr.msk.bf16.gmra.mrb[28].mxu1 %vm384_vm0, %v2673_v61  ;;  %v2319_v21 = vadd.f32 %v2287_v13, %v2251_v8  ;;  %v3167_v58 = vmul.f32 %v6490_v37, %v9283_v32  ;;  %v3168_v62 = vmul.f32 %v6491_v4, %v9283_v32  ;;  %v2386_v1 = vadd.f32 %v2354_v24, %v2318_v40  ;;  %v6495_v61 = vld [vmem:[#allocation2 + $0x11] sm:$0xff]  ;;  %v6498_v25 = vld [vmem:[#allocation2 + $0x28] sm:$0xff] }
 0x312   : > { %v2656_v5 = vsel %vm2592_vm7, %v2560_v6, %v2624_v3  ;;  %v2657_v16 = vsel %vm2593_vm9, %v2561_v17, %v2625_v59  ;;  %v9295_v45 = vrot.slane %v3161_v42, %v11263_v15  ;;  %v3235_v22 = vmul.f32 %v6492_v52, %v9289_v10  ;;  %v6500_v6 = vld [vmem:[#allocation2 + $0x29] sm:$0xff] }
 0x313   : > { %v2674_v49 = vpack.c.bf16 %v2657_v16, %v2656_v5  ;;  %v2387_v20 = vadd.f32 %v2355_v46, %v2319_v21  ;;  %v3236_v57 = vmul.f32 %v6493_v27, %v9289_v10  ;;  %v3303_v2 = vmul.f32 %v6494_v26, %v9292_v28  ;;  %v9322_v60 = vld [vmem:[#allocation2 + $0x47] sm:$0xff]  ;;  %v9326_v54 = vld [vmem:[#allocation2 + $0x4f] sm:$0xff] }
 0x314   : > { %v3304_v50 = vmul.f32 %v6495_v61, %v9292_v28  ;;  %v2454_v63 = vadd.f32 %v2422_v12, %v2386_v1  ;;  %v3371_v34 = vmul.f32 %v6496_v35, %v9295_v45  ;;  %v3372_v44 = vmul.f32 %v6497_v30, %v9295_v45  ;;  %v9330_v40 = vld [vmem:[#allocation2 + $0x48] sm:$0xff]  ;;  %v9334_v37 = vld [vmem:[#allocation2 + $0x50] sm:$0xff] }
 0x315   : > { %6143 = vmatprep.mubr.msk.bf16.mxu1 %vm384_vm0, %v2674_v49  ;;  %v2455_v18 = vadd.f32 %v2423_v41, %v2387_v20  ;;  %v3267_v39 = vadd.f32 %v3235_v22, %v3167_v58  ;;  %v3268_v38 = vadd.f32 %v3236_v57, %v3168_v62  ;;  %v9305_v47 = vrot.slane %v3161_v42, %v11264_v19  ;;  %v6506_v22 = vld [vmem:[#allocation2 + $0x49] sm:$0xff]  ;;  %v6507_v57 = vld [vmem:[#allocation2 + $0x51] sm:$0xff] }
 0x316   : > { %v9308_v51 = vrot.slane %v3161_v42, %v11265_v7  ;;  %v2522_v23 = vadd.f32 %v2490_v48, %v2454_v63  ;;  %v9311_v13 = vrot.slane %v3162_v56, %v11263_v15  ;;  %v9314_v9 = vrot.slane %v3162_v56, %v11264_v19 }
 0x317   : > { %v2523_v36 = vadd.f32 %v2491_v55, %v2455_v18  ;;  %v3335_v24 = vadd.f32 %v3303_v2, %v3267_v39  ;;  %v3336_v29 = vadd.f32 %v3304_v50, %v3268_v38  ;;  %v3439_v11 = vmul.f32 %v6498_v25, %v9305_v47 }
 0x318   : > { %v3440_v46 = vmul.f32 %v6499_v0, %v9305_v47  ;;  %v2562_v43 = vadd.f32 %v9055_v14, %v2522_v23  ;;  %v3507_v17 = vmul.f32 %v6500_v6, %v9308_v51  ;;  %v3508_v41 = vmul.f32 %v6501_v33, %v9308_v51 }
 0x319   : > { %v2563_v12 = vadd.f32 %v9055_v14, %v2523_v36  ;;  %v3403_v53 = vadd.f32 %v3371_v34, %v3335_v24  ;;  %v3404_v48 = vadd.f32 %v3372_v44, %v3336_v29  ;;  %v3575_v8 = vmul.f32 %v9322_v60, %v9311_v13  ;;  %v9358_v24 = vld [vmem:[#allocation8 + $0x2] ss:$0 sm:$0xff] }
 0x31a   : > { %v3576_v55 = vmul.f32 %v9326_v54, %v9311_v13  ;;  %vm2594_vm10 = vcmp.gt.f32.partialorder %v2562_v43, 0.0  ;;  %v2626_v14 = vmul.f32 0.1, %v2562_v43  ;;  %v3643_v21 = vmul.f32 %v9330_v40, %v9314_v9 }
 0x31b   : > { %vm2595_vm11 = vcmp.gt.f32.partialorder %v2563_v12, 0.0  ;;  %v2627_v42 = vmul.f32 0.1, %v2563_v12  ;;  %v3471_v3 = vadd.f32 %v3439_v11, %v3403_v53  ;;  %v3472_v59 = vadd.f32 %v3440_v46, %v3404_v48  ;;  %v9370_v48 = vld [vmem:[#allocation2 + $0x68] sm:$0xff] }
 0x31c   : > { %v3644_v58 = vmul.f32 %v9334_v37, %v9314_v9  ;;  %v2658_v4 = vsel %vm2594_vm10, %v2562_v43, %v2626_v14  ;;  %v9339_v5 = vrot.slane %v3162_v56, %v11265_v7  ;;  %v3169_v16 = vmul.f32 %v6496_v35, %v9283_v32 }
 0x31d   : > { %v2659_v62 = vsel %vm2595_vm11, %v2563_v12, %v2627_v42  ;;  %v3539_v1 = vadd.f32 %v3507_v17, %v3471_v3  ;;  %v3540_v20 = vadd.f32 %v3508_v41, %v3472_v59  ;;  %v3170_v52 = vmul.f32 %v6497_v30, %v9283_v32  ;;  %v9362_v12 = vld [vmem:[#allocation2 + $0x67] sm:$0xff]  ;;  %v9366_v17 = vld [vmem:[#allocation2 + $0x6f] sm:$0xff] }
 0x31e   : > { %v2675_v49 = vpack.c.bf16 %v2659_v62, %v2658_v4  ;;  %v3711_v27 = vmul.f32 %v6506_v22, %v9339_v5  ;;  %v3712_v26 = vmul.f32 %v6507_v57, %v9339_v5  ;;  %v3237_v2 = vmul.f32 %v6498_v25, %v9289_v10  ;;  %v9380_v59 = vld [vmem:[#allocation2 + $0x69] sm:$0xff] }
 0x31f   : > { %v3238_v61 = vmul.f32 %v6499_v0, %v9289_v10  ;;  %v3607_v56 = vadd.f32 %v3575_v8, %v3539_v1  ;;  %v3608_v50 = vadd.f32 %v3576_v55, %v3540_v20  ;;  %v3305_v63 = vmul.f32 %v6500_v6, %v9292_v28  ;;  %v9374_v55 = vld [vmem:[#allocation2 + $0x70] sm:$0xff] }
 0x320   : > { %6144 = vmatmul.mubr.msk.bf16.gmra.mrb[32].mxu1 %vm384_vm0, %v2675_v49  ;;  %v3306_v18 = vmul.f32 %v6501_v33, %v9292_v28  ;;  %v3269_v35 = vadd.f32 %v3237_v2, %v3169_v16  ;;  %v3373_v30 = vmul.f32 %v9322_v60, %v9295_v45  ;;  %v3374_v44 = vmul.f32 %v9326_v54, %v9295_v45 }
 0x321   : > { %v3270_v34 = vadd.f32 %v3238_v61, %v3170_v52  ;;  %v3675_v39 = vadd.f32 %v3643_v21, %v3607_v56  ;;  %v3676_v38 = vadd.f32 %v3644_v58, %v3608_v50  ;;  %v3441_v23 = vmul.f32 %v9330_v40, %v9305_v47  ;;  %v9384_v58 = vld [vmem:[#allocation2 + $0x71] sm:$0xff] }
 0x322   : > { %v3442_v36 = vmul.f32 %v9334_v37, %v9305_v47  ;;  %v3337_v29 = vadd.f32 %v3305_v63, %v3269_v35  ;;  %v3509_v11 = vmul.f32 %v6506_v22, %v9308_v51  ;;  %v3510_v0 = vmul.f32 %v6507_v57, %v9308_v51 }
 0x323   : > { %v3338_v25 = vadd.f32 %v3306_v18, %v3270_v34  ;;  %v3743_v46 = vadd.f32 %v3711_v27, %v3675_v39  ;;  %v3744_v43 = vadd.f32 %v3712_v26, %v3676_v38  ;;  %v3577_v6 = vmul.f32 %v9362_v12, %v9311_v13 }
 0x324   : > { %v3578_v33 = vmul.f32 %v9366_v17, %v9311_v13  ;;  %v3405_v41 = vadd.f32 %v3373_v30, %v3337_v29  ;;  %v3645_v8 = vmul.f32 %v9370_v48, %v9314_v9  ;;  %v3646_v14 = vmul.f32 %v9374_v55, %v9314_v9 }
 0x325   : > { %v3406_v53 = vadd.f32 %v3374_v44, %v3338_v25  ;;  %v3783_v42 = vadd.f32 %v9358_v24, %v3743_v46  ;;  %v3784_v3 = vadd.f32 %v9358_v24, %v3744_v43  ;;  %v3713_v21 = vmul.f32 %v9380_v59, %v9339_v5  ;;  %v9411_v25 = vld [vmem:[#allocation2 + $0x87] sm:$0xff] }
 0x326   : > { %v3714_v4 = vmul.f32 %v9384_v58, %v9339_v5  ;;  %v3473_v62 = vadd.f32 %v3441_v23, %v3405_v41  ;;  %v3171_v49 = vmul.f32 %v9322_v60, %v9283_v32  ;;  %v3172_v1 = vmul.f32 %v9326_v54, %v9283_v32 }
 0x327   : > { %v3474_v16 = vadd.f32 %v3442_v36, %v3406_v53  ;;  %vm3815_vm12 = vcmp.gt.f32.partialorder %v3783_v42, 0.0  ;;  %vm3816_vm13 = vcmp.gt.f32.partialorder %v3784_v3, 0.0  ;;  %v3847_v20 = vmul.f32 0.1, %v3783_v42  ;;  %v9419_v53 = vld [vmem:[#allocation2 + $0x88] sm:$0xff] }
 0x328   : > { %v3848_v52 = vmul.f32 0.1, %v3784_v3  ;;  %v3541_v27 = vadd.f32 %v3509_v11, %v3473_v62  ;;  %v3239_v2 = vmul.f32 %v9330_v40, %v9289_v10  ;;  %v3240_v61 = vmul.f32 %v9334_v37, %v9289_v10 }
 0x329   : > { %v3542_v26 = vadd.f32 %v3510_v0, %v3474_v16  ;;  %v3879_v56 = vsel %vm3815_vm12, %v3783_v42, %v3847_v20  ;;  %v3307_v63 = vmul.f32 %v6506_v22, %v9292_v28  ;;  %v3308_v60 = vmul.f32 %v6507_v57, %v9292_v28 }
 0x32a   : > { %v3880_v50 = vsel %vm3816_vm13, %v3784_v3, %v3848_v52  ;;  %v3609_v54 = vadd.f32 %v3577_v6, %v3541_v27  ;;  %v3271_v34 = vadd.f32 %v3239_v2, %v3171_v49  ;;  %v3272_v30 = vadd.f32 %v3240_v61, %v3172_v1  ;;  %v9415_v6 = vld [vmem:[#allocation2 + $0x8f] sm:$0xff] }
 0x32b   : > { %v3911_v18 = vpack.c.bf16 %v3880_v50, %v3879_v56  ;;  %v3610_v35 = vadd.f32 %v3578_v33, %v3542_v26  ;;  %v3375_v44 = vmul.f32 %v9362_v12, %v9295_v45  ;;  %v3376_v40 = vmul.f32 %v9366_v17, %v9295_v45  ;;  %v9427_v3 = vld [vmem:[#allocation2 + $0x89] sm:$0xff]  ;;  %v9433_v49 = vld [vmem:[#allocation2 + $0x91] sm:$0xff] }
 0x32c   : > { %v3443_v37 = vmul.f32 %v9370_v48, %v9305_v47  ;;  %v3677_v39 = vadd.f32 %v3645_v8, %v3609_v54  ;;  %v3339_v38 = vadd.f32 %v3307_v63, %v3271_v34  ;;  %v3444_v57 = vmul.f32 %v9374_v55, %v9305_v47 }
 0x32d   : > { %6157 = vmatprep.mubr.msk.bf16.mxu1 %vm384_vm0, %v3911_v18  ;;  %v3678_v22 = vadd.f32 %v3646_v14, %v3610_v35  ;;  %v3340_v23 = vadd.f32 %v3308_v60, %v3272_v30  ;;  %v3511_v36 = vmul.f32 %v9380_v59, %v9308_v51  ;;  %v3512_v29 = vmul.f32 %v9384_v58, %v9308_v51  ;;  %v9423_v14 = vld [vmem:[#allocation2 + $0x90] sm:$0xff] }
 0x32e   : > { %v3579_v11 = vmul.f32 %v9411_v25, %v9311_v13  ;;  %v3745_v0 = vadd.f32 %v3713_v21, %v3677_v39  ;;  %v3407_v43 = vadd.f32 %v3375_v44, %v3339_v38  ;;  %v3580_v33 = vmul.f32 %v9415_v6, %v9311_v13 }
 0x32f   : > { %v3746_v46 = vadd.f32 %v3714_v4, %v3678_v22  ;;  %v3408_v41 = vadd.f32 %v3376_v40, %v3340_v23  ;;  %v3647_v8 = vmul.f32 %v9419_v53, %v9314_v9  ;;  %v3648_v42 = vmul.f32 %v9423_v14, %v9314_v9 }
 0x330   : > { %v3715_v21 = vmul.f32 %v9427_v3, %v9339_v5  ;;  %v3785_v4 = vadd.f32 %v9358_v24, %v3745_v0  ;;  %v3475_v16 = vadd.f32 %v3443_v37, %v3407_v43  ;;  %v3716_v1 = vmul.f32 %v9433_v49, %v9339_v5  ;;  %v9466_v43 = vld [vmem:[#allocation2 + $0xaf] sm:$0xff] }
 0x331   : > { %v3786_v62 = vadd.f32 %v9358_v24, %v3746_v46  ;;  %v3476_v20 = vadd.f32 %v3444_v57, %v3408_v41  ;;  %v3173_v52 = vmul.f32 %v9362_v12, %v9283_v32  ;;  %v3174_v27 = vmul.f32 %v9366_v17, %v9283_v32 }
 0x332   : > { %v3241_v26 = vmul.f32 %v9370_v48, %v9289_v10  ;;  %vm3817_vm14 = vcmp.gt.f32.partialorder %v3785_v4, 0.0  ;;  %v3849_v2 = vmul.f32 0.1, %v3785_v4  ;;  %v3543_v56 = vadd.f32 %v3511_v36, %v3475_v16  ;;  %v9462_v36 = vld [vmem:[#allocation2 + $0xa7] sm:$0xff] }
 0x333   : > { %vm3818_vm15 = vcmp.gt.f32.partialorder %v3786_v62, 0.0  ;;  %v3850_v61 = vmul.f32 0.1, %v3786_v62  ;;  %v3544_v50 = vadd.f32 %v3512_v29, %v3476_v20  ;;  %v3242_v63 = vmul.f32 %v9374_v55, %v9289_v10  ;;  %v9478_v16 = vld [vmem:[#allocation2 + $0xa9] sm:$0xff] }
 0x334   : > { %v3273_v60 = vadd.f32 %v3241_v26, %v3173_v52  ;;  %v3881_v18 = vsel %vm3817_vm14, %v3785_v4, %v3849_v2  ;;  %v3309_v12 = vmul.f32 %v9380_v59, %v9292_v28  ;;  %v3310_v17 = vmul.f32 %v9384_v58, %v9292_v28  ;;  %v9474_v4 = vld [vmem:[#allocation2 + $0xb0] sm:$0xff] }
 0x335   : > { %v3882_v54 = vsel %vm3818_vm15, %v3786_v62, %v3850_v61  ;;  %v3611_v48 = vadd.f32 %v3579_v11, %v3543_v56  ;;  %v3612_v34 = vadd.f32 %v3580_v33, %v3544_v50  ;;  %v3274_v30 = vadd.f32 %v3242_v63, %v3174_v27  ;;  %v9484_v27 = vld [vmem:[#allocation2 + $0xb1] sm:$0xff] }
 0x336   : > { %v3912_v35 = vpack.c.bf16 %v3882_v54, %v3881_v18  ;;  %v3341_v44 = vadd.f32 %v3309_v12, %v3273_v60  ;;  %v3377_v40 = vmul.f32 %v9411_v25, %v9295_v45  ;;  %v3378_v55 = vmul.f32 %v9415_v6, %v9295_v45 }
 0x337   : > { %v3445_v37 = vmul.f32 %v9419_v53, %v9305_v47  ;;  %v3679_v59 = vadd.f32 %v3647_v8, %v3611_v48  ;;  %v3680_v39 = vadd.f32 %v3648_v42, %v3612_v34  ;;  %v3342_v22 = vadd.f32 %v3310_v17, %v3274_v30  ;;  %v9470_v8 = vld [vmem:[#allocation2 + $0xa8] sm:$0xff] }
 0x338   : > { %6158 = vmatmul.mubr.msk.bf16.vlgmr.msra.gmra.mrb[36].mxu1 %vm384_vm0, %v3912_v35  ;;  %v3446_v58 = vmul.f32 %v9423_v14, %v9305_v47  ;;  %v3409_v38 = vadd.f32 %v3377_v40, %v3341_v44  ;;  %v3513_v57 = vmul.f32 %v9427_v3, %v9308_v51  ;;  %v3514_v23 = vmul.f32 %v9433_v49, %v9308_v51 }
 0x339   : > { %v3581_v29 = vmul.f32 %v9462_v36, %v9311_v13  ;;  %v3747_v11 = vadd.f32 %v3715_v21, %v3679_v59  ;;  %v3748_v0 = vadd.f32 %v3716_v1, %v3680_v39  ;;  %v3410_v46 = vadd.f32 %v3378_v55, %v3342_v22 }
 0x33a   : > { %v3582_v33 = vmul.f32 %v9466_v43, %v9311_v13  ;;  %v3477_v41 = vadd.f32 %v3445_v37, %v3409_v38  ;;  %v3649_v42 = vmul.f32 %v9470_v8, %v9314_v9  ;;  %v3650_v62 = vmul.f32 %v9474_v4, %v9314_v9 }
 0x33b   : > { %v3717_v21 = vmul.f32 %v9478_v16, %v9339_v5  ;;  %v3787_v1 = vadd.f32 %v9358_v24, %v3747_v11  ;;  %v3788_v20 = vadd.f32 %v9358_v24, %v3748_v0  ;;  %v3478_v52 = vadd.f32 %v3446_v58, %v3410_v46  ;;  %v9518_v46 = vld [vmem:[#allocation2 + $0xcf] sm:$0xff] }
 0x33c   : > { %v3718_v26 = vmul.f32 %v9484_v27, %v9339_v5  ;;  %v3545_v2 = vadd.f32 %v3513_v57, %v3477_v41  ;;  %v3175_v61 = vmul.f32 %v9411_v25, %v9283_v32  ;;  %v3176_v56 = vmul.f32 %v9415_v6, %v9283_v32  ;;  %v9513_v57 = vld [vmem:[#allocation2 + $0xc7] sm:$0xff] }
 0x33d   : > { %v3243_v50 = vmul.f32 %v9419_v53, %v9289_v10  ;;  %vm3819_vm2 = vcmp.gt.f32.partialorder %v3787_v1, 0.0  ;;  %vm3820_vm4 = vcmp.gt.f32.partialorder %v3788_v20, 0.0  ;;  %v3851_v63 = vmul.f32 0.1, %v3787_v1 }
 0x33e   : > { %v3852_v60 = vmul.f32 0.1, %v3788_v20  ;;  %v3546_v18 = vadd.f32 %v3514_v23, %v3478_v52  ;;  %v3613_v54 = vadd.f32 %v3581_v29, %v3545_v2  ;;  %v3244_v12 = vmul.f32 %v9423_v14, %v9289_v10 }
 0x33f   : > { %v3275_v17 = vadd.f32 %v3243_v50, %v3175_v61  ;;  %v3883_v35 = vsel %vm3819_vm2, %v3787_v1, %v3851_v63  ;;  %v3311_v25 = vmul.f32 %v9427_v3, %v9292_v28  ;;  %v3312_v6 = vmul.f32 %v9433_v49, %v9292_v28  ;;  %v6531_v50 = vld [vmem:[#allocation2 + $0xd1] sm:$0xff] }
 0x340   : > { %v3884_v48 = vsel %vm3820_vm4, %v3788_v20, %v3852_v60  ;;  %v3614_v53 = vadd.f32 %v3582_v33, %v3546_v18  ;;  %v3681_v30 = vadd.f32 %v3649_v42, %v3613_v54  ;;  %v3276_v44 = vadd.f32 %v3244_v12, %v3176_v56  ;;  %v9522_v42 = vld [vmem:[#allocation2 + $0xc8] sm:$0xff] }
 0x341   : > { %v3913_v34 = vpack.c.bf16 %v3884_v48, %v3883_v35  ;;  %v3343_v40 = vadd.f32 %v3311_v25, %v3275_v17  ;;  %v3379_v55 = vmul.f32 %v9462_v36, %v9295_v45  ;;  %v3380_v14 = vmul.f32 %v9466_v43, %v9295_v45  ;;  %v9530_v20 = vld [vmem:[#allocation2 + $0xc9] sm:$0xff] }
 0x342   : > { %v3447_v37 = vmul.f32 %v9470_v8, %v9305_v47  ;;  %v3682_v3 = vadd.f32 %v3650_v62, %v3614_v53  ;;  %v3749_v59 = vadd.f32 %v3717_v21, %v3681_v30  ;;  %v3344_v39 = vadd.f32 %v3312_v6, %v3276_v44  ;;  %v9526_v21 = vld [vmem:[#allocation2 + $0xd0] sm:$0xff] }
 0x343   : > { %6161 = vmatprep.mubr.msk.bf16.mxu1 %vm384_vm0, %v3913_v34  ;;  %v3448_v49 = vmul.f32 %v9474_v4, %v9305_v47  ;;  %v3411_v22 = vadd.f32 %v3379_v55, %v3343_v40  ;;  %v3515_v58 = vmul.f32 %v9478_v16, %v9308_v51  ;;  %v3516_v38 = vmul.f32 %v9484_v27, %v9308_v51 }
 0x344   : > { %v3583_v23 = vmul.f32 %v9513_v57, %v9311_v13  ;;  %v3750_v29 = vadd.f32 %v3718_v26, %v3682_v3  ;;  %v3789_v11 = vadd.f32 %v9358_v24, %v3749_v59  ;;  %v3412_v0 = vadd.f32 %v3380_v14, %v3344_v39 }
 0x345   : > { %v3584_v33 = vmul.f32 %v9518_v46, %v9311_v13  ;;  %v3479_v41 = vadd.f32 %v3447_v37, %v3411_v22  ;;  %v3651_v62 = vmul.f32 %v9522_v42, %v9314_v9  ;;  %v3652_v1 = vmul.f32 %v9526_v21, %v9314_v9  ;;  %v9560_v22 = vld [vmem:[#allocation2 + $0xe7] sm:$0xff] }
 0x346   : > { %v3719_v52 = vmul.f32 %v9530_v20, %v9339_v5  ;;  %v3790_v26 = vadd.f32 %v9358_v24, %v3750_v29  ;;  %vm3821_vm5 = vcmp.gt.f32.partialorder %v3789_v11, 0.0  ;;  %v3853_v2 = vmul.f32 0.1, %v3789_v11 }
 0x347   : > { %v3480_v61 = vadd.f32 %v3448_v49, %v3412_v0  ;;  %v3547_v56 = vadd.f32 %v3515_v58, %v3479_v41  ;;  %v3720_v63 = vmul.f32 %v6531_v50, %v9339_v5  ;;  %v3177_v60 = vmul.f32 %v9462_v36, %v9283_v32 }
 0x348   : > { %v3178_v18 = vmul.f32 %v9466_v43, %v9283_v32  ;;  %vm3822_vm6 = vcmp.gt.f32.partialorder %v3790_v26, 0.0  ;;  %v3854_v54 = vmul.f32 0.1, %v3790_v26  ;;  %v3885_v12 = vsel %vm3821_vm5, %v3789_v11, %v3853_v2 }
 0x349   : > { %v3548_v17 = vadd.f32 %v3516_v38, %v3480_v61  ;;  %v3615_v35 = vadd.f32 %v3583_v23, %v3547_v56  ;;  %v3245_v48 = vmul.f32 %v9470_v8, %v9289_v10  ;;  %v3246_v25 = vmul.f32 %v9474_v4, %v9289_v10  ;;  %v9564_v38 = vld [vmem:[#allocation2 + $0xef] sm:$0xff] }
 0x34a   : > { %v3313_v6 = vmul.f32 %v9478_v16, %v9292_v28  ;;  %v3886_v34 = vsel %vm3822_vm6, %v3790_v26, %v3854_v54  ;;  %v3314_v36 = vmul.f32 %v9484_v27, %v9292_v28  ;;  %v3381_v43 = vmul.f32 %v9513_v57, %v9295_v45  ;;  %v9578_v26 = vld [vmem:[#allocation2 + $0xe9] sm:$0xff]  ;;  %v9582_v61 = vld [vmem:[#allocation2 + $0xf1] sm:$0xff] }
 0x34b   : > { %v3616_v53 = vadd.f32 %v3584_v33, %v3548_v17  ;;  %v3914_v30 = vpack.c.bf16 %v3886_v34, %v3885_v12  ;;  %v3683_v44 = vadd.f32 %v3651_v62, %v3615_v35  ;;  %v3277_v40 = vadd.f32 %v3245_v48, %v3177_v60  ;;  %v9569_v33 = vld [vmem:[#allocation2 + $0xe8] sm:$0xff] }
 0x34c   : > { %v3278_v55 = vadd.f32 %v3246_v25, %v3178_v18  ;;  %v3382_v8 = vmul.f32 %v9518_v46, %v9295_v45  ;;  %v3449_v4 = vmul.f32 %v9522_v42, %v9305_v47  ;;  %v3450_v16 = vmul.f32 %v9526_v21, %v9305_v47 }
 0x34d   : > { %v3684_v14 = vadd.f32 %v3652_v1, %v3616_v53  ;;  %6162 = vmatmul.mubr.msk.bf16.gmra.mrb[40].mxu1 %vm384_vm0, %v3914_v30  ;;  %v3751_v27 = vadd.f32 %v3719_v52, %v3683_v44  ;;  %v3345_v37 = vadd.f32 %v3313_v6, %v3277_v40  ;;  %v3517_v59 = vmul.f32 %v9530_v20, %v9308_v51  ;;  %v9574_v1 = vld [vmem:[#allocation2 + $0xf0] sm:$0xff] }
 0x34e   : > { %v3346_v3 = vadd.f32 %v3314_v36, %v3278_v55  ;;  %v3518_v49 = vmul.f32 %v6531_v50, %v9308_v51  ;;  %v3585_v58 = vmul.f32 %v9560_v22, %v9311_v13  ;;  %v3586_v23 = vmul.f32 %v9564_v38, %v9311_v13 }
 0x34f   : > { %v3752_v39 = vadd.f32 %v3720_v63, %v3684_v14  ;;  %v3791_v29 = vadd.f32 %v9358_v24, %v3751_v27  ;;  %v3413_v11 = vadd.f32 %v3381_v43, %v3345_v37  ;;  %v3653_v41 = vmul.f32 %v9569_v33, %v9314_v9  ;;  %v9610_v37 = vld [vmem:[#allocation2 + $0x107] sm:$0xff] }
 0x350   : > { %v3414_v0 = vadd.f32 %v3382_v8, %v3346_v3  ;;  %v3654_v52 = vmul.f32 %v9574_v1, %v9314_v9  ;;  %v3721_v2 = vmul.f32 %v9578_v26, %v9339_v5  ;;  %v3722_v56 = vmul.f32 %v9582_v61, %v9339_v5 }
 0x351   : > { %v3792_v62 = vadd.f32 %v9358_v24, %v3752_v39  ;;  %vm3823_vm7 = vcmp.gt.f32.partialorder %v3791_v29, 0.0  ;;  %v3855_v63 = vmul.f32 0.1, %v3791_v29  ;;  %v3481_v60 = vadd.f32 %v3449_v4, %v3413_v11  ;;  %v9618_v11 = vld [vmem:[#allocation2 + $0x108] sm:$0xff] }
 0x352   : > { %v3482_v18 = vadd.f32 %v3450_v16, %v3414_v0  ;;  %v3179_v12 = vmul.f32 %v9513_v57, %v9283_v32  ;;  %v3180_v17 = vmul.f32 %v9518_v46, %v9283_v32  ;;  %v3247_v6 = vmul.f32 %v9522_v42, %v9289_v10 }
 0x353   : > { %vm3824_vm9 = vcmp.gt.f32.partialorder %v3792_v62, 0.0  ;;  %v3856_v54 = vmul.f32 0.1, %v3792_v62  ;;  %v3887_v35 = vsel %vm3823_vm7, %v3791_v29, %v3855_v63  ;;  %v3549_v48 = vadd.f32 %v3517_v59, %v3481_v60 }
 0x354   : > { %v3550_v25 = vadd.f32 %v3518_v49, %v3482_v18  ;;  %v3248_v53 = vmul.f32 %v9526_v21, %v9289_v10  ;;  %v3315_v36 = vmul.f32 %v9530_v20, %v9292_v28  ;;  %v3316_v43 = vmul.f32 %v6531_v50, %v9292_v28  ;;  %v9632_v18 = vld [vmem:[#allocation2 + $0x111] sm:$0xff] }
 0x355   : > { %v3888_v34 = vsel %vm3824_vm9, %v3792_v62, %v3856_v54  ;;  %v3617_v57 = vadd.f32 %v3585_v58, %v3549_v48  ;;  %v3279_v40 = vadd.f32 %v3247_v6, %v3179_v12  ;;  %v3383_v55 = vmul.f32 %v9560_v22, %v9295_v45  ;;  %v9614_v58 = vld [vmem:[#allocation2 + $0x10f] sm:$0xff] }
 0x356   : > { %v3915_v30 = vpack.c.bf16 %v3888_v34, %v3887_v35  ;;  %v3618_v44 = vadd.f32 %v3586_v23, %v3550_v25  ;;  %v3280_v46 = vadd.f32 %v3248_v53, %v3180_v17  ;;  %v3384_v42 = vmul.f32 %v9564_v38, %v9295_v45 }
 0x357   : > { %v3451_v14 = vmul.f32 %v9569_v33, %v9305_v47  ;;  %v3685_v21 = vadd.f32 %v3653_v41, %v3617_v57  ;;  %v3347_v8 = vadd.f32 %v3315_v36, %v3279_v40  ;;  %v3452_v50 = vmul.f32 %v9574_v1, %v9305_v47  ;;  %v9622_v41 = vld [vmem:[#allocation2 + $0x110] sm:$0xff] }
 0x358   : > { %6165 = vmatprep.mubr.msk.bf16.mxu1 %vm384_vm0, %v3915_v30  ;;  %v3686_v20 = vadd.f32 %v3654_v52, %v3618_v44  ;;  %v3348_v4 = vadd.f32 %v3316_v43, %v3280_v46  ;;  %v3519_v16 = vmul.f32 %v9578_v26, %v9308_v51  ;;  %v3520_v27 = vmul.f32 %v9582_v61, %v9308_v51  ;;  %v9626_v52 = vld [vmem:[#allocation2 + $0x109] sm:$0xff] }
 0x359   : > { %v3587_v3 = vmul.f32 %v9610_v37, %v9311_v13  ;;  %v3753_v59 = vadd.f32 %v3721_v2, %v3685_v21  ;;  %v3415_v49 = vadd.f32 %v3383_v55, %v3347_v8  ;;  %v3588_v23 = vmul.f32 %v9614_v58, %v9311_v13 }
 0x35a   : > { %v3754_v39 = vadd.f32 %v3722_v56, %v3686_v20  ;;  %v3416_v29 = vadd.f32 %v3384_v42, %v3348_v4  ;;  %v3655_v0 = vmul.f32 %v9618_v11, %v9314_v9  ;;  %v3656_v62 = vmul.f32 %v9622_v41, %v9314_v9 }
 0x35b   : > { %v3723_v2 = vmul.f32 %v9626_v52, %v9339_v5  ;;  %v3793_v56 = vadd.f32 %v9358_v24, %v3753_v59  ;;  %v3483_v60 = vadd.f32 %v3451_v14, %v3415_v49  ;;  %v3724_v54 = vmul.f32 %v9632_v18, %v9339_v5  ;;  %v9665_v49 = vld [vmem:[#allocation2 + $0x12f] sm:$0xff] }
 0x35c   : > { %v3794_v63 = vadd.f32 %v9358_v24, %v3754_v39  ;;  %v3484_v12 = vadd.f32 %v3452_v50, %v3416_v29  ;;  %v3181_v17 = vmul.f32 %v9560_v22, %v9283_v32  ;;  %v3182_v35 = vmul.f32 %v9564_v38, %v9283_v32 }
 0x35d   : > { %v3249_v48 = vmul.f32 %v9569_v33, %v9289_v10  ;;  %vm3825_vm10 = vcmp.gt.f32.partialorder %v3793_v56, 0.0  ;;  %v3857_v25 = vmul.f32 0.1, %v3793_v56  ;;  %v3551_v34 = vadd.f32 %v3519_v16, %v3483_v60  ;;  %v9661_v16 = vld [vmem:[#allocation2 + $0x127] sm:$0xff] }
 0x35e   : > { %vm3826_vm11 = vcmp.gt.f32.partialorder %v3794_v63, 0.0  ;;  %v3858_v6 = vmul.f32 0.1, %v3794_v63  ;;  %v3552_v53 = vadd.f32 %v3520_v27, %v3484_v12  ;;  %v3250_v36 = vmul.f32 %v9574_v1, %v9289_v10  ;;  %v9677_v60 = vld [vmem:[#allocation2 + $0x129] sm:$0xff] }
 0x35f   : > { %v3281_v43 = vadd.f32 %v3249_v48, %v3181_v17  ;;  %v3889_v30 = vsel %vm3825_vm10, %v3793_v56, %v3857_v25  ;;  %v3317_v22 = vmul.f32 %v9578_v26, %v9292_v28  ;;  %v3318_v38 = vmul.f32 %v9582_v61, %v9292_v28  ;;  %v9673_v56 = vld [vmem:[#allocation2 + $0x130] sm:$0xff] }
 0x360   : > { %v3890_v57 = vsel %vm3826_vm11, %v3794_v63, %v3858_v6  ;;  %v3619_v33 = vadd.f32 %v3587_v3, %v3551_v34  ;;  %v3620_v40 = vadd.f32 %v3588_v23, %v3552_v53  ;;  %v3282_v46 = vadd.f32 %v3250_v36, %v3182_v35  ;;  %v9683_v35 = vld [vmem:[#allocation2 + $0x131] sm:$0xff] }
 0x361   : > { %v3916_v44 = vpack.c.bf16 %v3890_v57, %v3889_v30  ;;  %v3349_v55 = vadd.f32 %v3317_v22, %v3281_v43  ;;  %v3385_v42 = vmul.f32 %v9610_v37, %v9295_v45  ;;  %v3386_v1 = vmul.f32 %v9614_v58, %v9295_v45 }
 0x362   : > { %v3453_v14 = vmul.f32 %v9618_v11, %v9305_v47  ;;  %v3687_v26 = vadd.f32 %v3655_v0, %v3619_v33  ;;  %v3688_v21 = vadd.f32 %v3656_v62, %v3620_v40  ;;  %v3350_v20 = vadd.f32 %v3318_v38, %v3282_v46  ;;  %v9669_v0 = vld [vmem:[#allocation2 + $0x128] sm:$0xff] }
 0x363   : > { %6166 = vmatmul.mubr.msk.bf16.gmra.mrb[44].mxu1 %vm384_vm0, %v3916_v44  ;;  %v3454_v61 = vmul.f32 %v9622_v41, %v9305_v47  ;;  %v3417_v8 = vadd.f32 %v3385_v42, %v3349_v55  ;;  %v3521_v50 = vmul.f32 %v9626_v52, %v9308_v51  ;;  %v3522_v4 = vmul.f32 %v9632_v18, %v9308_v51 }
 0x364   : > { %v3589_v27 = vmul.f32 %v9661_v16, %v9311_v13  ;;  %v3755_v3 = vadd.f32 %v3723_v2, %v3687_v26  ;;  %v3756_v59 = vadd.f32 %v3724_v54, %v3688_v21  ;;  %v3418_v39 = vadd.f32 %v3386_v1, %v3350_v20 }
 0x365   : > { %v3590_v23 = vmul.f32 %v9665_v49, %v9311_v13  ;;  %v3485_v29 = vadd.f32 %v3453_v14, %v3417_v8  ;;  %v3657_v62 = vmul.f32 %v9669_v0, %v9314_v9  ;;  %v3658_v63 = vmul.f32 %v9673_v56, %v9314_v9 }
 0x366   : > { %v3725_v2 = vmul.f32 %v9677_v60, %v9339_v5  ;;  %v3795_v54 = vadd.f32 %v9358_v24, %v3755_v3  ;;  %v3796_v12 = vadd.f32 %v9358_v24, %v3756_v59  ;;  %v3486_v17 = vadd.f32 %v3454_v61, %v3418_v39  ;;  %v9717_v39 = vld [vmem:[#allocation2 + $0x14f] sm:$0xff] }
 0x367   : > { %v3726_v48 = vmul.f32 %v9683_v35, %v9339_v5  ;;  %v3553_v25 = vadd.f32 %v3521_v50, %v3485_v29  ;;  %v3183_v6 = vmul.f32 %v9610_v37, %v9283_v32  ;;  %v3184_v34 = vmul.f32 %v9614_v58, %v9283_v32  ;;  %v9712_v50 = vld [vmem:[#allocation2 + $0x147] sm:$0xff] }
 0x368   : > { %v3251_v53 = vmul.f32 %v9618_v11, %v9289_v10  ;;  %vm3827_vm12 = vcmp.gt.f32.partialorder %v3795_v54, 0.0  ;;  %vm3828_vm13 = vcmp.gt.f32.partialorder %v3796_v12, 0.0  ;;  %v3859_v36 = vmul.f32 0.1, %v3795_v54 }
 0x369   : > { %v3860_v43 = vmul.f32 0.1, %v3796_v12  ;;  %v3554_v30 = vadd.f32 %v3522_v4, %v3486_v17  ;;  %v3621_v57 = vadd.f32 %v3589_v27, %v3553_v25  ;;  %v3252_v22 = vmul.f32 %v9622_v41, %v9289_v10 }
 0x36a   : > { %v3283_v38 = vadd.f32 %v3251_v53, %v3183_v6  ;;  %v3891_v44 = vsel %vm3827_vm12, %v3795_v54, %v3859_v36  ;;  %v3319_v37 = vmul.f32 %v9626_v52, %v9292_v28  ;;  %v3320_v58 = vmul.f32 %v9632_v18, %v9292_v28  ;;  %v6555_v53 = vld [vmem:[#allocation2 + $0x151] sm:$0xff] }
 0x36b   : > { %v3892_v33 = vsel %vm3828_vm13, %v3796_v12, %v3860_v43  ;;  %v3622_v11 = vadd.f32 %v3590_v23, %v3554_v30  ;;  %v3689_v46 = vadd.f32 %v3657_v62, %v3621_v57  ;;  %v3284_v55 = vadd.f32 %v3252_v22, %v3184_v34  ;;  %v9721_v62 = vld [vmem:[#allocation2 + $0x148] sm:$0xff] }
 0x36c   : > { %v3917_v40 = vpack.c.bf16 %v3892_v33, %v3891_v44  ;;  %v3351_v42 = vadd.f32 %v3319_v37, %v3283_v38  ;;  %v3387_v1 = vmul.f32 %v9661_v16, %v9295_v45  ;;  %v3388_v41 = vmul.f32 %v9665_v49, %v9295_v45  ;;  %v9729_v12 = vld [vmem:[#allocation2 + $0x149] sm:$0xff] }
 0x36d   : > { %v3455_v14 = vmul.f32 %v9669_v0, %v9305_v47  ;;  %v3690_v52 = vadd.f32 %v3658_v63, %v3622_v11  ;;  %v3757_v26 = vadd.f32 %v3725_v2, %v3689_v46  ;;  %v3352_v21 = vadd.f32 %v3320_v58, %v3284_v55  ;;  %v9725_v2 = vld [vmem:[#allocation2 + $0x150] sm:$0xff] }
 0x36e   : > { %6169 = vmatprep.mubr.msk.bf16.mxu1 %vm384_vm0, %v3917_v40  ;;  %v3456_v18 = vmul.f32 %v9673_v56, %v9305_v47  ;;  %v3419_v20 = vadd.f32 %v3387_v1, %v3351_v42  ;;  %v3523_v61 = vmul.f32 %v9677_v60, %v9308_v51  ;;  %v3524_v8 = vmul.f32 %v9683_v35, %v9308_v51 }
 0x36f   : > { %v3591_v4 = vmul.f32 %v9712_v50, %v9311_v13  ;;  %v3758_v27 = vadd.f32 %v3726_v48, %v3690_v52  ;;  %v3797_v3 = vadd.f32 %v9358_v24, %v3757_v26  ;;  %v3420_v59 = vadd.f32 %v3388_v41, %v3352_v21 }
 0x370   : > { %v3592_v23 = vmul.f32 %v9717_v39, %v9311_v13  ;;  %v3487_v29 = vadd.f32 %v3455_v14, %v3419_v20  ;;  %v3659_v63 = vmul.f32 %v9721_v62, %v9314_v9  ;;  %v3660_v54 = vmul.f32 %v9725_v2, %v9314_v9  ;;  %v9759_v20 = vld [vmem:[#allocation2 + $0x167] sm:$0xff] }
 0x371   : > { %v3727_v17 = vmul.f32 %v9729_v12, %v9339_v5  ;;  %v3798_v48 = vadd.f32 %v9358_v24, %v3758_v27  ;;  %vm3829_vm14 = vcmp.gt.f32.partialorder %v3797_v3, 0.0  ;;  %v3861_v25 = vmul.f32 0.1, %v3797_v3 }
 0x372   : > { %v3488_v6 = vadd.f32 %v3456_v18, %v3420_v59  ;;  %v3555_v34 = vadd.f32 %v3523_v61, %v3487_v29  ;;  %v3728_v36 = vmul.f32 %v6555_v53, %v9339_v5  ;;  %v3185_v43 = vmul.f32 %v9661_v16, %v9283_v32 }
 0x373   : > { %v3186_v30 = vmul.f32 %v9665_v49, %v9283_v32  ;;  %vm3830_vm15 = vcmp.gt.f32.partialorder %v3798_v48, 0.0  ;;  %v3862_v57 = vmul.f32 0.1, %v3798_v48  ;;  %v3893_v22 = vsel %vm3829_vm14, %v3797_v3, %v3861_v25 }
 0x374   : > { %v3556_v38 = vadd.f32 %v3524_v8, %v3488_v6  ;;  %v3623_v44 = vadd.f32 %v3591_v4, %v3555_v34  ;;  %v3253_v33 = vmul.f32 %v9669_v0, %v9289_v10  ;;  %v3254_v37 = vmul.f32 %v9673_v56, %v9289_v10  ;;  %v9763_v8 = vld [vmem:[#allocation2 + $0x16f] sm:$0xff] }
 0x375   : > { %v3321_v58 = vmul.f32 %v9677_v60, %v9292_v28  ;;  %v3894_v40 = vsel %vm3830_vm15, %v3798_v48, %v3862_v57  ;;  %v3322_v16 = vmul.f32 %v9683_v35, %v9292_v28  ;;  %v3389_v49 = vmul.f32 %v9712_v50, %v9295_v45  ;;  %v9777_v48 = vld [vmem:[#allocation2 + $0x169] sm:$0xff]  ;;  %v9781_v6 = vld [vmem:[#allocation2 + $0x171] sm:$0xff] }
 0x376   : > { %v3624_v11 = vadd.f32 %v3592_v23, %v3556_v38  ;;  %v3918_v46 = vpack.c.bf16 %v3894_v40, %v3893_v22  ;;  %v3691_v55 = vadd.f32 %v3659_v63, %v3623_v44  ;;  %v3285_v42 = vadd.f32 %v3253_v33, %v3185_v43  ;;  %v9768_v23 = vld [vmem:[#allocation2 + $0x168] sm:$0xff] }
 0x377   : > { %v3286_v1 = vadd.f32 %v3254_v37, %v3186_v30  ;;  %v3390_v0 = vmul.f32 %v9717_v39, %v9295_v45  ;;  %v3457_v56 = vmul.f32 %v9721_v62, %v9305_v47  ;;  %v3458_v60 = vmul.f32 %v9725_v2, %v9305_v47 }
 0x378   : > { %v3692_v41 = vadd.f32 %v3660_v54, %v3624_v11  ;;  %6170 = vmatmul.mubr.msk.bf16.gmra.mrb[48].mxu1 %vm384_vm0, %v3918_v46  ;;  %v3759_v35 = vadd.f32 %v3727_v17, %v3691_v55  ;;  %v3353_v14 = vadd.f32 %v3321_v58, %v3285_v42  ;;  %v3525_v26 = vmul.f32 %v9729_v12, %v9308_v51  ;;  %v9773_v54 = vld [vmem:[#allocation2 + $0x170] sm:$0xff] }
 0x379   : > { %v3354_v52 = vadd.f32 %v3322_v16, %v3286_v1  ;;  %v3526_v18 = vmul.f32 %v6555_v53, %v9308_v51  ;;  %v3593_v61 = vmul.f32 %v9759_v20, %v9311_v13  ;;  %v3594_v4 = vmul.f32 %v9763_v8, %v9311_v13 }
 0x37a   : > { %v3760_v21 = vadd.f32 %v3728_v36, %v3692_v41  ;;  %v3799_v27 = vadd.f32 %v9358_v24, %v3759_v35  ;;  %v3421_v3 = vadd.f32 %v3389_v49, %v3353_v14  ;;  %v3661_v29 = vmul.f32 %v9768_v23, %v9314_v9  ;;  %v9809_v14 = vld [vmem:[#allocation2 + $0x187] sm:$0xff] }
 0x37b   : > { %v3422_v59 = vadd.f32 %v3390_v0, %v3354_v52  ;;  %v3662_v17 = vmul.f32 %v9773_v54, %v9314_v9  ;;  %v3729_v25 = vmul.f32 %v9777_v48, %v9339_v5  ;;  %v3730_v34 = vmul.f32 %v9781_v6, %v9339_v5 }
 0x37c   : > { %v3800_v63 = vadd.f32 %v9358_v24, %v3760_v21  ;;  %vm3831_vm2 = vcmp.gt.f32.partialorder %v3799_v27, 0.0  ;;  %v3863_v36 = vmul.f32 0.1, %v3799_v27  ;;  %v3489_v43 = vadd.f32 %v3457_v56, %v3421_v3  ;;  %v9817_v3 = vld [vmem:[#allocation2 + $0x188] sm:$0xff] }
 0x37d   : > { %v3490_v30 = vadd.f32 %v3458_v60, %v3422_v59  ;;  %v3187_v22 = vmul.f32 %v9712_v50, %v9283_v32  ;;  %v3188_v38 = vmul.f32 %v9717_v39, %v9283_v32  ;;  %v3255_v58 = vmul.f32 %v9721_v62, %v9289_v10 }
 0x37e   : > { %vm3832_vm4 = vcmp.gt.f32.partialorder %v3800_v63, 0.0  ;;  %v3864_v57 = vmul.f32 0.1, %v3800_v63  ;;  %v3895_v44 = vsel %vm3831_vm2, %v3799_v27, %v3863_v36  ;;  %v3557_v33 = vadd.f32 %v3525_v26, %v3489_v43 }
 0x37f   : > { %v3558_v37 = vadd.f32 %v3526_v18, %v3490_v30  ;;  %v3256_v11 = vmul.f32 %v9725_v2, %v9289_v10  ;;  %v3323_v16 = vmul.f32 %v9729_v12, %v9292_v28  ;;  %v3324_v49 = vmul.f32 %v6555_v53, %v9292_v28  ;;  %v9831_v30 = vld [vmem:[#allocation2 + $0x191] sm:$0xff] }
 0x380   : > { %v3896_v40 = vsel %vm3832_vm4, %v3800_v63, %v3864_v57  ;;  %v3625_v50 = vadd.f32 %v3593_v61, %v3557_v33  ;;  %v3287_v42 = vadd.f32 %v3255_v58, %v3187_v22  ;;  %v3391_v1 = vmul.f32 %v9759_v20, %v9295_v45  ;;  %v9813_v61 = vld [vmem:[#allocation2 + $0x18f] sm:$0xff] }
 0x381   : > { %v3919_v46 = vpack.c.bf16 %v3896_v40, %v3895_v44  ;;  %v3626_v55 = vadd.f32 %v3594_v4, %v3558_v37  ;;  %v3288_v39 = vadd.f32 %v3256_v11, %v3188_v38  ;;  %v3392_v62 = vmul.f32 %v9763_v8, %v9295_v45 }
 0x382   : > { %v3459_v41 = vmul.f32 %v9768_v23, %v9305_v47  ;;  %v3693_v2 = vadd.f32 %v3661_v29, %v3625_v50  ;;  %v3355_v0 = vadd.f32 %v3323_v16, %v3287_v42  ;;  %v3460_v53 = vmul.f32 %v9773_v54, %v9305_v47  ;;  %v9821_v29 = vld [vmem:[#allocation2 + $0x190] sm:$0xff] }
 0x383   : > { %6173 = vmatprep.mubr.msk.bf16.mxu1 %vm384_vm0, %v3919_v46  ;;  %v3694_v12 = vadd.f32 %v3662_v17, %v3626_v55  ;;  %v3356_v56 = vadd.f32 %v3324_v49, %v3288_v39  ;;  %v3527_v60 = vmul.f32 %v9777_v48, %v9308_v51  ;;  %v3528_v35 = vmul.f32 %v9781_v6, %v9308_v51  ;;  %v9825_v17 = vld [vmem:[#allocation2 + $0x189] sm:$0xff] }
 0x384   : > { %v3595_v52 = vmul.f32 %v9809_v14, %v9311_v13  ;;  %v3761_v26 = vadd.f32 %v3729_v25, %v3693_v2  ;;  %v3423_v18 = vadd.f32 %v3391_v1, %v3355_v0  ;;  %v3596_v4 = vmul.f32 %v9813_v61, %v9311_v13 }
 0x385   : > { %v3762_v21 = vadd.f32 %v3730_v34, %v3694_v12  ;;  %v3424_v27 = vadd.f32 %v3392_v62, %v3356_v56  ;;  %v3663_v59 = vmul.f32 %v9817_v3, %v9314_v9  ;;  %v3664_v63 = vmul.f32 %v9821_v29, %v9314_v9 }
 0x386   : > { %v3731_v25 = vmul.f32 %v9825_v17, %v9339_v5  ;;  %v3801_v34 = vadd.f32 %v9358_v24, %v3761_v26  ;;  %v3491_v43 = vadd.f32 %v3459_v41, %v3423_v18  ;;  %v3732_v57 = vmul.f32 %v9831_v30, %v9339_v5  ;;  %v9864_v18 = vld [vmem:[#allocation2 + $0x1af] sm:$0xff] }
 0x387   : > { %v3802_v36 = vadd.f32 %v9358_v24, %v3762_v21  ;;  %v3492_v22 = vadd.f32 %v3460_v53, %v3424_v27  ;;  %v3189_v38 = vmul.f32 %v9759_v20, %v9283_v32  ;;  %v3190_v44 = vmul.f32 %v9763_v8, %v9283_v32 }
 0x388   : > { %v3257_v33 = vmul.f32 %v9768_v23, %v9289_v10  ;;  %vm3833_vm5 = vcmp.gt.f32.partialorder %v3801_v34, 0.0  ;;  %v3865_v37 = vmul.f32 0.1, %v3801_v34  ;;  %v3559_v40 = vadd.f32 %v3527_v60, %v3491_v43  ;;  %v9860_v60 = vld [vmem:[#allocation2 + $0x1a7] sm:$0xff] }
 0x389   : > { %vm3834_vm6 = vcmp.gt.f32.partialorder %v3802_v36, 0.0  ;;  %v3866_v58 = vmul.f32 0.1, %v3802_v36  ;;  %v3560_v11 = vadd.f32 %v3528_v35, %v3492_v22  ;;  %v3258_v16 = vmul.f32 %v9773_v54, %v9289_v10  ;;  %v9876_v43 = vld [vmem:[#allocation2 + $0x1a9] sm:$0xff] }
 0x38a   : > { %v3289_v49 = vadd.f32 %v3257_v33, %v3189_v38  ;;  %v3897_v46 = vsel %vm3833_vm5, %v3801_v34, %v3865_v37  ;;  %v3325_v20 = vmul.f32 %v9777_v48, %v9292_v28  ;;  %v3326_v8 = vmul.f32 %v9781_v6, %v9292_v28  ;;  %v9872_v34 = vld [vmem:[#allocation2 + $0x1b0] sm:$0xff] }
 0x38b   : > { %v3898_v50 = vsel %vm3834_vm6, %v3802_v36, %v3866_v58  ;;  %v3627_v23 = vadd.f32 %v3595_v52, %v3559_v40  ;;  %v3628_v42 = vadd.f32 %v3596_v4, %v3560_v11  ;;  %v3290_v39 = vadd.f32 %v3258_v16, %v3190_v44  ;;  %v9882_v44 = vld [vmem:[#allocation2 + $0x1b1] sm:$0xff] }
 0x38c   : > { %v3920_v55 = vpack.c.bf16 %v3898_v50, %v3897_v46  ;;  %v3357_v1 = vadd.f32 %v3325_v20, %v3289_v49  ;;  %v3393_v62 = vmul.f32 %v9809_v14, %v9295_v45  ;;  %v3394_v54 = vmul.f32 %v9813_v61, %v9295_v45 }
 0x38d   : > { %v3461_v41 = vmul.f32 %v9817_v3, %v9305_v47  ;;  %v3695_v48 = vadd.f32 %v3663_v59, %v3627_v23  ;;  %v3696_v2 = vadd.f32 %v3664_v63, %v3628_v42  ;;  %v3358_v12 = vadd.f32 %v3326_v8, %v3290_v39  ;;  %v9868_v59 = vld [vmem:[#allocation2 + $0x1a8] sm:$0xff] }
 0x38e   : > { %6174 = vmatmul.mubr.msk.bf16.gmra.mrb[52].mxu1 %vm384_vm0, %v3920_v55  ;;  %v3462_v6 = vmul.f32 %v9821_v29, %v9305_v47  ;;  %v3425_v0 = vadd.f32 %v3393_v62, %v3357_v1  ;;  %v3529_v53 = vmul.f32 %v9825_v17, %v9308_v51  ;;  %v3530_v56 = vmul.f32 %v9831_v30, %v9308_v51 }
 0x38f   : > { %v3597_v35 = vmul.f32 %v9860_v60, %v9311_v13  ;;  %v3763_v52 = vadd.f32 %v3731_v25, %v3695_v48  ;;  %v3764_v26 = vadd.f32 %v3732_v57, %v3696_v2  ;;  %v3426_v21 = vadd.f32 %v3394_v54, %v3358_v12 }
 0x390   : > { %v3598_v4 = vmul.f32 %v9864_v18, %v9311_v13  ;;  %v3493_v27 = vadd.f32 %v3461_v41, %v3425_v0  ;;  %v3665_v63 = vmul.f32 %v9868_v59, %v9314_v9  ;;  %v3666_v36 = vmul.f32 %v9872_v34, %v9314_v9 }
 0x391   : > { %v3733_v25 = vmul.f32 %v9876_v43, %v9339_v5  ;;  %v3803_v57 = vadd.f32 %v9358_v24, %v3763_v52  ;;  %v3804_v22 = vadd.f32 %v9358_v24, %v3764_v26  ;;  %v3494_v38 = vadd.f32 %v3462_v6, %v3426_v21  ;;  %v9916_v21 = vld [vmem:[#allocation2 + $0x1cf] sm:$0xff] }
 0x392   : > { %v3734_v33 = vmul.f32 %v9882_v44, %v9339_v5  ;;  %v3561_v37 = vadd.f32 %v3529_v53, %v3493_v27  ;;  %v3191_v58 = vmul.f32 %v9809_v14, %v9283_v32  ;;  %v3192_v40 = vmul.f32 %v9813_v61, %v9283_v32  ;;  %v9911_v53 = vld [vmem:[#allocation2 + $0x1c7] sm:$0xff] }
 0x393   : > { %v3259_v11 = vmul.f32 %v9817_v3, %v9289_v10  ;;  %vm3835_vm7 = vcmp.gt.f32.partialorder %v3803_v57, 0.0  ;;  %vm3836_vm9 = vcmp.gt.f32.partialorder %v3804_v22, 0.0  ;;  %v3867_v16 = vmul.f32 0.1, %v3803_v57 }
 0x394   : > { %v3868_v49 = vmul.f32 0.1, %v3804_v22  ;;  %v3562_v46 = vadd.f32 %v3530_v56, %v3494_v38  ;;  %v3629_v50 = vadd.f32 %v3597_v35, %v3561_v37  ;;  %v3260_v20 = vmul.f32 %v9821_v29, %v9289_v10 }
 0x395   : > { %v3291_v8 = vadd.f32 %v3259_v11, %v3191_v58  ;;  %v3899_v55 = vsel %vm3835_vm7, %v3803_v57, %v3867_v16  ;;  %v3327_v14 = vmul.f32 %v9825_v17, %v9292_v28  ;;  %v3328_v61 = vmul.f32 %v9831_v30, %v9292_v28  ;;  %v9933_v11 = vld [vmem:[#allocation2 + $0x1d1] sm:$0xff] }
 0x396   : > { %v3900_v23 = vsel %vm3836_vm9, %v3804_v22, %v3868_v49  ;;  %v3630_v3 = vadd.f32 %v3598_v4, %v3562_v46  ;;  %v3697_v39 = vadd.f32 %v3665_v63, %v3629_v50  ;;  %v3292_v1 = vadd.f32 %v3260_v20, %v3192_v40  ;;  %v9920_v63 = vld [vmem:[#allocation2 + $0x1c8] sm:$0xff] }
 0x397   : > { %v3921_v42 = vpack.c.bf16 %v3900_v23, %v3899_v55  ;;  %v3359_v62 = vadd.f32 %v3327_v14, %v3291_v8  ;;  %v3395_v54 = vmul.f32 %v9860_v60, %v9295_v45  ;;  %v3396_v29 = vmul.f32 %v9864_v18, %v9295_v45  ;;  %v9928_v22 = vld [vmem:[#allocation2 + $0x1c9] sm:$0xff] }
 0x398   : > { %v3463_v41 = vmul.f32 %v9868_v59, %v9305_v47  ;;  %v3698_v17 = vadd.f32 %v3666_v36, %v3630_v3  ;;  %v3765_v48 = vadd.f32 %v3733_v25, %v3697_v39  ;;  %v3360_v2 = vadd.f32 %v3328_v61, %v3292_v1  ;;  %v9924_v25 = vld [vmem:[#allocation2 + $0x1d0] sm:$0xff] }
 0x399   : > { %6177 = vmatprep.mubr.msk.bf16.mxu1 %vm384_vm0, %v3921_v42  ;;  %v3464_v30 = vmul.f32 %v9872_v34, %v9305_v47  ;;  %v3427_v12 = vadd.f32 %v3395_v54, %v3359_v62  ;;  %v3531_v6 = vmul.f32 %v9876_v43, %v9308_v51  ;;  %v3532_v0 = vmul.f32 %v9882_v44, %v9308_v51 }
 0x39a   : > { %v3599_v56 = vmul.f32 %v9911_v53, %v9311_v13  ;;  %v3766_v35 = vadd.f32 %v3734_v33, %v3698_v17  ;;  %v3805_v52 = vadd.f32 %v9358_v24, %v3765_v48  ;;  %v3428_v26 = vadd.f32 %v3396_v29, %v3360_v2 }
 0x39b   : > { %v3600_v4 = vmul.f32 %v9916_v21, %v9311_v13  ;;  %v3495_v27 = vadd.f32 %v3463_v41, %v3427_v12  ;;  %v3667_v36 = vmul.f32 %v9920_v63, %v9314_v9  ;;  %v3668_v57 = vmul.f32 %v9924_v25, %v9314_v9 }
 0x39c   : > { %v3735_v38 = vmul.f32 %v9928_v22, %v9339_v5  ;;  %v3806_v33 = vadd.f32 %v9358_v24, %v3766_v35  ;;  %vm3837_vm10 = vcmp.gt.f32.partialorder %v3805_v52, 0.0  ;;  %v3869_v37 = vmul.f32 0.1, %v3805_v52 }
 0x39d   : > { %v3496_v58 = vadd.f32 %v3464_v30, %v3428_v26  ;;  %v3563_v40 = vadd.f32 %v3531_v6, %v3495_v27  ;;  %v3736_v16 = vmul.f32 %v9933_v11, %v9339_v5  ;;  %v3193_v49 = vmul.f32 %v9860_v60, %v9283_v32  ;;  %v9962_v30 = vld [vmem:[#allocation2 + $0x1e7] sm:$0xff]  ;;  %v9966_v6 = vld [vmem:[#allocation2 + $0x1ef] sm:$0xff] }
 0x39e   : > { %v3194_v46 = vmul.f32 %v9864_v18, %v9283_v32  ;;  %vm3838_vm11 = vcmp.gt.f32.partialorder %v3806_v33, 0.0  ;;  %v3870_v50 = vmul.f32 0.1, %v3806_v33  ;;  %v3901_v20 = vsel %vm3837_vm10, %v3805_v52, %v3869_v37 }
 0x39f   : > { %v3564_v8 = vadd.f32 %v3532_v0, %v3496_v58  ;;  %v3631_v24 = vadd.f32 %v3599_v56, %v3563_v40  ;;  %v3261_v55 = vmul.f32 %v9868_v59, %v9289_v10  ;;  %v3262_v23 = vmul.f32 %v9872_v34, %v9289_v10  ;;  %v9970_v56 = vld [vmem:[#allocation8 + $0x2] ss:$0 sm:$0xff] }
 0x3a0   : > { %v3329_v14 = vmul.f32 %v9876_v43, %v9292_v28  ;;  %v3902_v61 = vsel %vm3838_vm11, %v3806_v33, %v3870_v50  ;;  %v3330_v60 = vmul.f32 %v9882_v44, %v9292_v28  ;;  %v3397_v18 = vmul.f32 %v9911_v53, %v9295_v45  ;;  %v9982_v33 = vld [vmem:[#allocation2 + $0x1e9] sm:$0xff]  ;;  %v9986_v58 = vld [vmem:[#allocation2 + $0x1f1] sm:$0xff] }
 0x3a1   : > { %v3632_v42 = vadd.f32 %v3600_v4, %v3564_v8  ;;  %v3922_v3 = vpack.c.bf16 %v3902_v61, %v3901_v20  ;;  %v3699_v39 = vadd.f32 %v3667_v36, %v3631_v24  ;;  %v3293_v1 = vadd.f32 %v3261_v55, %v3193_v49  ;;  %v9973_v4 = vld [vmem:[#allocation2 + $0x1e8] sm:$0xff] }
 0x3a2   : > { %v3294_v62 = vadd.f32 %v3262_v23, %v3194_v46  ;;  %v3398_v59 = vmul.f32 %v9916_v21, %v9295_v45  ;;  %v3465_v34 = vmul.f32 %v9920_v63, %v9305_v47  ;;  %v3466_v43 = vmul.f32 %v9924_v25, %v9305_v47 }
 0x3a3   : > { %v3700_v54 = vadd.f32 %v3668_v57, %v3632_v42  ;;  %6178 = vmatmul.mubr.msk.bf16.gmra.mrb[56].mxu1 %vm384_vm0, %v3922_v3  ;;  %v3767_v44 = vadd.f32 %v3735_v38, %v3699_v39  ;;  %v3361_v29 = vadd.f32 %v3329_v14, %v3293_v1  ;;  %v3533_v17 = vmul.f32 %v9928_v22, %v9308_v51  ;;  %v9978_v57 = vld [vmem:[#allocation2 + $0x1f0] sm:$0xff] }
 0x3a4   : > { %v3362_v41 = vadd.f32 %v3330_v60, %v3294_v62  ;;  %v3534_v2 = vmul.f32 %v9933_v11, %v9308_v51  ;;  %v3601_v12 = vmul.f32 %v9962_v30, %v9311_v13  ;;  %v3602_v0 = vmul.f32 %v9966_v6, %v9311_v13 }
 0x3a5   : > { %v3768_v48 = vadd.f32 %v3736_v16, %v3700_v54  ;;  %v3807_v35 = vadd.f32 %v9970_v56, %v3767_v44  ;;  %v3429_v52 = vadd.f32 %v3397_v18, %v3361_v29  ;;  %v3669_v27 = vmul.f32 %v9973_v4, %v9314_v9 }
 0x3a6   : > { %v3430_v26 = vadd.f32 %v3398_v59, %v3362_v41  ;;  %v3670_v38 = vmul.f32 %v9978_v57, %v9314_v9  ;;  %v3737_v37 = vmul.f32 %v9982_v33, %v9339_v5  ;;  %v3738_v40 = vmul.f32 %v9986_v58, %v9339_v5 }
 0x3a7   : > { %v3808_v36 = vadd.f32 %v9970_v56, %v3768_v48  ;;  %vm3839_vm12 = vcmp.gt.f32.partialorder %v3807_v35, 0.0  ;;  %v3871_v16 = vmul.f32 0.1, %v3807_v35  ;;  %v3497_v49 = vadd.f32 %v3465_v34, %v3429_v52  ;;  %v6587_v48 = vld [vmem:[#allocation2 + $0x207] sm:$0xff] }
 0x3a8   : > { %v3498_v46 = vadd.f32 %v3466_v43, %v3430_v26  ;;  %v3195_v20 = vmul.f32 %v9911_v53, %v9283_v32  ;;  %v3196_v8 = vmul.f32 %v9916_v21, %v9283_v32  ;;  %v3263_v14 = vmul.f32 %v9920_v63, %v9289_v10  ;;  %v6588_v26 = vld [vmem:[#allocation2 + $0x20f] sm:$0xff] }
 0x3a9   : > { %vm3840_vm13 = vcmp.gt.f32.partialorder %v3808_v36, 0.0  ;;  %v3872_v50 = vmul.f32 0.1, %v3808_v36  ;;  %v3903_v24 = vsel %vm3839_vm12, %v3807_v35, %v3871_v16  ;;  %v3565_v55 = vadd.f32 %v3533_v17, %v3497_v49  ;;  %v6590_v49 = vld [vmem:[#allocation2 + $0x210] sm:$0xff] }
 0x3aa   : > { %v3566_v23 = vadd.f32 %v3534_v2, %v3498_v46  ;;  %v3264_v42 = vmul.f32 %v9924_v25, %v9289_v10  ;;  %v3331_v60 = vmul.f32 %v9928_v22, %v9292_v28  ;;  %v3332_v18 = vmul.f32 %v9933_v11, %v9292_v28 }
 0x3ab   : > { %v3904_v61 = vsel %vm3840_vm13, %v3808_v36, %v3872_v50  ;;  %v3633_v3 = vadd.f32 %v3601_v12, %v3565_v55  ;;  %v3295_v21 = vadd.f32 %v3263_v14, %v3195_v20  ;;  %v10002_v1 = vpop.f32.mrb[0].mxu1  ;;  %v3399_v63 = vmul.f32 %v9962_v30, %v9295_v45  ;;  %v6591_v50 = vld [vmem:[#allocation2 + $0x209] sm:$0xff] }
 0x3ac   : > { %v3923_v53 = vpack.c.bf16 %v3904_v61, %v3903_v24  ;;  %v3634_v39 = vadd.f32 %v3602_v0, %v3566_v23  ;;  %11266 = vst [vmem:[#allocation24_spill] sm:$0xff] %v10002_v1  ;;  %v3296_v62 = vadd.f32 %v3264_v42, %v3196_v8  ;;  %v3400_v54 = vmul.f32 %v9966_v6, %v9295_v45  ;;  %v6109_v22 = vpop.f32.mrb[1].mxu1 }
 0x3ad   : > { %v3467_v25 = vmul.f32 %v9973_v4, %v9305_v47  ;;  %v3701_v11 = vadd.f32 %v3669_v27, %v3633_v3  ;;  %v3363_v34 = vadd.f32 %v3331_v60, %v3295_v21  ;;  %v3468_v43 = vmul.f32 %v9978_v57, %v9305_v47  ;;  %v1905_v44 = vpop.f32.mrb[2].mxu1 }
 0x3ae   : > { %6181 = vmatprep.mubr.msk.bf16.mxu1 %vm384_vm0, %v3923_v53  ;;  %v3702_v59 = vadd.f32 %v3670_v38, %v3634_v39  ;;  %v3364_v29 = vadd.f32 %v3332_v18, %v3296_v62  ;;  %v3535_v41 = vmul.f32 %v9982_v33, %v9308_v51  ;;  %v3536_v17 = vmul.f32 %v9986_v58, %v9308_v51  ;;  %v6110_v12 = vpop.f32.mrb[3].mxu1  ;;  %v6589_v38 = vld [vmem:[#allocation2 + $0x208] sm:$0xff] }
 0x3af   : > { %v3603_v2 = vmul.f32 %v6587_v48, %v9311_v13  ;;  %v3769_v0 = vadd.f32 %v3737_v37, %v3701_v11  ;;  %v3431_v52 = vadd.f32 %v3399_v63, %v3363_v34  ;;  %v3604_v27 = vmul.f32 %v6588_v26, %v9311_v13 }
 0x3b0   : > { %v3770_v35 = vadd.f32 %v3738_v40, %v3702_v59  ;;  %v3432_v36 = vadd.f32 %v3400_v54, %v3364_v29  ;;  %v3671_v16 = vmul.f32 %v6589_v38, %v9314_v9  ;;  %v3672_v46 = vmul.f32 %v6590_v49, %v9314_v9  ;;  %v6592_v40 = vld [vmem:[#allocation2 + $0x211] sm:$0xff] }
 0x3b1   : > { %v3739_v20 = vmul.f32 %v6591_v50, %v9339_v5  ;;  %v3809_v8 = vadd.f32 %v9970_v56, %v3769_v0  ;;  %v3499_v37 = vadd.f32 %v3467_v25, %v3431_v52  ;;  %v3740_v55 = vmul.f32 %v6592_v40, %v9339_v5  ;;  %v6593_v52 = vld [vmem:[#allocation2 + $0x227] sm:$0xff] }
 0x3b2   : > { %v3810_v24 = vadd.f32 %v9970_v56, %v3770_v35  ;;  %v3500_v23 = vadd.f32 %v3468_v43, %v3432_v36  ;;  %v3197_v14 = vmul.f32 %v9962_v30, %v9283_v32  ;;  %v3198_v61 = vmul.f32 %v9966_v6, %v9283_v32  ;;  %v10043_v35 = vld [vmem:[#allocation11 + $0x1] ss:$0 sm:$0xff] }
 0x3b3   : > { %v3265_v42 = vmul.f32 %v9973_v4, %v9289_v10  ;;  %vm3841_vm14 = vcmp.gt.f32.partialorder %v3809_v8, 0.0  ;;  %v3873_v60 = vmul.f32 0.1, %v3809_v8  ;;  %v3567_v53 = vadd.f32 %v3535_v41, %v3499_v37  ;;  %v6117_v62 = vpop.f32.mrb[4].mxu1 }
 0x3b4   : > { %vm3842_vm15 = vcmp.gt.f32.partialorder %v3810_v24, 0.0  ;;  %v3874_v18 = vmul.f32 0.1, %v3810_v24  ;;  %v3568_v3 = vadd.f32 %v3536_v17, %v3500_v23  ;;  %v3266_v39 = vmul.f32 %v9978_v57, %v9289_v10  ;;  %v2783_v6 = vpop.f32.mrb[5].mxu1 }
 0x3b5   : > { %v3297_v21 = vadd.f32 %v3265_v42, %v3197_v14  ;;  %v3905_v63 = vsel %vm3841_vm14, %v3809_v8, %v3873_v60  ;;  %v3333_v30 = vmul.f32 %v9982_v33, %v9292_v28  ;;  %v3334_v32 = vmul.f32 %v9986_v58, %v9292_v28  ;;  %v6118_v59 = vpop.f32.mrb[6].mxu1  ;;  %v6597_v42 = vld [vmem:[#allocation2 + $0x229] sm:$0xff] }
 0x3b6   : > { %v3906_v54 = vsel %vm3842_vm15, %v3810_v24, %v3874_v18  ;;  %v3635_v25 = vadd.f32 %v3603_v2, %v3567_v53  ;;  %v3636_v22 = vadd.f32 %v3604_v27, %v3568_v3  ;;  %v3298_v11 = vadd.f32 %v3266_v39, %v3198_v61  ;;  %v2786_v44 = vpop.f32.mrb[7].mxu1  ;;  %v6594_v27 = vld [vmem:[#allocation2 + $0x22f] sm:$0xff] }
 0x3b7   : > { %v3924_v4 = vpack.c.bf16 %v3906_v54, %v3905_v63  ;;  %v3365_v34 = vadd.f32 %v3333_v30, %v3297_v21  ;;  %v3401_v43 = vmul.f32 %v6587_v48, %v9295_v45  ;;  %v3402_v10 = vmul.f32 %v6588_v26, %v9295_v45  ;;  %v6596_v24 = vld [vmem:[#allocation2 + $0x230] sm:$0xff] }
 0x3b8   : > { %v3469_v57 = vmul.f32 %v6589_v38, %v9305_v47  ;;  %v3703_v33 = vadd.f32 %v3671_v16, %v3635_v25  ;;  %v3704_v29 = vadd.f32 %v3672_v46, %v3636_v22  ;;  %v3366_v41 = vadd.f32 %v3334_v32, %v3298_v11  ;;  %v6595_v46 = vld [vmem:[#allocation2 + $0x228] sm:$0xff]  ;;  %v6598_v18 = vld [vmem:[#allocation2 + $0x231] sm:$0xff] }
 0x3b9   : > { %6182 = vmatmul.mubr.msk.bf16.gmra.mrb[60].mxu1 %vm384_vm0, %v3924_v4  ;;  %v3470_v28 = vmul.f32 %v6590_v49, %v9305_v47  ;;  %v3433_v58 = vadd.f32 %v3401_v43, %v3365_v34  ;;  %v3537_v17 = vmul.f32 %v6591_v50, %v9308_v51  ;;  %v3538_v45 = vmul.f32 %v6592_v40, %v9308_v51 }
 0x3ba   : > { %v3771_v2 = vadd.f32 %v3739_v20, %v3703_v33  ;;  %v3772_v12 = vadd.f32 %v3740_v55, %v3704_v29  ;;  %v3434_v0 = vadd.f32 %v3402_v10, %v3366_v41  ;;  %v3605_v26 = vmul.f32 %v6593_v52, %v9311_v13 }
 0x3bb   : > { %v3501_v48 = vadd.f32 %v3469_v57, %v3433_v58  ;;  %v3606_v36 = vmul.f32 %v6594_v27, %v9311_v13  ;;  %v3673_v50 = vmul.f32 %v6595_v46, %v9314_v9  ;;  %v3674_v51 = vmul.f32 %v6596_v24, %v9314_v9 }
 0x3bc   : > { %v6121_v38 = vpop.f32.mrb[8].mxu1  ;;  %v3811_v47 = vadd.f32 %v9970_v56, %v3771_v2  ;;  %v3812_v16 = vadd.f32 %v9970_v56, %v3772_v12  ;;  %v3502_v49 = vadd.f32 %v3470_v28, %v3434_v0  ;;  %v2792_v37 = vadd.f32 %v6117_v62, %v10043_v35 }
 0x3bd   : > { %v2799_v20 = vpop.f32.mrb[9].mxu1  ;;  %v3569_v8 = vadd.f32 %v3537_v17, %v3501_v48  ;;  %v2784_v40 = vadd.f32 %v10043_v35, %v2783_v6  ;;  %v3741_v60 = vmul.f32 %v6597_v42, %v9339_v5  ;;  %v3742_v53 = vmul.f32 %v6598_v18, %v9339_v5 }
 0x3be   : > { %v6122_v55 = vpop.f32.mrb[10].mxu1  ;;  %vm3843_vm2 = vcmp.gt.f32.partialorder %v3811_v47, 0.0  ;;  %vm3844_vm4 = vcmp.gt.f32.partialorder %v3812_v16, 0.0  ;;  %v3875_v13 = vmul.f32 0.1, %v3811_v47  ;;  %v3570_v14 = vadd.f32 %v3538_v45, %v3502_v49 }
 0x3bf   : > { %v3876_v23 = vmul.f32 0.1, %v3812_v16  ;;  %v3637_v61 = vadd.f32 %v3605_v26, %v3569_v8  ;;  %v2802_v3 = vpop.f32.mrb[11].mxu1  ;;  %vm2910_vm5 = vcmp.gt.f32.partialorder %v2784_v40, 0.0  ;;  %v2942_v21 = vmul.f32 0.1, %v2784_v40 }
 0x3c0   : > { %v3907_v39 = vsel %vm3843_vm2, %v3811_v47, %v3875_v13  ;;  %v3638_v63 = vadd.f32 %v3606_v36, %v3570_v14  ;;  %v2944_v30 = vmul.f32 0.1, %v2792_v37  ;;  %vm2912_vm6 = vcmp.gt.f32.partialorder %v2792_v37, 0.0 }
 0x3c1   : > { %v3908_v9 = vsel %vm3844_vm4, %v3812_v16, %v3876_v23  ;;  %v3705_v54 = vadd.f32 %v3673_v50, %v3637_v61  ;;  %v2795_v32 = vadd.f32 %v6118_v59, %v10043_v35  ;;  %v2787_v6 = vadd.f32 %v10043_v35, %v2786_v44 }
 0x3c2   : > { %v3925_v62 = vpack.c.bf16 %v3908_v9, %v3907_v39  ;;  %v3706_v4 = vadd.f32 %v3674_v51, %v3638_v63  ;;  %v2974_v22 = vsel %vm2910_vm5, %v2784_v40, %v2942_v21  ;;  %v2976_v57 = vsel %vm2912_vm6, %v2792_v37, %v2944_v30 }
 0x3c3   : > { %v3773_v25 = vadd.f32 %v3741_v60, %v3705_v54  ;;  %vm2913_vm7 = vcmp.gt.f32.partialorder %v2795_v32, 0.0  ;;  %v2945_v11 = vmul.f32 0.1, %v2795_v32  ;;  %vm2911_vm9 = vcmp.gt.f32.partialorder %v2787_v6, 0.0 }
 0x3c4   : > { %6185 = vmatprep.mubr.msk.bf16.mxu1 %vm384_vm0, %v3925_v62  ;;  %v6125_v5 = vpop.f32.mrb[12].mxu1  ;;  %v2943_v34 = vmul.f32 0.1, %v2787_v6  ;;  %v3774_v43 = vadd.f32 %v3742_v53, %v3706_v4  ;;  %v3006_v29 = vsel %vm1757_vm8, %v2974_v22, 0.0  ;;  %v2808_v44 = vadd.f32 %v6121_v38, %v10043_v35 }
 0x3c5   : > { %v3813_v10 = vadd.f32 %v9970_v56, %v3773_v25  ;;  %v2815_v33 = vpop.f32.mrb[13].mxu1  ;;  %v2800_v41 = vadd.f32 %v10043_v35, %v2799_v20  ;;  %v2977_v2 = vsel %vm2913_vm7, %v2795_v32, %v2945_v11  ;;  %v2811_v45 = vadd.f32 %v6122_v55, %v10043_v35 }
 0x3c6   : > { %v2975_v59 = vsel %vm2911_vm9, %v2787_v6, %v2943_v34  ;;  %v6126_v28 = vpop.f32.mrb[14].mxu1  ;;  %v3814_v58 = vadd.f32 %v9970_v56, %v3774_v43  ;;  %v3009_v36 = vsel %vm1757_vm8, %v2976_v57, 0.0  ;;  %vm2916_vm13 = vcmp.gt.f32.partialorder %v2808_v44, 0.0 }
 0x3c7   : > { %vm3845_vm10 = vcmp.gt.f32.partialorder %v3813_v10, 0.0  ;;  %v3877_v17 = vmul.f32 0.1, %v3813_v10  ;;  %v2818_v12 = vpop.f32.mrb[15].mxu1  ;;  %v3007_v0 = vsel %vm1757_vm8, %v2975_v59, 0.0  ;;  %vm2914_vm11 = vcmp.gt.f32.partialorder %v2800_v41, 0.0 }
 0x3c8   : > { %v2946_v48 = vmul.f32 0.1, %v2800_v41  ;;  %vm3846_vm12 = vcmp.gt.f32.partialorder %v3814_v58, 0.0  ;;  %v3878_v52 = vmul.f32 0.1, %v3814_v58  ;;  %v3008_v27 = vadd.f32 %v3007_v0, %v3006_v29 }
 0x3c9   : > { %v3909_v26 = vsel %vm3845_vm10, %v3813_v10, %v3877_v17  ;;  %v2948_v38 = vmul.f32 0.1, %v2808_v44  ;;  %v3011_v16 = vsel %vm1757_vm8, %v2977_v2, 0.0  ;;  %v2803_v46 = vadd.f32 %v10043_v35, %v2802_v3 }
 0x3ca   : > { %v2978_v56 = vsel %vm2914_vm11, %v2800_v41, %v2946_v48  ;;  %v3910_v47 = vsel %vm3846_vm12, %v3814_v58, %v3878_v52  ;;  %v3010_v49 = vadd.f32 %v3009_v36, %v3008_v27  ;;  %v2949_v24 = vmul.f32 0.1, %v2811_v45 }
 0x3cb   : > { %v3926_v20 = vpack.c.bf16 %v3910_v47, %v3909_v26  ;;  %v3013_v8 = vsel %vm1757_vm8, %v2978_v56, 0.0  ;;  %v2816_v51 = vadd.f32 %v10043_v35, %v2815_v33  ;;  %vm2917_vm14 = vcmp.gt.f32.partialorder %v2811_v45, 0.0 }
 0x3cc   : > { %v6129_v50 = vpop.f32.mrb[16].mxu1  ;;  %v3012_v40 = vadd.f32 %v3011_v16, %v3010_v49  ;;  %vm2915_vm15 = vcmp.gt.f32.partialorder %v2803_v46, 0.0  ;;  %v2947_v55 = vmul.f32 0.1, %v2803_v46  ;;  %v2980_v23 = vsel %vm2916_vm13, %v2808_v44, %v2948_v38 }
 0x3cd   : > { %v2831_v37 = vpop.f32.mrb[17].mxu1  ;;  %6186 = vmatmul.mubr.msk.bf16.gmra.mrb[64].mxu1 %vm384_vm0, %v3926_v20  ;;  %vm2918_vm2 = vcmp.gt.f32.partialorder %v2816_v51, 0.0  ;;  %v2950_v14 = vmul.f32 0.1, %v2816_v51  ;;  %v2824_v60 = vadd.f32 %v6125_v5, %v10043_v35  ;;  %v2819_v18 = vadd.f32 %v10043_v35, %v2818_v12 }
 0x3ce   : > { %v6130_v13 = vpop.f32.mrb[18].mxu1  ;;  %v3014_v61 = vadd.f32 %v3013_v8, %v3012_v40  ;;  %v2979_v42 = vsel %vm2915_vm15, %v2803_v46, %v2947_v55  ;;  %6233 = vmatprep.mubr.msk.bf16.mxu1 %vm6999_vm3, %v11257_v31  ;;  %v2981_v3 = vsel %vm2917_vm14, %v2811_v45, %v2949_v24  ;;  %v2827_v62 = vadd.f32 %v6126_v28, %v10043_v35 }
 0x3cf   : > { %v2834_v53 = vpop.f32.mrb[19].mxu1  ;;  %v3015_v39 = vsel %vm1757_vm8, %v2979_v42, 0.0  ;;  %v2982_v21 = vsel %vm2918_vm2, %v2816_v51, %v2950_v14  ;;  %v3017_v63 = vsel %vm1757_vm8, %v2980_v23, 0.0  ;;  %vm2919_vm4 = vcmp.gt.f32.partialorder %v2819_v18, 0.0 }
 0x3d0   : > { %v3016_v9 = vadd.f32 %v3015_v39, %v3014_v61  ;;  %v2951_v54 = vmul.f32 0.1, %v2819_v18  ;;  %v3019_v30 = vsel %vm1757_vm8, %v2981_v3, 0.0  ;;  %v2952_v6 = vmul.f32 0.1, %v2824_v60 }
 0x3d1   : > { %v2832_v4 = vadd.f32 %v10043_v35, %v2831_v37  ;;  %vm2920_vm5 = vcmp.gt.f32.partialorder %v2824_v60, 0.0  ;;  %v3021_v22 = vsel %vm1757_vm8, %v2982_v21, 0.0  ;;  %v2835_v11 = vadd.f32 %v10043_v35, %v2834_v53 }
 0x3d2   : > { %v3018_v32 = vadd.f32 %v3017_v63, %v3016_v9  ;;  %v2983_v5 = vsel %vm2919_vm4, %v2819_v18, %v2951_v54  ;;  %v2953_v10 = vmul.f32 0.1, %v2827_v62  ;;  %vm2921_vm6 = vcmp.gt.f32.partialorder %v2827_v62, 0.0 }
 0x3d3   : > { %v3023_v33 = vsel %vm1757_vm8, %v2983_v5, 0.0  ;;  %vm2922_vm7 = vcmp.gt.f32.partialorder %v2832_v4, 0.0  ;;  %v2954_v29 = vmul.f32 0.1, %v2832_v4  ;;  %v2984_v44 = vsel %vm2920_vm5, %v2824_v60, %v2952_v6 }
 0x3d4   : > { %v6133_v25 = vpop.f32.mrb[20].mxu1  ;;  %v3020_v43 = vadd.f32 %v3019_v30, %v3018_v32  ;;  %v2840_v28 = vadd.f32 %v6129_v50, %v10043_v35  ;;  %v2955_v58 = vmul.f32 0.1, %v2835_v11  ;;  %v2843_v17 = vadd.f32 %v6130_v13, %v10043_v35 }
 0x3d5   : > { %v2847_v34 = vpop.f32.mrb[21].mxu1  ;;  %vm2923_vm9 = vcmp.gt.f32.partialorder %v2835_v11, 0.0  ;;  %v2985_v2 = vsel %vm2921_vm6, %v2827_v62, %v2953_v10  ;;  %v2986_v0 = vsel %vm2922_vm7, %v2832_v4, %v2954_v29  ;;  %v3025_v45 = vsel %vm1757_vm8, %v2984_v44, 0.0 }
 0x3d6   : > { %v6134_v57 = vpop.f32.mrb[22].mxu1  ;;  %v3022_v41 = vadd.f32 %v3021_v22, %v3020_v43  ;;  %v2848_v48 = vadd.f32 %v10043_v35, %v2847_v34  ;;  %v2956_v26 = vmul.f32 0.1, %v2840_v28  ;;  %v2987_v27 = vsel %vm2923_vm9, %v2835_v11, %v2955_v58 }
 0x3d7   : > { %v2850_v59 = vpop.f32.mrb[23].mxu1  ;;  %v3027_v38 = vsel %vm1757_vm8, %v2985_v2, 0.0  ;;  %vm2924_vm10 = vcmp.gt.f32.partialorder %v2840_v28, 0.0  ;;  %v3029_v56 = vsel %vm1757_vm8, %v2986_v0, 0.0  ;;  %v2957_v46 = vmul.f32 0.1, %v2843_v17 }
 0x3d8   : > { %v3024_v12 = vadd.f32 %v3023_v33, %v3022_v41  ;;  %v2851_v47 = vadd.f32 %v10043_v35, %v2850_v59  ;;  %v2958_v50 = vmul.f32 0.1, %v2848_v48  ;;  %vm2925_vm11 = vcmp.gt.f32.partialorder %v2843_v17, 0.0 }
 0x3d9   : > { %v3031_v8 = vsel %vm1757_vm8, %v2987_v27, 0.0  ;;  %vm2926_vm12 = vcmp.gt.f32.partialorder %v2848_v48, 0.0  ;;  %v2988_v51 = vsel %vm2924_vm10, %v2840_v28, %v2956_v26  ;;  %v2856_v40 = vadd.f32 %v6133_v25, %v10043_v35 }
 0x3da   : > { %v3026_v52 = vadd.f32 %v3025_v45, %v3024_v12  ;;  %v2959_v55 = vmul.f32 0.1, %v2851_v47  ;;  %v2859_v13 = vadd.f32 %v6134_v57, %v10043_v35  ;;  %vm2927_vm13 = vcmp.gt.f32.partialorder %v2851_v47, 0.0 }
 0x3db   : > { %v2989_v23 = vsel %vm2925_vm11, %v2843_v17, %v2957_v46  ;;  %v2990_v61 = vsel %vm2926_vm12, %v2848_v48, %v2958_v50  ;;  %v3033_v60 = vsel %vm1757_vm8, %v2988_v51, 0.0  ;;  %v2960_v53 = vmul.f32 0.1, %v2856_v40 }
 0x3dc   : > { %v6137_v36 = vpop.f32.mrb[24].mxu1  ;;  %v3028_v49 = vadd.f32 %v3027_v38, %v3026_v52  ;;  %v2991_v3 = vsel %vm2927_vm13, %v2851_v47, %v2959_v55  ;;  %v3035_v21 = vsel %vm1757_vm8, %v2989_v23, 0.0  ;;  %vm2928_vm14 = vcmp.gt.f32.partialorder %v2856_v40, 0.0 }
 0x3dd   : > { %v2863_v16 = vpop.f32.mrb[25].mxu1  ;;  %v3037_v62 = vsel %vm1757_vm8, %v2990_v61, 0.0  ;;  %v2961_v63 = vmul.f32 0.1, %v2859_v13  ;;  %vm2929_vm15 = vcmp.gt.f32.partialorder %v2859_v13, 0.0  ;;  %v3039_v4 = vsel %vm1757_vm8, %v2991_v3, 0.0 }
 0x3de   : > { %v6138_v20 = vpop.f32.mrb[26].mxu1  ;;  %v3030_v37 = vadd.f32 %v3029_v56, %v3028_v49  ;;  %v2864_v42 = vadd.f32 %v10043_v35, %v2863_v16  ;;  %v2992_v22 = vsel %vm2928_vm14, %v2856_v40, %v2960_v53  ;;  %v2872_v11 = vadd.f32 %v6137_v36, %v10043_v35 }
 0x3df   : > { %v2866_v24 = vpop.f32.mrb[27].mxu1  ;;  %v2993_v43 = vsel %vm2929_vm15, %v2859_v13, %v2961_v63  ;;  %v2875_v33 = vadd.f32 %v6138_v20, %v10043_v35  ;;  %v3041_v59 = vsel %vm1757_vm8, %v2992_v22, 0.0 }
 0x3e0   : > { %v3032_v14 = vadd.f32 %v3031_v8, %v3030_v37  ;;  %v2867_v39 = vadd.f32 %v10043_v35, %v2866_v24  ;;  %v2962_v32 = vmul.f32 0.1, %v2864_v42  ;;  %vm2930_vm2 = vcmp.gt.f32.partialorder %v2864_v42, 0.0 }
 0x3e1   : > { %v2964_v41 = vmul.f32 0.1, %v2872_v11  ;;  %v3043_v17 = vsel %vm1757_vm8, %v2993_v43, 0.0  ;;  %vm2932_vm5 = vcmp.gt.f32.partialorder %v2872_v11, 0.0  ;;  %v2965_v0 = vmul.f32 0.1, %v2875_v33 }
 0x3e2   : > { %v3034_v18 = vadd.f32 %v3033_v60, %v3032_v14  ;;  %v2963_v34 = vmul.f32 0.1, %v2867_v39  ;;  %vm2931_vm4 = vcmp.gt.f32.partialorder %v2867_v39, 0.0  ;;  %v2994_v57 = vsel %vm2930_vm2, %v2864_v42, %v2962_v32 }
 0x3e3   : > { %v3045_v2 = vsel %vm1757_vm8, %v2994_v57, 0.0  ;;  %vm2933_vm6 = vcmp.gt.f32.partialorder %v2875_v33, 0.0  ;;  %v2996_v52 = vsel %vm2932_vm5, %v2872_v11, %v2964_v41  ;;  %v10126_v41 = vld [vmem:[#allocation11 + $0x2] ss:$0 sm:$0xff] }
 0x3e4   : > { %v6141_v9 = vpop.f32.mrb[28].mxu1  ;;  %v3036_v30 = vadd.f32 %v3035_v21, %v3034_v18  ;;  %v2995_v28 = vsel %vm2931_vm4, %v2867_v39, %v2963_v34  ;;  %v2997_v38 = vsel %vm2933_vm6, %v2875_v33, %v2965_v0  ;;  %v3049_v49 = vsel %vm1757_vm8, %v2996_v52, 0.0 }
 0x3e5   : > { %v2879_v54 = vpop.f32.mrb[29].mxu1  ;;  %v3047_v45 = vsel %vm1757_vm8, %v2995_v28, 0.0  ;;  %v2888_v27 = vadd.f32 %v6141_v9, %v10043_v35  ;;  %v3051_v51 = vsel %vm1757_vm8, %v2997_v38, 0.0 }
 0x3e6   : > { %v6142_v6 = vpop.f32.mrb[30].mxu1  ;;  %v3038_v5 = vadd.f32 %v3037_v62, %v3036_v30  ;;  %v2880_v29 = vadd.f32 %v10043_v35, %v2879_v54 }
 0x3e7   : > { %v2882_v25 = vpop.f32.mrb[31].mxu1  ;;  %v2891_v16 = vadd.f32 %v6142_v6, %v10043_v35  ;;  %v2968_v20 = vmul.f32 0.1, %v2888_v27  ;;  %vm2936_vm10 = vcmp.gt.f32.partialorder %v2888_v27, 0.0 }
 0x3e8   : > { %v3040_v10 = vadd.f32 %v3039_v4, %v3038_v5  ;;  %v2883_v58 = vadd.f32 %v10043_v35, %v2882_v25  ;;  %v2966_v48 = vmul.f32 0.1, %v2880_v29  ;;  %vm2934_vm7 = vcmp.gt.f32.partialorder %v2880_v29, 0.0 }
 0x3e9   : > { %vm2937_vm11 = vcmp.gt.f32.partialorder %v2891_v16, 0.0  ;;  %v2969_v23 = vmul.f32 0.1, %v2891_v16  ;;  %v3000_v18 = vsel %vm2936_vm10, %v2888_v27, %v2968_v20 }
 0x3ea   : > { %v3042_v44 = vadd.f32 %v3041_v59, %v3040_v10  ;;  %v2967_v36 = vmul.f32 0.1, %v2883_v58  ;;  %vm2935_vm9 = vcmp.gt.f32.partialorder %v2883_v58, 0.0  ;;  %v2998_v47 = vsel %vm2934_vm7, %v2880_v29, %v2966_v48 }
 0x3eb   : > { %v3053_v37 = vsel %vm1757_vm8, %v2998_v47, 0.0  ;;  %v3001_v9 = vsel %vm2937_vm11, %v2891_v16, %v2969_v23  ;;  %v3057_v54 = vsel %vm1757_vm8, %v3000_v18, 0.0 }
 0x3ec   : > { %v3044_v12 = vadd.f32 %v3043_v17, %v3042_v44  ;;  %v2999_v8 = vsel %vm2935_vm9, %v2883_v58, %v2967_v36  ;;  %v3059_v4 = vsel %vm1757_vm8, %v3001_v9, 0.0 }
 0x3ed   : > { %v3055_v61 = vsel %vm1757_vm8, %v2999_v8, 0.0 }
 0x3ee   : > { %v3046_v26 = vadd.f32 %v3045_v2, %v3044_v12 }
 0x3f0   : > { %v3048_v56 = vadd.f32 %v3047_v45, %v3046_v26 }
 0x3f2   : > { %v3050_v50 = vadd.f32 %v3049_v49, %v3048_v56 }
 0x3f3   : > { %v6145_v46 = vpop.f32.mrb[32].mxu1 }
 0x3f4   : > { %v2895_v24 = vpop.f32.mrb[33].mxu1  ;;  %v3052_v13 = vadd.f32 %v3051_v51, %v3050_v50  ;;  %v2904_v3 = vadd.f32 %v6145_v46, %v10043_v35 }
 0x3f5   : > { %v2896_v40 = vadd.f32 %v10043_v35, %v2895_v24  ;;  %v6146_v55 = vpop.f32.mrb[34].mxu1 }
 0x3f6   : > { %v2898_v14 = vpop.f32.mrb[35].mxu1  ;;  %v3054_v53 = vadd.f32 %v3053_v37, %v3052_v13  ;;  %v2907_v63 = vadd.f32 %v6146_v55, %v10043_v35  ;;  %v2972_v32 = vmul.f32 0.1, %v2904_v3  ;;  %vm2940_vm14 = vcmp.gt.f32.partialorder %v2904_v3, 0.0 }
 0x3f7   : > { %vm2938_vm12 = vcmp.gt.f32.partialorder %v2896_v40, 0.0  ;;  %v2970_v42 = vmul.f32 0.1, %v2896_v40  ;;  %v2899_v60 = vadd.f32 %v10043_v35, %v2898_v14 }
 0x3f8   : > { %v3056_v21 = vadd.f32 %v3055_v61, %v3054_v53  ;;  %v2973_v5 = vmul.f32 0.1, %v2907_v63  ;;  %vm2941_vm15 = vcmp.gt.f32.partialorder %v2907_v63, 0.0  ;;  %v3004_v34 = vsel %vm2940_vm14, %v2904_v3, %v2972_v32 }
 0x3f9   : > { %vm2939_vm13 = vcmp.gt.f32.partialorder %v2899_v60, 0.0  ;;  %v2971_v39 = vmul.f32 0.1, %v2899_v60  ;;  %v3002_v62 = vsel %vm2938_vm12, %v2896_v40, %v2970_v42  ;;  %v3065_v35 = vsel %vm1757_vm8, %v3004_v34, 0.0 }
 0x3fa   : > { %v3058_v30 = vadd.f32 %v3057_v54, %v3056_v21  ;;  %v3061_v25 = vsel %vm1757_vm8, %v3002_v62, 0.0  ;;  %v3005_v10 = vsel %vm2941_vm15, %v2907_v63, %v2973_v5 }
 0x3fb   : > { %v3003_v6 = vsel %vm2939_vm13, %v2899_v60, %v2971_v39  ;;  %v3067_v29 = vsel %vm1757_vm8, %v3005_v10, 0.0 }
 0x3fc   : > { %v3060_v22 = vadd.f32 %v3059_v4, %v3058_v30  ;;  %v3063_v11 = vsel %vm1757_vm8, %v3003_v6, 0.0 }
 0x3fe   : > { %v3062_v43 = vadd.f32 %v3061_v25, %v3060_v22 }
 0x400   : > { %v3064_v57 = vadd.f32 %v3063_v11, %v3062_v43 }
 0x402   : > { %v3066_v33 = vadd.f32 %v3065_v35, %v3064_v57 }
 0x404   : > { %v3068_v59 = vadd.f32 %v3067_v29, %v3066_v33 }
 0x406   : > { %v3069_v44 = vrot.slane %v3068_v59, 4 }
 0x408   : > { %v3070_v28 = vadd.f32 %v3069_v44, %v3068_v59 }
 0x40a   : > { %v3071_v17 = vrot.slane %v3070_v28, 2 }
 0x40b   : > { %v6159_v58 = vpop.f32.mrb[36].mxu1 }
 0x40c   : > { %v4043_v2 = vadd.f32 %v6159_v58, %v10126_v41  ;;  %v4034_v12 = vpop.f32.mrb[37].mxu1  ;;  %v3072_v45 = vadd.f32 %v3071_v17, %v3070_v28  ;;  %v6358_v17 = vld [vmem:[#allocation12 + $0x8] sm:$0xff]  }
 0x40d   : > { %v4035_v0 = vadd.f32 %v10126_v41, %v4034_v12  ;;  %v6160_v48 = vpop.f32.mrb[38].mxu1  ;;  %6148 = vmatpush3.bf16.msra.mxu0 %v6358_v17 }
 0x40e   : > { %v4046_v52 = vadd.f32 %v6160_v48, %v10126_v41  ;;  %v4037_v26 = vpop.f32.mrb[39].mxu1  ;;  %v4195_v27 = vmul.f32 0.1, %v4043_v2  ;;  %v3073_v56 = vrot.slane %v3072_v45, 1  ;;  %vm4163_vm4 = vcmp.gt.f32.partialorder %v4043_v2, 0.0  ;;  %6189 = vmatprep.subr.bf16.mxu0 %v11257_v31 }
 0x40f   : > { %vm4161_vm2 = vcmp.gt.f32.partialorder %v4035_v0, 0.0  ;;  %v4193_v36 = vmul.f32 0.1, %v4035_v0  ;;  %v4038_v38 = vadd.f32 %v10126_v41, %v4037_v26 }
 0x410   : > { %v4196_v16 = vmul.f32 0.1, %v4046_v52  ;;  %v3074_v46 = vadd.f32 %v3073_v56, %v3072_v45  ;;  %vm4164_vm6 = vcmp.gt.f32.partialorder %v4046_v52, 0.0  ;;  %v4227_v50 = vsel %vm4163_vm4, %v4043_v2, %v4195_v27 }
 0x411   : > { %v4225_v47 = vsel %vm4161_vm2, %v4035_v0, %v4193_v36  ;;  %vm4162_vm5 = vcmp.gt.f32.partialorder %v4038_v38, 0.0  ;;  %v4194_v49 = vmul.f32 0.1, %v4038_v38  ;;  %v4260_v13 = vsel %vm1757_vm8, %v4227_v50, 0.0 }
 0x412   : > { %v10132_v8 = vmul.f32 0.00390625, %v3074_v46  ;;  %v4257_v24 = vsel %vm1757_vm8, %v4225_v47, 0.0  ;;  %v4228_v37 = vsel %vm4164_vm6, %v4046_v52, %v4196_v16 }
 0x413   : > { %v4226_v20 = vsel %vm4162_vm5, %v4038_v38, %v4194_v49  ;;  %v4262_v61 = vsel %vm1757_vm8, %v4228_v37, 0.0 }
 0x414   : > { %v4258_v51 = vsel %vm1757_vm8, %v4226_v20, 0.0  ;;  %v10137_v55 = vmul.f32 0.70710677, %v10132_v8 }
 0x415   : > { %v4259_v40 = vadd.f32 %v4258_v51, %v4257_v24 }
 0x416   : > { %v3080_v14 = vand.u32 2147483647, %v10137_v55  ;;  %vm3078_vm13 = vcmp.ge.f32.partialorder %v10137_v55, 0.0 }
 0x417   : > { %v4261_v23 = vadd.f32 %v4260_v13, %v4259_v40 }
 0x418   : > { %v3081_v60 = vmul.f32 0.3275911, %v3080_v14  ;;  %v3093_v62 = vsub.f32 0.0, %v3080_v14 }
 0x419   : > { %v4263_v42 = vadd.f32 %v4262_v61, %v4261_v23 }
 0x41a   : > { %v3082_v18 = vadd.f32 1.0, %v3081_v60  ;;  %v3094_v11 = vmul.f32 %v3093_v62, %v3080_v14 }
 0x41c   : > { %6367 = vrcp.f32 %v3082_v18  ;;  %v3095_v28 = vmul.f32 1.442695, %v3094_v11 }
 0x41e   : > { %6369 = vpow2.f32 %v3095_v28 }
 0x420   : > { %v6163_v53 = vpop.f32.mrb[40].mxu1 }
 0x421   : > { %v4059_v3 = vadd.f32 %v6163_v53, %v10126_v41  ;;  %v4050_v39 = vpop.f32.mrb[41].mxu1 }
 0x422   : > { %v4051_v9 = vadd.f32 %v10126_v41, %v4050_v39  ;;  %v6164_v21 = vpop.f32.mrb[42].mxu1  ;;  %v11267_v39 = vmov -1.0  }
 0x423   : > { %v4062_v63 = vadd.f32 %v6164_v21, %v10126_v41  ;;  %v4053_v54 = vpop.f32.mrb[43].mxu1  ;;  %v4199_v30 = vmul.f32 0.1, %v4059_v3  ;;  %vm4167_vm9 = vcmp.gt.f32.partialorder %v4059_v3, 0.0 }
 0x424   : > { %vm4165_vm7 = vcmp.gt.f32.partialorder %v4051_v9, 0.0  ;;  %v4197_v32 = vmul.f32 0.1, %v4051_v9  ;;  %v4054_v6 = vadd.f32 %v10126_v41, %v4053_v54  ;;  %v3076_v54 = vmul.f32 0.5, %v10132_v8 }
 0x425   : > { %v4200_v25 = vmul.f32 0.1, %v4062_v63  ;;  %vm4168_vm11 = vcmp.gt.f32.partialorder %v4062_v63, 0.0  ;;  %v4231_v43 = vsel %vm4167_vm9, %v4059_v3, %v4199_v30 }
 0x426   : > { %v4229_v4 = vsel %vm4165_vm7, %v4051_v9, %v4197_v32  ;;  %vm4166_vm10 = vcmp.gt.f32.partialorder %v4054_v6, 0.0  ;;  %v4198_v22 = vmul.f32 0.1, %v4054_v6  ;;  %v6368_v5 = vpop.eup %6367  ;;  %v4268_v58 = vsel %vm1757_vm8, %v4231_v43, 0.0 }
 0x427   : > { %v4264_v34 = vsel %vm1757_vm8, %v4229_v4, 0.0  ;;  %v3084_v35 = vmul.f32 1.0614054, %v6368_v5  ;;  %v4232_v29 = vsel %vm4168_vm11, %v4062_v63, %v4200_v25  ;;  %v3079_v9 = vsel %vm3078_vm13, 1.0, %v11267_v39 }
 0x428   : > { %v4265_v10 = vadd.f32 %v4264_v34, %v4263_v42  ;;  %v4230_v57 = vsel %vm4166_vm10, %v4054_v6, %v4198_v22  ;;  %v4270_v0 = vsel %vm1757_vm8, %v4232_v29, 0.0  ;;  %v6370_v24 = vpop.eup %6369  ;;  %v6360_v34 = vld [vmem:[#allocation9 + $0x30] sm:$0xff]  }
 0x429   : > { %v4266_v33 = vsel %vm1757_vm8, %v4230_v57, 0.0  ;;  %v3085_v44 = vadd.f32 -1.4531521, %v3084_v35 }
 0x42a   : > { %v4267_v59 = vadd.f32 %v4266_v33, %v4265_v10 }
 0x42b   : > { %v3086_v12 = vmul.f32 %v6368_v5, %v3085_v44 }
 0x42c   : > { %v4269_v2 = vadd.f32 %v4268_v58, %v4267_v59 }
 0x42d   : > { %v3087_v45 = vadd.f32 1.4214138, %v3086_v12 }
 0x42e   : > { %v4271_v48 = vadd.f32 %v4270_v0, %v4269_v2 }
 0x42f   : > { %v3088_v52 = vmul.f32 %v6368_v5, %v3087_v45 }
 0x431   : > { %v3089_v26 = vadd.f32 -0.28449672, %v3088_v52 }
 0x433   : > { %v3090_v27 = vmul.f32 %v6368_v5, %v3089_v26 }
 0x435   : > { %v3091_v47 = vadd.f32 0.2548296, %v3090_v27 }
 0x436   : > { %v6167_v36 = vpop.f32.mrb[44].mxu1 }
 0x437   : > { %v4075_v38 = vadd.f32 %v6167_v36, %v10126_v41  ;;  %v4066_v56 = vpop.f32.mrb[45].mxu1  ;;  %v3092_v20 = vmul.f32 %v6368_v5, %v3091_v47  ;;  %v6359_v5 = vld [vmem:[#allocation12 + $0x10] sm:$0xff]   ;;  %v4411_v47 = vld [vmem:[#allocation6 + $0x24] sm:$0x7] }
 0x438   : > { %v4067_v16 = vadd.f32 %v10126_v41, %v4066_v56  ;;  %v6168_v49 = vpop.f32.mrb[46].mxu1 }
 0x439   : > { %v4078_v46 = vadd.f32 %v6168_v49, %v10126_v41  ;;  %v4069_v50 = vpop.f32.mrb[47].mxu1  ;;  %v4203_v51 = vmul.f32 0.1, %v4075_v38  ;;  %vm4171_vm14 = vcmp.gt.f32.partialorder %v4075_v38, 0.0  ;;  %v3097_v13 = vmul.f32 %v6370_v24, %v3092_v20  ;;  %v6600_v20 = vld [vmem:[#allocation2 + $0xf] sm:$0xff] }
 0x43a   : > { %vm4169_vm12 = vcmp.gt.f32.partialorder %v4067_v16, 0.0  ;;  %v4201_v37 = vmul.f32 0.1, %v4067_v16  ;;  %v4070_v40 = vadd.f32 %v10126_v41, %v4069_v50  ;;  %v10177_v49 = vrot.slane %v4411_v47, %v11264_v19 }
 0x43b   : > { %v4204_v14 = vmul.f32 0.1, %v4078_v46  ;;  %vm4172_vm2 = vcmp.gt.f32.partialorder %v4078_v46, 0.0  ;;  %v3098_v60 = vsub.f32 1.0, %v3097_v13  ;;  %v4235_v18 = vsel %vm4171_vm14, %v4075_v38, %v4203_v51  ;;  %v6601_v51 = vld [vmem:[#allocation2 + $0x8] sm:$0xff] }
 0x43c   : > { %v4233_v23 = vsel %vm4169_vm12, %v4067_v16, %v4201_v37  ;;  %vm4170_vm15 = vcmp.gt.f32.partialorder %v4070_v40, 0.0  ;;  %v4202_v61 = vmul.f32 0.1, %v4070_v40  ;;  %v4276_v30 = vsel %vm1757_vm8, %v4235_v18, 0.0 }
 0x43d   : > { %v4272_v42 = vsel %vm1757_vm8, %v4233_v23, 0.0  ;;  %v3099_v62 = vmul.f32 %v3098_v60, %v3079_v9  ;;  %v4236_v63 = vsel %vm4172_vm2, %v4078_v46, %v4204_v14  ;;  %v10174_v16 = vrot.slane %v4411_v47, %v11263_v15  ;;  %v6599_v46 = vld [vmem:[#allocation2 + $0x7] sm:$0xff]  ;;  %v6604_v60 = vld [vmem:[#allocation2 + $0x2f] sm:$0xff] }
 0x43e   : > { %v4273_v53 = vadd.f32 %v4272_v42, %v4271_v48  ;;  %v4234_v3 = vsel %vm4170_vm15, %v4070_v40, %v4202_v61  ;;  %v4278_v4 = vsel %vm1757_vm8, %v4236_v63, 0.0  ;;  %v4486_v37 = vmul.f32 %v6601_v51, %v10177_v49  ;;  %v6602_v40 = vld [vmem:[#allocation2 + $0x10] sm:$0xff]  ;;  %v4412_v23 = vld [vmem:[#allocation6 + $0x28] sm:$0x7] }
 0x43f   : > { %v4274_v21 = vsel %vm1757_vm8, %v4234_v3, 0.0  ;;  %v3100_v32 = vadd.f32 1.0, %v3099_v62  ;;  %v4418_v50 = vmul.f32 %v6599_v46, %v10174_v16  ;;  %v4419_v24 = vmul.f32 %v6600_v20, %v10174_v16  ;;  %v6603_v61 = vld [vmem:[#allocation2 + $0x27] sm:$0xff] }
 0x440   : > { %v4275_v55 = vadd.f32 %v4274_v21, %v4273_v53  ;;  %v4487_v13 = vmul.f32 %v6602_v40, %v10177_v49  ;;  %v10184_v14 = vrot.slane %v4411_v47, %v11265_v7  ;;  %v4420_v42 = vmul.f32 %v6603_v61, %v10174_v16  ;;  %v6605_v62 = vld [vmem:[#allocation2 + $0x28] sm:$0xff] }
 0x441   : > { %v3101_v25 = vmul.f32 %v3100_v32, %v3076_v54  ;;  %v10188_v18 = vmul.f32 %v6604_v60, %v10174_v16  ;;  %v4518_v3 = vadd.f32 %v4486_v37, %v4418_v50  ;;  %v10191_v21 = vrot.slane %v4412_v23, %v11263_v15 }
 0x442   : > { %v4277_v6 = vadd.f32 %v4276_v30, %v4275_v55  ;;  %v4519_v9 = vadd.f32 %v4487_v13, %v4419_v24  ;;  %v4488_v63 = vmul.f32 %v6605_v62, %v10177_v49  ;;  %v6606_v30 = vld [vmem:[#allocation2 + $0x9] sm:$0xff]  ;;  %v10212_v20 = vrot.slane %v4412_v23, %v11265_v7 }
 0x443   : > { %v3102_v11 = vpack.c.bf16 %v3101_v25, %v3101_v25  ;;  %v4554_v32 = vmul.f32 %v6606_v30, %v10184_v14  ;;  %v6608_v25 = vld [vmem:[#allocation2 + $0x30] sm:$0xff] }
 0x444   : > { %v4279_v22 = vadd.f32 %v4278_v4, %v4277_v6  ;;  %v6607_v6 = vld [vmem:[#allocation2 + $0x11] sm:$0xff]  ;;  %v6609_v13 = vld [vmem:[#allocation2 + $0x29] sm:$0xff] }
 0x445   : > { %6150 = vmatmul.mubr.msk.bf16.vlgmr.msra.gmra.mrb[32].mxu0 %vm1757_vm8, %v3102_v11  ;;  %v4555_v4 = vmul.f32 %v6607_v6, %v10184_v14 }
 0x446   : > { %6190 = vmatpush3.bf16.msra.mxu0 %v6359_v5  ;;  %6191 = vmatprep.mubr.msk.bf16.mxu0 %vm6999_vm3, %v11257_v31 }
 0x447   : > { %6195 = vmatprep.subr.bf16.mxu0 %v6360_v34  ;;  %v4622_v34 = vmul.f32 %v6603_v61, %v10191_v21  ;;  %v4758_v61 = vmul.f32 %v6609_v13, %v10212_v20 }
 0x44b   : > { %v6171_v43 = vpop.f32.mrb[48].mxu1 }
 0x44c   : > { %v4091_v8 = vadd.f32 %v6171_v43, %v10126_v41  ;;  %v4082_v10 = vpop.f32.mrb[49].mxu1  ;;  %v4623_v43 = vmul.f32 %v6604_v60, %v10191_v21 }
 0x44d   : > { %v4083_v57 = vadd.f32 %v10126_v41, %v4082_v10  ;;  %v6172_v35 = vpop.f32.mrb[50].mxu1 }
 0x44e   : > { %v4094_v33 = vadd.f32 %v6172_v35, %v10126_v41  ;;  %v4085_v29 = vpop.f32.mrb[51].mxu1  ;;  %v4207_v59 = vmul.f32 0.1, %v4091_v8  ;;  %vm4175_vm5 = vcmp.gt.f32.partialorder %v4091_v8, 0.0 }
 0x44f   : > { %vm4173_vm4 = vcmp.gt.f32.partialorder %v4083_v57, 0.0  ;;  %v4205_v44 = vmul.f32 0.1, %v4083_v57  ;;  %v4086_v28 = vadd.f32 %v10126_v41, %v4085_v29 }
 0x450   : > { %v4208_v17 = vmul.f32 0.1, %v4094_v33  ;;  %vm4176_vm6 = vcmp.gt.f32.partialorder %v4094_v33, 0.0  ;;  %v4239_v12 = vsel %vm4175_vm5, %v4091_v8, %v4207_v59  ;;  %v10202_v8 = vrot.slane %v4412_v23, %v11264_v19 }
 0x451   : > { %v4237_v58 = vsel %vm4173_vm4, %v4083_v57, %v4205_v44  ;;  %vm4174_vm3 = vcmp.gt.f32.partialorder %v4086_v28, 0.0  ;;  %v4206_v31 = vmul.f32 0.1, %v4086_v28  ;;  %v4284_v27 = vsel %vm1757_vm8, %v4239_v12, 0.0  ;;  %v4413_v12 = vld [vmem:[#allocation6 + $0x2c] sm:$0x7] }
 0x452   : > { %v4280_v2 = vsel %vm1757_vm8, %v4237_v58, 0.0  ;;  %v4240_v52 = vsel %vm4176_vm6, %v4094_v33, %v4208_v17  ;;  %v4586_v33 = vadd.f32 %v4554_v32, %v4518_v3  ;;  %v4587_v44 = vadd.f32 %v4555_v4, %v4519_v9  ;;  %v6612_v3 = vld [vmem:[#allocation2 + $0x4f] sm:$0xff] }
 0x453   : > { %v4281_v0 = vadd.f32 %v4280_v2, %v4279_v22  ;;  %v4238_v48 = vsel %vm4174_vm3, %v4086_v28, %v4206_v31  ;;  %v4286_v38 = vsel %vm1757_vm8, %v4240_v52, 0.0  ;;  %v4489_v22 = vmul.f32 %v6608_v25, %v10177_v49  ;;  %v6615_v32 = vld [vmem:[#allocation2 + $0x49] sm:$0xff] }
 0x454   : > { %v4282_v45 = vsel %vm1757_vm8, %v4238_v48, 0.0  ;;  %v4654_v17 = vadd.f32 %v4622_v34, %v4586_v33  ;;  %v4655_v52 = vadd.f32 %v4623_v43, %v4587_v44  ;;  %v4691_v47 = vmul.f32 %v6608_v25, %v10202_v8 }
 0x455   : > { %v4283_v26 = vadd.f32 %v4282_v45, %v4281_v0  ;;  %v4520_v0 = vadd.f32 %v4488_v63, %v4420_v42  ;;  %v10215_v24 = vrot.slane %v4413_v12, %v11263_v15  ;;  %v10218_v40 = vrot.slane %v4413_v12, %v11264_v19  ;;  %v6610_v42 = vld [vmem:[#allocation2 + $0x31] sm:$0xff]  ;;  %v6613_v19 = vld [vmem:[#allocation2 + $0x48] sm:$0xff] }
 0x456   : > { %v4723_v37 = vadd.f32 %v4691_v47, %v4655_v52  ;;  %v4759_v60 = vmul.f32 %v6610_v42, %v10212_v20  ;;  %v4521_v4 = vadd.f32 %v4489_v22, %v10188_v18  ;;  %v4625_v33 = vmul.f32 %v6612_v3, %v10191_v21  ;;  %v10261_v47 = vld [vmem:[#allocation2 + $0x70] sm:$0xff] }
 0x457   : > { %v4285_v36 = vadd.f32 %v4284_v27, %v4283_v26  ;;  %v4690_v26 = vmul.f32 %v6605_v62, %v10202_v8  ;;  %v4827_v15 = vmul.f32 %v6612_v3, %v10215_v24  ;;  %v4894_v63 = vmul.f32 %v6613_v19, %v10218_v40 }
 0x458   : > { %v4791_v30 = vadd.f32 %v4759_v60, %v4723_v37  ;;  %v4692_v18 = vmul.f32 %v6613_v19, %v10202_v8  ;;  %v10265_v37 = vld [vmem:[#allocation2 + $0x69] sm:$0xff] }
 0x459   : > { %v4287_v56 = vadd.f32 %v4286_v38, %v4285_v36  ;;  %v4722_v50 = vadd.f32 %v4690_v26, %v4654_v17 }
 0x461   : > { %v6175_v53 = vpop.f32.mrb[52].mxu1 }
 0x462   : > { %v4107_v55 = vadd.f32 %v6175_v53, %v10126_v41  ;;  %v4098_v54 = vpop.f32.mrb[53].mxu1  ;;  %v6611_v53 = vld [vmem:[#allocation2 + $0x47] sm:$0xff] }
 0x463   : > { %v4099_v5 = vadd.f32 %v10126_v41, %v4098_v54  ;;  %v6176_v11 = vpop.f32.mrb[54].mxu1  ;;  %v4826_v23 = vmul.f32 %v6611_v53, %v10215_v24  ;;  %v4790_v54 = vadd.f32 %v4758_v61, %v4722_v50  ;;  %v4624_v34 = vmul.f32 %v6611_v53, %v10191_v21  ;;  %v10269_v61 = vld [vmem:[#allocation2 + $0x71] sm:$0xff] }
 0x464   : > { %vm4179_vm7 = vcmp.gt.f32.partialorder %v4107_v55, 0.0  ;;  %v4211_v10 = vmul.f32 0.1, %v4107_v55  ;;  %v4110_v57 = vadd.f32 %v6176_v11, %v10126_v41  ;;  %v4101_v35 = vpop.f32.mrb[55].mxu1  ;;  %v4557_v11 = vmul.f32 %v6610_v42, %v10184_v14 }
 0x465   : > { %vm4177_vm9 = vcmp.gt.f32.partialorder %v4099_v5, 0.0  ;;  %v4209_v29 = vmul.f32 0.1, %v4099_v5  ;;  %v4102_v59 = vadd.f32 %v10126_v41, %v4101_v35  ;;  %v4858_v43 = vadd.f32 %v4826_v23, %v4790_v54 }
 0x466   : > { %v4243_v28 = vsel %vm4179_vm7, %v4107_v55, %v4211_v10  ;;  %vm4180_vm10 = vcmp.gt.f32.partialorder %v4110_v57, 0.0  ;;  %v4212_v58 = vmul.f32 0.1, %v4110_v57  ;;  %v4859_v10 = vadd.f32 %v4827_v15, %v4791_v30 }
 0x467   : > { %v4241_v31 = vsel %vm4177_vm9, %v4099_v5, %v4209_v29  ;;  %vm4178_vm11 = vcmp.gt.f32.partialorder %v4102_v59, 0.0  ;;  %v4210_v2 = vmul.f32 0.1, %v4102_v59  ;;  %v4292_v48 = vsel %vm1757_vm8, %v4243_v28, 0.0 }
 0x468   : > { %v4288_v45 = vsel %vm1757_vm8, %v4241_v31, 0.0  ;;  %v4244_v36 = vsel %vm4180_vm10, %v4110_v57, %v4212_v58  ;;  %v4556_v5 = vmul.f32 %v6609_v13, %v10184_v14  ;;  %v10237_v57 = vld [vmem:[#allocation2 + $0x51] sm:$0xff]  ;;  %v4926_v44 = vadd.f32 %v4894_v63, %v4858_v43 }
 0x469   : > { %v4289_v27 = vadd.f32 %v4288_v45, %v4287_v56  ;;  %v4242_v38 = vsel %vm4178_vm11, %v4102_v59, %v4210_v2  ;;  %v10221_v56 = vrot.slane %v4413_v12, %v11265_v7  ;;  %v4294_v9 = vsel %vm1757_vm8, %v4244_v36, 0.0  ;;  %v6614_v7 = vld [vmem:[#allocation2 + $0x50] sm:$0xff]  ;;  %v10257_v36 = vld [vmem:[#allocation2 + $0x68] sm:$0xff] }
 0x46a   : > { %v4290_v46 = vsel %vm1757_vm8, %v4242_v38, 0.0  ;;  %v4895_v55 = vmul.f32 %v6614_v7, %v10218_v40  ;;  %v4588_v29 = vadd.f32 %v4556_v5, %v4520_v0  ;;  %v4589_v59 = vadd.f32 %v4557_v11, %v4521_v4  ;;  %v10247_v31 = vld [vmem:[#allocation8 + $0x3] ss:$0 sm:$0xff] }
 0x46b   : > { %v4291_v51 = vadd.f32 %v4290_v46, %v4289_v27  ;;  %v4962_v6 = vmul.f32 %v6615_v32, %v10221_v56  ;;  %v4963_v35 = vmul.f32 %v10237_v57, %v10221_v56  ;;  %v4693_v22 = vmul.f32 %v6614_v7, %v10202_v8  ;;  %v10253_v45 = vld [vmem:[#allocation2 + $0x6f] sm:$0xff] }
 0x46c   : > { %v4927_v28 = vadd.f32 %v4895_v55, %v4859_v10  ;;  %v4760_v58 = vmul.f32 %v6615_v32, %v10212_v20  ;;  %v4761_v17 = vmul.f32 %v10237_v57, %v10212_v20  ;;  %v4656_v2 = vadd.f32 %v4624_v34, %v4588_v29 }
 0x46d   : > { %v4293_v62 = vadd.f32 %v4292_v48, %v4291_v51  ;;  %v4657_v12 = vadd.f32 %v4625_v33, %v4589_v59  ;;  %v10249_v48 = vld [vmem:[#allocation2 + $0x67] sm:$0xff]  ;;  %v4829_v52 = vmul.f32 %v10253_v45, %v10215_v24  ;;  %v4994_v26 = vadd.f32 %v4962_v6, %v4926_v44 }
 0x46e   : > { %v4828_v0 = vmul.f32 %v10249_v48, %v10215_v24  ;;  %v4995_v27 = vadd.f32 %v4963_v35, %v4927_v28  ;;  %v4896_v38 = vmul.f32 %v10257_v36, %v10218_v40  ;;  %v4897_v46 = vmul.f32 %v10261_v47, %v10218_v40 }
 0x46f   : > { %v10232_v25 = vadd.f32 %v4294_v9, %v4293_v62  ;;  %v4724_v50 = vadd.f32 %v4692_v18, %v4656_v2  ;;  %v4725_v51 = vadd.f32 %v4693_v22, %v4657_v12  ;;  %v4964_v13 = vmul.f32 %v10265_v37, %v10221_v56 }
 0x470   : > { %v4965_v42 = vmul.f32 %v10269_v61, %v10221_v56  ;;  %v5034_v60 = vadd.f32 %v10247_v31, %v4994_v26  ;;  %v5035_v23 = vadd.f32 %v10247_v31, %v4995_v27  ;;  %v4422_v15 = vmul.f32 %v6611_v53, %v10174_v16 }
 0x471   : > { %v4423_v9 = vmul.f32 %v6612_v3, %v10174_v16  ;;  %v4792_v63 = vadd.f32 %v4760_v58, %v4724_v50  ;;  %v4793_v55 = vadd.f32 %v4761_v17, %v4725_v51  ;;  %v4490_v54 = vmul.f32 %v6613_v19, %v10177_v49 }
 0x472   : > { %v4491_v30 = vmul.f32 %v6614_v7, %v10177_v49  ;;  %vm5066_vm12 = vcmp.gt.f32.partialorder %v5034_v60, 0.0  ;;  %v5098_v5 = vmul.f32 0.1, %v5034_v60  ;;  %v4558_v11 = vmul.f32 %v6615_v32, %v10184_v14 }
 0x473   : > { %vm5067_vm13 = vcmp.gt.f32.partialorder %v5035_v23, 0.0  ;;  %v5099_v53 = vmul.f32 0.1, %v5035_v23  ;;  %v4860_v3 = vadd.f32 %v4828_v0, %v4792_v63  ;;  %v4861_v33 = vadd.f32 %v4829_v52, %v4793_v55 }
 0x474   : > { %v10285_v59 = vsel %vm5066_vm12, %v5034_v60, %v5098_v5  ;;  %v4522_v50 = vadd.f32 %v4490_v54, %v4422_v15  ;;  %v4559_v55 = vmul.f32 %v10237_v57, %v10184_v14  ;;  %v4627_v15 = vmul.f32 %v10253_v45, %v10191_v21 }
 0x475   : > { %v10287_v22 = vsel %vm5067_vm13, %v5035_v23, %v5099_v53  ;;  %v4928_v12 = vadd.f32 %v4896_v38, %v4860_v3  ;;  %v4929_v0 = vadd.f32 %v4897_v46, %v4861_v33  ;;  %v4626_v38 = vmul.f32 %v10249_v48, %v10191_v21  ;;  %v10694_v33 = vld [vmem:[#allocation2 + $0x151] sm:$0xff] }
 0x476   : > { %v6179_v62 = vpop.f32.mrb[56].mxu1  ;;  %v4695_v57 = vmul.f32 %v10261_v47, %v10202_v8 }
 0x477   : > { %v4123_v6 = vadd.f32 %v6179_v62, %v10126_v41  ;;  %v4114_v4 = vpop.f32.mrb[57].mxu1  ;;  %v4996_v60 = vadd.f32 %v4964_v13, %v4928_v12  ;;  %v4997_v23 = vadd.f32 %v4965_v42, %v4929_v0  ;;  %v4523_v62 = vadd.f32 %v4491_v30, %v4423_v9  ;;  %v10336_v12 = vld [vmem:[#allocation2 + $0x89] sm:$0xff] }
 0x478   : > { %v4115_v34 = vadd.f32 %v10126_v41, %v4114_v4  ;;  %v6180_v43 = vpop.f32.mrb[58].mxu1  ;;  %v4694_v13 = vmul.f32 %v10257_v36, %v10202_v8  ;;  %v4966_v0 = vmul.f32 %v10336_v12, %v10221_v56 }
 0x479   : > { %vm4183_vm14 = vcmp.gt.f32.partialorder %v4123_v6, 0.0  ;;  %v4215_v10 = vmul.f32 0.1, %v4123_v6  ;;  %v4126_v35 = vadd.f32 %v6180_v43, %v10126_v41  ;;  %v4117_v19 = vpop.f32.mrb[59].mxu1  ;;  %v5036_v46 = vadd.f32 %v10247_v31, %v4996_v60 }
 0x47a   : > { %vm4181_vm15 = vcmp.gt.f32.partialorder %v4115_v34, 0.0  ;;  %v4213_v7 = vmul.f32 0.1, %v4115_v34  ;;  %v4118_v29 = vadd.f32 %v10126_v41, %v4117_v19  ;;  %v4591_v9 = vadd.f32 %v4559_v55, %v4523_v62 }
 0x47b   : > { %v4247_v32 = vsel %vm4183_vm14, %v4123_v6, %v4215_v10  ;;  %vm4184_vm2 = vcmp.gt.f32.partialorder %v4126_v35, 0.0  ;;  %v4216_v18 = vmul.f32 0.1, %v4126_v35  ;;  %v4590_v6 = vadd.f32 %v4558_v11, %v4522_v50 }
 0x47c   : > { %v4300_v44 = vsel %vm1757_vm8, %v4247_v32, 0.0  ;;  %v4245_v28 = vsel %vm4181_vm15, %v4115_v34, %v4213_v7  ;;  %vm4182_vm4 = vcmp.gt.f32.partialorder %v4118_v29, 0.0  ;;  %v4214_v58 = vmul.f32 0.1, %v4118_v29  ;;  %v10322_v32 = vld [vmem:[#allocation2 + $0x8f] sm:$0xff] }
 0x47d   : > { %v4296_v17 = vsel %vm1757_vm8, %v4245_v28, 0.0  ;;  %v4248_v2 = vsel %vm4184_vm2, %v4126_v35, %v4216_v18  ;;  %v4658_v54 = vadd.f32 %v4626_v38, %v4590_v6  ;;  %vm5068_vm5 = vcmp.gt.f32.partialorder %v5036_v46, 0.0  ;;  %v10316_v35 = vld [vmem:[#allocation2 + $0x87] sm:$0xff]  ;;  %v10352_v6 = vld [vmem:[#allocation2 + $0x91] sm:$0xff] }
 0x47e   : > { %v4297_v52 = vadd.f32 %v4296_v17, %v10232_v25  ;;  %v4302_v26 = vsel %vm1757_vm8, %v4248_v2, 0.0  ;;  %v4246_v27 = vsel %vm4182_vm4, %v4118_v29, %v4214_v58  ;;  %v5037_v25 = vadd.f32 %v10247_v31, %v4997_v23  ;;  %v10328_v28 = vld [vmem:[#allocation2 + $0x88] sm:$0xff]  ;;  %v10332_v17 = vld [vmem:[#allocation2 + $0x90] sm:$0xff] }
 0x47f   : > { %v4298_v51 = vsel %vm1757_vm8, %v4246_v27, 0.0  ;;  %v5100_v30 = vmul.f32 0.1, %v5036_v46  ;;  %v4659_v11 = vadd.f32 %v4627_v15, %v4591_v9  ;;  %v4726_v34 = vadd.f32 %v4694_v13, %v4658_v54 }
 0x480   : > { %v4299_v63 = vadd.f32 %v4298_v51, %v4297_v52  ;;  %vm5069_vm3 = vcmp.gt.f32.partialorder %v5037_v25, 0.0  ;;  %v5101_v4 = vmul.f32 0.1, %v5037_v25  ;;  %v4762_v43 = vmul.f32 %v10265_v37, %v10212_v20 }
 0x481   : > { %v10310_v53 = vsel %vm5068_vm5, %v5036_v46, %v5100_v30  ;;  %v4763_v10 = vmul.f32 %v10269_v61, %v10212_v20  ;;  %v4830_v19 = vmul.f32 %v10316_v35, %v10215_v24  ;;  %v4727_v7 = vadd.f32 %v4695_v57, %v4659_v11 }
 0x482   : > { %v4301_v42 = vadd.f32 %v4300_v44, %v4299_v63  ;;  %v10312_v3 = vsel %vm5069_vm3, %v5037_v25, %v5101_v4  ;;  %v4794_v29 = vadd.f32 %v4762_v43, %v4726_v34  ;;  %v4831_v18 = vmul.f32 %v10322_v32, %v10215_v24 }
 0x483   : > { %v4898_v58 = vmul.f32 %v10328_v28, %v10218_v40  ;;  %v4899_v2 = vmul.f32 %v10332_v17, %v10218_v40  ;;  %v4795_v52 = vadd.f32 %v4763_v10, %v4727_v7  ;;  %v4424_v27 = vmul.f32 %v10249_v48, %v10174_v16 }
 0x484   : > { %v10306_v5 = vadd.f32 %v4302_v26, %v4301_v42  ;;  %v4862_v26 = vadd.f32 %v4830_v19, %v4794_v29  ;;  %v4425_v50 = vmul.f32 %v10253_v45, %v10174_v16  ;;  %v4492_v51 = vmul.f32 %v10257_v36, %v10177_v49 }
 0x485   : > { %v4493_v60 = vmul.f32 %v10261_v47, %v10177_v49  ;;  %v4560_v23 = vmul.f32 %v10265_v37, %v10184_v14  ;;  %v4561_v62 = vmul.f32 %v10269_v61, %v10184_v14  ;;  %v4863_v63 = vadd.f32 %v4831_v18, %v4795_v52 }
 0x486   : > { %v4930_v55 = vadd.f32 %v4898_v58, %v4862_v26  ;;  %v4967_v48 = vmul.f32 %v10352_v6, %v10221_v56  ;;  %v4628_v45 = vmul.f32 %v10316_v35, %v10191_v21  ;;  %v4524_v38 = vadd.f32 %v4492_v51, %v4424_v27 }
 0x487   : > { %v4525_v46 = vadd.f32 %v4493_v60, %v4425_v50  ;;  %v4629_v47 = vmul.f32 %v10322_v32, %v10191_v21  ;;  %v4696_v37 = vmul.f32 %v10328_v28, %v10202_v8  ;;  %v4931_v15 = vadd.f32 %v4899_v2, %v4863_v63 }
 0x488   : > { %v4998_v13 = vadd.f32 %v4966_v0, %v4930_v55  ;;  %v4697_v42 = vmul.f32 %v10332_v17, %v10202_v8  ;;  %v4592_v57 = vadd.f32 %v4560_v23, %v4524_v38  ;;  %v4764_v4 = vmul.f32 %v10336_v12, %v10212_v20 }
 0x489   : > { %v4593_v30 = vadd.f32 %v4561_v62, %v4525_v46  ;;  %v4999_v10 = vadd.f32 %v4967_v48, %v4931_v15  ;;  %v4765_v26 = vmul.f32 %v10352_v6, %v10212_v20 }
 0x48a   : > { %v5038_v29 = vadd.f32 %v10247_v31, %v4998_v13  ;;  %v4660_v48 = vadd.f32 %v4628_v45, %v4592_v57 }
 0x48b   : > { %v5039_v2 = vadd.f32 %v10247_v31, %v4999_v10 }
 0x48c   : > { %v6183_v36 = vpop.f32.mrb[60].mxu1  ;;  %vm5070_vm11 = vcmp.gt.f32.partialorder %v5038_v29, 0.0  ;;  %v5102_v62 = vmul.f32 0.1, %v5038_v29 }
 0x48d   : > { %v4139_v61 = vadd.f32 %v6183_v36, %v10126_v41  ;;  %v4130_v25 = vpop.f32.mrb[61].mxu1  ;;  %vm5071_vm12 = vcmp.gt.f32.partialorder %v5039_v2, 0.0  ;;  %v5103_v55 = vmul.f32 0.1, %v5039_v2  ;;  %v4661_v36 = vadd.f32 %v4629_v47, %v4593_v30  ;;  %v10389_v47 = vld [vmem:[#allocation2 + $0xb0] sm:$0xff] }
 0x48e   : > { %v4131_v9 = vadd.f32 %v10126_v41, %v4130_v25  ;;  %v6184_v54 = vpop.f32.mrb[62].mxu1  ;;  %v6629_v25 = vld [vmem:[#allocation2 + $0xa7] sm:$0xff]  ;;  %v4901_v57 = vmul.f32 %v10389_v47, %v10218_v40 }
 0x48f   : > { %vm4187_vm6 = vcmp.gt.f32.partialorder %v4139_v61, 0.0  ;;  %v4219_v11 = vmul.f32 0.1, %v4139_v61  ;;  %v4142_v34 = vadd.f32 %v6184_v54, %v10126_v41  ;;  %v4133_v43 = vpop.f32.mrb[63].mxu1  ;;  %v4832_v15 = vmul.f32 %v6629_v25, %v10215_v24  ;;  %v6630_v54 = vld [vmem:[#allocation2 + $0xaf] sm:$0xff] }
 0x490   : > { %vm4185_vm7 = vcmp.gt.f32.partialorder %v4131_v9, 0.0  ;;  %v4217_v19 = vmul.f32 0.1, %v4131_v9  ;;  %v4134_v7 = vadd.f32 %v10126_v41, %v4133_v43  ;;  %v10382_v13 = vsel %vm5071_vm12, %v5039_v2, %v5103_v55  ;;  %v10385_v43 = vld [vmem:[#allocation2 + $0xa8] sm:$0xff] }
 0x491   : > { %v4251_v18 = vsel %vm4187_vm6, %v4139_v61, %v4219_v11  ;;  %vm4188_vm9 = vcmp.gt.f32.partialorder %v4142_v34, 0.0  ;;  %v4220_v58 = vmul.f32 0.1, %v4142_v34  ;;  %v10379_v61 = vsel %vm5070_vm11, %v5038_v29, %v5102_v62  ;;  %v10393_v30 = vld [vmem:[#allocation2 + $0xa9] sm:$0xff] }
 0x492   : > { %v4249_v0 = vsel %vm4185_vm7, %v4131_v9, %v4217_v19  ;;  %vm4186_vm10 = vcmp.gt.f32.partialorder %v4134_v7, 0.0  ;;  %v4218_v52 = vmul.f32 0.1, %v4134_v7  ;;  %v4308_v27 = vsel %vm1757_vm8, %v4251_v18, 0.0  ;;  %v10397_v19 = vld [vmem:[#allocation2 + $0xb1] sm:$0xff] }
 0x493   : > { %v4304_v50 = vsel %vm1757_vm8, %v4249_v0, 0.0  ;;  %v4252_v51 = vsel %vm4188_vm9, %v4142_v34, %v4220_v58  ;;  %v4728_v9 = vadd.f32 %v4696_v37, %v4660_v48  ;;  %v4833_v11 = vmul.f32 %v6630_v54, %v10215_v24 }
 0x494   : > { %v4305_v60 = vadd.f32 %v4304_v50, %v10306_v5  ;;  %v4250_v23 = vsel %vm4186_vm10, %v4134_v7, %v4218_v52  ;;  %v4310_v38 = vsel %vm1757_vm8, %v4252_v51, 0.0  ;;  %v4729_v5 = vadd.f32 %v4697_v42, %v4661_v36 }
 0x495   : > { %v4306_v63 = vsel %vm1757_vm8, %v4250_v23, 0.0  ;;  %v4900_v45 = vmul.f32 %v10385_v43, %v10218_v40  ;;  %v4968_v37 = vmul.f32 %v10393_v30, %v10221_v56  ;;  %v4796_v42 = vadd.f32 %v4764_v4, %v4728_v9 }
 0x496   : > { %v4307_v46 = vadd.f32 %v4306_v63, %v4305_v60  ;;  %v4797_v10 = vadd.f32 %v4765_v26, %v4729_v5  ;;  %v4969_v7 = vmul.f32 %v10397_v19, %v10221_v56  ;;  %v4426_v29 = vmul.f32 %v10316_v35, %v10174_v16  ;;  %v10431_v5 = vld [vmem:[#allocation2 + $0xcf] sm:$0xff] }
 0x497   : > { %v4427_v58 = vmul.f32 %v10322_v32, %v10174_v16  ;;  %v4494_v2 = vmul.f32 %v10328_v28, %v10177_v49  ;;  %v4495_v4 = vmul.f32 %v10332_v17, %v10177_v49  ;;  %v4864_v0 = vadd.f32 %v4832_v15, %v4796_v42  ;;  %v10441_v42 = vld [vmem:[#allocation2 + $0xd0] sm:$0xff] }
 0x498   : > { %v4309_v34 = vadd.f32 %v4308_v27, %v4307_v46  ;;  %v4865_v52 = vadd.f32 %v4833_v11, %v4797_v10  ;;  %v4562_v26 = vmul.f32 %v10336_v12, %v10184_v14  ;;  %v4563_v27 = vmul.f32 %v10352_v6, %v10184_v14 }
 0x499   : > { %v4526_v35 = vadd.f32 %v4494_v2, %v4426_v29  ;;  %v4527_v50 = vadd.f32 %v4495_v4, %v4427_v58  ;;  %v4630_v51 = vmul.f32 %v6629_v25, %v10191_v21  ;;  %v4631_v32 = vmul.f32 %v6630_v54, %v10191_v21 }
 0x49a   : > { %v10403_v18 = vadd.f32 %v4310_v38, %v4309_v34  ;;  %v4932_v60 = vadd.f32 %v4900_v45, %v4864_v0  ;;  %v4933_v23 = vadd.f32 %v4901_v57, %v4865_v52  ;;  %v4698_v17 = vmul.f32 %v10385_v43, %v10202_v8  ;;  %v10427_v38 = vld [vmem:[#allocation2 + $0xc7] sm:$0xff]  ;;  %v10449_v0 = vld [vmem:[#allocation2 + $0xd1] sm:$0xff] }
 0x49b   : > { %v4594_v62 = vadd.f32 %v4562_v26, %v4526_v35  ;;  %v4595_v63 = vadd.f32 %v4563_v27, %v4527_v50  ;;  %v4699_v12 = vmul.f32 %v10389_v47, %v10202_v8  ;;  %v4766_v6 = vmul.f32 %v10393_v30, %v10212_v20  ;;  %v10435_v34 = vld [vmem:[#allocation2 + $0xc8] sm:$0xff] }
 0x49c   : > { %v5000_v55 = vadd.f32 %v4968_v37, %v4932_v60  ;;  %v5001_v48 = vadd.f32 %v4969_v7, %v4933_v23  ;;  %v4767_v36 = vmul.f32 %v10397_v19, %v10212_v20  ;;  %v4834_v46 = vmul.f32 %v10427_v38, %v10215_v24  ;;  %v10445_v7 = vld [vmem:[#allocation2 + $0xc9] sm:$0xff] }
 0x49d   : > { %v4662_v15 = vadd.f32 %v4630_v51, %v4594_v62  ;;  %v4663_v9 = vadd.f32 %v4631_v32, %v4595_v63  ;;  %v4835_v11 = vmul.f32 %v10431_v5, %v10215_v24  ;;  %v4902_v45 = vmul.f32 %v10435_v34, %v10218_v40 }
 0x49e   : > { %v5040_v57 = vadd.f32 %v10247_v31, %v5000_v55  ;;  %v5041_v37 = vadd.f32 %v10247_v31, %v5001_v48  ;;  %v4903_v10 = vmul.f32 %v10441_v42, %v10218_v40  ;;  %v4970_v29 = vmul.f32 %v10445_v7, %v10221_v56 }
 0x49f   : > { %v4730_v2 = vadd.f32 %v4698_v17, %v4662_v15  ;;  %v4731_v4 = vadd.f32 %v4699_v12, %v4663_v9  ;;  %v4971_v52 = vmul.f32 %v10449_v0, %v10221_v56  ;;  %v4428_v26 = vmul.f32 %v6629_v25, %v10174_v16 }
 0x4a0   : > { %v6187_v58 = vpop.f32.mrb[64].mxu1  ;;  %vm5072_vm13 = vcmp.gt.f32.partialorder %v5040_v57, 0.0  ;;  %v5104_v50 = vmul.f32 0.1, %v5040_v57  ;;  %v4429_v51 = vmul.f32 %v6630_v54, %v10174_v16  ;;  %vm5073_vm14 = vcmp.gt.f32.partialorder %v5041_v37, 0.0 }
 0x4a1   : > { %v4155_v27 = vadd.f32 %v6187_v58, %v10126_v41  ;;  %v4146_v35 = vpop.f32.mrb[65].mxu1  ;;  %v5105_v23 = vmul.f32 0.1, %v5041_v37  ;;  %v4798_v17 = vadd.f32 %v4766_v6, %v4730_v2  ;;  %v4799_v55 = vadd.f32 %v4767_v36, %v4731_v4 }
 0x4a2   : > { %v4147_v32 = vadd.f32 %v10126_v41, %v4146_v35  ;;  %v6188_v60 = vpop.f32.mrb[66].mxu1  ;;  %v10460_v15 = vsel %vm5072_vm13, %v5040_v57, %v5104_v50 }
 0x4a3   : > { %vm4191_vm15 = vcmp.gt.f32.partialorder %v4155_v27, 0.0  ;;  %v4223_v62 = vmul.f32 0.1, %v4155_v27  ;;  %v4158_v63 = vadd.f32 %v6188_v60, %v10126_v41  ;;  %v4149_v12 = vpop.f32.mrb[67].mxu1  ;;  %v10462_v58 = vsel %vm5073_vm14, %v5041_v37, %v5105_v23 }
 0x4a4   : > { %vm4189_vm2 = vcmp.gt.f32.partialorder %v4147_v32, 0.0  ;;  %v4221_v25 = vmul.f32 0.1, %v4147_v32  ;;  %v4150_v48 = vadd.f32 %v10126_v41, %v4149_v12  ;;  %v4866_v4 = vadd.f32 %v4834_v46, %v4798_v17 }
 0x4a5   : > { %v4255_v54 = vsel %vm4191_vm15, %v4155_v27, %v4223_v62  ;;  %vm4192_vm4 = vcmp.gt.f32.partialorder %v4158_v63, 0.0  ;;  %v4224_v9 = vmul.f32 0.1, %v4158_v63  ;;  %v4867_v28 = vadd.f32 %v4835_v11, %v4799_v55 }
 0x4a6   : > { %v4316_v6 = vsel %vm1757_vm8, %v4255_v54, 0.0  ;;  %v4253_v2 = vsel %vm4189_vm2, %v4147_v32, %v4221_v25  ;;  %vm4190_vm5 = vcmp.gt.f32.partialorder %v4150_v48, 0.0  ;;  %v4222_v35 = vmul.f32 0.1, %v4150_v48 }
 0x4a7   : > { %v4312_v60 = vsel %vm1757_vm8, %v4253_v2, 0.0  ;;  %v4256_v36 = vsel %vm4192_vm4, %v4158_v63, %v4224_v9  ;;  %v4496_v27 = vmul.f32 %v10385_v43, %v10177_v49  ;;  %v4934_v23 = vadd.f32 %v4902_v45, %v4866_v4 }
 0x4a8   : > { %v4313_v41 = vadd.f32 %v4312_v60, %v10403_v18  ;;  %v4318_v57 = vsel %vm1757_vm8, %v4256_v36, 0.0  ;;  %v4254_v50 = vsel %vm4190_vm5, %v4150_v48, %v4222_v35  ;;  %v4935_v62 = vadd.f32 %v4903_v10, %v4867_v28  ;;  %v10491_v60 = vld [vmem:[#allocation2 + $0xe7] sm:$0xff] }
 0x4a9   : > { %v4314_v37 = vsel %vm1757_vm8, %v4254_v50, 0.0  ;;  %v4497_v32 = vmul.f32 %v10389_v47, %v10177_v49  ;;  %v4528_v25 = vadd.f32 %v4496_v27, %v4428_v26  ;;  %v4564_v46 = vmul.f32 %v10393_v30, %v10184_v14  ;;  %v10501_v50 = vld [vmem:[#allocation2 + $0xef] sm:$0xff] }
 0x4aa   : > { %v4315_v12 = vadd.f32 %v4314_v37, %v4313_v41  ;;  %v4565_v18 = vmul.f32 %v10397_v19, %v10184_v14  ;;  %v5002_v11 = vadd.f32 %v4970_v29, %v4934_v23  ;;  %v5003_v17 = vadd.f32 %v4971_v52, %v4935_v62 }
 0x4ab   : > { %v4529_v63 = vadd.f32 %v4497_v32, %v4429_v51  ;;  %v4632_v43 = vmul.f32 %v10427_v38, %v10191_v21  ;;  %v4596_v45 = vadd.f32 %v4564_v46, %v4528_v25  ;;  %v4633_v28 = vmul.f32 %v10431_v5, %v10191_v21  ;;  %v10505_v32 = vld [vmem:[#allocation2 + $0xe8] sm:$0xff]  ;;  %v10511_v46 = vld [vmem:[#allocation2 + $0xf0] sm:$0xff] }
 0x4ac   : > { %v4317_v55 = vadd.f32 %v4316_v6, %v4315_v12  ;;  %v4700_v47 = vmul.f32 %v10435_v34, %v10202_v8  ;;  %v5042_v10 = vadd.f32 %v10247_v31, %v5002_v11  ;;  %v5043_v30 = vadd.f32 %v10247_v31, %v5003_v17  ;;  %v10515_v11 = vld [vmem:[#allocation2 + $0xe9] sm:$0xff] }
 0x4ad   : > { %v4597_v26 = vadd.f32 %v4565_v18, %v4529_v63  ;;  %v4701_v19 = vmul.f32 %v10441_v42, %v10202_v8  ;;  %v4664_v52 = vadd.f32 %v4632_v43, %v4596_v45  ;;  %v4768_v51 = vmul.f32 %v10445_v7, %v10212_v20 }
 0x4ae   : > { %v4319_v29 = vadd.f32 %v4318_v57, %v4317_v55  ;;  %v4769_v48 = vmul.f32 %v10449_v0, %v10212_v20  ;;  %vm5074_vm3 = vcmp.gt.f32.partialorder %v5042_v10, 0.0  ;;  %vm5075_vm6 = vcmp.gt.f32.partialorder %v5043_v30, 0.0 }
 0x4af   : > { %v5106_v54 = vmul.f32 0.1, %v5042_v10  ;;  %v5107_v9 = vmul.f32 0.1, %v5043_v30  ;;  %v4665_v2 = vadd.f32 %v4633_v28, %v4597_v26  ;;  %v4732_v35 = vadd.f32 %v4700_v47, %v4664_v52  ;;  %v10531_v52 = vld [vmem:[#allocation2 + $0xf1] sm:$0xff] }
 0x4b0   : > { %v4320_v6 = vrot.slane %v4319_v29, 4  ;;  %v4836_v36 = vmul.f32 %v10491_v60, %v10215_v24  ;;  %v4837_v27 = vmul.f32 %v10501_v50, %v10215_v24  ;;  %v4904_v12 = vmul.f32 %v10505_v32, %v10218_v40 }
 0x4b1   : > { %v10497_v41 = vsel %vm5074_vm3, %v5042_v10, %v5106_v54  ;;  %v10499_v57 = vsel %vm5075_vm6, %v5043_v30, %v5107_v9  ;;  %v4733_v23 = vadd.f32 %v4701_v19, %v4665_v2  ;;  %v4800_v62 = vadd.f32 %v4768_v51, %v4732_v35 }
 0x4b2   : > { %v4321_v37 = vadd.f32 %v4320_v6, %v4319_v29  ;;  %v4905_v18 = vmul.f32 %v10511_v46, %v10218_v40  ;;  %v4972_v17 = vmul.f32 %v10515_v11, %v10221_v56  ;;  %v4430_v63 = vmul.f32 %v10427_v38, %v10174_v16 }
 0x4b3   : > { %v4801_v55 = vadd.f32 %v4769_v48, %v4733_v23  ;;  %v4868_v45 = vadd.f32 %v4836_v36, %v4800_v62  ;;  %v4431_v28 = vmul.f32 %v10431_v5, %v10174_v16  ;;  %v4498_v47 = vmul.f32 %v10435_v34, %v10177_v49 }
 0x4b4   : > { %v4322_v43 = vrot.slane %v4321_v37, 2  ;;  %v4499_v10 = vmul.f32 %v10441_v42, %v10177_v49  ;;  %v4566_v30 = vmul.f32 %v10445_v7, %v10184_v14  ;;  %v4567_v26 = vmul.f32 %v10449_v0, %v10184_v14 }
 0x4b5   : > { %v4869_v38 = vadd.f32 %v4837_v27, %v4801_v55  ;;  %v4936_v29 = vadd.f32 %v4904_v12, %v4868_v45  ;;  %v4973_v5 = vmul.f32 %v10531_v52, %v10221_v56  ;;  %v4530_v51 = vadd.f32 %v4498_v47, %v4430_v63 }
 0x4b6   : > { %v4323_v19 = vadd.f32 %v4322_v43, %v4321_v37  ;;  %v4531_v48 = vadd.f32 %v4499_v10, %v4431_v28  ;;  %v4634_v34 = vmul.f32 %v10491_v60, %v10191_v21  ;;  %v4635_v42 = vmul.f32 %v10501_v50, %v10191_v21  ;;  %v10552_v43 = vld [vmem:[#allocation2 + $0x10f] sm:$0xff] }
 0x4b7   : > { %v4937_v54 = vadd.f32 %v4905_v18, %v4869_v38  ;;  %v5004_v9 = vadd.f32 %v4972_v17, %v4936_v29  ;;  %v4702_v0 = vmul.f32 %v10505_v32, %v10202_v8  ;;  %v4598_v6 = vadd.f32 %v4566_v30, %v4530_v51  ;;  %v10548_v17 = vld [vmem:[#allocation2 + $0x107] sm:$0xff]  ;;  %v10561_v38 = vld [vmem:[#allocation2 + $0x110] sm:$0xff] }
 0x4b8   : > { %v4324_v7 = vrot.slane %v4323_v19, 1  ;;  %v4599_v2 = vadd.f32 %v4567_v26, %v4531_v48  ;;  %v4703_v35 = vmul.f32 %v10511_v46, %v10202_v8  ;;  %v4770_v36 = vmul.f32 %v10515_v11, %v10212_v20  ;;  %v10557_v26 = vld [vmem:[#allocation2 + $0x108] sm:$0xff] }
 0x4b9   : > { %v5005_v37 = vadd.f32 %v4973_v5, %v4937_v54  ;;  %v5044_v23 = vadd.f32 %v10247_v31, %v5004_v9  ;;  %v4771_v62 = vmul.f32 %v10531_v52, %v10212_v20  ;;  %v4666_v12 = vadd.f32 %v4634_v34, %v4598_v6  ;;  %v10565_v48 = vld [vmem:[#allocation2 + $0x109] sm:$0xff]  ;;  %v10573_v6 = vld [vmem:[#allocation2 + $0x111] sm:$0xff] }
 0x4ba   : > { %v4325_v27 = vadd.f32 %v4324_v7, %v4323_v19  ;;  %v4667_v18 = vadd.f32 %v4635_v42, %v4599_v2  ;;  %v4838_v63 = vmul.f32 %v10548_v17, %v10215_v24  ;;  %v4839_v55 = vmul.f32 %v10552_v43, %v10215_v24 }
 0x4bb   : > { %v5045_v28 = vadd.f32 %v10247_v31, %v5005_v37  ;;  %vm5076_vm7 = vcmp.gt.f32.partialorder %v5044_v23, 0.0  ;;  %v5108_v47 = vmul.f32 0.1, %v5044_v23  ;;  %v4734_v10 = vadd.f32 %v4702_v0, %v4666_v12 }
 0x4bc   : > { %v4326_v45 = vmul.f32 0.00390625, %v4325_v27  ;;  %v4735_v30 = vadd.f32 %v4703_v35, %v4667_v18  ;;  %v4906_v19 = vmul.f32 %v10557_v26, %v10218_v40  ;;  %v4907_v29 = vmul.f32 %v10561_v38, %v10218_v40 }
 0x4bd   : > { %vm5077_vm9 = vcmp.gt.f32.partialorder %v5045_v28, 0.0  ;;  %v5109_v51 = vmul.f32 0.1, %v5045_v28  ;;  %v4974_v34 = vmul.f32 %v10565_v48, %v10221_v56  ;;  %v10571_v7 = vsel %vm5076_vm7, %v5044_v23, %v5108_v47 }
 0x4be   : > { %v4328_v5 = vmul.f32 0.70710677, %v4326_v45  ;;  %v10569_v42 = vmul.f32 0.5, %v4326_v45  ;;  %v4802_v54 = vadd.f32 %v4770_v36, %v4734_v10  ;;  %v4803_v9 = vadd.f32 %v4771_v62, %v4735_v30 }
 0x4bf   : > { %v4975_v2 = vmul.f32 %v10573_v6, %v10221_v56  ;;  %v4432_v35 = vmul.f32 %v10491_v60, %v10174_v16  ;;  %v10582_v37 = vsel %vm5077_vm9, %v5045_v28, %v5109_v51  ;;  %v4433_v62 = vmul.f32 %v10501_v50, %v10174_v16 }
 0x4c0   : > { %vm4329_vm10 = vcmp.ge.f32.partialorder %v4328_v5, 0.0  ;;  %v4331_v0 = vand.u32 2147483647, %v4328_v5  ;;  %v4870_v12 = vadd.f32 %v4838_v63, %v4802_v54  ;;  %v4871_v23 = vadd.f32 %v4839_v55, %v4803_v9 }
 0x4c1   : > { %v10580_v27 = vsel %vm4329_vm10, 1.0, %v11267_v39  ;;  %v4500_v45 = vmul.f32 %v10505_v32, %v10177_v49  ;;  %v4501_v60 = vmul.f32 %v10511_v46, %v10177_v49  ;;  %v4568_v30 = vmul.f32 %v10515_v11, %v10184_v14 }
 0x4c2   : > { %v4332_v18 = vmul.f32 0.3275911, %v4331_v0  ;;  %v4344_v36 = vsub.f32 0.0, %v4331_v0  ;;  %v4938_v47 = vadd.f32 %v4906_v19, %v4870_v12  ;;  %v4939_v10 = vadd.f32 %v4907_v29, %v4871_v23 }
 0x4c3   : > { %v4532_v63 = vadd.f32 %v4500_v45, %v4432_v35  ;;  %v4569_v55 = vmul.f32 %v10531_v52, %v10184_v14  ;;  %v4533_v50 = vadd.f32 %v4501_v60, %v4433_v62  ;;  %v4636_v32 = vmul.f32 %v10548_v17, %v10191_v21 }
 0x4c4   : > { %v4333_v28 = vadd.f32 1.0, %v4332_v18  ;;  %v4345_v5 = vmul.f32 %v4344_v36, %v4331_v0  ;;  %v5006_v51 = vadd.f32 %v4974_v34, %v4938_v47  ;;  %v5007_v54 = vadd.f32 %v4975_v2, %v4939_v10  ;;  %v10610_v47 = vld [vmem:[#allocation2 + $0x127] sm:$0xff] }
 0x4c5   : > { %v4600_v29 = vadd.f32 %v4568_v30, %v4532_v63  ;;  %v4637_v46 = vmul.f32 %v10552_v43, %v10191_v21  ;;  %v4601_v0 = vadd.f32 %v4569_v55, %v4533_v50  ;;  %v4704_v52 = vmul.f32 %v10557_v26, %v10202_v8  ;;  %v10626_v50 = vld [vmem:[#allocation2 + $0x130] sm:$0xff] }
 0x4c6   : > { %6371 = vrcp.f32 %v4333_v28  ;;  %v4346_v19 = vmul.f32 1.442695, %v4345_v5  ;;  %v5046_v11 = vadd.f32 %v10247_v31, %v5006_v51  ;;  %v5047_v9 = vadd.f32 %v10247_v31, %v5007_v54  ;;  %v10618_v28 = vld [vmem:[#allocation2 + $0x12f] sm:$0xff] }
 0x4c7   : > { %v4668_v2 = vadd.f32 %v4636_v32, %v4600_v29  ;;  %v4705_v35 = vmul.f32 %v10561_v38, %v10202_v8  ;;  %v4772_v12 = vmul.f32 %v10565_v48, %v10212_v20  ;;  %v4669_v36 = vadd.f32 %v4637_v46, %v4601_v0  ;;  %v10622_v51 = vld [vmem:[#allocation2 + $0x128] sm:$0xff]  ;;  %v10634_v46 = vld [vmem:[#allocation2 + $0x131] sm:$0xff] }
 0x4c8   : > { %vm5078_vm11 = vcmp.gt.f32.partialorder %v5046_v11, 0.0  ;;  %vm5079_vm12 = vcmp.gt.f32.partialorder %v5047_v9, 0.0  ;;  %v5110_v23 = vmul.f32 0.1, %v5046_v11  ;;  %v5111_v18 = vmul.f32 0.1, %v5047_v9 }
 0x4c9   : > { %v4736_v62 = vadd.f32 %v4704_v52, %v4668_v2  ;;  %v4773_v45 = vmul.f32 %v10573_v6, %v10212_v20  ;;  %v4840_v10 = vmul.f32 %v10610_v47, %v10215_v24  ;;  %6373 = vpow2.f32 %v4346_v19  ;;  %v10630_v19 = vld [vmem:[#allocation2 + $0x129] sm:$0xff] }
 0x4ca   : > { %v10614_v60 = vsel %vm5078_vm11, %v5046_v11, %v5110_v23  ;;  %v10616_v30 = vsel %vm5079_vm12, %v5047_v9, %v5111_v18  ;;  %v4841_v5 = vmul.f32 %v10618_v28, %v10215_v24  ;;  %v4737_v63 = vadd.f32 %v4705_v35, %v4669_v36 }
 0x4cb   : > { %11268 = vst [vmem:[#allocation21_spill] sm:$0xff] %v10614_v60  ;;  %v4804_v55 = vadd.f32 %v4772_v12, %v4736_v62  ;;  %v4908_v54 = vmul.f32 %v10622_v51, %v10218_v40  ;;  %v4909_v32 = vmul.f32 %v10626_v50, %v10218_v40  ;;  %v4976_v29 = vmul.f32 %v10630_v19, %v10221_v56 }
 0x4cc   : > { %v4977_v11 = vmul.f32 %v10634_v46, %v10221_v56  ;;  %v4434_v9 = vmul.f32 %v10548_v17, %v10174_v16  ;;  %v4435_v0 = vmul.f32 %v10552_v43, %v10174_v16  ;;  %v4805_v52 = vadd.f32 %v4773_v45, %v4737_v63 }
 0x4cd   : > { %v4872_v2 = vadd.f32 %v4840_v10, %v4804_v55  ;;  %v4502_v35 = vmul.f32 %v10557_v26, %v10177_v49  ;;  %v4503_v12 = vmul.f32 %v10561_v38, %v10177_v49  ;;  %v4570_v23 = vmul.f32 %v10565_v48, %v10184_v14 }
 0x4ce   : > { %v4571_v18 = vmul.f32 %v10573_v6, %v10184_v14  ;;  %v4638_v17 = vmul.f32 %v10610_v47, %v10191_v21  ;;  %v4639_v43 = vmul.f32 %v10618_v28, %v10191_v21  ;;  %v4873_v62 = vadd.f32 %v4841_v5, %v4805_v52 }
 0x4cf   : > { %v4940_v45 = vadd.f32 %v4908_v54, %v4872_v2  ;;  %v4534_v26 = vadd.f32 %v4502_v35, %v4434_v9  ;;  %v4535_v10 = vadd.f32 %v4503_v12, %v4435_v0  ;;  %v4706_v6 = vmul.f32 %v10622_v51, %v10202_v8  ;;  %v10667_v9 = vld [vmem:[#allocation2 + $0x147] sm:$0xff] }
 0x4d0   : > { %v10654_v36 = vpop.eup %6371  ;;  %v4707_v63 = vmul.f32 %v10626_v50, %v10202_v8  ;;  %v4941_v55 = vadd.f32 %v4909_v32, %v4873_v62  ;;  %v4774_v5 = vmul.f32 %v10630_v19, %v10212_v20  ;;  %v4775_v54 = vmul.f32 %v10634_v46, %v10212_v20  ;;  %v10679_v62 = vld [vmem:[#allocation2 + $0x148] sm:$0xff] }
 0x4d1   : > { %v4335_v38 = vmul.f32 1.0614054, %v10654_v36  ;;  %v5008_v34 = vadd.f32 %v4976_v29, %v4940_v45  ;;  %v4602_v25 = vadd.f32 %v4570_v23, %v4534_v26  ;;  %v4603_v4 = vadd.f32 %v4571_v18, %v4535_v10  ;;  %v10675_v23 = vld [vmem:[#allocation2 + $0x14f] sm:$0xff] }
 0x4d2   : > { %v4842_v0 = vmul.f32 %v10667_v9, %v10215_v24  ;;  %v5009_v52 = vadd.f32 %v4977_v11, %v4941_v55  ;;  %v4843_v18 = vmul.f32 %v10675_v23, %v10215_v24  ;;  %v4910_v45 = vmul.f32 %v10679_v62, %v10218_v40  ;;  %v10683_v26 = vld [vmem:[#allocation2 + $0x150] sm:$0xff] }
 0x4d3   : > { %v4336_v44 = vadd.f32 -1.4531521, %v4335_v38  ;;  %v5048_v2 = vadd.f32 %v10247_v31, %v5008_v34  ;;  %v4670_v35 = vadd.f32 %v4638_v17, %v4602_v25  ;;  %v4671_v32 = vadd.f32 %v4639_v43, %v4603_v4  ;;  %v10672_v29 = vpop.eup %6373 }
 0x4d4   : > { %v4911_v25 = vmul.f32 %v10683_v26, %v10218_v40  ;;  %v5049_v4 = vadd.f32 %v10247_v31, %v5009_v52  ;;  %v4436_v38 = vmul.f32 %v10610_v47, %v10174_v16  ;;  %v4979_v52 = vmul.f32 %v10694_v33, %v10221_v56 }
 0x4d5   : > { %v4337_v12 = vmul.f32 %v10654_v36, %v4336_v44  ;;  %v5112_v34 = vmul.f32 0.1, %v5048_v2  ;;  %v4738_v11 = vadd.f32 %v4706_v6, %v4670_v35  ;;  %v10688_v44 = vld [vmem:[#allocation2 + $0x149] sm:$0xff]  ;;  %vm5080_vm13 = vcmp.gt.f32.partialorder %v5048_v2, 0.0 }
 0x4d6   : > { %v4978_v17 = vmul.f32 %v10688_v44, %v10221_v56  ;;  %v4739_v10 = vadd.f32 %v4707_v63, %v4671_v32  ;;  %vm5081_vm14 = vcmp.gt.f32.partialorder %v5049_v4, 0.0  ;;  %v5113_v55 = vmul.f32 0.1, %v5049_v4 }
 0x4d7   : > { %v4338_v43 = vadd.f32 1.4214138, %v4337_v12  ;;  %v4806_v48 = vadd.f32 %v4774_v5, %v4738_v11  ;;  %v4437_v39 = vmul.f32 %v10618_v28, %v10174_v16  ;;  %v4504_v63 = vmul.f32 %v10622_v51, %v10177_v49 }
 0x4d8   : > { %v4807_v35 = vadd.f32 %v4775_v54, %v4739_v10  ;;  %v10703_v32 = vsel %vm5080_vm13, %v5048_v2, %v5112_v34  ;;  %v4505_v5 = vmul.f32 %v10626_v50, %v10177_v49  ;;  %v4572_v12 = vmul.f32 %v10630_v19, %v10184_v14 }
 0x4d9   : > { %v4339_v6 = vmul.f32 %v10654_v36, %v4338_v43  ;;  %v4874_v47 = vadd.f32 %v4842_v0, %v4806_v48  ;;  %v10709_v1 = vsel %vm5081_vm14, %v5049_v4, %v5113_v55  ;;  %v4536_v54 = vadd.f32 %v4504_v63, %v4436_v38 }
 0x4da   : > { %v4875_v43 = vadd.f32 %v4843_v18, %v4807_v35  ;;  %v4537_v60 = vadd.f32 %v4505_v5, %v4437_v39  ;;  %v4573_v28 = vmul.f32 %v10634_v46, %v10184_v14  ;;  %v4640_v51 = vmul.f32 %v10667_v9, %v10191_v21 }
 0x4db   : > { %v4340_v11 = vadd.f32 -0.28449672, %v4339_v6  ;;  %v4942_v10 = vadd.f32 %v4910_v45, %v4874_v47  ;;  %v4604_v50 = vadd.f32 %v4572_v12, %v4536_v54  ;;  %v4641_v19 = vmul.f32 %v10675_v23, %v10191_v21  ;;  %v10733_v47 = vld [vmem:[#allocation2 + $0x16f] sm:$0xff] }
 0x4dc   : > { %v4943_v0 = vadd.f32 %v4911_v25, %v4875_v43  ;;  %v4605_v4 = vadd.f32 %v4573_v28, %v4537_v60  ;;  %v4708_v18 = vmul.f32 %v10679_v62, %v10202_v8  ;;  %v4709_v39 = vmul.f32 %v10683_v26, %v10202_v8  ;;  %v10737_v43 = vld [vmem:[#allocation2 + $0x168] sm:$0xff] }
 0x4dd   : > { %v4341_v48 = vmul.f32 %v10654_v36, %v4340_v11  ;;  %v5010_v2 = vadd.f32 %v4978_v17, %v4942_v10  ;;  %v4672_v34 = vadd.f32 %v4640_v51, %v4604_v50  ;;  %v4776_v38 = vmul.f32 %v10688_v44, %v10212_v20  ;;  %v10727_v17 = vld [vmem:[#allocation2 + $0x167] sm:$0xff]  ;;  %v10746_v50 = vld [vmem:[#allocation2 + $0x170] sm:$0xff] }
 0x4de   : > { %v5011_v46 = vadd.f32 %v4979_v52, %v4943_v0  ;;  %v4673_v55 = vadd.f32 %v4641_v19, %v4605_v4  ;;  %v4777_v6 = vmul.f32 %v10694_v33, %v10212_v20  ;;  %v4844_v60 = vmul.f32 %v10727_v17, %v10215_v24 }
 0x4df   : > { %v4342_v45 = vadd.f32 0.2548296, %v4341_v48  ;;  %v5050_v25 = vadd.f32 %v10247_v31, %v5010_v2  ;;  %v4740_v52 = vadd.f32 %v4708_v18, %v4672_v34  ;;  %v4845_v5 = vmul.f32 %v10733_v47, %v10215_v24 }
 0x4e0   : > { %v5051_v63 = vadd.f32 %v10247_v31, %v5011_v46  ;;  %v4741_v11 = vadd.f32 %v4709_v39, %v4673_v55  ;;  %v4912_v54 = vmul.f32 %v10737_v43, %v10218_v40  ;;  %v5169_v51 = vpack.c.bf16 %v10709_v1, %v10703_v32  ;;  %v10752_v39 = vld [vmem:[#allocation2 + $0x169] sm:$0xff]  ;;  %v10756_v46 = vld [vmem:[#allocation2 + $0x171] sm:$0xff] }
 0x4e1   : > { %v4343_v35 = vmul.f32 %v10654_v36, %v4342_v45  ;;  %vm5082_vm15 = vcmp.gt.f32.partialorder %v5050_v25, 0.0  ;;  %v5114_v12 = vmul.f32 0.1, %v5050_v25  ;;  %v4808_v28 = vadd.f32 %v4776_v38, %v4740_v52 }
 0x4e2   : > { %vm5083_vm2 = vcmp.gt.f32.partialorder %v5051_v63, 0.0  ;;  %v5115_v36 = vmul.f32 0.1, %v5051_v63  ;;  %v4809_v0 = vadd.f32 %v4777_v6, %v4741_v11  ;;  %v4913_v19 = vmul.f32 %v10746_v50, %v10218_v40 }
 0x4e3   : > { %v4348_v10 = vmul.f32 %v10672_v29, %v4343_v35  ;;  %v10744_v48 = vsel %vm5082_vm15, %v5050_v25, %v5114_v12  ;;  %v4876_v18 = vadd.f32 %v4844_v60, %v4808_v28  ;;  %v4980_v29 = vmul.f32 %v10752_v39, %v10221_v56 }
 0x4e4   : > { %v10750_v4 = vsel %vm5083_vm2, %v5051_v63, %v5115_v36  ;;  %v4877_v45 = vadd.f32 %v4845_v5, %v4809_v0  ;;  %v4981_v34 = vmul.f32 %v10756_v46, %v10221_v56  ;;  %v4438_v38 = vmul.f32 %v10667_v9, %v10174_v16 }
 0x4e5   : > { %v4349_v2 = vsub.f32 1.0, %v4348_v10  ;;  %v4439_v25 = vmul.f32 %v10675_v23, %v10174_v16  ;;  %v4944_v6 = vadd.f32 %v4912_v54, %v4876_v18  ;;  %v4506_v60 = vmul.f32 %v10679_v62, %v10177_v49 }
 0x4e6   : > { %v4507_v35 = vmul.f32 %v10683_v26, %v10177_v49  ;;  %v4945_v63 = vadd.f32 %v4913_v19, %v4877_v45  ;;  %v4574_v52 = vmul.f32 %v10688_v44, %v10184_v14  ;;  %v4575_v5 = vmul.f32 %v10694_v33, %v10184_v14  ;;  %v6361_v45 = vld [vmem:[#allocation9 + $0x38] sm:$0xff]  }
 0x4e7   : > { %v4350_v55 = vmul.f32 %v4349_v2, %v10580_v27  ;;  %v4642_v9 = vmul.f32 %v10727_v17, %v10191_v21  ;;  %v5012_v12 = vadd.f32 %v4980_v29, %v4944_v6  ;;  %v4538_v27 = vadd.f32 %v4506_v60, %v4438_v38 }
 0x4e8   : > { %v4539_v11 = vadd.f32 %v4507_v35, %v4439_v25  ;;  %v5170_v62 = vpack.c.bf16 %v10750_v4, %v10744_v48  ;;  %v5013_v54 = vadd.f32 %v4981_v34, %v4945_v63  ;;  %v4643_v26 = vmul.f32 %v10733_v47, %v10191_v21  ;;  %v10797_v35 = vld [vmem:[#allocation2 + $0x18f] sm:$0xff] }
 0x4e9   : > { %v4351_v23 = vadd.f32 1.0, %v4350_v55  ;;  %v4710_v44 = vmul.f32 %v10737_v43, %v10202_v8  ;;  %v5052_v33 = vadd.f32 %v10247_v31, %v5012_v12  ;;  %v4606_v36 = vadd.f32 %v4574_v52, %v4538_v27  ;;  %v10790_v55 = vld [vmem:[#allocation2 + $0x187] sm:$0xff] }
 0x4ea   : > { %v4607_v28 = vadd.f32 %v4575_v5, %v4539_v11  ;;  %v5053_v0 = vadd.f32 %v10247_v31, %v5013_v54  ;;  %v4711_v19 = vmul.f32 %v10746_v50, %v10202_v8  ;;  %v4778_v2 = vmul.f32 %v10752_v39, %v10212_v20  ;;  %v10801_v52 = vld [vmem:[#allocation2 + $0x188] sm:$0xff]  ;;  %v6675_v11 = vld [vmem:[#allocation2 + $0x190] sm:$0xff] }
 0x4eb   : > { %v4352_v10 = vmul.f32 %v4351_v23, %v10569_v42  ;;  %v4779_v18 = vmul.f32 %v10756_v46, %v10212_v20  ;;  %vm5084_vm4 = vcmp.gt.f32.partialorder %v5052_v33, 0.0  ;;  %v5116_v34 = vmul.f32 0.1, %v5052_v33 }
 0x4ec   : > { %v4674_v42 = vadd.f32 %v4642_v9, %v4606_v36  ;;  %vm5085_vm5 = vcmp.gt.f32.partialorder %v5053_v0, 0.0  ;;  %v5117_v38 = vmul.f32 0.1, %v5053_v0  ;;  %v4675_v25 = vadd.f32 %v4643_v26, %v4607_v28  ;;  %v6674_v9 = vld [vmem:[#allocation9 + $0x30] sm:$0xff]  }
 0x4ed   : > { %v4353_v29 = vpack.c.bf16 %v4352_v10, %v4352_v10  ;;  %v4846_v31 = vmul.f32 %v10790_v55, %v10215_v24  ;;  %v10795_v6 = vsel %vm5084_vm4, %v5052_v33, %v5116_v34  ;;  %v4847_v63 = vmul.f32 %v10797_v35, %v10215_v24  ;;  %v10813_v33 = vld [vmem:[#allocation2 + $0x191] sm:$0xff] }
 0x4ee   : > { %v4742_v60 = vadd.f32 %v4710_v44, %v4674_v42  ;;  %v4914_v5 = vmul.f32 %v10801_v52, %v10218_v40  ;;  %v11269_v23 = vpack.c.bf16 %v10287_v22, %v10285_v59  ;;  %v10809_v12 = vsel %vm5085_vm5, %v5053_v0, %v5117_v38  ;;  %v6676_v44 = vld [vmem:[#allocation2 + $0x189] sm:$0xff] }
 0x4ef   : > { %6192 = vmatmul.mubr.msk.bf16.vlgmr.msra.gmra.mrb[36].mxu0 %vm1757_vm8, %v4353_v29  ;;  %v4743_v27 = vadd.f32 %v4711_v19, %v4675_v25  ;;  %v4915_v54 = vmul.f32 %v6675_v11, %v10218_v40  ;;  %v4982_v10 = vmul.f32 %v6676_v44, %v10221_v56  ;;  %v4983_v36 = vmul.f32 %v10813_v33, %v10221_v56 }
 0x4f0   : > { %6196 = vmatpush3.bf16.msra.mxu0 %v6674_v9  ;;  %6199 = vmatprep.mubr.msk.bf16.mxu0 %vm384_vm0, %v11269_v23  ;;  %v4810_v26 = vadd.f32 %v4778_v2, %v4742_v60  ;;  %v4440_v59 = vmul.f32 %v10727_v17, %v10174_v16  ;;  %v4441_v28 = vmul.f32 %v10733_v47, %v10174_v16 }
 0x4f1   : > { %6197 = vmatprep.subr.bf16.mxu0 %v6361_v45  ;;  %v4811_v22 = vadd.f32 %v4779_v18, %v4743_v27  ;;  %v4508_v0 = vmul.f32 %v10737_v43, %v10177_v49  ;;  %v4509_v19 = vmul.f32 %v10746_v50, %v10177_v49  ;;  %v4576_v29 = vmul.f32 %v10752_v39, %v10184_v14  ;;  %v10847_v27 = vld [vmem:[#allocation2 + $0x1af] sm:$0xff] }
 0x4f2   : > { %v4878_v2 = vadd.f32 %v4846_v31, %v4810_v26  ;;  %v4577_v34 = vmul.f32 %v10756_v46, %v10184_v14  ;;  %v4644_v17 = vmul.f32 %v10790_v55, %v10191_v21  ;;  %v4645_v43 = vmul.f32 %v10797_v35, %v10191_v21  ;;  %v10851_v26 = vld [vmem:[#allocation2 + $0x1a8] sm:$0xff] }
 0x4f3   : > { %v4879_v18 = vadd.f32 %v4847_v63, %v4811_v22  ;;  %v4540_v42 = vadd.f32 %v4508_v0, %v4440_v59  ;;  %v4541_v47 = vadd.f32 %v4509_v19, %v4441_v28  ;;  %v4712_v50 = vmul.f32 %v10801_v52, %v10202_v8  ;;  %v10859_v28 = vld [vmem:[#allocation2 + $0x1b0] sm:$0xff] }
 0x4f4   : > { %6198 = vmatpush3.bf16.msra.mxu0 %v6361_v45  ;;  %v4946_v38 = vadd.f32 %v4914_v5, %v4878_v2  ;;  %v4713_v25 = vmul.f32 %v6675_v11, %v10202_v8  ;;  %v4780_v39 = vmul.f32 %v6676_v44, %v10212_v20  ;;  %v4781_v45 = vmul.f32 %v10813_v33, %v10212_v20  ;;  %v10843_v5 = vld [vmem:[#allocation2 + $0x1a7] sm:$0xff]  ;;  %v10863_v19 = vld [vmem:[#allocation8 + $0x3] ss:$0 sm:$0xff] }
 0x4f5   : > { %v4947_v31 = vadd.f32 %v4915_v54, %v4879_v18  ;;  %v4608_v46 = vadd.f32 %v4576_v29, %v4540_v42  ;;  %v4609_v60 = vadd.f32 %v4577_v34, %v4541_v47  ;;  %v11270_v63 = vpack.c.bf16 %v10312_v3, %v10310_v53  ;;  %v10866_v29 = vld [vmem:[#allocation2 + $0x1a9] sm:$0xff] }
 0x4f6   : > { %v5014_v9 = vadd.f32 %v4982_v10, %v4946_v38  ;;  %v4848_v23 = vmul.f32 %v10843_v5, %v10215_v24  ;;  %v4849_v54 = vmul.f32 %v10847_v27, %v10215_v24  ;;  %v4916_v59 = vmul.f32 %v10851_v26, %v10218_v40 }
 0x4f7   : > { %6200 = vmatmul.mubr.msk.bf16.vlgmr.msra.gmra.mrb[40].mxu0 %vm384_vm0, %v11270_v63  ;;  %v11271_v53 = vpack.c.bf16 %v10382_v13, %v10379_v61  ;;  %v5015_v3 = vadd.f32 %v4983_v36, %v4947_v31  ;;  %v4676_v10 = vadd.f32 %v4644_v17, %v4608_v46  ;;  %v4677_v22 = vadd.f32 %v4645_v43, %v4609_v60  ;;  %v10870_v61 = vld [vmem:[#allocation2 + $0x1b1] sm:$0xff] }
 0x4f8   : > { %v4917_v0 = vmul.f32 %v10859_v28, %v10218_v40  ;;  %v5054_v2 = vadd.f32 %v10863_v19, %v5014_v9  ;;  %v4984_v34 = vmul.f32 %v10866_v29, %v10221_v56  ;;  %v4985_v13 = vmul.f32 %v10870_v61, %v10221_v56 }
 0x4f9   : > { %6203 = vmatprep.mubr.msk.bf16.mxu0 %vm384_vm0, %v11271_v53  ;;  %v4442_v36 = vmul.f32 %v10790_v55, %v10174_v16  ;;  %v5055_v17 = vadd.f32 %v10863_v19, %v5015_v3  ;;  %v4744_v18 = vadd.f32 %v4712_v50, %v4676_v10  ;;  %v4745_v42 = vadd.f32 %v4713_v25, %v4677_v22 }
 0x4fa   : > { %v4443_v47 = vmul.f32 %v10797_v35, %v10174_v16  ;;  %vm5086_vm3 = vcmp.gt.f32.partialorder %v5054_v2, 0.0  ;;  %v5118_v43 = vmul.f32 0.1, %v5054_v2  ;;  %v4510_v38 = vmul.f32 %v10801_v52, %v10177_v49 }
 0x4fb   : > { %v4511_v31 = vmul.f32 %v6675_v11, %v10177_v49  ;;  %vm5087_vm6 = vcmp.gt.f32.partialorder %v5055_v17, 0.0  ;;  %v5119_v46 = vmul.f32 0.1, %v5055_v17  ;;  %v4812_v60 = vadd.f32 %v4780_v39, %v4744_v18 }
 0x4fc   : > { %v4813_v63 = vadd.f32 %v4781_v45, %v4745_v42  ;;  %v10882_v9 = vsel %vm5086_vm3, %v5054_v2, %v5118_v43  ;;  %v4542_v55 = vadd.f32 %v4510_v38, %v4442_v36  ;;  %v4578_v50 = vmul.f32 %v6676_v44, %v10184_v14  ;;  %v10913_v42 = vld [vmem:[#allocation2 + $0x1c7] sm:$0xff]  ;;  %v10917_v43 = vld [vmem:[#allocation2 + $0x1cf] sm:$0xff] }
 0x4fd   : > { %v4543_v53 = vadd.f32 %v4511_v31, %v4443_v47  ;;  %v10885_v25 = vsel %vm5087_vm6, %v5055_v17, %v5119_v46  ;;  %v4880_v35 = vadd.f32 %v4848_v23, %v4812_v60  ;;  %v4579_v10 = vmul.f32 %v10813_v33, %v10184_v14  ;;  %v10921_v31 = vld [vmem:[#allocation2 + $0x1c8] sm:$0xff] }
 0x4fe   : > { %v4881_v3 = vadd.f32 %v4849_v54, %v4813_v63  ;;  %v11272_v52 = vpack.c.bf16 %v10462_v58, %v10460_v15  ;;  %v5171_v11 = vpack.c.bf16 %v10809_v12, %v10795_v6  ;;  %v4610_v39 = vadd.f32 %v4578_v50, %v4542_v55  ;;  %v10927_v63 = vld [vmem:[#allocation2 + $0x1d0] sm:$0xff] }
 0x4ff   : > { %v4646_v45 = vmul.f32 %v10843_v5, %v10191_v21  ;;  %v4647_v44 = vmul.f32 %v10847_v27, %v10191_v21  ;;  %v11273_v23 = vpack.c.bf16 %v10499_v57, %v10497_v41  ;;  %v4948_v33 = vadd.f32 %v4916_v59, %v4880_v35  ;;  %v10931_v50 = vld [vmem:[#allocation2 + $0x1c9] sm:$0xff] }
 0x500   : > { %6204 = vmatmul.mubr.msk.bf16.gmra.mrb[44].mxu0 %vm384_vm0, %v11272_v52  ;;  %v4949_v54 = vadd.f32 %v4917_v0, %v4881_v3  ;;  %v4611_v15 = vadd.f32 %v4579_v10, %v4543_v53  ;;  %v4714_v58 = vmul.f32 %v10851_v26, %v10202_v8  ;;  %v5172_v22 = vpack.c.bf16 %v10885_v25, %v10882_v9  ;;  %v6698_v6 = vld [vmem:[#allocation2 + $0x20f] sm:$0xff] }
 0x501   : > { %6207 = vmatprep.mubr.msk.bf16.mxu0 %vm384_vm0, %v11273_v23  ;;  %v4678_v2 = vadd.f32 %v4646_v45, %v4610_v39  ;;  %v4715_v36 = vmul.f32 %v10859_v28, %v10202_v8  ;;  %v4782_v17 = vmul.f32 %v10866_v29, %v10212_v20  ;;  %v5016_v18 = vadd.f32 %v4984_v34, %v4948_v33 }
 0x502   : > { %v5017_v41 = vadd.f32 %v4985_v13, %v4949_v54  ;;  %v4679_v57 = vadd.f32 %v4647_v44, %v4611_v15  ;;  %v4783_v59 = vmul.f32 %v10870_v61, %v10212_v20  ;;  %v4850_v47 = vmul.f32 %v10913_v42, %v10215_v24  ;;  %v11275_v54 = vld [vmem:[#allocation21_spill] sm:$0xff] }
 0x503   : > { %v4746_v0 = vadd.f32 %v4714_v58, %v4678_v2  ;;  %v4851_v38 = vmul.f32 %v10917_v43, %v10215_v24  ;;  %v4918_v34 = vmul.f32 %v10921_v31, %v10218_v40  ;;  %v5056_v13 = vadd.f32 %v10863_v19, %v5016_v18 }
 0x504   : > { %v5057_v46 = vadd.f32 %v10863_v19, %v5017_v41  ;;  %v4747_v60 = vadd.f32 %v4715_v36, %v4679_v57  ;;  %v4919_v55 = vmul.f32 %v10927_v63, %v10218_v40  ;;  %v4986_v35 = vmul.f32 %v10931_v50, %v10221_v56  ;;  %v6690_v36 = vld [vmem:[#allocation2 + $0x1d1] sm:$0xff] }
 0x505   : > { %v4814_v53 = vadd.f32 %v4782_v17, %v4746_v0  ;;  %v4444_v3 = vmul.f32 %v10843_v5, %v10174_v16  ;;  %v4445_v10 = vmul.f32 %v10847_v27, %v10174_v16  ;;  %vm5088_vm7 = vcmp.gt.f32.partialorder %v5056_v13, 0.0 }
 0x506   : > { %vm5089_vm9 = vcmp.gt.f32.partialorder %v5057_v46, 0.0  ;;  %v5120_v52 = vmul.f32 0.1, %v5056_v13  ;;  %v5121_v39 = vmul.f32 0.1, %v5057_v46  ;;  %v11274_v45 = vpack.c.bf16 %v10582_v37, %v10571_v7 }
 0x507   : > { %v4815_v44 = vadd.f32 %v4783_v59, %v4747_v60  ;;  %v4882_v23 = vadd.f32 %v4850_v47, %v4814_v53  ;;  %v4512_v33 = vmul.f32 %v10851_v26, %v10177_v49  ;;  %v4513_v5 = vmul.f32 %v10859_v28, %v10177_v49 }
 0x508   : > { %6208 = vmatmul.mubr.msk.bf16.gmra.mrb[48].mxu0 %vm384_vm0, %v11274_v45  ;;  %v11276_v27 = vpack.c.bf16 %v10616_v30, %v11275_v54  ;;  %v10951_v15 = vsel %vm5088_vm7, %v5056_v13, %v5120_v52  ;;  %v10953_v58 = vsel %vm5089_vm9, %v5057_v46, %v5121_v39  ;;  %v4580_v7 = vmul.f32 %v10866_v29, %v10184_v14  ;;  %v10982_v39 = vld [vmem:[#allocation2 + $0x1e8] sm:$0xff] }
 0x509   : > { %v4581_v37 = vmul.f32 %v10870_v61, %v10184_v14  ;;  %v4883_v2 = vadd.f32 %v4851_v38, %v4815_v44  ;;  %v4950_v26 = vadd.f32 %v4918_v34, %v4882_v23  ;;  %v4987_v28 = vmul.f32 %v6690_v36, %v10221_v56  ;;  %v10986_v44 = vld [vmem:[#allocation2 + $0x1f0] sm:$0xff] }
 0x50a   : > { %6211 = vmatprep.mubr.msk.bf16.mxu0 %vm384_vm0, %v11276_v27  ;;  %v4544_v17 = vadd.f32 %v4512_v33, %v4444_v3  ;;  %v5173_v30 = vpack.c.bf16 %v10953_v58, %v10951_v15  ;;  %v4545_v18 = vadd.f32 %v4513_v5, %v4445_v10  ;;  %v4648_v41 = vmul.f32 %v10913_v42, %v10191_v21  ;;  %v10974_v3 = vld [vmem:[#allocation2 + $0x1e7] sm:$0xff]  ;;  %v10978_v10 = vld [vmem:[#allocation2 + $0x1ef] sm:$0xff] }
 0x50b   : > { %v4649_v57 = vmul.f32 %v10917_v43, %v10191_v21  ;;  %v4951_v29 = vadd.f32 %v4919_v55, %v4883_v2  ;;  %v5018_v59 = vadd.f32 %v4986_v35, %v4950_v26  ;;  %v4716_v61 = vmul.f32 %v10921_v31, %v10202_v8  ;;  %v11277_v58 = vld [vmem:[#allocation24_spill] sm:$0xff] }
 0x50c   : > { %v4612_v0 = vadd.f32 %v4580_v7, %v4544_v17  ;;  %v4613_v47 = vadd.f32 %v4581_v37, %v4545_v18  ;;  %v4717_v38 = vmul.f32 %v10927_v63, %v10202_v8  ;;  %v4784_v34 = vmul.f32 %v10931_v50, %v10212_v20  ;;  %v10999_v7 = vld [vmem:[#allocation2 + $0x1e9] sm:$0xff]  ;;  %v6696_v18 = vld [vmem:[#allocation2 + $0x1f1] sm:$0xff] }
 0x50d   : > { %v4785_v13 = vmul.f32 %v6690_v36, %v10212_v20  ;;  %v5019_v46 = vadd.f32 %v4987_v28, %v4951_v29  ;;  %v5058_v60 = vadd.f32 %v10863_v19, %v5018_v59  ;;  %v4852_v55 = vmul.f32 %v10974_v3, %v10215_v24 }
 0x50e   : > { %v4680_v53 = vadd.f32 %v4648_v41, %v4612_v0  ;;  %v4681_v35 = vadd.f32 %v4649_v57, %v4613_v47  ;;  %v4853_v52 = vmul.f32 %v10978_v10, %v10215_v24  ;;  %v4920_v45 = vmul.f32 %v10982_v39, %v10218_v40 }
 0x50f   : > { %v4921_v23 = vmul.f32 %v10986_v44, %v10218_v40  ;;  %v5059_v33 = vadd.f32 %v10863_v19, %v5019_v46  ;;  %vm5090_vm10 = vcmp.gt.f32.partialorder %v5058_v60, 0.0  ;;  %v5122_v5 = vmul.f32 0.1, %v5058_v60 }
 0x510   : > { %6212 = vmatmul.mubr.msk.bf16.gmra.mrb[52].mxu0 %vm384_vm0, %v5169_v51  ;;  %v4748_v54 = vadd.f32 %v4716_v61, %v4680_v53  ;;  %v4749_v27 = vadd.f32 %v4717_v38, %v4681_v35  ;;  %v4988_v37 = vmul.f32 %v10999_v7, %v10221_v56  ;;  %v4446_v1 = vmul.f32 %v10913_v42, %v10174_v16  ;;  %v6697_v53 = vld [vmem:[#allocation2 + $0x207] sm:$0xff] }
 0x511   : > { %6215 = vmatprep.mubr.msk.bf16.mxu0 %vm384_vm0, %v5170_v62  ;;  %v4447_v32 = vmul.f32 %v10917_v43, %v10174_v16  ;;  %vm5091_vm11 = vcmp.gt.f32.partialorder %v5059_v33, 0.0  ;;  %v5123_v51 = vmul.f32 0.1, %v5059_v33  ;;  %v11007_v2 = vsel %vm5090_vm10, %v5058_v60, %v5122_v5 }
 0x512   : > { %v4816_v26 = vadd.f32 %v4784_v34, %v4748_v54  ;;  %v4817_v48 = vadd.f32 %v4785_v13, %v4749_v27  ;;  %v4514_v4 = vmul.f32 %v10921_v31, %v10177_v49  ;;  %v4515_v62 = vmul.f32 %v10927_v63, %v10177_v49  ;;  %v6700_v54 = vld [vmem:[#allocation2 + $0x210] sm:$0xff] }
 0x513   : > { %v4582_v28 = vmul.f32 %v10931_v50, %v10184_v14  ;;  %v11015_v17 = vsel %vm5091_vm11, %v5059_v33, %v5123_v51  ;;  %v4989_v43 = vmul.f32 %v6696_v18, %v10221_v56  ;;  %v4583_v41 = vmul.f32 %v6690_v36, %v10184_v14  ;;  %v6699_v33 = vld [vmem:[#allocation2 + $0x208] sm:$0xff] }
 0x514   : > { %v4884_v42 = vadd.f32 %v4852_v55, %v4816_v26  ;;  %v4885_v57 = vadd.f32 %v4853_v52, %v4817_v48  ;;  %v4546_v29 = vadd.f32 %v4514_v4, %v4446_v1  ;;  %v4547_v59 = vadd.f32 %v4515_v62, %v4447_v32 }
 0x515   : > { %v4650_v31 = vmul.f32 %v10974_v3, %v10191_v21  ;;  %v5174_v63 = vpack.c.bf16 %v11015_v17, %v11007_v2  ;;  %v4651_v50 = vmul.f32 %v10978_v10, %v10191_v21  ;;  %v4718_v61 = vmul.f32 %v10982_v39, %v10202_v8 }
 0x516   : > { %v4952_v0 = vadd.f32 %v4920_v45, %v4884_v42  ;;  %v4953_v47 = vadd.f32 %v4921_v23, %v4885_v57  ;;  %v4614_v38 = vadd.f32 %v4582_v28, %v4546_v29  ;;  %v4615_v34 = vadd.f32 %v4583_v41, %v4547_v59 }
 0x517   : > { %v4719_v36 = vmul.f32 %v10986_v44, %v10202_v8  ;;  %v4786_v46 = vmul.f32 %v10999_v7, %v10212_v20  ;;  %v4787_v60 = vmul.f32 %v6696_v18, %v10212_v20  ;;  %v4854_v55 = vmul.f32 %v6697_v53, %v10215_v24 }
 0x518   : > { %6216 = vmatmul.mubr.msk.bf16.gmra.mrb[56].mxu0 %vm384_vm0, %v5171_v11  ;;  %v5020_v13 = vadd.f32 %v4988_v37, %v4952_v0  ;;  %v5021_v35 = vadd.f32 %v4989_v43, %v4953_v47  ;;  %v4682_v52 = vadd.f32 %v4650_v31, %v4614_v38  ;;  %v4683_v45 = vadd.f32 %v4651_v50, %v4615_v34  ;;  %v11042_v11 = vpop.f32.mrb[32].mxu0  ;;  %v6701_v37 = vld [vmem:[#allocation2 + $0x209] sm:$0xff]  ;;  %v6702_v43 = vld [vmem:[#allocation2 + $0x211] sm:$0xff] }
 0x519   : > { %6219 = vmatprep.mubr.msk.bf16.mxu0 %vm384_vm0, %v5172_v22  ;;  %v4855_v12 = vmul.f32 %v6698_v6, %v10215_v24  ;;  %v4922_v5 = vmul.f32 %v6699_v33, %v10218_v40  ;;  %v4923_v27 = vmul.f32 %v6700_v54, %v10218_v40  ;;  %v4990_v9 = vmul.f32 %v6701_v37, %v10221_v56  ;;  %v6151_v25 = vpop.f32.mrb[33].mxu0  ;;  %v1858_v31 = vld [vmem:[#allocation14] sm:$0x1] }
 0x51a   : > { %v5060_v23 = vadd.f32 %v10863_v19, %v5020_v13  ;;  %v5061_v22 = vadd.f32 %v10863_v19, %v5021_v35  ;;  %v4750_v1 = vadd.f32 %v4718_v61, %v4682_v52  ;;  %v4751_v32 = vadd.f32 %v4719_v36, %v4683_v45  ;;  %v3152_v2 = vpop.f32.mrb[34].mxu0  ;;  %v6704_v45 = vld [vmem:[#allocation2 + $0x22f] sm:$0xff] }
 0x51b   : > { %v4448_v51 = vmul.f32 %v10974_v3, %v10174_v16  ;;  %v4449_v48 = vmul.f32 %v10978_v10, %v10174_v16  ;;  %v4516_v4 = vmul.f32 %v10982_v39, %v10177_v49  ;;  %v6152_v62 = vpop.f32.mrb[35].mxu0  ;;  %v4991_v41 = vmul.f32 %v6702_v43, %v10221_v56 }
 0x51c   : > { %vm5092_vm12 = vcmp.gt.f32.partialorder %v5060_v23, 0.0  ;;  %v5124_v26 = vmul.f32 0.1, %v5060_v23  ;;  %vm5093_vm13 = vcmp.gt.f32.partialorder %v5061_v22, 0.0  ;;  %v5125_v28 = vmul.f32 0.1, %v5061_v22 }
 0x51d   : > { %v4818_v17 = vadd.f32 %v4786_v46, %v4750_v1  ;;  %v4819_v42 = vadd.f32 %v4787_v60, %v4751_v32  ;;  %v4517_v3 = vmul.f32 %v10986_v44, %v10177_v49  ;;  %v4548_v57 = vadd.f32 %v4516_v4, %v4448_v51 }
 0x51e   : > { %v4584_v29 = vmul.f32 %v10999_v7, %v10184_v14  ;;  %v5156_v59 = vsel %vm5092_vm12, %v5060_v23, %v5124_v26  ;;  %v4585_v39 = vmul.f32 %v6696_v18, %v10184_v14  ;;  %v5157_v0 = vsel %vm5093_vm13, %v5061_v22, %v5125_v28  ;;  %v6705_v23 = vld [vmem:[#allocation2 + $0x228] sm:$0xff] }
 0x51f   : > { %v4886_v16 = vadd.f32 %v4854_v55, %v4818_v17  ;;  %v4887_v10 = vadd.f32 %v4855_v12, %v4819_v42  ;;  %v4549_v50 = vadd.f32 %v4517_v3, %v4449_v48  ;;  %v4652_v49 = vmul.f32 %v6697_v53, %v10191_v21  ;;  %v6703_v55 = vld [vmem:[#allocation2 + $0x227] sm:$0xff] }
 0x520   : > { %6220 = vmatmul.mubr.msk.bf16.gmra.mrb[60].mxu0 %vm384_vm0, %v5173_v30  ;;  %v4616_v61 = vadd.f32 %v4584_v29, %v4548_v57  ;;  %v4653_v47 = vmul.f32 %v6698_v6, %v10191_v21  ;;  %v4720_v38 = vmul.f32 %v6699_v33, %v10202_v8  ;;  %v4721_v34 = vmul.f32 %v6700_v54, %v10202_v8  ;;  %v6707_v22 = vld [vmem:[#allocation2 + $0x229] sm:$0xff] }
 0x521   : > { %6223 = vmatprep.mubr.msk.bf16.mxu0 %vm384_vm0, %v5174_v63  ;;  %v4954_v44 = vadd.f32 %v4922_v5, %v4886_v16  ;;  %v4955_v7 = vadd.f32 %v4923_v27, %v4887_v10  ;;  %v4617_v14 = vadd.f32 %v4585_v39, %v4549_v50  ;;  %v4788_v15 = vmul.f32 %v6701_v37, %v10212_v20  ;;  %v6362_v29 = vld [vmem:[#allocation12 + $0x18] sm:$0xff]  }
 0x522   : > { %v4684_v18 = vadd.f32 %v4652_v49, %v4616_v61  ;;  %v1903_v30 = vadd.f32 %v11277_v58, %v1858_v31  ;;  %v5175_v36 = vpack.c.bf16 %v5157_v0, %v5156_v59  ;;  %v4789_v63 = vmul.f32 %v6702_v43, %v10212_v20  ;;  %6232 = vmatpush3.bf16.msra.mxu1 %v6362_v29 }
 0x523   : > { %v5022_v13 = vadd.f32 %v4990_v9, %v4954_v44  ;;  %v5023_v46 = vadd.f32 %v4991_v41, %v4955_v7  ;;  %v4685_v60 = vadd.f32 %v4653_v47, %v4617_v14  ;;  %v4856_v21 = vmul.f32 %v6703_v55, %v10215_v24  ;;  %v6706_v9 = vld [vmem:[#allocation2 + $0x230] sm:$0xff] }
 0x524   : > { %v4752_v53 = vadd.f32 %v4720_v38, %v4684_v18  ;;  %v4857_v8 = vmul.f32 %v6704_v45, %v10215_v24  ;;  %v4924_v33 = vmul.f32 %v6705_v23, %v10218_v40  ;;  %v3155_v5 = vadd.f32 %v11042_v11, %v1903_v30  ;;  %v6708_v11 = vld [vmem:[#allocation2 + $0x231] sm:$0xff] }
 0x525   : > { %v5062_v35 = vadd.f32 %v10863_v19, %v5022_v13  ;;  %v5063_v52 = vadd.f32 %v10863_v19, %v5023_v46  ;;  %v4753_v6 = vadd.f32 %v4721_v34, %v4685_v60  ;;  %v4925_v25 = vmul.f32 %v6706_v9, %v10218_v40 }
 0x526   : > { %v4820_v12 = vadd.f32 %v4788_v15, %v4752_v53  ;;  %v4992_v24 = vmul.f32 %v6707_v22, %v10221_v56  ;;  %v4993_v48 = vmul.f32 %v6708_v11, %v10221_v56  ;;  %v3157_v56 = vld [vmem:[#allocation14 + $0x1] sm:$0x1] }
 0x527   : > { %vm5094_vm14 = vcmp.gt.f32.partialorder %v5062_v35, 0.0  ;;  %vm5095_vm15 = vcmp.gt.f32.partialorder %v5063_v52, 0.0  ;;  %v5126_v20 = vmul.f32 0.1, %v5062_v35  ;;  %v5127_v54 = vmul.f32 0.1, %v5063_v52 }
 0x528   : > { %6224 = vmatmul.mubr.msk.bf16.gmra.mrb[64].mxu0 %vm384_vm0, %v5175_v36  ;;  %v4821_v27 = vadd.f32 %v4789_v63, %v4753_v6  ;;  %v4888_v37 = vadd.f32 %v4856_v21, %v4820_v12  ;;  %v3158_v59 = vadd.f32 %v3157_v56, %v3155_v5 }
 0x529   : > { %v5158_v1 = vsel %vm5094_vm14, %v5062_v35, %v5126_v20  ;;  %v5159_v32 = vsel %vm5095_vm15, %v5063_v52, %v5127_v54 }
 0x52a   : > { %v5176_v51 = vpack.c.bf16 %v5159_v32, %v5158_v1  ;;  %v4889_v2 = vadd.f32 %v4857_v8, %v4821_v27  ;;  %v4956_v26 = vadd.f32 %v4924_v33, %v4888_v37 }
 0x52c   : > { %6227 = vmatprep.mubr.msk.bf16.mxu0 %vm384_vm0, %v5176_v51  ;;  %v4957_v4 = vadd.f32 %v4925_v25, %v4889_v2  ;;  %v5024_v62 = vadd.f32 %v4992_v24, %v4956_v26 }
 0x52e   : > { %v5025_v28 = vadd.f32 %v4993_v48, %v4957_v4  ;;  %v5064_v17 = vadd.f32 %v10863_v19, %v5024_v62 }
 0x530   : > { %v5065_v40 = vadd.f32 %v10863_v19, %v5025_v28  ;;  %vm5096_vm2 = vcmp.gt.f32.partialorder %v5064_v17, 0.0  ;;  %v5128_v42 = vmul.f32 0.1, %v5064_v17  ;;  %v11089_v19 = vld [vmem:[#allocation11 + $0x3] ss:$0 sm:$0xff] }
 0x532   : > { %vm5097_vm4 = vcmp.gt.f32.partialorder %v5065_v40, 0.0  ;;  %v5129_v43 = vmul.f32 0.1, %v5065_v40  ;;  %v5160_v41 = vsel %vm5096_vm2, %v5064_v17, %v5128_v42 }
 0x534   : > { %v5161_v3 = vsel %vm5097_vm4, %v5065_v40, %v5129_v43 }
 0x535   : > { %v5177_v57 = vpack.c.bf16 %v5161_v3, %v5160_v41 }
 0x537   : > { %6228 = vmatmul.mubr.msk.bf16.gmra.mrb[68].mxu0 %vm384_vm0, %v5177_v57 }
 0x5c2   : > { %v4400_v16 = vpop.f32.mrb[36].mxu0 }
 0x5c3   : > { %v11087_v10 = vadd.f32 %v4400_v16, %v3158_v59  ;;  %v6193_v39 = vpop.f32.mrb[37].mxu0 }
 0x5c4   : > { %v4403_v31 = vpop.f32.mrb[38].mxu0 }
 0x5c5   : > { %v6194_v0 = vpop.f32.mrb[39].mxu0 }
 0x5ca   : > { %v6201_v50 = vpop.f32.mrb[40].mxu0 }
 0x5cb   : > { %v5294_v61 = vadd.f32 %v6201_v50, %v11089_v19  ;;  %v5285_v49 = vpop.f32.mrb[41].mxu0 }
 0x5cc   : > { %v5286_v44 = vadd.f32 %v11089_v19, %v5285_v49  ;;  %v6202_v7 = vpop.f32.mrb[42].mxu0 }
 0x5cd   : > { %v5297_v47 = vadd.f32 %v6202_v7, %v11089_v19  ;;  %v5288_v38 = vpop.f32.mrb[43].mxu0  ;;  %v5446_v14 = vmul.f32 0.1, %v5294_v61  ;;  %vm5414_vm5 = vcmp.gt.f32.partialorder %v5294_v61, 0.0 }
 0x5ce   : > { %vm5412_vm0 = vcmp.gt.f32.partialorder %v5286_v44, 0.0  ;;  %v5444_v18 = vmul.f32 0.1, %v5286_v44  ;;  %v5289_v34 = vadd.f32 %v11089_v19, %v5288_v38 }
 0x5cf   : > { %v5447_v58 = vmul.f32 0.1, %v5297_v47  ;;  %vm5415_vm6 = vcmp.gt.f32.partialorder %v5297_v47, 0.0  ;;  %v5478_v36 = vsel %vm5414_vm5, %v5294_v61, %v5446_v14 }
 0x5d0   : > { %v5476_v15 = vsel %vm5412_vm0, %v5286_v44, %v5444_v18  ;;  %vm5413_vm3 = vcmp.gt.f32.partialorder %v5289_v34, 0.0  ;;  %v5445_v30 = vmul.f32 0.1, %v5289_v34  ;;  %v5511_v8 = vsel %vm1757_vm8, %v5478_v36, 0.0 }
 0x5d1   : > { %v5508_v60 = vsel %vm1757_vm8, %v5476_v15, 0.0  ;;  %v5479_v21 = vsel %vm5415_vm6, %v5297_v47, %v5447_v58 }
 0x5d2   : > { %v5477_v13 = vsel %vm5413_vm3, %v5289_v34, %v5445_v30  ;;  %v5513_v20 = vsel %vm1757_vm8, %v5479_v21, 0.0 }
 0x5d3   : > { %v6205_v46 = vpop.f32.mrb[44].mxu0  ;;  %v5509_v53 = vsel %vm1757_vm8, %v5477_v13, 0.0 }
 0x5d4   : > { %v5310_v63 = vadd.f32 %v6205_v46, %v11089_v19  ;;  %v5301_v55 = vpop.f32.mrb[45].mxu0  ;;  %v5510_v35 = vadd.f32 %v5509_v53, %v5508_v60 }
 0x5d5   : > { %v5302_v52 = vadd.f32 %v11089_v19, %v5301_v55  ;;  %v6206_v45 = vpop.f32.mrb[46].mxu0 }
 0x5d6   : > { %v5313_v6 = vadd.f32 %v6206_v45, %v11089_v19  ;;  %v5304_v12 = vpop.f32.mrb[47].mxu0  ;;  %v5512_v23 = vadd.f32 %v5511_v8, %v5510_v35  ;;  %vm5418_vm9 = vcmp.gt.f32.partialorder %v5310_v63, 0.0  ;;  %v5450_v54 = vmul.f32 0.1, %v5310_v63 }
 0x5d7   : > { %vm5416_vm7 = vcmp.gt.f32.partialorder %v5302_v52, 0.0  ;;  %v5448_v33 = vmul.f32 0.1, %v5302_v52  ;;  %v5305_v5 = vadd.f32 %v11089_v19, %v5304_v12 }
 0x5d8   : > { %v5514_v37 = vadd.f32 %v5513_v20, %v5512_v23  ;;  %v5451_v9 = vmul.f32 0.1, %v5313_v6  ;;  %vm5419_vm11 = vcmp.gt.f32.partialorder %v5313_v6, 0.0  ;;  %v5482_v32 = vsel %vm5418_vm9, %v5310_v63, %v5450_v54 }
 0x5d9   : > { %v5480_v27 = vsel %vm5416_vm7, %v5302_v52, %v5448_v33  ;;  %vm5417_vm10 = vcmp.gt.f32.partialorder %v5305_v5, 0.0  ;;  %v5449_v22 = vmul.f32 0.1, %v5305_v5  ;;  %v5519_v42 = vsel %vm1757_vm8, %v5482_v32, 0.0 }
 0x5da   : > { %v5515_v25 = vsel %vm1757_vm8, %v5480_v27, 0.0  ;;  %v5483_v11 = vsel %vm5419_vm11, %v5313_v6, %v5451_v9 }
 0x5db   : > { %v5516_v24 = vadd.f32 %v5515_v25, %v5514_v37  ;;  %v6209_v1 = vpop.f32.mrb[48].mxu0  ;;  %v5481_v51 = vsel %vm5417_vm10, %v5305_v5, %v5449_v22  ;;  %v5521_v3 = vsel %vm1757_vm8, %v5483_v11, 0.0 }
 0x5dc   : > { %v5326_v2 = vadd.f32 %v6209_v1, %v11089_v19  ;;  %v5317_v26 = vpop.f32.mrb[49].mxu0  ;;  %v5517_v48 = vsel %vm1757_vm8, %v5481_v51, 0.0 }
 0x5dd   : > { %v5318_v4 = vadd.f32 %v11089_v19, %v5317_v26  ;;  %v6210_v62 = vpop.f32.mrb[50].mxu0  ;;  %v5518_v28 = vadd.f32 %v5517_v48, %v5516_v24 }
 0x5de   : > { %v5329_v17 = vadd.f32 %v6210_v62, %v11089_v19  ;;  %v5320_v40 = vpop.f32.mrb[51].mxu0  ;;  %vm5422_vm13 = vcmp.gt.f32.partialorder %v5326_v2, 0.0  ;;  %v5454_v29 = vmul.f32 0.1, %v5326_v2 }
 0x5df   : > { %vm5420_vm12 = vcmp.gt.f32.partialorder %v5318_v4, 0.0  ;;  %v5452_v43 = vmul.f32 0.1, %v5318_v4  ;;  %v5321_v41 = vadd.f32 %v11089_v19, %v5320_v40  ;;  %v5520_v57 = vadd.f32 %v5519_v42, %v5518_v28 }
 0x5e0   : > { %v5455_v59 = vmul.f32 0.1, %v5329_v17  ;;  %vm5423_vm15 = vcmp.gt.f32.partialorder %v5329_v17, 0.0  ;;  %v5486_v61 = vsel %vm5422_vm13, %v5326_v2, %v5454_v29 }
 0x5e1   : > { %v5484_v56 = vsel %vm5420_vm12, %v5318_v4, %v5452_v43  ;;  %vm5421_vm14 = vcmp.gt.f32.partialorder %v5321_v41, 0.0  ;;  %v5453_v16 = vmul.f32 0.1, %v5321_v41  ;;  %v5522_v39 = vadd.f32 %v5521_v3, %v5520_v57 }
 0x5e2   : > { %v5523_v31 = vsel %vm1757_vm8, %v5484_v56, 0.0  ;;  %v5487_v38 = vsel %vm5423_vm15, %v5329_v17, %v5455_v59  ;;  %v5527_v30 = vsel %vm1757_vm8, %v5486_v61, 0.0 }
 0x5e3   : > { %v5485_v0 = vsel %vm5421_vm14, %v5321_v41, %v5453_v16  ;;  %v6213_v50 = vpop.f32.mrb[52].mxu0  ;;  %v5524_v49 = vadd.f32 %v5523_v31, %v5522_v39  ;;  %v5529_v46 = vsel %vm1757_vm8, %v5487_v38, 0.0 }
 0x5e4   : > { %v5525_v44 = vsel %vm1757_vm8, %v5485_v0, 0.0  ;;  %v5342_v7 = vadd.f32 %v6213_v50, %v11089_v19  ;;  %v5333_v47 = vpop.f32.mrb[53].mxu0 }
 0x5e5   : > { %v5334_v14 = vadd.f32 %v11089_v19, %v5333_v47  ;;  %v6214_v18 = vpop.f32.mrb[54].mxu0  ;;  %v5526_v34 = vadd.f32 %v5525_v44, %v5524_v49 }
 0x5e6   : > { %v5345_v15 = vadd.f32 %v6214_v18, %v11089_v19  ;;  %v5336_v58 = vpop.f32.mrb[55].mxu0  ;;  %vm5426_vm4 = vcmp.gt.f32.partialorder %v5342_v7, 0.0  ;;  %v5458_v53 = vmul.f32 0.1, %v5342_v7 }
 0x5e7   : > { %vm5424_vm2 = vcmp.gt.f32.partialorder %v5334_v14, 0.0  ;;  %v5456_v36 = vmul.f32 0.1, %v5334_v14  ;;  %v5337_v13 = vadd.f32 %v11089_v19, %v5336_v58  ;;  %v5528_v60 = vadd.f32 %v5527_v30, %v5526_v34 }
 0x5e8   : > { %v5459_v55 = vmul.f32 0.1, %v5345_v15  ;;  %vm5427_vm5 = vcmp.gt.f32.partialorder %v5345_v15, 0.0  ;;  %v5490_v6 = vsel %vm5426_vm4, %v5342_v7, %v5458_v53 }
 0x5e9   : > { %v5488_v63 = vsel %vm5424_vm2, %v5334_v14, %v5456_v36  ;;  %vm5425_vm0 = vcmp.gt.f32.partialorder %v5337_v13, 0.0  ;;  %v5457_v21 = vmul.f32 0.1, %v5337_v13  ;;  %v5530_v35 = vadd.f32 %v5529_v46, %v5528_v60 }
 0x5ea   : > { %v5531_v52 = vsel %vm1757_vm8, %v5488_v63, 0.0  ;;  %v5491_v20 = vsel %vm5427_vm5, %v5345_v15, %v5459_v55  ;;  %v5535_v22 = vsel %vm1757_vm8, %v5490_v6, 0.0 }
 0x5eb   : > { %v5489_v45 = vsel %vm5425_vm0, %v5337_v13, %v5457_v21  ;;  %v6217_v8 = vpop.f32.mrb[56].mxu0  ;;  %v5532_v12 = vadd.f32 %v5531_v52, %v5530_v35  ;;  %v5537_v32 = vsel %vm1757_vm8, %v5491_v20, 0.0 }
 0x5ec   : > { %v5533_v23 = vsel %vm1757_vm8, %v5489_v45, 0.0  ;;  %v5358_v33 = vadd.f32 %v6217_v8, %v11089_v19  ;;  %v5349_v5 = vpop.f32.mrb[57].mxu0 }
 0x5ed   : > { %v5350_v54 = vadd.f32 %v11089_v19, %v5349_v5  ;;  %v6218_v27 = vpop.f32.mrb[58].mxu0  ;;  %v5534_v37 = vadd.f32 %v5533_v23, %v5532_v12 }
 0x5ee   : > { %v5361_v9 = vadd.f32 %v6218_v27, %v11089_v19  ;;  %v5352_v25 = vpop.f32.mrb[59].mxu0  ;;  %vm5430_vm6 = vcmp.gt.f32.partialorder %v5358_v33, 0.0  ;;  %v5462_v2 = vmul.f32 0.1, %v5358_v33 }
 0x5ef   : > { %vm5428_vm3 = vcmp.gt.f32.partialorder %v5350_v54, 0.0  ;;  %v5460_v24 = vmul.f32 0.1, %v5350_v54  ;;  %v5353_v1 = vadd.f32 %v11089_v19, %v5352_v25  ;;  %v5536_v51 = vadd.f32 %v5535_v22, %v5534_v37 }
 0x5f0   : > { %v5463_v11 = vmul.f32 0.1, %v5361_v9  ;;  %vm5431_vm9 = vcmp.gt.f32.partialorder %v5361_v9, 0.0  ;;  %v5494_v40 = vsel %vm5430_vm6, %v5358_v33, %v5462_v2 }
 0x5f1   : > { %v5492_v26 = vsel %vm5428_vm3, %v5350_v54, %v5460_v24  ;;  %vm5429_vm7 = vcmp.gt.f32.partialorder %v5353_v1, 0.0  ;;  %v5461_v48 = vmul.f32 0.1, %v5353_v1  ;;  %v5538_v4 = vadd.f32 %v5537_v32, %v5536_v51 }
 0x5f2   : > { %v5539_v62 = vsel %vm1757_vm8, %v5492_v26, 0.0  ;;  %v5495_v57 = vsel %vm5431_vm9, %v5361_v9, %v5463_v11  ;;  %v5543_v31 = vsel %vm1757_vm8, %v5494_v40, 0.0 }
 0x5f3   : > { %v5493_v28 = vsel %vm5429_vm7, %v5353_v1, %v5461_v48  ;;  %v6221_v17 = vpop.f32.mrb[60].mxu0  ;;  %v5540_v42 = vadd.f32 %v5539_v62, %v5538_v4  ;;  %v5545_v61 = vsel %vm1757_vm8, %v5495_v57, 0.0 }
 0x5f4   : > { %v5541_v43 = vsel %vm1757_vm8, %v5493_v28, 0.0  ;;  %v5374_v41 = vadd.f32 %v6221_v17, %v11089_v19  ;;  %v5365_v3 = vpop.f32.mrb[61].mxu0 }
 0x5f5   : > { %v5366_v29 = vadd.f32 %v11089_v19, %v5365_v3  ;;  %v6222_v56 = vpop.f32.mrb[62].mxu0  ;;  %v5542_v59 = vadd.f32 %v5541_v43, %v5540_v42 }
 0x5f6   : > { %v5377_v16 = vadd.f32 %v6222_v56, %v11089_v19  ;;  %v5368_v39 = vpop.f32.mrb[63].mxu0  ;;  %vm5434_vm11 = vcmp.gt.f32.partialorder %v5374_v41, 0.0  ;;  %v5466_v44 = vmul.f32 0.1, %v5374_v41 }
 0x5f7   : > { %vm5432_vm10 = vcmp.gt.f32.partialorder %v5366_v29, 0.0  ;;  %v5464_v0 = vmul.f32 0.1, %v5366_v29  ;;  %v5369_v50 = vadd.f32 %v11089_v19, %v5368_v39  ;;  %v5544_v49 = vadd.f32 %v5543_v31, %v5542_v59 }
 0x5f8   : > { %v5467_v47 = vmul.f32 0.1, %v5377_v16  ;;  %vm5435_vm13 = vcmp.gt.f32.partialorder %v5377_v16, 0.0  ;;  %v5498_v58 = vsel %vm5434_vm11, %v5374_v41, %v5466_v44 }
 0x5f9   : > { %v5496_v7 = vsel %vm5432_vm10, %v5366_v29, %v5464_v0  ;;  %vm5433_vm12 = vcmp.gt.f32.partialorder %v5369_v50, 0.0  ;;  %v5465_v38 = vmul.f32 0.1, %v5369_v50  ;;  %v5546_v14 = vadd.f32 %v5545_v61, %v5544_v49 }
 0x5fa   : > { %v5547_v18 = vsel %vm1757_vm8, %v5496_v7, 0.0  ;;  %v5499_v60 = vsel %vm5435_vm13, %v5377_v16, %v5467_v47  ;;  %v5551_v52 = vsel %vm1757_vm8, %v5498_v58, 0.0 }
 0x5fb   : > { %v5497_v34 = vsel %vm5433_vm12, %v5369_v50, %v5465_v38  ;;  %v6225_v15 = vpop.f32.mrb[64].mxu0  ;;  %v5548_v30 = vadd.f32 %v5547_v18, %v5546_v14  ;;  %v5553_v6 = vsel %vm1757_vm8, %v5499_v60, 0.0 }
 0x5fc   : > { %v5549_v36 = vsel %vm1757_vm8, %v5497_v34, 0.0  ;;  %v5390_v13 = vadd.f32 %v6225_v15, %v11089_v19  ;;  %v5381_v46 = vpop.f32.mrb[65].mxu0 }
 0x5fd   : > { %v5382_v53 = vadd.f32 %v11089_v19, %v5381_v46  ;;  %v6226_v63 = vpop.f32.mrb[66].mxu0  ;;  %v5550_v55 = vadd.f32 %v5549_v36, %v5548_v30 }
 0x5fe   : > { %v5393_v21 = vadd.f32 %v6226_v63, %v11089_v19  ;;  %v5384_v35 = vpop.f32.mrb[67].mxu0  ;;  %v5470_v23 = vmul.f32 0.1, %v5390_v13  ;;  %vm5438_vm15 = vcmp.gt.f32.partialorder %v5390_v13, 0.0 }
 0x5ff   : > { %vm5436_vm14 = vcmp.gt.f32.partialorder %v5382_v53, 0.0  ;;  %v5468_v45 = vmul.f32 0.1, %v5382_v53  ;;  %v5385_v8 = vadd.f32 %v11089_v19, %v5384_v35  ;;  %v5552_v12 = vadd.f32 %v5551_v52, %v5550_v55 }
 0x600   : > { %v5471_v27 = vmul.f32 0.1, %v5393_v21  ;;  %vm5439_vm4 = vcmp.gt.f32.partialorder %v5393_v21, 0.0  ;;  %v5502_v9 = vsel %vm5438_vm15, %v5390_v13, %v5470_v23 }
 0x601   : > { %v5500_v33 = vsel %vm5436_vm14, %v5382_v53, %v5468_v45  ;;  %vm5437_vm2 = vcmp.gt.f32.partialorder %v5385_v8, 0.0  ;;  %v5469_v5 = vmul.f32 0.1, %v5385_v8  ;;  %v5554_v20 = vadd.f32 %v5553_v6, %v5552_v12 }
 0x602   : > { %v5555_v54 = vsel %vm1757_vm8, %v5500_v33, 0.0  ;;  %v5503_v24 = vsel %vm5439_vm4, %v5393_v21, %v5471_v27  ;;  %v5559_v32 = vsel %vm1757_vm8, %v5502_v9, 0.0 }
 0x603   : > { %v5501_v37 = vsel %vm5437_vm2, %v5385_v8, %v5469_v5  ;;  %v5556_v25 = vadd.f32 %v5555_v54, %v5554_v20  ;;  %v5561_v2 = vsel %vm1757_vm8, %v5503_v24, 0.0  ;;  %v11278_v54 = vmov -1.0  }
 0x604   : > { %v5557_v22 = vsel %vm1757_vm8, %v5501_v37, 0.0 }
 0x605   : > { %v5558_v1 = vadd.f32 %v5557_v22, %v5556_v25 }
 0x607   : > { %v5560_v51 = vadd.f32 %v5559_v32, %v5558_v1  ;;  %v4408_v1 = vld [vmem:[#allocation14 + $0x2] sm:$0x1] }
 0x608   : > { %v4409_v32 = vadd.f32 %v4408_v1, %v11087_v10 }
 0x609   : > { %v5562_v11 = vadd.f32 %v5561_v2, %v5560_v51  ;;  %v5659_v2 = vld [vmem:[#allocation14 + $0x3] sm:$0x1] }
 0x60a   : > { %v6229_v26 = vpop.f32.mrb[68].mxu0 }
 0x60b   : > { %v5406_v48 = vadd.f32 %v6229_v26, %v11089_v19  ;;  %v5397_v4 = vpop.f32.mrb[69].mxu0 }
 0x60c   : > { %v5398_v62 = vadd.f32 %v11089_v19, %v5397_v4  ;;  %v6230_v28 = vpop.f32.mrb[70].mxu0 }
 0x60d   : > { %v5409_v17 = vadd.f32 %v6230_v28, %v11089_v19  ;;  %v5400_v40 = vpop.f32.mrb[71].mxu0  ;;  %v5474_v42 = vmul.f32 0.1, %v5406_v48  ;;  %vm5442_vm5 = vcmp.gt.f32.partialorder %v5406_v48, 0.0 }
 0x60e   : > { %vm5440_vm0 = vcmp.gt.f32.partialorder %v5398_v62, 0.0  ;;  %v5472_v43 = vmul.f32 0.1, %v5398_v62  ;;  %v5401_v41 = vadd.f32 %v11089_v19, %v5400_v40 }
 0x60f   : > { %v5475_v57 = vmul.f32 0.1, %v5409_v17  ;;  %vm5443_vm6 = vcmp.gt.f32.partialorder %v5409_v17, 0.0  ;;  %v5506_v59 = vsel %vm5442_vm5, %v5406_v48, %v5474_v42 }
 0x610   : > { %v5504_v3 = vsel %vm5440_vm0, %v5398_v62, %v5472_v43  ;;  %vm5441_vm3 = vcmp.gt.f32.partialorder %v5401_v41, 0.0  ;;  %v5473_v29 = vmul.f32 0.1, %v5401_v41  ;;  %v5567_v61 = vsel %vm1757_vm8, %v5506_v59, 0.0 }
 0x611   : > { %v5563_v56 = vsel %vm1757_vm8, %v5504_v3, 0.0  ;;  %v5507_v0 = vsel %vm5443_vm6, %v5409_v17, %v5475_v57 }
 0x612   : > { %v5564_v16 = vadd.f32 %v5563_v56, %v5562_v11  ;;  %v5505_v39 = vsel %vm5441_vm3, %v5401_v41, %v5473_v29  ;;  %v5569_v19 = vsel %vm1757_vm8, %v5507_v0, 0.0 }
 0x613   : > { %v5565_v31 = vsel %vm1757_vm8, %v5505_v39, 0.0 }
 0x614   : > { %v5566_v50 = vadd.f32 %v5565_v31, %v5564_v16 }
 0x616   : > { %v5568_v49 = vadd.f32 %v5567_v61, %v5566_v50 }
 0x618   : > { %v5570_v44 = vadd.f32 %v5569_v19, %v5568_v49 }
 0x61a   : > { %v5571_v7 = vrot.slane %v5570_v44, 4 }
 0x61c   : > { %v5572_v47 = vadd.f32 %v5571_v7, %v5570_v44 }
 0x61e   : > { %v5573_v38 = vrot.slane %v5572_v47, 2 }
 0x620   : > { %v5574_v14 = vadd.f32 %v5573_v38, %v5572_v47 }
 0x622   : > { %v5575_v18 = vrot.slane %v5574_v14, 1 }
 0x624   : > { %v5576_v34 = vadd.f32 %v5575_v18, %v5574_v14 }
 0x626   : > { %v5577_v15 = vmul.f32 0.00390625, %v5576_v34 }
 0x628   : > { %v5579_v58 = vmul.f32 0.70710677, %v5577_v15  ;;  %v5578_v9 = vmul.f32 0.5, %v5577_v15 }
 0x62a   : > { %v5582_v30 = vand.u32 2147483647, %v5579_v58  ;;  %vm5580_vm7 = vcmp.ge.f32.partialorder %v5579_v58, 0.0 }
 0x62b   : > { %v5581_v27 = vsel %vm5580_vm7, 1.0, %v11278_v54 }
 0x62c   : > { %v5583_v36 = vmul.f32 0.3275911, %v5582_v30  ;;  %v5595_v46 = vsub.f32 0.0, %v5582_v30 }
 0x62e   : > { %v5584_v13 = vadd.f32 1.0, %v5583_v36  ;;  %v5596_v53 = vmul.f32 %v5595_v46, %v5582_v30 }
 0x630   : > { %6375 = vrcp.f32 %v5584_v13  ;;  %v5597_v21 = vmul.f32 1.442695, %v5596_v53 }
 0x632   : > { %6377 = vpow2.f32 %v5597_v21 }
 0x63a   : > { %v6376_v60 = vpop.eup %6375 }
 0x63b   : > { %v5586_v63 = vmul.f32 1.0614054, %v6376_v60 }
 0x63c   : > { %v6378_v33 = vpop.eup %6377 }
 0x63d   : > { %v5587_v55 = vadd.f32 -1.4531521, %v5586_v63 }
 0x63f   : > { %v5588_v35 = vmul.f32 %v6376_v60, %v5587_v55 }
 0x641   : > { %v5589_v52 = vadd.f32 1.4214138, %v5588_v35 }
 0x643   : > { %v5590_v45 = vmul.f32 %v6376_v60, %v5589_v52 }
 0x645   : > { %v5591_v8 = vadd.f32 -0.28449672, %v5590_v45 }
 0x647   : > { %v5592_v6 = vmul.f32 %v6376_v60, %v5591_v8 }
 0x649   : > { %v5593_v12 = vadd.f32 0.2548296, %v5592_v6 }
 0x64b   : > { %v5594_v23 = vmul.f32 %v6376_v60, %v5593_v12 }
 0x64d   : > { %v5599_v5 = vmul.f32 %v6378_v33, %v5594_v23 }
 0x64f   : > { %v5600_v20 = vsub.f32 1.0, %v5599_v5 }
 0x651   : > { %v5601_v37 = vmul.f32 %v5600_v20, %v5581_v27 }
 0x653   : > { %v5602_v25 = vadd.f32 1.0, %v5601_v37 }
 0x655   : > { %v5603_v22 = vmul.f32 %v5602_v25, %v5578_v9 }
 0x657   : > { %v5604_v24 = vpack.c.bf16 %v5603_v22, %v5603_v22 }
 0x659   : > { %6234 = vmatmul.mubr.msk.bf16.vlgmr.msra.gmra.mrb[68].mxu1 %vm1757_vm8, %v5604_v24 }
 0x72c   : > { %v5651_v51 = vpop.f32.mrb[68].mxu1 }
 0x72d   : > { %v5657_v26 = vadd.f32 %v5651_v51, %v4409_v32  ;;  %v6235_v11 = vpop.f32.mrb[69].mxu1 }
 0x72e   : > { %v5654_v48 = vpop.f32.mrb[70].mxu1 }
 0x72f   : > { %v5660_v4 = vadd.f32 %v5659_v2, %v5657_v26  ;;  %v6236_v62 = vpop.f32.mrb[71].mxu1 }
 0x731   : > { %5661 = vst.msk [vmem:[%s382_s28] sm:$0x1] %vm388_vm1, %v5660_v4 }
 0x732   : > { %6920 = shalt.err (!%p6917_p8)
}
 0x733   : > { %s6921_s18 = scalar_lea.hbm %s11163_s12, 16  ;;  %s6925_s13 = scalar_lea.hbm %s11215_s7, 32 }
 0x734   : > { %p6922_p4 = scmp.ne.s32.totalorder %s11163_s12, %s6921_s18  ;;  %p6926_p3 = scmp.lt.u32.totalorder %s11163_s12, %s11215_s7 }
 0x735   : > { %p6927_p5 = scmp.lt.u32.totalorder %s6925_s13, %s6921_s18  ;;  %p6929_p6 = scmp.lt.u32.totalorder %s6921_s18, %s11163_s12 }
 0x736   : > { %p6923_p10 = pnand %p6922_p4, %p11279_p9 }
 0x737   : > { %p6928_p7 = por %p6927_p5, %p6926_p3 }
 0x738   : > { %p6924_p11 = pneg %p6923_p10 }
 0x739   : > { %p6930_p12 = por %p6929_p6, %p6928_p7 }
 0x73b   : > { %p6931_p1 = pnand %p6930_p12, %p6924_p11 }
 0x73d   : > { %6934 = shalt.err (!%p6931_p1)
}
 0x73e   : > { %6263 = dma.vmem_to_hbm [thread:$0]  (%p11279_p9), %s11165_s10, 16, %s11163_s12, %s5663_s30  }
 0x73f PF: > { %s5687_s22 = sand.u32 1, %s6973_s24   ;;  %p11280_p13 = scmp.ne.s32.totalorder %s11240_s20, 0 }
 0x740   : > { %p11281_p0 = scmp.ge.s32.totalorder %s6985_s27, 2  ;;  %s5688_s11 = scalar_lea.sflag [#allocation5], %s5687_s22 }
 0x742   : > { %p6289_p2 = pnand %p11281_p0, %p11280_p13 }
 0x744   : > { %6968 = dma.done.wait (!%p6289_p2), %s5688_s11, 16  }
 0x745   : > { %6970 = vsyncadd (!%p6289_p2), %s5688_s11, 4294967280  ;;  %p23_p8 = scmp.ge.s32.totalorder %s7243_s19, 4   ;;  %s11282_s24 = smov %s6977_s25 }
 0x746   : > { %s11283_s25 = smov %s6981_s26  ;;  %s11284_s26 = smov %s7254_s17 }
 0x747   : > { %s11285_s27 = smov %s7243_s19  ;;  %25 = sbr.rel (!%p23_p8) target bundleno = 8 (0x8), region = 136 }
 0x74e   :  { %5692 = vsyncpa [#allocation4], 1 }
 0x74f   :  { %5694 = vsyncpa [#allocation4 + $0x1], 1 }
 0x750   :  { %5695 = vsyncpa [#allocation7], 1 }
 0x751   :  { %5696 = vsyncpa [#allocation10], 1 }
 0x752   :  { %5697 = vsyncpa [#allocation13], 1 }
 0x753   :  { %5698 = vsyncpa [#allocation5], 1 }
 0x754   :  { %5700 = vsyncpa [#allocation5 + $0x1], 1 }

</bundles_post_ra>
